<compile_context>
chip_gen: v5e
topology: v5e:2x2
jax: 0.10.0
libtpu: 0.0.40
codegen_flags: <defaults>
</compile_context>

<pallas_src>
import jax
import jax.numpy as jnp
import numpy as np
from jax.experimental import pallas as pl
from jax.experimental.pallas import tpu as pltpu

EPS = 1e-5


def _generator_kernel(x_ref,
                      w1, g1, be1,
                      w2, g2, be2,
                      w3, g3, be3,
                      w4, b4,
                      out_ref):
    def lin_bn_relu(h, w_ref, g_ref, be_ref):
        # Linear (MXU, bf16 weights, f32 accumulation).  The pre-BN Linear
        # bias is omitted on purpose: a per-feature shift is exactly cancelled
        # by the BatchNorm (training-mode) mean subtraction that follows.
        h = jnp.dot(h.astype(jnp.bfloat16), w_ref[...],
                    preferred_element_type=jnp.float32)
        # BatchNorm1d (training mode: biased batch stats over the batch dim),
        # folded into one per-feature scale + shift.  Mean-shifted variance
        # (two reductions) for numerical robustness; the extra VALU work is
        # free because the kernel is DMA-bound, not slot-bound.
        mu = jnp.mean(h, axis=0, keepdims=True)
        d = h - mu
        var = jnp.mean(d * d, axis=0, keepdims=True)
        scale = g_ref[...] * jax.lax.rsqrt(var + EPS)   # rsqrt -> EUP slot
        h = d * scale + be_ref[...]
        return jnp.maximum(h, 0.0)                       # ReLU

    h = x_ref[...]
    h = lin_bn_relu(h, w1, g1, be1)
    h = lin_bn_relu(h, w2, g2, be2)
    h = lin_bn_relu(h, w3, g3, be3)
    # Final Linear (+ bias) + Tanh.  Output stays 784-wide: the masked partial
    # store is tiny compared with the weight bytes a lane-pad would add.
    h = jnp.dot(h.astype(jnp.bfloat16), w4[...],
                preferred_element_type=jnp.float32) + b4[...]
    out_ref[...] = jnp.tanh(h).astype(out_ref.dtype)


def prepare_params(params):
    """One-time conversion of PyTorch-layout params into kernel-ready params.

    Call this ONCE at parameter init/load time, never per forward call:
      * Linear weights cast to bf16 (halves weight DMA; f32 MXU accumulation)
      * pre-BN Linear biases dropped (cancelled by training-mode BN mean sub)
      * no lane padding of w4 (masked output store beats extra weight bytes
        at small batch; re-evaluate only for very large B)

    TODO(synk): generation-specific low precision -- int8 weights with
    per-channel scales folded into the BN scale on v5e/v6e, fp8 (e4m3) on v7x.
    """
    (w1, b1, g1, be1, w2, b2, g2, be2, w3, b3, g3, be3, w4, b4) = params
    del b1, b2, b3
    return (w1.astype(jnp.bfloat16), g1, be1,
            w2.astype(jnp.bfloat16), g2, be2,
            w3.astype(jnp.bfloat16), g3, be3,
            w4.astype(jnp.bfloat16), b4)


def generator_forward(x, kernel_params, *, out_dtype=jnp.float32):
    """x: [B, latent_dim] float32.  kernel_params: output of prepare_params.

    Single-block invocation: the whole batch is processed in one kernel call,
    so BatchNorm batch statistics are exact.  Works for B up to ~2K on v7x
    (64 MiB per-TC VMEM); larger batches need the batch-tiled grid (TODO).
    """
    (w1, g1, be1, w2, g2, be2, w3, g3, be3, w4, b4) = kernel_params
    B = x.shape[0]
    out_dim = w4.shape[1]

    args = (x, w1, g1, be1, w2, g2, be2, w3, g3, be3, w4, b4)

    def full_spec(a):
        return pl.BlockSpec(a.shape, lambda *_: (0,) * a.ndim)

    # VMEM budget sized against v7x's 64 MiB per-TensorCore ceiling:
    #   params (resident once, no grid => no double-buffering)   ~3.2 MB
    #   activations (f32): x, h1(256), h2(512), h3(1024)(+temps), out(784)
    arg_bytes = sum(int(np.prod(a.shape)) * a.dtype.itemsize for a in args)
    act_bytes = B * (256 + 512 + 2 * 1024 + 2 * out_dim) * 4
    vmem_limit = int(min(56 << 20, max(16 << 20, arg_bytes + act_bytes + (8 << 20))))

    # TODO(synk): for B beyond the v7x VMEM ceiling (~2K rows at f32), add a
    # batch-tiled grid: "parallel" batch axis (uses both v7x TensorCores),
    # weights resident with constant index_maps + pipeline_mode=pl.Buffered(1),
    # batch tile 256 (v6e/v7x) / 128 (v5e), and a two-pass / cross-tile
    # reduction of per-feature sum and sum-of-squares so BN stats stay exact.
    return pl.pallas_call(
        _generator_kernel,
        out_shape=jax.ShapeDtypeStruct((B, out_dim), out_dtype),
        in_specs=[full_spec(a) for a in args],
        out_specs=pl.BlockSpec((B, out_dim), lambda *_: (0, 0)),
        compiler_params=pltpu.CompilerParams(vmem_limit_bytes=vmem_limit),
    )(*args)


def init_params(latent_dim, key):
    """Deterministic parameter init mimicking PyTorch defaults (shapes only)."""
    dims = [latent_dim, 256, 512, 1024, 784]
    params = []
    keys = jax.random.split(key, 8)
    ki = 0
    for li in range(4):
        fan_in, fan_out = dims[li], dims[li + 1]
        bound = 1.0 / np.sqrt(fan_in)
        w = jax.random.uniform(keys[ki], (fan_in, fan_out), jnp.float32,
                               minval=-bound, maxval=bound)
        b = jax.random.uniform(keys[ki + 1], (1, fan_out), jnp.float32,
                               minval=-bound, maxval=bound)
        ki += 2
        params += [w, b]
        if li < 3:
            # BatchNorm affine params (PyTorch default: weight=1, bias=0)
            gamma = jnp.ones((1, fan_out), jnp.float32)
            beta = jnp.zeros((1, fan_out), jnp.float32)
            params += [gamma, beta]
    return params


def reference_forward(x, params):
    """Pure-JAX reference: f32 math with bf16-quantized weights (matching the
    kernel's weight dtype).  Keeps the pre-BN Linear biases and the canonical
    two-pass BatchNorm so the kernel's bias-drop / BN-fold are validated
    against the original module's formulation."""
    (w1, b1, g1, be1, w2, b2, g2, be2, w3, b3, g3, be3, w4, b4) = params

    def q(w):  # same weight quantization the kernel sees
        return w.astype(jnp.bfloat16).astype(jnp.float32)

    def lin_bn_relu(h, w, b, g, be):
        h = h @ q(w) + b
        mu = h.mean(0, keepdims=True)
        var = ((h - mu) ** 2).mean(0, keepdims=True)
        h = (h - mu) / jnp.sqrt(var + EPS) * g + be
        return jnp.maximum(h, 0.0)

    h = lin_bn_relu(x, w1, b1, g1, be1)
    h = lin_bn_relu(h, w2, b2, g2, be2)
    h = lin_bn_relu(h, w3, b3, g3, be3)
    return jnp.tanh(h @ q(w4) + b4)


if __name__ == "__main__":
    latent_dim = 32
    batch = 8

    key = jax.random.PRNGKey(0)
    k_x, k_p = jax.random.split(key)
    x = jax.random.normal(k_x, (batch, latent_dim), jnp.float32)
    params = init_params(latent_dim, k_p)

    # One-time weight preparation (hoisted out of the forward path).
    kernel_params = prepare_params(params)

    out = generator_forward(x, kernel_params)
    out = jax.block_until_ready(out)

    ref = reference_forward(x, params)
    assert out.shape == (batch, 784)
    np.testing.assert_allclose(np.asarray(out), np.asarray(ref),
                               rtol=1e-2, atol=3e-2)

    print("KERNEL_OK")
</pallas_src>

<mosaic_0001>
module attributes {stable_mosaic.version = 11 : i64} {
  func.func @_generator_kernel(%arg0: memref<8x32xf32, #tpu.memory_space<vmem>>, %arg1: memref<32x256xbf16, #tpu.memory_space<vmem>>, %arg2: memref<1x256xf32, #tpu.memory_space<vmem>>, %arg3: memref<1x256xf32, #tpu.memory_space<vmem>>, %arg4: memref<256x512xbf16, #tpu.memory_space<vmem>>, %arg5: memref<1x512xf32, #tpu.memory_space<vmem>>, %arg6: memref<1x512xf32, #tpu.memory_space<vmem>>, %arg7: memref<512x1024xbf16, #tpu.memory_space<vmem>>, %arg8: memref<1x1024xf32, #tpu.memory_space<vmem>>, %arg9: memref<1x1024xf32, #tpu.memory_space<vmem>>, %arg10: memref<1024x784xbf16, #tpu.memory_space<vmem>>, %arg11: memref<1x784xf32, #tpu.memory_space<vmem>>, %arg12: memref<8x784xf32, #tpu.memory_space<vmem>>) attributes {dimension_semantics = [], scalar_prefetch = 0 : i64, scratch_operands = 0 : i64, tpu.core_type = #tpu.core_type<tc>} {
    %c0 = arith.constant 0 : index
    %c0_0 = arith.constant 0 : index
    %0 = vector.load %arg0[%c0, %c0_0] : memref<8x32xf32, #tpu.memory_space<vmem>>, vector<8x32xf32>
    %1 = arith.truncf %0 : vector<8x32xf32> to vector<8x32xbf16>
    %c0_1 = arith.constant 0 : index
    %c0_2 = arith.constant 0 : index
    %2 = vector.load %arg1[%c0_1, %c0_2] : memref<32x256xbf16, #tpu.memory_space<vmem>>, vector<32x256xbf16>
    %cst = arith.constant dense<0.000000e+00> : vector<8x256xf32>
    %3 = tpu.matmul %1, %2, %cst {dimension_numbers = #tpu.dot_dimension_numbers<[1], [0], [0], [1], [0, 0, 1, 1], [], []>} : vector<8x32xbf16>, vector<32x256xbf16>, vector<8x256xf32> -> vector<8x256xf32>
    %cst_3 = arith.constant dense<0.000000e+00> : vector<256xf32>
    %4 = vector.multi_reduction <add>, %3, %cst_3 [0] : vector<8x256xf32> to vector<256xf32>
    %5 = vector.shape_cast %4 : vector<256xf32> to vector<1x256xf32>
    %cst_4 = arith.constant 8.000000e+00 : f32
    %6 = vector.broadcast %cst_4 : f32 to vector<1x256xf32>
    %7 = arith.divf %5, %6 : vector<1x256xf32>
    %8 = vector.broadcast %7 : vector<1x256xf32> to vector<8x256xf32>
    %9 = arith.subf %3, %8 : vector<8x256xf32>
    %10 = arith.mulf %9, %9 : vector<8x256xf32>
    %cst_5 = arith.constant dense<0.000000e+00> : vector<256xf32>
    %11 = vector.multi_reduction <add>, %10, %cst_5 [0] : vector<8x256xf32> to vector<256xf32>
    %12 = vector.shape_cast %11 : vector<256xf32> to vector<1x256xf32>
    %cst_6 = arith.constant 8.000000e+00 : f32
    %13 = vector.broadcast %cst_6 : f32 to vector<1x256xf32>
    %14 = arith.divf %12, %13 : vector<1x256xf32>
    %c0_7 = arith.constant 0 : index
    %c0_8 = arith.constant 0 : index
    %15 = vector.load %arg2[%c0_7, %c0_8] : memref<1x256xf32, #tpu.memory_space<vmem>>, vector<1x256xf32>
    %cst_9 = arith.constant 9.99999974E-6 : f32
    %16 = vector.broadcast %cst_9 : f32 to vector<1x256xf32>
    %17 = arith.addf %14, %16 : vector<1x256xf32>
    %18 = math.rsqrt %17 : vector<1x256xf32>
    %19 = arith.mulf %15, %18 : vector<1x256xf32>
    %20 = vector.broadcast %19 : vector<1x256xf32> to vector<8x256xf32>
    %21 = arith.mulf %9, %20 : vector<8x256xf32>
    %c0_10 = arith.constant 0 : index
    %c0_11 = arith.constant 0 : index
    %22 = vector.load %arg3[%c0_10, %c0_11] : memref<1x256xf32, #tpu.memory_space<vmem>>, vector<1x256xf32>
    %23 = vector.broadcast %22 : vector<1x256xf32> to vector<8x256xf32>
    %24 = arith.addf %21, %23 : vector<8x256xf32>
    %cst_12 = arith.constant 0.000000e+00 : f32
    %25 = vector.broadcast %cst_12 : f32 to vector<8x256xf32>
    %26 = arith.maximumf %24, %25 : vector<8x256xf32>
    %27 = arith.truncf %26 : vector<8x256xf32> to vector<8x256xbf16>
    %c0_13 = arith.constant 0 : index
    %c0_14 = arith.constant 0 : index
    %28 = vector.load %arg4[%c0_13, %c0_14] : memref<256x512xbf16, #tpu.memory_space<vmem>>, vector<256x512xbf16>
    %cst_15 = arith.constant dense<0.000000e+00> : vector<8x512xf32>
    %29 = tpu.matmul %27, %28, %cst_15 {dimension_numbers = #tpu.dot_dimension_numbers<[1], [0], [0], [1], [0, 0, 1, 1], [], []>} : vector<8x256xbf16>, vector<256x512xbf16>, vector<8x512xf32> -> vector<8x512xf32>
    %cst_16 = arith.constant dense<0.000000e+00> : vector<512xf32>
    %30 = vector.multi_reduction <add>, %29, %cst_16 [0] : vector<8x512xf32> to vector<512xf32>
    %31 = vector.shape_cast %30 : vector<512xf32> to vector<1x512xf32>
    %cst_17 = arith.constant 8.000000e+00 : f32
    %32 = vector.broadcast %cst_17 : f32 to vector<1x512xf32>
    %33 = arith.divf %31, %32 : vector<1x512xf32>
    %34 = vector.broadcast %33 : vector<1x512xf32> to vector<8x512xf32>
    %35 = arith.subf %29, %34 : vector<8x512xf32>
    %36 = arith.mulf %35, %35 : vector<8x512xf32>
    %cst_18 = arith.constant dense<0.000000e+00> : vector<512xf32>
    %37 = vector.multi_reduction <add>, %36, %cst_18 [0] : vector<8x512xf32> to vector<512xf32>
    %38 = vector.shape_cast %37 : vector<512xf32> to vector<1x512xf32>
    %cst_19 = arith.constant 8.000000e+00 : f32
    %39 = vector.broadcast %cst_19 : f32 to vector<1x512xf32>
    %40 = arith.divf %38, %39 : vector<1x512xf32>
    %c0_20 = arith.constant 0 : index
    %c0_21 = arith.constant 0 : index
    %41 = vector.load %arg5[%c0_20, %c0_21] : memref<1x512xf32, #tpu.memory_space<vmem>>, vector<1x512xf32>
    %cst_22 = arith.constant 9.99999974E-6 : f32
    %42 = vector.broadcast %cst_22 : f32 to vector<1x512xf32>
    %43 = arith.addf %40, %42 : vector<1x512xf32>
    %44 = math.rsqrt %43 : vector<1x512xf32>
    %45 = arith.mulf %41, %44 : vector<1x512xf32>
    %46 = vector.broadcast %45 : vector<1x512xf32> to vector<8x512xf32>
    %47 = arith.mulf %35, %46 : vector<8x512xf32>
    %c0_23 = arith.constant 0 : index
    %c0_24 = arith.constant 0 : index
    %48 = vector.load %arg6[%c0_23, %c0_24] : memref<1x512xf32, #tpu.memory_space<vmem>>, vector<1x512xf32>
    %49 = vector.broadcast %48 : vector<1x512xf32> to vector<8x512xf32>
    %50 = arith.addf %47, %49 : vector<8x512xf32>
    %cst_25 = arith.constant 0.000000e+00 : f32
    %51 = vector.broadcast %cst_25 : f32 to vector<8x512xf32>
    %52 = arith.maximumf %50, %51 : vector<8x512xf32>
    %53 = arith.truncf %52 : vector<8x512xf32> to vector<8x512xbf16>
    %c0_26 = arith.constant 0 : index
    %c0_27 = arith.constant 0 : index
    %54 = vector.load %arg7[%c0_26, %c0_27] : memref<512x1024xbf16, #tpu.memory_space<vmem>>, vector<512x1024xbf16>
    %cst_28 = arith.constant dense<0.000000e+00> : vector<8x1024xf32>
    %55 = tpu.matmul %53, %54, %cst_28 {dimension_numbers = #tpu.dot_dimension_numbers<[1], [0], [0], [1], [0, 0, 1, 1], [], []>} : vector<8x512xbf16>, vector<512x1024xbf16>, vector<8x1024xf32> -> vector<8x1024xf32>
    %cst_29 = arith.constant dense<0.000000e+00> : vector<1024xf32>
    %56 = vector.multi_reduction <add>, %55, %cst_29 [0] : vector<8x1024xf32> to vector<1024xf32>
    %57 = vector.shape_cast %56 : vector<1024xf32> to vector<1x1024xf32>
    %cst_30 = arith.constant 8.000000e+00 : f32
    %58 = vector.broadcast %cst_30 : f32 to vector<1x1024xf32>
    %59 = arith.divf %57, %58 : vector<1x1024xf32>
    %60 = vector.broadcast %59 : vector<1x1024xf32> to vector<8x1024xf32>
    %61 = arith.subf %55, %60 : vector<8x1024xf32>
    %62 = arith.mulf %61, %61 : vector<8x1024xf32>
    %cst_31 = arith.constant dense<0.000000e+00> : vector<1024xf32>
    %63 = vector.multi_reduction <add>, %62, %cst_31 [0] : vector<8x1024xf32> to vector<1024xf32>
    %64 = vector.shape_cast %63 : vector<1024xf32> to vector<1x1024xf32>
    %cst_32 = arith.constant 8.000000e+00 : f32
    %65 = vector.broadcast %cst_32 : f32 to vector<1x1024xf32>
    %66 = arith.divf %64, %65 : vector<1x1024xf32>
    %c0_33 = arith.constant 0 : index
    %c0_34 = arith.constant 0 : index
    %67 = vector.load %arg8[%c0_33, %c0_34] : memref<1x1024xf32, #tpu.memory_space<vmem>>, vector<1x1024xf32>
    %cst_35 = arith.constant 9.99999974E-6 : f32
    %68 = vector.broadcast %cst_35 : f32 to vector<1x1024xf32>
    %69 = arith.addf %66, %68 : vector<1x1024xf32>
    %70 = math.rsqrt %69 : vector<1x1024xf32>
    %71 = arith.mulf %67, %70 : vector<1x1024xf32>
    %72 = vector.broadcast %71 : vector<1x1024xf32> to vector<8x1024xf32>
    %73 = arith.mulf %61, %72 : vector<8x1024xf32>
    %c0_36 = arith.constant 0 : index
    %c0_37 = arith.constant 0 : index
    %74 = vector.load %arg9[%c0_36, %c0_37] : memref<1x1024xf32, #tpu.memory_space<vmem>>, vector<1x1024xf32>
    %75 = vector.broadcast %74 : vector<1x1024xf32> to vector<8x1024xf32>
    %76 = arith.addf %73, %75 : vector<8x1024xf32>
    %cst_38 = arith.constant 0.000000e+00 : f32
    %77 = vector.broadcast %cst_38 : f32 to vector<8x1024xf32>
    %78 = arith.maximumf %76, %77 : vector<8x1024xf32>
    %79 = arith.truncf %78 : vector<8x1024xf32> to vector<8x1024xbf16>
    %c0_39 = arith.constant 0 : index
    %c0_40 = arith.constant 0 : index
    %80 = vector.load %arg10[%c0_39, %c0_40] : memref<1024x784xbf16, #tpu.memory_space<vmem>>, vector<1024x784xbf16>
    %cst_41 = arith.constant dense<0.000000e+00> : vector<8x784xf32>
    %81 = tpu.matmul %79, %80, %cst_41 {dimension_numbers = #tpu.dot_dimension_numbers<[1], [0], [0], [1], [0, 0, 1, 1], [], []>} : vector<8x1024xbf16>, vector<1024x784xbf16>, vector<8x784xf32> -> vector<8x784xf32>
    %c0_42 = arith.constant 0 : index
    %c0_43 = arith.constant 0 : index
    %82 = vector.load %arg11[%c0_42, %c0_43] : memref<1x784xf32, #tpu.memory_space<vmem>>, vector<1x784xf32>
    %83 = vector.broadcast %82 : vector<1x784xf32> to vector<8x784xf32>
    %84 = arith.addf %81, %83 : vector<8x784xf32>
    %85 = math.tanh %84 : vector<8x784xf32>
    %c0_44 = arith.constant 0 : index
    %c0_45 = arith.constant 0 : index
    %86 = vector.load %arg12[%c0_44, %c0_45] : memref<8x784xf32, #tpu.memory_space<vmem>>, vector<8x784xf32>
    tpu.vector_store %arg12[%c0_44, %c0_45], %85 {strides = array<i32>} : memref<8x784xf32, #tpu.memory_space<vmem>>, vector<8x784xf32>,
    return
  }
}

</mosaic_0001>

<bundles_post_ra>
// kernel: tpu_custom_call.1
= control target key start
LH: loop header
LB: loop body
LE: loop exit
PB: predicated region body
PF: predicated region fallthrough
CT: control target
= control target key end

     0   :  { %s15843_s0 = inlined_call_operand.vmem [shape: f32[8,32], index: 0, kind: input, shape index: {}]   ;;  %s15844_s1 = inlined_call_operand.vmem [shape: bf16[32,256], index: 1, kind: input, shape index: {}]   ;;  %s15845_s2 = inlined_call_operand.vmem [shape: f32[1,256], index: 2, kind: input, shape index: {}]   ;;  %s15846_s3 = inlined_call_operand.vmem [shape: f32[1,256], index: 3, kind: input, shape index: {}]   ;;  %s15847_s4 = inlined_call_operand.vmem [shape: bf16[256,512], index: 4, kind: input, shape index: {}]   ;;  %s15848_s5 = inlined_call_operand.vmem [shape: f32[1,512], index: 5, kind: input, shape index: {}]   ;;  %s15849_s6 = inlined_call_operand.vmem [shape: f32[1,512], index: 6, kind: input, shape index: {}]   ;;  %s15850_s7 = inlined_call_operand.vmem [shape: bf16[512,1024], index: 7, kind: input, shape index: {}]   ;;  %s15851_s8 = inlined_call_operand.vmem [shape: f32[1,1024], index: 8, kind: input, shape index: {}]   ;;  %s15852_s9 = inlined_call_operand.vmem [shape: f32[1,1024], index: 9, kind: input, shape index: {}]   ;;  %s15853_s10 = inlined_call_operand.vmem [shape: bf16[1024,784], index: 10, kind: input, shape index: {}]   ;;  %s15854_s11 = inlined_call_operand.vmem [shape: f32[1,784], index: 11, kind: input, shape index: {}]   ;;  %s15855_s12 = inlined_call_operand.hbm [shape: f32[8,784], index: 12, kind: output, shape index: {}]  }
   0x1   :  { %v6698_v0 = vld [vmem:[%s15844_s1 + $0x10] sm:$0xf]  ;;  %v9781_v1 = vld [vmem:[%s15844_s1 + $0x14] sm:$0xf0]  ;;  %v9780_v2 = vld [vmem:[%s15844_s1 + $0x14] sm:$0xf] }
   0x2   :  { %v6699_v3 = vor.u32 %v9781_v1, %v6698_v0  ;;  %v6700_v4 = vld [vmem:[%s15844_s1 + $0x18] sm:$0xf0]  ;;  %v6690_v5 = vld [vmem:[%s15844_s1] sm:$0xf]  ;;  %v9779_v6 = vld [vmem:[%s15844_s1 + $0x4] sm:$0xf0] }
   0x3   :  { %v6703_v7 = vor.u32 %v9780_v2, %v6700_v4  ;;  %v9778_v8 = vld [vmem:[%s15844_s1 + $0x4] sm:$0xf]  ;;  %v6692_v9 = vld [vmem:[%s15844_s1 + $0x8] sm:$0xf0]  ;;  %v6691_v10 = vor.u32 %v9779_v6, %v6690_v5 }
   0x4   :  { %79 = vmatpush.bf16.msra.mxu0 %v6699_v3  ;;  %v43_v11 = vld [vmem:[%s15843_s0] sm:$0xff] }
   0x5   :  { %17 = vsyncpa [#allocation3], 0  ;;  %92 = vmatpush.bf16.msra.mxu1 %v6703_v7  ;;  %v6695_v12 = vor.u32 %v9778_v8, %v6692_v9  ;;  %v44_v13 = vpack.c.bf16 %v43_v11, %v43_v11  ;;  %vm69_vm0 = vcmask 261120   ;;  %v10624_v14 = vmov 8.0   ;;  %v6820_v16 = vld [vmem:[%s15847_s4 + $0xe0] sm:$0xf] }
   0x6   :  { %10552 = vrcp.f32 %v10624_v14  ;;  %v9812_v17 = vld [vmem:[%s15847_s4 + $0xec] sm:$0xf0]  ;;  %v6948_v18 = vld [vmem:[%s15847_s4 + $0x1e0] sm:$0xf]  ;;  %v9810_v21 = vld [vmem:[%s15847_s4 + $0xe4] sm:$0xf] }
   0x7   :  { %v6821_v19 = vor.u32 %v9812_v17, %v6820_v16  ;;  %v9844_v20 = vld [vmem:[%s15847_s4 + $0x1ec] sm:$0xf0]  ;;  %v6822_v22 = vld [vmem:[%s15847_s4 + $0xf0] sm:$0xf0]  ;;  %v9842_v25 = vld [vmem:[%s15847_s4 + $0x1e4] sm:$0xf] }
   0x8   :  { %80 = vmatpush.bf16.msra.mxu0 %v6691_v10  ;;  %v6949_v23 = vor.u32 %v9844_v20, %v6948_v18  ;;  %v6825_v24 = vor.u32 %v9810_v21, %v6822_v22  ;;  %v6950_v26 = vld [vmem:[%s15847_s4 + $0x1f0] sm:$0xf0]  ;;  %v6804_v29 = vld [vmem:[%s15847_s4 + $0xc0] sm:$0xf]  ;;  %v9808_v30 = vld [vmem:[%s15847_s4 + $0xcc] sm:$0xf0] }
   0x9   :  { %93 = vmatpush.bf16.msra.mxu1 %v6695_v12  ;;  %571 = vmatpush.bf16.msra.mxu2 %v6821_v19  ;;  %v6953_v28 = vor.u32 %v9842_v25, %v6950_v26  ;;  %v6932_v31 = vld [vmem:[%s15847_s4 + $0x1c0] sm:$0xf]  ;;  %v6805_v32 = vor.u32 %v9808_v30, %v6804_v29  ;;  %v9840_v33 = vld [vmem:[%s15847_s4 + $0x1cc] sm:$0xf0]  ;;  %v9806_v34 = vld [vmem:[%s15847_s4 + $0xc4] sm:$0xf] }
   0xa   :  { %584 = vmatpush.bf16.msra.mxu3 %v6949_v23  ;;  %v6806_v35 = vld [vmem:[%s15847_s4 + $0xd0] sm:$0xf0]  ;;  %v6933_v36 = vor.u32 %v9840_v33, %v6932_v31  ;;  %v9838_v38 = vld [vmem:[%s15847_s4 + $0x1c4] sm:$0xf]  ;;  %v6788_v42 = vld [vmem:[%s15847_s4 + $0xa0] sm:$0xf] }
   0xb   :  { %6704 = vmatmul.msk.bf16.vlgmr.msra.gmra.mxu0 %vm69_vm0, %v44_v13  ;;  %v6809_v37 = vor.u32 %v9806_v34, %v6806_v35  ;;  %v6934_v39 = vld [vmem:[%s15847_s4 + $0x1d0] sm:$0xf0]  ;;  %v9804_v43 = vld [vmem:[%s15847_s4 + $0xac] sm:$0xf0]  ;;  %v6916_v44 = vld [vmem:[%s15847_s4 + $0x1a0] sm:$0xf] }
   0xc   :  { %6705 = vmatmul.msk.bf16.vlgmr.msra.gmra.mxu1 %vm69_vm0, %v44_v13  ;;  %v10718_v15 = vpop.eup %10552  ;;  %597 = vmatpush.bf16.msrb.mxu0 %v6825_v24  ;;  %v6937_v41 = vor.u32 %v9838_v38, %v6934_v39  ;;  %v6789_v45 = vor.u32 %v9804_v43, %v6788_v42  ;;  %v9836_v46 = vld [vmem:[%s15847_s4 + $0x1ac] sm:$0xf0]  ;;  %v9802_v47 = vld [vmem:[%s15847_s4 + $0xa4] sm:$0xf]  ;;  %v6790_v48 = vld [vmem:[%s15847_s4 + $0xb0] sm:$0xf0] }
   0xd   :  { %v112_v27 = vmul.f32 8.0, %v10718_v15  ;;  %610 = vmatpush.bf16.msrb.mxu1 %v6953_v28  ;;  %572 = vmatpush.bf16.msra.mxu2 %v6805_v32  ;;  %v6917_v50 = vor.u32 %v9836_v46, %v6916_v44  ;;  %v6793_v51 = vor.u32 %v9802_v47, %v6790_v48  ;;  %v9834_v52 = vld [vmem:[%s15847_s4 + $0x1a4] sm:$0xf]  ;;  %v6918_v53 = vld [vmem:[%s15847_s4 + $0x1b0] sm:$0xf0]  ;;  %vm116_vm1 = vweird.f32 %v10718_v15 }
   0xe   :  { %585 = vmatpush.bf16.msra.mxu3 %v6933_v36  ;;  %v6921_v56 = vor.u32 %v9834_v52, %v6918_v53  ;;  %v6772_v59 = vld [vmem:[%s15847_s4 + $0x80] sm:$0xf]  ;;  %v9800_v60 = vld [vmem:[%s15847_s4 + $0x8c] sm:$0xf0]  ;;  %v9798_v1 = vld [vmem:[%s15847_s4 + $0x84] sm:$0xf] }
   0xf   :  { %v113_v40 = vsub.f32 1.0, %v112_v27  ;;  %v6773_v62 = vor.u32 %v9800_v60, %v6772_v59  ;;  %v6900_v63 = vld [vmem:[%s15847_s4 + $0x180] sm:$0xf]  ;;  %v9832_v0 = vld [vmem:[%s15847_s4 + $0x18c] sm:$0xf0]  ;;  %vm164_vm7 = vcmask 1040384  }
  0x10   :  { %598 = vmatpush.bf16.msrb.mxu0 %v6809_v37  ;;  %v6901_v3 = vor.u32 %v9832_v0, %v6900_v63  ;;  %v6774_v4 = vld [vmem:[%s15847_s4 + $0x90] sm:$0xf0]  ;;  %v9830_v5 = vld [vmem:[%s15847_s4 + $0x184] sm:$0xf]  ;;  %v6756_v12 = vld [vmem:[%s15847_s4 + $0x60] sm:$0xf] }
  0x11   :  { %611 = vmatpush.bf16.msrb.mxu1 %v6937_v41  ;;  %573 = vmatpush.bf16.msra.mxu2 %v6789_v45  ;;  %v114_v57 = vmul.f32 %v10718_v15, %v113_v40  ;;  %v6902_v6 = vld [vmem:[%s15847_s4 + $0x190] sm:$0xf0]  ;;  %v6777_v8 = vor.u32 %v9798_v1, %v6774_v4  ;;  %v9796_v13 = vld [vmem:[%s15847_s4 + $0x6c] sm:$0xf0]  ;;  %v6884_v17 = vld [vmem:[%s15847_s4 + $0x160] sm:$0xf] }
  0x12   :  { %586 = vmatpush.bf16.msra.mxu3 %v6917_v50  ;;  %v6905_v9 = vor.u32 %v9830_v5, %v6902_v6  ;;  %v6757_v16 = vor.u32 %v9796_v13, %v6756_v12  ;;  %v9828_v18 = vld [vmem:[%s15847_s4 + $0x16c] sm:$0xf0]  ;;  %v9794_v19 = vld [vmem:[%s15847_s4 + $0x64] sm:$0xf]  ;;  %v6758_v23 = vld [vmem:[%s15847_s4 + $0x70] sm:$0xf0] }
  0x13   :  { %v115_v10 = vadd.f32 %v10718_v15, %v114_v57  ;;  %v6885_v22 = vor.u32 %v9828_v18, %v6884_v17  ;;  %v9826_v24 = vld [vmem:[%s15847_s4 + $0x164] sm:$0xf]  ;;  %v6886_v25 = vld [vmem:[%s15847_s4 + $0x170] sm:$0xf0]  ;;  %v6761_v28 = vor.u32 %v9794_v19, %v6758_v23  ;;  %v6740_v32 = vld [vmem:[%s15847_s4 + $0x40] sm:$0xf] }
  0x14   :  { %599 = vmatpush.bf16.msrb.mxu0 %v6793_v51  ;;  %v6889_v29 = vor.u32 %v9826_v24, %v6886_v25  ;;  %v9792_v34 = vld [vmem:[%s15847_s4 + $0x4c] sm:$0xf0]  ;;  %v6868_v35 = vld [vmem:[%s15847_s4 + $0x140] sm:$0xf]  ;;  %v9790_v39 = vld [vmem:[%s15847_s4 + $0x44] sm:$0xf] }
  0x15   :  { %612 = vmatpush.bf16.msrb.mxu1 %v6921_v56  ;;  %574 = vmatpush.bf16.msra.mxu2 %v6773_v62  ;;  %v10855_v30 = vsel %vm116_vm1, %v10718_v15, %v115_v10  ;;  %v9824_v15 = vld [vmem:[%s15847_s4 + $0x14c] sm:$0xf0]  ;;  %v6741_v37 = vor.u32 %v9792_v34, %v6740_v32  ;;  %v6742_v40 = vld [vmem:[%s15847_s4 + $0x50] sm:$0xf0]  ;;  %v9822_v41 = vld [vmem:[%s15847_s4 + $0x144] sm:$0xf] }
  0x16   :  { %587 = vmatpush.bf16.msra.mxu3 %v6901_v3  ;;  %v6869_v38 = vor.u32 %v9824_v15, %v6868_v35  ;;  %v6745_v43 = vor.u32 %v9790_v39, %v6742_v40  ;;  %v6870_v44 = vld [vmem:[%s15847_s4 + $0x150] sm:$0xf0]  ;;  %v6724_v47 = vld [vmem:[%s15847_s4 + $0x20] sm:$0xf]  ;;  %v9788_v48 = vld [vmem:[%s15847_s4 + $0x2c] sm:$0xf0] }
  0x17   :  { %v6873_v46 = vor.u32 %v9822_v41, %v6870_v44  ;;  %v6852_v50 = vld [vmem:[%s15847_s4 + $0x120] sm:$0xf]  ;;  %v6725_v52 = vor.u32 %v9788_v48, %v6724_v47  ;;  %v9820_v53 = vld [vmem:[%s15847_s4 + $0x12c] sm:$0xf0]  ;;  %v6726_v56 = vld [vmem:[%s15847_s4 + $0x30] sm:$0xf0] }
  0x18   :  { %600 = vmatpush.bf16.msrb.mxu0 %v6777_v8  ;;  %v9818_v59 = vld [vmem:[%s15847_s4 + $0x124] sm:$0xf]  ;;  %v6854_v60 = vld [vmem:[%s15847_s4 + $0x130] sm:$0xf0]  ;;  %v9784_v0 = vld [vmem:[%s15847_s4 + $0xc] sm:$0xf0] }
  0x19   :  { %613 = vmatpush.bf16.msrb.mxu1 %v6905_v9  ;;  %575 = vmatpush.bf16.msra.mxu2 %v6757_v16  ;;  %v6857_v62 = vor.u32 %v9818_v59, %v6854_v60  ;;  %v6836_v1 = vld [vmem:[%s15847_s4 + $0x100] sm:$0xf]  ;;  %v9816_v4 = vld [vmem:[%s15847_s4 + $0x10c] sm:$0xf0]  ;;  %v9782_v5 = vld [vmem:[%s15847_s4 + $0x4] sm:$0xf] }
  0x1a   :  { %588 = vmatpush.bf16.msra.mxu3 %v6885_v22  ;;  %v6710_v8 = vld [vmem:[%s15847_s4 + $0x10] sm:$0xf0]  ;;  %v9814_v9 = vld [vmem:[%s15847_s4 + $0x104] sm:$0xf]  ;;  %v6828_v13 = vld [vmem:[%s15847_s4 + $0xe8] sm:$0xf] }
  0x1b   :  { %v6838_v12 = vld [vmem:[%s15847_s4 + $0x110] sm:$0xf0]  ;;  %v6956_v19 = vld [vmem:[%s15847_s4 + $0x1e8] sm:$0xf]  ;;  %v9811_v23 = vld [vmem:[%s15847_s4 + $0xec] sm:$0xf] }
  0x1c   :  { %601 = vmatpush.bf16.msrb.mxu0 %v6761_v28  ;;  %v6841_v17 = vor.u32 %v9814_v9, %v6838_v12  ;;  %v6830_v24 = vld [vmem:[%s15847_s4 + $0xf8] sm:$0xf0]  ;;  %v6812_v32 = vld [vmem:[%s15847_s4 + $0xc8] sm:$0xf]  ;;  %v9805_v48 = vld [vmem:[%s15847_s4 + $0xb4] sm:$0xf0] }
  0x1d   :  { %614 = vmatpush.bf16.msrb.mxu1 %v6889_v29  ;;  %576 = vmatpush.bf16.msra.mxu2 %v6741_v37  ;;  %v6958_v28 = vld [vmem:[%s15847_s4 + $0x1f8] sm:$0xf0]  ;;  %v6940_v34 = vld [vmem:[%s15847_s4 + $0x1c8] sm:$0xf]  ;;  %v9807_v37 = vld [vmem:[%s15847_s4 + $0xcc] sm:$0xf] }
  0x1e   :  { %589 = vmatpush.bf16.msra.mxu3 %v6869_v38  ;;  %v6814_v38 = vld [vmem:[%s15847_s4 + $0xd8] sm:$0xf0] }
  0x1f   :  { %v6817_v41 = vor.u32 %v9807_v37, %v6814_v38  ;;  %v6910_v12 = vld [vmem:[%s15847_s4 + $0x198] sm:$0xf0]  ;;  %v6732_v38 = vld [vmem:[%s15847_s4 + $0x28] sm:$0xf] }
  0x20   :  { %602 = vmatpush.bf16.msrb.mxu0 %v6745_v43  ;;  %v6942_v43 = vld [vmem:[%s15847_s4 + $0x1d8] sm:$0xf0] }
  0x21   :  { %615 = vmatpush.bf16.msrb.mxu1 %v6873_v46  ;;  %577 = vmatpush.bf16.msra.mxu2 %v6725_v52  ;;  %v6796_v46 = vld [vmem:[%s15847_s4 + $0xa8] sm:$0xf]  ;;  %v6878_v37 = vld [vmem:[%s15847_s4 + $0x158] sm:$0xf0] }
  0x25   :  { %616 = vmatpush.bf16.msrb.mxu1 %v6857_v62  ;;  %v6926_v62 = vld [vmem:[%s15847_s4 + $0x1b8] sm:$0xf0] }
  0x29   :  { %617 = vmatpush.bf16.msrb.mxu1 %v6841_v17  ;;  %v6892_v17 = vld [vmem:[%s15847_s4 + $0x168] sm:$0xf] }
  0x88   :  { %v10787_v49 = vpop.f32.mrf.mxu0 }
  0x89   :  { %v99_v54 = vrot.slane %v10787_v49, 4  ;;  %v10796_v55 = vpop.f32.mrf.mxu1 }
  0x8a   :  { %v105_v58 = vrot.slane %v10796_v55, 4 }
  0x8b   :  { %v100_v61 = vadd.f32 %v99_v54, %v10787_v49  ;;  %v9786_v54 = vld [vmem:[%s15847_s4 + $0x24] sm:$0xf] }
  0x8c   :  { %v106_v2 = vadd.f32 %v105_v58, %v10796_v55  ;;  %v6729_v58 = vor.u32 %v9786_v54, %v6726_v56  ;;  %v9837_v54 = vld [vmem:[%s15847_s4 + $0x1b4] sm:$0xf0]  ;;  %v9803_v56 = vld [vmem:[%s15847_s4 + $0xac] sm:$0xf] }
  0x8d   :  { %v101_v7 = vrot.slane %v100_v61, 2 }
  0x8e   :  { %v107_v11 = vrot.slane %v106_v2, 2  ;;  %603 = vmatpush.bf16.msrb.mxu0 %v6729_v58 }
  0x8f   :  { %v102_v14 = vadd.f32 %v101_v7, %v100_v61  ;;  %v6837_v7 = vor.u32 %v9816_v4, %v6836_v1  ;;  %v9801_v1 = vld [vmem:[%s15847_s4 + $0x94] sm:$0xf0] }
  0x90   :  { %v108_v20 = vadd.f32 %v107_v11, %v106_v2  ;;  %v84_v21 = vpop.f32.mrf.mxu0  ;;  %v6713_v11 = vor.u32 %v9782_v5, %v6710_v8  ;;  %v6782_v8 = vld [vmem:[%s15847_s4 + $0x98] sm:$0xf0] }
  0x91   :  { %v103_v26 = vrot.slane %v102_v14, 1  ;;  %v97_v27 = vpop.f32.mrf.mxu1 }
  0x92   :  { %v109_v31 = vrot.slane %v108_v20, 1  ;;  %604 = vmatpush.bf16.msrb.mxu0 %v6713_v11  ;;  %v9843_v27 = vld [vmem:[%s15847_s4 + $0x1ec] sm:$0xf] }
  0x93   :  { %v104_v33 = vadd.f32 %v103_v26, %v102_v14  ;;  %v9813_v14 = vld [vmem:[%s15847_s4 + $0xf4] sm:$0xf0]  ;;  %v6833_v26 = vor.u32 %v9811_v23, %v6830_v24  ;;  %v9831_v11 = vld [vmem:[%s15847_s4 + $0x18c] sm:$0xf] }
  0x94   :  { %v110_v36 = vadd.f32 %v109_v31, %v108_v20  ;;  %v6829_v18 = vor.u32 %v9813_v14, %v6828_v13  ;;  %v9845_v20 = vld [vmem:[%s15847_s4 + $0x1f4] sm:$0xf0]  ;;  %v6961_v31 = vor.u32 %v9843_v27, %v6958_v28  ;;  %v6913_v13 = vor.u32 %v9831_v11, %v6910_v12  ;;  %v6764_v14 = vld [vmem:[%s15847_s4 + $0x68] sm:$0xf]  ;;  %v9827_v24 = vld [vmem:[%s15847_s4 + $0x16c] sm:$0xf] }
  0x95   :  { %v118_v42 = vmul.f32 %v10855_v30, %v104_v33  ;;  %v6957_v22 = vor.u32 %v9845_v20, %v6956_v19  ;;  %v9809_v33 = vld [vmem:[%s15847_s4 + $0xd4] sm:$0xf0]  ;;  %v9795_v20 = vld [vmem:[%s15847_s4 + $0x6c] sm:$0xf] }
  0x96   :  { %v119_v45 = vmul.f32 %v10855_v30, %v110_v36  ;;  %649 = vmatpush.bf16.msra.mxu0 %v6833_v26  ;;  %v6813_v15 = vor.u32 %v9809_v33, %v6812_v32  ;;  %v9841_v36 = vld [vmem:[%s15847_s4 + $0x1d4] sm:$0xf0]  ;;  %662 = vmatpush.bf16.msra.mxu1 %v6961_v31  ;;  %v6748_v26 = vld [vmem:[%s15847_s4 + $0x48] sm:$0xf]  ;;  %v9791_v33 = vld [vmem:[%s15847_s4 + $0x4c] sm:$0xf] }
  0x97   :  { %v10893_v51 = vsub.f32 %v10787_v49, %v118_v42  ;;  %v6853_v49 = vor.u32 %v9820_v53, %v6852_v50  ;;  %v6941_v40 = vor.u32 %v9841_v36, %v6940_v34  ;;  %v9839_v42 = vld [vmem:[%s15847_s4 + $0x1cc] sm:$0xf]  ;;  %v6924_v50 = vld [vmem:[%s15847_s4 + $0x1a8] sm:$0xf]  ;;  %v6797_v53 = vor.u32 %v9805_v48, %v6796_v46  ;;  %v9829_v19 = vld [vmem:[%s15847_s4 + $0x174] sm:$0xf0] }
  0x98   :  { %v10905_v57 = vsub.f32 %v10796_v55, %v119_v45  ;;  %v6708_v55 = vld [vmem:[%s15847_s4] sm:$0xf]  ;;  %v6945_v45 = vor.u32 %v9839_v42, %v6942_v43  ;;  %v6925_v59 = vor.u32 %v9837_v54, %v6924_v50  ;;  %v9793_v28 = vld [vmem:[%s15847_s4 + $0x54] sm:$0xf0]  ;;  %v6750_v34 = vld [vmem:[%s15847_s4 + $0x58] sm:$0xf0] }
  0x99   :  { %v122_v61 = vmul.f32 %v10893_v51, %v10893_v51  ;;  %590 = vmatpush.bf16.msra.mxu3 %v6853_v49  ;;  %v6709_v3 = vor.u32 %v9784_v0, %v6708_v55  ;;  %v6798_v49 = vld [vmem:[%s15847_s4 + $0xb8] sm:$0xf0]  ;;  %v9825_v31 = vld [vmem:[%s15847_s4 + $0x154] sm:$0xf0]  ;;  %v6749_v32 = vor.u32 %v9793_v28, %v6748_v26  ;;  %v6753_v42 = vor.u32 %v9791_v33, %v6750_v34  ;;  %v6860_v43 = vld [vmem:[%s15847_s4 + $0x128] sm:$0xf] }
  0x9a   :  { %v123_v63 = vmul.f32 %v10905_v57, %v10905_v57  ;;  %650 = vmatpush.bf16.msra.mxu0 %v6817_v41  ;;  %663 = vmatpush.bf16.msra.mxu1 %v6945_v45  ;;  %v6801_v60 = vor.u32 %v9803_v56, %v6798_v49  ;;  %v6734_v48 = vld [vmem:[%s15847_s4 + $0x38] sm:$0xf0] }
  0x9b   :  { %v124_v2 = vrot.slane %v122_v61, 4  ;;  %578 = vmatpush.bf16.msra.mxu2 %v6709_v3  ;;  %v9833_v3 = vld [vmem:[%s15847_s4 + $0x194] sm:$0xf0]  ;;  %v6862_v54 = vld [vmem:[%s15847_s4 + $0x138] sm:$0xf0] }
  0x9c   :  { %v130_v6 = vrot.slane %v123_v63, 4 }
  0x9d   :  { %v125_v10 = vadd.f32 %v124_v2, %v122_v61  ;;  %591 = vmatpush.bf16.msra.mxu3 %v6837_v7  ;;  %v9835_v61 = vld [vmem:[%s15847_s4 + $0x1ac] sm:$0xf]  ;;  %v6908_v2 = vld [vmem:[%s15847_s4 + $0x188] sm:$0xf] }
  0x9e   :  { %v131_v16 = vadd.f32 %v130_v6, %v123_v63  ;;  %v6780_v63 = vld [vmem:[%s15847_s4 + $0x88] sm:$0xf]  ;;  %v6929_v0 = vor.u32 %v9835_v61, %v6926_v62  ;;  %v6909_v6 = vor.u32 %v9833_v3, %v6908_v2  ;;  %v9799_v7 = vld [vmem:[%s15847_s4 + $0x8c] sm:$0xf]  ;;  %651 = vmatpush.bf16.msra.mxu0 %v6801_v60  ;;  %v6718_v2 = vld [vmem:[%s15847_s4 + $0x18] sm:$0xf0] }
  0x9f   :  { %v126_v21 = vrot.slane %v125_v10, 2  ;;  %623 = vmatpush.bf16.msrb.mxu2 %v6829_v18  ;;  %v6781_v5 = vor.u32 %v9801_v1, %v6780_v63  ;;  %v6844_v62 = vld [vmem:[%s15847_s4 + $0x108] sm:$0xf]  ;;  %v9817_v63 = vld [vmem:[%s15847_s4 + $0x114] sm:$0xf0] }
  0xa0   :  { %v132_v25 = vrot.slane %v131_v16, 2  ;;  %664 = vmatpush.bf16.msra.mxu1 %v6929_v0  ;;  %v9783_v1 = vld [vmem:[%s15847_s4 + $0xc] sm:$0xf] }
  0xa1   :  { %v127_v29 = vadd.f32 %v126_v21, %v125_v10  ;;  %636 = vmatpush.bf16.msrb.mxu3 %v6957_v22  ;;  %v6785_v10 = vor.u32 %v9799_v7, %v6782_v8  ;;  %v6766_v21 = vld [vmem:[%s15847_s4 + $0x78] sm:$0xf0]  ;;  %v6893_v22 = vor.u32 %v9829_v19, %v6892_v17  ;;  %v6721_v11 = vor.u32 %v9783_v1, %v6718_v2 }
  0xa2   :  { %v133_v35 = vadd.f32 %v132_v25, %v131_v16  ;;  %v9797_v16 = vld [vmem:[%s15847_s4 + $0x74] sm:$0xf0]  ;;  %v6769_v23 = vor.u32 %v9795_v20, %v6766_v21  ;;  %v6894_v25 = vld [vmem:[%s15847_s4 + $0x178] sm:$0xf0]  ;;  %v175_v20 = vld [vmem:[%s15846_s3] sm:$0x3] }
  0xa3   :  { %v128_v39 = vrot.slane %v127_v29, 1  ;;  %624 = vmatpush.bf16.msrb.mxu2 %v6813_v15  ;;  %v6765_v18 = vor.u32 %v9797_v16, %v6764_v14  ;;  %652 = vmatpush.bf16.msra.mxu0 %v6785_v10  ;;  %v6897_v27 = vor.u32 %v9827_v24, %v6894_v25  ;;  %v6846_v7 = vld [vmem:[%s15847_s4 + $0x118] sm:$0xf0]  ;;  %v6845_v10 = vor.u32 %v9817_v63, %v6844_v62  ;;  %v7924_v63 = vld [vmem:[%s15850_s7 + $0x780] sm:$0xf]  ;;  %s6679_s3 = sshll.u32 %s15855_s12, 4  ;;  %s6680_s3 = int_to_ptr.hbm [resolvable:$true] %s6679_s3 }
  0xa4   :  { %v134_v44 = vrot.slane %v133_v35, 1  ;;  %665 = vmatpush.bf16.msra.mxu1 %v6913_v13  ;;  %v177_v24 = vperm.slane %v175_v20, 0 }
  0xa5   :  { %v129_v47 = vadd.f32 %v128_v39, %v127_v29  ;;  %637 = vmatpush.bf16.msrb.mxu3 %v6941_v40  ;;  %v6876_v29 = vld [vmem:[%s15847_s4 + $0x148] sm:$0xf]  ;;  %v9789_v39 = vld [vmem:[%s15847_s4 + $0x34] sm:$0xf0] }
  0xa6   :  { %v135_v52 = vadd.f32 %v134_v44, %v133_v35  ;;  %v9823_v35 = vld [vmem:[%s15847_s4 + $0x14c] sm:$0xf]  ;;  %v6877_v36 = vor.u32 %v9825_v31, %v6876_v29  ;;  %v9821_v44 = vld [vmem:[%s15847_s4 + $0x134] sm:$0xf0] }
  0xa7   :  { %v136_v58 = vmul.f32 %v129_v47, %v10855_v30  ;;  %625 = vmatpush.bf16.msrb.mxu2 %v6797_v53  ;;  %653 = vmatpush.bf16.msra.mxu0 %v6769_v23  ;;  %v6881_v46 = vor.u32 %v9823_v35, %v6878_v37  ;;  %v9787_v47 = vld [vmem:[%s15847_s4 + $0x2c] sm:$0xf]  ;;  %v6861_v49 = vor.u32 %v9821_v44, %v6860_v43  ;;  %v178_v23 = vperm.slane %v175_v20, 1  ;;  %v7956_v43 = vld [vmem:[%s15850_s7 + $0x7c0] sm:$0xf] }
  0xa8   :  { %v137_v55 = vmul.f32 %v135_v52, %v10855_v30  ;;  %666 = vmatpush.bf16.msra.mxu1 %v6897_v27  ;;  %v6733_v52 = vor.u32 %v9789_v39, %v6732_v38  ;;  %v9819_v53 = vld [vmem:[%s15847_s4 + $0x12c] sm:$0xf]  ;;  %v6737_v61 = vor.u32 %v9787_v47, %v6734_v48  ;;  %v9970_v38 = vld [vmem:[%s15850_s7 + $0x3dc] sm:$0xf0] }
  0xa9   :  { %v11027_v4 = vadd.f32 1e-05, %v136_v58  ;;  %638 = vmatpush.bf16.msrb.mxu3 %v6925_v59  ;;  %v6716_v58 = vld [vmem:[%s15847_s4 + $0x8] sm:$0xf]  ;;  %v9785_v59 = vld [vmem:[%s15847_s4 + $0x14] sm:$0xf0]  ;;  %v6865_v0 = vor.u32 %v9819_v53, %v6862_v54 }
  0xaa   :  { %v11035_v9 = vadd.f32 1e-05, %v137_v55  ;;  %v7700_v39 = vld [vmem:[%s15850_s7 + $0x5c0] sm:$0xf] }
  0xab   :  { %10554 = vrsqrt.f32 %v11027_v4  ;;  %626 = vmatpush.bf16.msrb.mxu2 %v6781_v5  ;;  %654 = vmatpush.bf16.msra.mxu0 %v6753_v42  ;;  %v6717_v5 = vor.u32 %v9785_v59, %v6716_v58  ;;  %vm147_vm6 = vweird.f32 %v11027_v4  ;;  %v10098_v44 = vld [vmem:[%s15850_s7 + $0x7dc] sm:$0xf0] }
  0xac   :  { %10556 = vrsqrt.f32 %v11035_v9  ;;  %667 = vmatpush.bf16.msra.mxu1 %v6881_v46  ;;  %vm157_vm3 = vweird.f32 %v11035_v9  ;;  %v7957_v46 = vor.u32 %v10098_v44, %v7956_v43  ;;  %v7156_v47 = vld [vmem:[%s15850_s7 + $0x180] sm:$0xf] }
  0xad   :  { %639 = vmatpush.bf16.msrb.mxu3 %v6909_v6  ;;  %v9815_v6 = vld [vmem:[%s15847_s4 + $0x10c] sm:$0xf]  ;;  %v9898_v48 = vld [vmem:[%s15850_s7 + $0x19c] sm:$0xf0] }
  0xae   :  { %v6849_v14 = vor.u32 %v9815_v6, %v6846_v7  ;;  %v7668_v58 = vld [vmem:[%s15850_s7 + $0x580] sm:$0xf] }
  0xaf   :  { %627 = vmatpush.bf16.msrb.mxu2 %v6765_v18  ;;  %655 = vmatpush.bf16.msra.mxu0 %v6737_v61  ;;  %v10026_v59 = vld [vmem:[%s15850_s7 + $0x59c] sm:$0xf0] }
  0xb0   :  { %668 = vmatpush.bf16.msra.mxu1 %v6865_v0  ;;  %v7669_v62 = vor.u32 %v10026_v59, %v7668_v58  ;;  %v7124_v6 = vld [vmem:[%s15850_s7 + $0x140] sm:$0xf] }
  0xb1   :  { %v11090_v15 = vpop.eup %10554  ;;  %640 = vmatpush.bf16.msrb.mxu3 %v6893_v22  ;;  %v9890_v7 = vld [vmem:[%s15850_s7 + $0x15c] sm:$0xf0] }
  0xb2   :  { %v10557_v40 = vpop.eup %10556  ;;  %v142_v41 = vmul.f32 %v11090_v15, %v11027_v4  ;;  %vm148_vm4 = vweird.f32 %v11090_v15 }
  0xb3   :  { %v152_v45 = vmul.f32 %v10557_v40, %v11035_v9  ;;  %628 = vmatpush.bf16.msrb.mxu2 %v6749_v32  ;;  %vm158_vm2 = vweird.f32 %v10557_v40  ;;  %v138_v9 = vld [vmem:[%s15845_s2] sm:$0x3]  ;;  %vm149_vm8 = vmor %vm147_vm6, %vm148_vm4  ;;  %656 = vmatpush.bf16.msra.mxu0 %v6721_v11  ;;  %vm794_vm6 = vcmask 1041408  }
  0xb4   :  { %v143_v50 = vmul.f32 %v11090_v15, %v142_v41  ;;  %vm159_vm5 = vmor %vm157_vm3, %vm158_vm2  ;;  %669 = vmatpush.bf16.msra.mxu1 %v6849_v14  ;;  %v7380_v11 = vld [vmem:[%s15850_s7 + $0x340] sm:$0xf] }
  0xb5   :  { %v153_v56 = vmul.f32 %v10557_v40, %v152_v45  ;;  %641 = vmatpush.bf16.msrb.mxu3 %v6877_v36 }
  0xb6   :  { %v144_v60 = vmul.f32 0.5, %v143_v50  ;;  %v7412_v50 = vld [vmem:[%s15850_s7 + $0x380] sm:$0xf] }
  0xb7   :  { %v154_v55 = vmul.f32 0.5, %v153_v56  ;;  %629 = vmatpush.bf16.msrb.mxu2 %v6733_v52  ;;  %v7157_v56 = vor.u32 %v9898_v48, %v7156_v47  ;;  %v9938_v47 = vld [vmem:[%s15850_s7 + $0x2dc] sm:$0xf0] }
  0xb8   :  { %v145_v3 = vsub.f32 1.5, %v144_v60  ;;  %v7572_v48 = vld [vmem:[%s15850_s7 + $0x4c0] sm:$0xf] }
  0xb9   :  { %v155_v8 = vsub.f32 1.5, %v154_v55  ;;  %642 = vmatpush.bf16.msrb.mxu3 %v6861_v49  ;;  %v9962_v49 = vld [vmem:[%s15850_s7 + $0x39c] sm:$0xf0] }
  0xba   :  { %v146_v12 = vmul.f32 %v11090_v15, %v145_v3  ;;  %v7413_v61 = vor.u32 %v9962_v49, %v7412_v50  ;;  %v10090_v55 = vld [vmem:[%s15850_s7 + $0x79c] sm:$0xf0] }
  0xbb   :  { %v156_v13 = vmul.f32 %v10557_v40, %v155_v8  ;;  %630 = vmatpush.bf16.msrb.mxu2 %v6717_v5  ;;  %v7925_v1 = vor.u32 %v10090_v55, %v7924_v63  ;;  %v9866_v63 = vld [vmem:[%s15850_s7 + $0x9c] sm:$0xf0] }
  0xbc   :  { %v150_v18 = vsel %vm149_vm8, %v11090_v15, %v146_v12  ;;  %v7444_v15 = vld [vmem:[%s15850_s7 + $0x3c0] sm:$0xf] }
  0xbd   :  { %v160_v16 = vsel %vm159_vm5, %v10557_v40, %v156_v13  ;;  %643 = vmatpush.bf16.msrb.mxu3 %v6845_v10  ;;  %v10034_v40 = vld [vmem:[%s15850_s7 + $0x5dc] sm:$0xf0]  ;;  %v7445_v41 = vor.u32 %v9970_v38, %v7444_v15  ;;  %v7125_v10 = vor.u32 %v9890_v7, %v7124_v6  ;;  %vm792_vm5 = vcmask 1042434  }
  0xbe   :  { %v163_v17 = vrot.slane %v160_v16, 7  ;;  %v7701_v42 = vor.u32 %v10034_v40, %v7700_v39  ;;  %v9954_v12 = vld [vmem:[%s15850_s7 + $0x35c] sm:$0xf0] }
  0xbf   :  { %v7636_v13 = vld [vmem:[%s15850_s7 + $0x540] sm:$0xf]  ;;  %v7381_v16 = vor.u32 %v9954_v12, %v7380_v11 }
  0xc0   :  { %v165_v19 = vsel %vm164_vm7, %v150_v18, %v163_v17  ;;  %v7892_v17 = vld [vmem:[%s15850_s7 + $0x740] sm:$0xf] }
  0xc1   :  { %v167_v4 = vmul.f32 %v165_v19, %v138_v9  ;;  %v10018_v9 = vld [vmem:[%s15850_s7 + $0x55c] sm:$0xf0] }
  0xc2   :  { %v10082_v18 = vld [vmem:[%s15850_s7 + $0x75c] sm:$0xf0]  ;;  %v7637_v20 = vor.u32 %v10018_v9, %v7636_v13 }
  0xc3   :  { %v169_v21 = vperm.slane %v167_v4, 0  ;;  %v170_v22 = vperm.slane %v167_v4, 1  ;;  %v7893_v4 = vor.u32 %v10082_v18, %v7892_v17  ;;  %v7284_v55 = vld [vmem:[%s15850_s7 + $0x280] sm:$0xf] }
  0xc4   :  { %v9930_v6 = vld [vmem:[%s15850_s7 + $0x29c] sm:$0xf0] }
  0xc5   :  { %v174_v25 = vmul.f32 %v170_v22, %v10905_v57  ;;  %v173_v26 = vmul.f32 %v169_v21, %v10893_v51  ;;  %v7188_v51 = vld [vmem:[%s15850_s7 + $0x1c0] sm:$0xf]  ;;  %v7285_v11 = vor.u32 %v9930_v6, %v7284_v55  ;;  %v9902_v55 = vld [vmem:[%s15850_s7 + $0x1c4] sm:$0xf] }
  0xc6   :  { %v9906_v57 = vld [vmem:[%s15850_s7 + $0x1dc] sm:$0xf0] }
  0xc7   :  { %v182_v27 = vadd.f32 %v178_v23, %v174_v25  ;;  %v181_v28 = vadd.f32 %v177_v24, %v173_v26  ;;  %v7189_v37 = vor.u32 %v9906_v57, %v7188_v51  ;;  %v7092_v22 = vld [vmem:[%s15850_s7 + $0x100] sm:$0xf] }
  0xc8   :  { %v9882_v23 = vld [vmem:[%s15850_s7 + $0x11c] sm:$0xf0] }
  0xc9   :  { %v183_v29 = vmax.f32 %v181_v28, 0.0  ;;  %v184_v31 = vmax.f32 %v182_v27, 0.0  ;;  %v7093_v27 = vor.u32 %v9882_v23, %v7092_v22  ;;  %v7348_v28 = vld [vmem:[%s15850_s7 + $0x300] sm:$0xf] }
  0xca   :  { %v10074_v51 = vld [vmem:[%s15850_s7 + $0x71c] sm:$0xf0] }
  0xcb   :  { %v185_v32 = vpack.c.bf16 %v183_v29, %v183_v29  ;;  %v186_v33 = vpack.c.bf16 %v184_v31, %v184_v31  ;;  %v9946_v29 = vld [vmem:[%s15850_s7 + $0x31c] sm:$0xf0] }
  0xcc   :  { %v7604_v31 = vld [vmem:[%s15850_s7 + $0x500] sm:$0xf] }
  0xcd   :  { %579 = vmatmul.bf16.vlgmr.msra.gmra.mxu2 %v185_v32  ;;  %592 = vmatmul.bf16.vlgmr.msra.gmra.mxu3 %v186_v33  ;;  %v7540_v7 = vld [vmem:[%s15850_s7 + $0x480] sm:$0xf] }
  0xce   :  { %605 = vmatmul.bf16.vlgmr.msrb.gmra.mxu0 %v185_v32  ;;  %618 = vmatmul.bf16.vlgmr.msrb.gmra.mxu1 %v186_v33  ;;  %v9994_v12 = vld [vmem:[%s15850_s7 + $0x49c] sm:$0xf0] }
  0xcf   :  { %2369 = vmatpush.bf16.msra.mxu2 %v7189_v37  ;;  %2382 = vmatpush.bf16.msra.mxu3 %v7445_v41  ;;  %v7060_v41 = vld [vmem:[%s15850_s7 + $0xc0] sm:$0xf] }
  0xd0   :  { %2395 = vmatpush.bf16.msrb.mxu0 %v7701_v42  ;;  %2408 = vmatpush.bf16.msrb.mxu1 %v7957_v46  ;;  %v9874_v42 = vld [vmem:[%s15850_s7 + $0xdc] sm:$0xf0] }
  0xd1   :  { %v7316_v46 = vld [vmem:[%s15850_s7 + $0x2c0] sm:$0xf] }
  0xd2   :  { %v7796_v13 = vld [vmem:[%s15850_s7 + $0x680] sm:$0xf] }
  0xd3   :  { %2370 = vmatpush.bf16.msra.mxu2 %v7157_v56  ;;  %2383 = vmatpush.bf16.msra.mxu3 %v7413_v61  ;;  %v9858_v22 = vld [vmem:[%s15850_s7 + $0x5c] sm:$0xf0] }
  0xd4   :  { %2396 = vmatpush.bf16.msrb.mxu0 %v7669_v62  ;;  %2409 = vmatpush.bf16.msrb.mxu1 %v7925_v1  ;;  %v7028_v62 = vld [vmem:[%s15850_s7 + $0x80] sm:$0xf] }
  0xd7   :  { %2371 = vmatpush.bf16.msra.mxu2 %v7125_v10  ;;  %2384 = vmatpush.bf16.msra.mxu3 %v7381_v16 }
  0xd8   :  { %2397 = vmatpush.bf16.msrb.mxu0 %v7637_v20  ;;  %2410 = vmatpush.bf16.msrb.mxu1 %v7893_v4 }
  0xdb   :  { %2372 = vmatpush.bf16.msra.mxu2 %v7093_v27  ;;  %v9922_v27 = vld [vmem:[%s15850_s7 + $0x25c] sm:$0xf0] }
  0xdd   :  { %631 = vmatmul.bf16.vlgmr.msrb.gmra.mxu2 %v185_v32  ;;  %644 = vmatmul.bf16.vlgmr.msrb.gmra.mxu3 %v186_v33 }
  0xde   :  { %657 = vmatmul.bf16.vlgmr.msra.gmra.mxu0 %v185_v32  ;;  %670 = vmatmul.bf16.vlgmr.msra.gmra.mxu1 %v186_v33  ;;  %v7349_v33 = vor.u32 %v9946_v29, %v7348_v28 }
  0xe0   :  { %2385 = vmatpush.bf16.msra.mxu3 %v7349_v33  ;;  %v9986_v33 = vld [vmem:[%s15850_s7 + $0x45c] sm:$0xf0] }
 0x14b   :  { %v606_v34 = vpop.f32.mrf.mxu0  ;;  %v619_v35 = vpop.f32.mrf.mxu1 }
 0x14c   :  { %v11170_v36 = vadd.f32 %v619_v35, %v606_v34  ;;  %v10010_v34 = vld [vmem:[%s15850_s7 + $0x51c] sm:$0xf0] }
 0x14d   :  { %v7860_v35 = vld [vmem:[%s15850_s7 + $0x700] sm:$0xf]  ;;  %v7605_v15 = vor.u32 %v10010_v34, %v7604_v31 }
 0x14e   :  { %v681_v45 = vrot.slane %v11170_v36, 4  ;;  %v7861_v37 = vor.u32 %v10074_v51, %v7860_v35 }
 0x14f   :  { %2398 = vmatpush.bf16.msrb.mxu0 %v7605_v15  ;;  %v10050_v15 = vld [vmem:[%s15850_s7 + $0x65c] sm:$0xf0] }
 0x150   :  { %v682_v52 = vadd.f32 %v681_v45, %v11170_v36  ;;  %v580_v53 = vpop.f32.mrf.mxu2  ;;  %v593_v54 = vpop.f32.mrf.mxu3  ;;  %2411 = vmatpush.bf16.msrb.mxu1 %v7861_v37  ;;  %v7061_v45 = vor.u32 %v9874_v42, %v7060_v41  ;;  %v9850_v41 = vld [vmem:[%s15850_s7 + $0x1c] sm:$0xf0] }
 0x151   :  { %v11207_v60 = vadd.f32 %v593_v54, %v580_v53  ;;  %v7828_v53 = vld [vmem:[%s15850_s7 + $0x6c0] sm:$0xf] }
 0x152   :  { %v683_v0 = vrot.slane %v682_v52, 2  ;;  %v10066_v54 = vld [vmem:[%s15850_s7 + $0x6dc] sm:$0xf0]  ;;  %2373 = vmatpush.bf16.msra.mxu2 %v7061_v45 }
 0x153   :  { %v675_v2 = vrot.slane %v11207_v60, 4  ;;  %v608_v3 = vpop.f32.mrf.mxu0  ;;  %v621_v5 = vpop.f32.mrf.mxu1  ;;  %v7829_v59 = vor.u32 %v10066_v54, %v7828_v53 }
 0x154   :  { %v684_v8 = vadd.f32 %v683_v0, %v682_v52  ;;  %v10002_v52 = vld [vmem:[%s15850_s7 + $0x4dc] sm:$0xf0]  ;;  %v7029_v5 = vor.u32 %v9866_v63, %v7028_v62 }
 0x155   :  { %v676_v14 = vadd.f32 %v675_v2, %v11207_v60  ;;  %v7573_v58 = vor.u32 %v10002_v52, %v7572_v48  ;;  %2412 = vmatpush.bf16.msrb.mxu1 %v7829_v59  ;;  %v7732_v62 = vld [vmem:[%s15850_s7 + $0x600] sm:$0xf] }
 0x156   :  { %v685_v19 = vrot.slane %v684_v8, 1  ;;  %2374 = vmatpush.bf16.msra.mxu2 %v7029_v5  ;;  %v10042_v63 = vld [vmem:[%s15850_s7 + $0x61c] sm:$0xf0]  ;;  %v9966_v5 = vld [vmem:[%s15850_s7 + $0x3c4] sm:$0xf] }
 0x157   :  { %v677_v21 = vrot.slane %v676_v14, 2  ;;  %2399 = vmatpush.bf16.msrb.mxu0 %v7573_v58 }
 0x158   :  { %v686_v24 = vadd.f32 %v685_v19, %v684_v8  ;;  %v582_v25 = vpop.f32.mrf.mxu2  ;;  %v595_v26 = vpop.f32.mrf.mxu3 }
 0x159   :  { %v678_v32 = vadd.f32 %v677_v21, %v676_v14  ;;  %v10058_v14 = vld [vmem:[%s15850_s7 + $0x69c] sm:$0xf0] }
 0x15a   :  { %v700_v57 = vmul.f32 %v686_v24, %v10855_v30  ;;  %v7797_v17 = vor.u32 %v10058_v14, %v7796_v13  ;;  %v6996_v21 = vld [vmem:[%s15850_s7 + $0x40] sm:$0xf]  ;;  %v7702_v13 = vld [vmem:[%s15850_s7 + $0x5e0] sm:$0xf0] }
 0x15b   :  { %v679_v38 = vrot.slane %v678_v32, 1  ;;  %v658_v39 = vpop.f32.mrf.mxu0  ;;  %v671_v40 = vpop.f32.mrf.mxu1  ;;  %v6997_v25 = vor.u32 %v9858_v22, %v6996_v21  ;;  %v7252_v26 = vld [vmem:[%s15850_s7 + $0x240] sm:$0xf]  ;;  %v7158_v21 = vld [vmem:[%s15850_s7 + $0x1a0] sm:$0xf0] }
 0x15c   :  { %v11273_v43 = vsub.f32 %v11170_v36, %v700_v57  ;;  %v11275_v44 = vadd.f32 %v671_v40, %v658_v39  ;;  %v7317_v36 = vor.u32 %v9938_v47, %v7316_v46  ;;  %2413 = vmatpush.bf16.msrb.mxu1 %v7797_v17  ;;  %v7253_v31 = vor.u32 %v9922_v27, %v7252_v26  ;;  %v7764_v57 = vld [vmem:[%s15850_s7 + $0x640] sm:$0xf]  ;;  %v7958_v17 = vld [vmem:[%s15850_s7 + $0x7e0] sm:$0xf0] }
 0x15d   :  { %v680_v50 = vadd.f32 %v679_v38, %v678_v32  ;;  %v7508_v32 = vld [vmem:[%s15850_s7 + $0x440] sm:$0xf]  ;;  %2375 = vmatpush.bf16.msra.mxu2 %v6997_v25  ;;  %v7765_v39 = vor.u32 %v10050_v15, %v7764_v57  ;;  %v9958_v25 = vld [vmem:[%s15850_s7 + $0x384] sm:$0xf] }
 0x15e   :  { %v708_v56 = vmul.f32 %v11273_v43, %v11273_v43  ;;  %v693_v49 = vrot.slane %v11275_v44, 4  ;;  %2386 = vmatpush.bf16.msra.mxu3 %v7317_v36  ;;  %v7509_v51 = vor.u32 %v9986_v33, %v7508_v32  ;;  %v6964_v40 = vld [vmem:[%s15850_s7] sm:$0xf]  ;;  %v7414_v26 = vld [vmem:[%s15850_s7 + $0x3a0] sm:$0xf0] }
 0x15f   :  { %v699_v61 = vmul.f32 %v680_v50, %v10855_v30  ;;  %v6965_v48 = vor.u32 %v9850_v41, %v6964_v40  ;;  %v7220_v50 = vld [vmem:[%s15850_s7 + $0x200] sm:$0xf]  ;;  %v10022_v27 = vld [vmem:[%s15850_s7 + $0x584] sm:$0xf] }
 0x160   :  { %v717_v0 = vrot.slane %v708_v56, 4  ;;  %v694_v1 = vadd.f32 %v693_v49, %v11275_v44  ;;  %v632_v2 = vpop.f32.mrf.mxu2  ;;  %v645_v3 = vpop.f32.mrf.mxu3  ;;  %v9914_v36 = vld [vmem:[%s15850_s7 + $0x21c] sm:$0xf0]  ;;  %2414 = vmatpush.bf16.msrb.mxu1 %v7765_v39  ;;  %v10086_v32 = vld [vmem:[%s15850_s7 + $0x784] sm:$0xf] }
 0x161   :  { %v11316_v8 = vsub.f32 %v11207_v60, %v699_v61  ;;  %v11318_v10 = vadd.f32 %v645_v3, %v632_v2  ;;  %v7541_v60 = vor.u32 %v9994_v12, %v7540_v7  ;;  %v7221_v54 = vor.u32 %v9914_v36, %v7220_v50  ;;  %v9978_v49 = vld [vmem:[%s15850_s7 + $0x41c] sm:$0xf0]  ;;  %2376 = vmatpush.bf16.msra.mxu2 %v6965_v48  ;;  %v7190_v3 = vld [vmem:[%s15850_s7 + $0x1e0] sm:$0xf0] }
 0x162   :  { %v718_v16 = vadd.f32 %v717_v0, %v708_v56  ;;  %v695_v9 = vrot.slane %v694_v1, 2  ;;  %2387 = vmatpush.bf16.msra.mxu3 %v7285_v11  ;;  %v7476_v56 = vld [vmem:[%s15850_s7 + $0x400] sm:$0xf]  ;;  %v7733_v2 = vor.u32 %v10042_v63, %v7732_v62  ;;  %v7193_v7 = vor.u32 %v9902_v55, %v7190_v3  ;;  %v7446_v11 = vld [vmem:[%s15850_s7 + $0x3e0] sm:$0xf0] }
 0x163   :  { %v707_v18 = vmul.f32 %v11316_v8, %v11316_v8  ;;  %v687_v19 = vrot.slane %v11318_v10, 4  ;;  %v660_v20 = vpop.f32.mrf.mxu0  ;;  %v673_v4 = vpop.f32.mrf.mxu1  ;;  %2400 = vmatpush.bf16.msrb.mxu0 %v7541_v60  ;;  %v7477_v61 = vor.u32 %v9978_v49, %v7476_v56  ;;  %v10030_v12 = vld [vmem:[%s15850_s7 + $0x5c4] sm:$0xf] }
 0x164   :  { %v719_v23 = vrot.slane %v718_v16, 2  ;;  %v696_v24 = vadd.f32 %v695_v9, %v694_v1  ;;  %2415 = vmatpush.bf16.msrb.mxu1 %v7733_v2  ;;  %v7449_v9 = vor.u32 %v9966_v5, %v7446_v11  ;;  %v10094_v60 = vld [vmem:[%s15850_s7 + $0x7c4] sm:$0xf] }
 0x165   :  { %v711_v28 = vrot.slane %v707_v18, 4  ;;  %v688_v29 = vadd.f32 %v687_v19, %v11318_v10  ;;  %2421 = vmatpush.bf16.msrb.mxu2 %v7193_v7  ;;  %v7961_v20 = vor.u32 %v10094_v60, %v7958_v17  ;;  %v9894_v4 = vld [vmem:[%s15850_s7 + $0x184] sm:$0xf] }
 0x166   :  { %v720_v34 = vadd.f32 %v719_v23, %v718_v16  ;;  %v697_v35 = vrot.slane %v696_v24, 1  ;;  %2388 = vmatpush.bf16.msra.mxu3 %v7253_v31  ;;  %v7670_v31 = vld [vmem:[%s15850_s7 + $0x5a0] sm:$0xf0] }
 0x167   :  { %v712_v37 = vadd.f32 %v711_v28, %v707_v18  ;;  %v689_v38 = vrot.slane %v688_v29, 2  ;;  %2401 = vmatpush.bf16.msrb.mxu0 %v7509_v51  ;;  %v7926_v51 = vld [vmem:[%s15850_s7 + $0x7a0] sm:$0xf0] }
 0x168   :  { %v721_v42 = vrot.slane %v720_v34, 1  ;;  %v698_v45 = vadd.f32 %v697_v35, %v696_v24  ;;  %v634_v46 = vpop.f32.mrf.mxu2  ;;  %v647_v47 = vpop.f32.mrf.mxu3  ;;  %v7161_v24 = vor.u32 %v9894_v4, %v7158_v21  ;;  %2460 = vmatpush.bf16.msra.mxu1 %v7961_v20  ;;  %v7673_v35 = vor.u32 %v10022_v27, %v7670_v31  ;;  %v9886_v57 = vld [vmem:[%s15850_s7 + $0x144] sm:$0xf] }
 0x169   :  { %v713_v52 = vrot.slane %v712_v37, 2  ;;  %v690_v53 = vadd.f32 %v689_v38, %v688_v29  ;;  %v7417_v29 = vor.u32 %v9958_v25, %v7414_v26  ;;  %v7126_v15 = vld [vmem:[%s15850_s7 + $0x160] sm:$0xf0]  ;;  %v7929_v39 = vor.u32 %v10086_v32, %v7926_v51 }
 0x16a   :  { %v722_v58 = vadd.f32 %v721_v42, %v720_v34  ;;  %v702_v59 = vmul.f32 %v698_v45, %v10855_v30  ;;  %2389 = vmatpush.bf16.msra.mxu3 %v7221_v54  ;;  %2422 = vmatpush.bf16.msrb.mxu2 %v7161_v24  ;;  %v9950_v40 = vld [vmem:[%s15850_s7 + $0x344] sm:$0xf] }
 0x16b   :  { %v714_v0 = vadd.f32 %v713_v52, %v712_v37  ;;  %v691_v1 = vrot.slane %v690_v53, 1  ;;  %2402 = vmatpush.bf16.msrb.mxu0 %v7477_v61  ;;  %v7382_v41 = vld [vmem:[%s15850_s7 + $0x360] sm:$0xf0] }
 0x16c   :  { %v11392_v6 = vsub.f32 %v11275_v44, %v702_v59  ;;  %v7705_v44 = vor.u32 %v10030_v12, %v7702_v13  ;;  %v736_v18 = vmul.f32 %v722_v58, %v10855_v30  ;;  %v7385_v46 = vor.u32 %v9950_v40, %v7382_v41  ;;  %v10014_v47 = vld [vmem:[%s15850_s7 + $0x544] sm:$0xf]  ;;  %2461 = vmatpush.bf16.msra.mxu1 %v7929_v39 }
 0x16d   :  { %v715_v14 = vrot.slane %v714_v0, 1  ;;  %v692_v16 = vadd.f32 %v691_v1, %v690_v53  ;;  %v7638_v48 = vld [vmem:[%s15850_s7 + $0x560] sm:$0xf0] }
 0x16e   :  { %v710_v19 = vmul.f32 %v11392_v6, %v11392_v6  ;;  %2434 = vmatpush.bf16.msrb.mxu3 %v7449_v9  ;;  %v11447_v37 = vadd.f32 1e-05, %v736_v18  ;;  %v7641_v36 = vor.u32 %v10014_v47, %v7638_v48  ;;  %v10078_v52 = vld [vmem:[%s15850_s7 + $0x744] sm:$0xf] }
 0x16f   :  { %v716_v22 = vadd.f32 %v715_v14, %v714_v0  ;;  %v701_v23 = vmul.f32 %v692_v16, %v10855_v30  ;;  %2447 = vmatpush.bf16.msra.mxu0 %v7705_v44  ;;  %v7894_v53 = vld [vmem:[%s15850_s7 + $0x760] sm:$0xf0] }
 0x170   :  { %v729_v28 = vrot.slane %v710_v19, 4  ;;  %v7897_v56 = vor.u32 %v10078_v52, %v7894_v53  ;;  %v9878_v49 = vld [vmem:[%s15850_s7 + $0x104] sm:$0xf]  ;;  %10558 = vrsqrt.f32 %v11447_v37  ;;  %vm760_vm11 = vweird.f32 %v11447_v37 }
 0x171   :  { %v735_v33 = vmul.f32 %v716_v22, %v10855_v30  ;;  %v11436_v34 = vsub.f32 %v11318_v10, %v701_v23  ;;  %v7129_v10 = vor.u32 %v9886_v57, %v7126_v15  ;;  %v7094_v58 = vld [vmem:[%s15850_s7 + $0x120] sm:$0xf0] }
 0x172   :  { %v730_v38 = vadd.f32 %v729_v28, %v710_v19  ;;  %2435 = vmatpush.bf16.msrb.mxu3 %v7417_v29  ;;  %v7097_v61 = vor.u32 %v9878_v49, %v7094_v58  ;;  %v9942_v62 = vld [vmem:[%s15850_s7 + $0x304] sm:$0xf]  ;;  %2462 = vmatpush.bf16.msra.mxu1 %v7897_v56 }
 0x173   :  { %v11455_v42 = vadd.f32 1e-05, %v735_v33  ;;  %v709_v45 = vmul.f32 %v11436_v34, %v11436_v34  ;;  %2448 = vmatpush.bf16.msra.mxu0 %v7673_v35  ;;  %2423 = vmatpush.bf16.msrb.mxu2 %v7129_v10  ;;  %v7350_v63 = vld [vmem:[%s15850_s7 + $0x320] sm:$0xf0] }
 0x174   :  { %v731_v50 = vrot.slane %v730_v38, 2  ;;  %v10006_v55 = vld [vmem:[%s15850_s7 + $0x504] sm:$0xf]  ;;  %v7353_v5 = vor.u32 %v9942_v62, %v7350_v63 }
 0x175   :  { %v723_v54 = vrot.slane %v709_v45, 4  ;;  %v7606_v1 = vld [vmem:[%s15850_s7 + $0x520] sm:$0xf0]  ;;  %10560 = vrsqrt.f32 %v11455_v42  ;;  %vm750_vm0 = vweird.f32 %v11455_v42 }
 0x176   :  { %v732_v59 = vadd.f32 %v731_v50, %v730_v38  ;;  %2436 = vmatpush.bf16.msrb.mxu3 %v7385_v46  ;;  %v10070_v2 = vld [vmem:[%s15850_s7 + $0x704] sm:$0xf]  ;;  %v7609_v7 = vor.u32 %v10006_v55, %v7606_v1  ;;  %v11531_v29 = vpop.eup %10558 }
 0x177   :  { %v724_v0 = vadd.f32 %v723_v54, %v709_v45  ;;  %2449 = vmatpush.bf16.msra.mxu0 %v7641_v36  ;;  %v7862_v11 = vld [vmem:[%s15850_s7 + $0x720] sm:$0xf0]  ;;  %2424 = vmatpush.bf16.msrb.mxu2 %v7097_v61  ;;  %v755_v45 = vmul.f32 %v11531_v29, %v11447_v37  ;;  %vm761_vm9 = vweird.f32 %v11531_v29 }
 0x178   :  { %v733_v3 = vrot.slane %v732_v59, 1  ;;  %v9870_v12 = vld [vmem:[%s15850_s7 + $0xc4] sm:$0xf]  ;;  %v7865_v14 = vor.u32 %v10070_v2, %v7862_v11  ;;  %vm11617_vm13 = vmor %vm760_vm11, %vm761_vm9 }
 0x179   :  { %v725_v13 = vrot.slane %v724_v0, 2  ;;  %v7062_v16 = vld [vmem:[%s15850_s7 + $0xe0] sm:$0xf0]  ;;  %v756_v62 = vmul.f32 %v11531_v29, %v755_v45 }
 0x17a   :  { %v9934_v9 = vld [vmem:[%s15850_s7 + $0x2c4] sm:$0xf]  ;;  %v734_v44 = vadd.f32 %v733_v3, %v732_v59  ;;  %v7065_v60 = vor.u32 %v9870_v12, %v7062_v16  ;;  %2437 = vmatpush.bf16.msrb.mxu3 %v7353_v5  ;;  %2463 = vmatpush.bf16.msra.mxu1 %v7865_v14 }
 0x17b   :  { %v7318_v17 = vld [vmem:[%s15850_s7 + $0x2e0] sm:$0xf0]  ;;  %v726_v20 = vadd.f32 %v725_v13, %v724_v0  ;;  %2450 = vmatpush.bf16.msra.mxu0 %v7609_v7  ;;  %v11544_v15 = vpop.eup %10560 }
 0x17c   :  { %v9998_v18 = vld [vmem:[%s15850_s7 + $0x4c4] sm:$0xf]  ;;  %v7321_v4 = vor.u32 %v9934_v9, %v7318_v17  ;;  %v738_v24 = vmul.f32 %v734_v44, %v10855_v30  ;;  %2425 = vmatpush.bf16.msrb.mxu2 %v7065_v60  ;;  %v745_v52 = vmul.f32 %v11544_v15, %v11455_v42  ;;  %vm751_vm12 = vweird.f32 %v11544_v15  ;;  %v739_v42 = vld [vmem:[%s15848_s5] sm:$0xf] }
 0x17d   :  { %v7574_v19 = vld [vmem:[%s15850_s7 + $0x4e0] sm:$0xf0]  ;;  %v727_v31 = vrot.slane %v726_v20, 1  ;;  %vm752_vm2 = vmor %vm750_vm0, %vm751_vm12 }
 0x17e   :  { %v7577_v21 = vor.u32 %v9998_v18, %v7574_v19  ;;  %v10062_v22 = vld [vmem:[%s15850_s7 + $0x6c4] sm:$0xf]  ;;  %v11539_v35 = vadd.f32 1e-05, %v738_v24  ;;  %2438 = vmatpush.bf16.msrb.mxu3 %v7321_v4  ;;  %v746_v12 = vmul.f32 %v11544_v15, %v745_v52  ;;  %v757_v18 = vmul.f32 0.5, %v756_v62 }
 0x17f   :  { %v7830_v23 = vld [vmem:[%s15850_s7 + $0x6e0] sm:$0xf0]  ;;  %v728_v38 = vadd.f32 %v727_v31, %v726_v20 }
 0x180   :  { %v7833_v25 = vor.u32 %v10062_v22, %v7830_v23  ;;  %v9862_v26 = vld [vmem:[%s15850_s7 + $0x84] sm:$0xf]  ;;  %2451 = vmatpush.bf16.msra.mxu0 %v7577_v21  ;;  %10562 = vrsqrt.f32 %v11539_v35  ;;  %v747_v4 = vmul.f32 0.5, %v746_v12  ;;  %v758_v23 = vsub.f32 1.5, %v757_v18 }
 0x181   :  { %v7030_v27 = vld [vmem:[%s15850_s7 + $0xa0] sm:$0xf0]  ;;  %v737_v48 = vmul.f32 %v728_v38, %v10855_v30  ;;  %vm780_vm14 = vweird.f32 %v11539_v35 }
 0x182   :  { %v9926_v28 = vld [vmem:[%s15850_s7 + $0x284] sm:$0xf]  ;;  %v7033_v51 = vor.u32 %v9862_v26, %v7030_v27  ;;  %2464 = vmatpush.bf16.msra.mxu1 %v7833_v25  ;;  %v748_v26 = vsub.f32 1.5, %v747_v4  ;;  %v9899_v4 = vld [vmem:[%s15850_s7 + $0x1a4] sm:$0xf0] }
 0x183   :  { %v7286_v32 = vld [vmem:[%s15850_s7 + $0x2a0] sm:$0xf0]  ;;  %v11573_v56 = vadd.f32 1e-05, %v737_v48 }
 0x184   :  { %v9990_v33 = vld [vmem:[%s15850_s7 + $0x484] sm:$0xf]  ;;  %v7289_v39 = vor.u32 %v9926_v28, %v7286_v32  ;;  %2426 = vmatpush.bf16.msrb.mxu2 %v7033_v51  ;;  %v759_v28 = vmul.f32 %v11531_v29, %v758_v23  ;;  %v749_v51 = vmul.f32 %v11544_v15, %v748_v26  ;;  %v7420_v23 = vld [vmem:[%s15850_s7 + $0x388] sm:$0xf] }
 0x185   :  { %v7542_v57 = vld [vmem:[%s15850_s7 + $0x4a0] sm:$0xf0]  ;;  %10564 = vrsqrt.f32 %v11573_v56  ;;  %vm770_vm3 = vweird.f32 %v11573_v56  ;;  %v10027_v26 = vld [vmem:[%s15850_s7 + $0x5a4] sm:$0xf0] }
 0x186   :  { %v7545_v10 = vor.u32 %v9990_v33, %v7542_v57  ;;  %v10054_v40 = vld [vmem:[%s15850_s7 + $0x684] sm:$0xf]  ;;  %2439 = vmatpush.bf16.msrb.mxu3 %v7289_v39  ;;  %v10563_v11 = vpop.eup %10562  ;;  %v763_v38 = vsel %vm11617_vm13, %v11531_v29, %v759_v28  ;;  %v10091_v28 = vld [vmem:[%s15850_s7 + $0x7a4] sm:$0xf0] }
 0x187   :  { %v7798_v41 = vld [vmem:[%s15850_s7 + $0x6a0] sm:$0xf0]  ;;  %v775_v44 = vmul.f32 %v10563_v11, %v11539_v35  ;;  %vm781_vm10 = vweird.f32 %v10563_v11  ;;  %v788_v35 = vrot.slane %v763_v38, 7  ;;  %v7132_v33 = vld [vmem:[%s15850_s7 + $0x148] sm:$0xf] }
 0x188   :  { %v9854_v46 = vld [vmem:[%s15850_s7 + $0x44] sm:$0xf]  ;;  %v7801_v53 = vor.u32 %v10054_v40, %v7798_v41  ;;  %2452 = vmatpush.bf16.msra.mxu0 %v7545_v10  ;;  %vm782_vm1 = vmor %vm780_vm14, %vm781_vm10  ;;  %v753_v10 = vsel %vm752_vm2, %v11544_v15, %v749_v51  ;;  %v9891_v51 = vld [vmem:[%s15850_s7 + $0x164] sm:$0xf0] }
 0x189   :  { %v6998_v47 = vld [vmem:[%s15850_s7 + $0x60] sm:$0xf0]  ;;  %v776_v20 = vmul.f32 %v10563_v11, %v775_v44  ;;  %v791_v29 = vsel %vm164_vm7, %v753_v10, %v788_v35  ;;  %v7644_v10 = vld [vmem:[%s15850_s7 + $0x548] sm:$0xf] }
 0x18a   :  { %v9918_v50 = vld [vmem:[%s15850_s7 + $0x244] sm:$0xf]  ;;  %v7001_v49 = vor.u32 %v9854_v46, %v6998_v47  ;;  %2465 = vmatpush.bf16.msra.mxu1 %v7801_v53  ;;  %v811_v47 = vld [vmem:[%s15849_s6] sm:$0xf]  ;;  %v7900_v35 = vld [vmem:[%s15850_s7 + $0x748] sm:$0xf] }
 0x18b   :  { %v7254_v36 = vld [vmem:[%s15850_s7 + $0x260] sm:$0xf0]  ;;  %v10565_v21 = vpop.eup %10564  ;;  %v777_v22 = vmul.f32 0.5, %v776_v20  ;;  %v815_v52 = vperm.slane %v811_v47, 2  ;;  %v816_v53 = vperm.slane %v811_v47, 3 }
 0x18c   :  { %v9982_v54 = vld [vmem:[%s15850_s7 + $0x444] sm:$0xf]  ;;  %v7257_v58 = vor.u32 %v9918_v50, %v7254_v36  ;;  %2427 = vmatpush.bf16.msrb.mxu2 %v7001_v49  ;;  %v765_v24 = vmul.f32 %v10565_v21, %v11573_v56  ;;  %vm771_vm15 = vweird.f32 %v10565_v21  ;;  %v813_v50 = vperm.slane %v811_v47, 0  ;;  %v7164_v20 = vld [vmem:[%s15850_s7 + $0x188] sm:$0xf] }
 0x18d   :  { %v7510_v59 = vld [vmem:[%s15850_s7 + $0x460] sm:$0xf0]  ;;  %v778_v25 = vsub.f32 1.5, %v777_v22  ;;  %vm772_vm4 = vmor %vm770_vm3, %vm771_vm15  ;;  %v814_v36 = vperm.slane %v811_v47, 1 }
 0x18e   :  { %v10046_v61 = vld [vmem:[%s15850_s7 + $0x644] sm:$0xf]  ;;  %v7513_v63 = vor.u32 %v9982_v54, %v7510_v59  ;;  %2440 = vmatpush.bf16.msrb.mxu3 %v7257_v58  ;;  %v766_v27 = vmul.f32 %v10565_v21, %v765_v24  ;;  %v9963_v24 = vld [vmem:[%s15850_s7 + $0x3a4] sm:$0xf0] }
 0x18f   :  { %v7766_v55 = vld [vmem:[%s15850_s7 + $0x660] sm:$0xf0]  ;;  %v779_v31 = vmul.f32 %v10563_v11, %v778_v25  ;;  %v7676_v25 = vld [vmem:[%s15850_s7 + $0x588] sm:$0xf] }
 0x190   :  { %v9846_v0 = vld [vmem:[%s15850_s7 + $0x4] sm:$0xf]  ;;  %v7769_v2 = vor.u32 %v10046_v61, %v7766_v55  ;;  %2453 = vmatpush.bf16.msra.mxu0 %v7513_v63  ;;  %v767_v32 = vmul.f32 0.5, %v766_v27  ;;  %v7196_v55 = vld [vmem:[%s15850_s7 + $0x1c8] sm:$0xf] }
 0x191   :  { %v6966_v1 = vld [vmem:[%s15850_s7 + $0x20] sm:$0xf0]  ;;  %v783_v37 = vsel %vm782_vm1, %v10563_v11, %v779_v31  ;;  %v7932_v27 = vld [vmem:[%s15850_s7 + $0x788] sm:$0xf]  ;;  %v7165_v31 = vor.u32 %v9899_v4, %v7164_v20 }
 0x192   :  { %v9910_v3 = vld [vmem:[%s15850_s7 + $0x204] sm:$0xf]  ;;  %v6969_v13 = vor.u32 %v9846_v0, %v6966_v1  ;;  %2466 = vmatpush.bf16.msra.mxu1 %v7769_v2  ;;  %v768_v57 = vsub.f32 1.5, %v767_v32  ;;  %v790_v41 = vrot.slane %v783_v37, 5  ;;  %v7421_v32 = vor.u32 %v9963_v24, %v7420_v23  ;;  %v7388_v37 = vld [vmem:[%s15850_s7 + $0x348] sm:$0xf] }
 0x193   :  { %v7222_v5 = vld [vmem:[%s15850_s7 + $0x220] sm:$0xf0]  ;;  %v7933_v38 = vor.u32 %v10091_v28, %v7932_v27  ;;  %v7004_v4 = vld [vmem:[%s15850_s7 + $0x48] sm:$0xf] }
 0x194   :  { %v9974_v7 = vld [vmem:[%s15850_s7 + $0x404] sm:$0xf]  ;;  %v7225_v60 = vor.u32 %v9910_v3, %v7222_v5  ;;  %2428 = vmatpush.bf16.msrb.mxu2 %v6969_v13  ;;  %v769_v39 = vmul.f32 %v10565_v21, %v768_v57  ;;  %v9907_v5 = vld [vmem:[%s15850_s7 + $0x1e4] sm:$0xf0]  ;;  %v7677_v57 = vor.u32 %v10027_v26, %v7676_v25 }
 0x195   :  { %v7478_v14 = vld [vmem:[%s15850_s7 + $0x420] sm:$0xf0]  ;;  %v7260_v24 = vld [vmem:[%s15850_s7 + $0x248] sm:$0xf] }
 0x196   :  { %v10038_v16 = vld [vmem:[%s15850_s7 + $0x604] sm:$0xf]  ;;  %v7481_v17 = vor.u32 %v9974_v7, %v7478_v14  ;;  %2441 = vmatpush.bf16.msrb.mxu3 %v7225_v60  ;;  %v773_v40 = vsel %vm772_vm4, %v10565_v21, %v769_v39  ;;  %v7964_v7 = vld [vmem:[%s15850_s7 + $0x7c8] sm:$0xf] }
 0x197   :  { %v7734_v9 = vld [vmem:[%s15850_s7 + $0x620] sm:$0xf0]  ;;  %v789_v45 = vrot.slane %v773_v40, 6  ;;  %v9955_v39 = vld [vmem:[%s15850_s7 + $0x364] sm:$0xf0] }
 0x198   :  { %v7737_v19 = vor.u32 %v10038_v16, %v7734_v9  ;;  %2454 = vmatpush.bf16.msra.mxu0 %v7481_v17  ;;  %v10099_v16 = vld [vmem:[%s15850_s7 + $0x7e4] sm:$0xf0]  ;;  %v7197_v9 = vor.u32 %v9907_v5, %v7196_v55 }
 0x199   :  { %v793_v46 = vsel %vm792_vm5, %v789_v45, %v790_v41  ;;  %v7965_v22 = vor.u32 %v10099_v16, %v7964_v7  ;;  %v10019_v40 = vld [vmem:[%s15850_s7 + $0x564] sm:$0xf0]  ;;  %v7133_v45 = vor.u32 %v9891_v51, %v7132_v33 }
 0x19a   :  { %2467 = vmatpush.bf16.msra.mxu1 %v7737_v19  ;;  %v795_v15 = vsel %vm794_vm6, %v791_v29, %v793_v46  ;;  %v10083_v41 = vld [vmem:[%s15850_s7 + $0x764] sm:$0xf0]  ;;  %v7645_v47 = vor.u32 %v10019_v40, %v7644_v10 }
 0x19b   :  { %v797_v48 = vmul.f32 %v795_v15, %v739_v42  ;;  %v7389_v42 = vor.u32 %v9955_v39, %v7388_v37  ;;  %v7100_v29 = vld [vmem:[%s15850_s7 + $0x108] sm:$0xf]  ;;  %v7901_v15 = vor.u32 %v10083_v41, %v7900_v35 }
 0x19c   :  { %v9883_v46 = vld [vmem:[%s15850_s7 + $0x124] sm:$0xf0] }
 0x19d   :  { %v799_v54 = vperm.slane %v797_v48, 0  ;;  %v800_v56 = vperm.slane %v797_v48, 1  ;;  %v801_v49 = vperm.slane %v797_v48, 2  ;;  %v802_v58 = vperm.slane %v797_v48, 3  ;;  %v7356_v48 = vld [vmem:[%s15850_s7 + $0x308] sm:$0xf] }
 0x19e   :  { %v9939_v55 = vld [vmem:[%s15850_s7 + $0x2e4] sm:$0xf0] }
 0x19f   :  { %v807_v59 = vmul.f32 %v799_v54, %v11316_v8  ;;  %v808_v61 = vmul.f32 %v800_v56, %v11273_v43  ;;  %v809_v62 = vmul.f32 %v801_v49, %v11436_v34  ;;  %v810_v63 = vmul.f32 %v802_v58, %v11392_v6  ;;  %v7452_v43 = vld [vmem:[%s15850_s7 + $0x3c8] sm:$0xf] }
 0x1a0   :  { %v9971_v8 = vld [vmem:[%s15850_s7 + $0x3e4] sm:$0xf0]  ;;  %v7101_v56 = vor.u32 %v9883_v46, %v7100_v29  ;;  %v7198_v29 = vld [vmem:[%s15850_s7 + $0x1e8] sm:$0xf0] }
 0x1a1   :  { %v821_v0 = vadd.f32 %v813_v50, %v807_v59  ;;  %v822_v1 = vadd.f32 %v814_v36, %v808_v61  ;;  %v823_v2 = vadd.f32 %v815_v52, %v809_v62  ;;  %v824_v3 = vadd.f32 %v816_v53, %v810_v63  ;;  %v7708_v6 = vld [vmem:[%s15850_s7 + $0x5c8] sm:$0xf]  ;;  %v9967_v46 = vld [vmem:[%s15850_s7 + $0x3cc] sm:$0xf] }
 0x1a2   :  { %v10035_v34 = vld [vmem:[%s15850_s7 + $0x5e4] sm:$0xf0]  ;;  %v7453_v44 = vor.u32 %v9971_v8, %v7452_v43 }
 0x1a3   :  { %v825_v11 = vmax.f32 %v821_v0, 0.0  ;;  %v826_v12 = vmax.f32 %v822_v1, 0.0  ;;  %v827_v13 = vmax.f32 %v823_v2, 0.0  ;;  %v828_v14 = vmax.f32 %v824_v3, 0.0  ;;  %v9947_v50 = vld [vmem:[%s15850_s7 + $0x324] sm:$0xf0] }
 0x1a4   :  { %v7709_v21 = vor.u32 %v10035_v34, %v7708_v6  ;;  %v7612_v36 = vld [vmem:[%s15850_s7 + $0x508] sm:$0xf]  ;;  %v7357_v49 = vor.u32 %v9947_v50, %v7356_v48 }
 0x1a5   :  { %v11666_v60 = vpack.c.bf16 %v825_v11, %v825_v11  ;;  %v11668_v17 = vpack.c.bf16 %v826_v12, %v826_v12  ;;  %v11670_v18 = vpack.c.bf16 %v827_v13, %v827_v13  ;;  %v11672_v19 = vpack.c.bf16 %v828_v14, %v828_v14  ;;  %v10011_v52 = vld [vmem:[%s15850_s7 + $0x524] sm:$0xf0] }
 0x1a6   :  { %v7868_v53 = vld [vmem:[%s15850_s7 + $0x708] sm:$0xf]  ;;  %v7613_v61 = vor.u32 %v10011_v52, %v7612_v36  ;;  %v7710_v36 = vld [vmem:[%s15850_s7 + $0x5e8] sm:$0xf0] }
 0x1a7   :  { %2377 = vmatmul.bf16.vlgmr.msra.gmra.mxu2 %v11666_v60  ;;  %2390 = vmatmul.bf16.vlgmr.msra.gmra.mxu3 %v11668_v17  ;;  %v10075_v54 = vld [vmem:[%s15850_s7 + $0x724] sm:$0xf0]  ;;  %v10095_v52 = vld [vmem:[%s15850_s7 + $0x7cc] sm:$0xf] }
 0x1a8   :  { %2403 = vmatmul.bf16.vlgmr.msrb.gmra.mxu0 %v11670_v18  ;;  %2416 = vmatmul.bf16.vlgmr.msrb.gmra.mxu1 %v11672_v19  ;;  %v7068_v58 = vld [vmem:[%s15850_s7 + $0xc8] sm:$0xf]  ;;  %v7869_v62 = vor.u32 %v10075_v54, %v7868_v53  ;;  %v7966_v53 = vld [vmem:[%s15850_s7 + $0x7e8] sm:$0xf0] }
 0x1a9   :  { %2473 = vmatpush.bf16.msra.mxu2 %v7197_v9  ;;  %2486 = vmatpush.bf16.msra.mxu3 %v7453_v44  ;;  %v9875_v59 = vld [vmem:[%s15850_s7 + $0xe4] sm:$0xf0] }
 0x1aa   :  { %2499 = vmatpush.bf16.msrb.mxu0 %v7709_v21  ;;  %2512 = vmatpush.bf16.msrb.mxu1 %v7965_v22  ;;  %v7324_v63 = vld [vmem:[%s15850_s7 + $0x2c8] sm:$0xf]  ;;  %v7069_v5 = vor.u32 %v9875_v59, %v7068_v58  ;;  %v9895_v59 = vld [vmem:[%s15850_s7 + $0x18c] sm:$0xf] }
 0x1ab   :  { %v7580_v0 = vld [vmem:[%s15850_s7 + $0x4c8] sm:$0xf]  ;;  %v7325_v43 = vor.u32 %v9939_v55, %v7324_v63  ;;  %v7969_v63 = vor.u32 %v10095_v52, %v7966_v53  ;;  %v9959_v55 = vld [vmem:[%s15850_s7 + $0x38c] sm:$0xf] }
 0x1ac   :  { %v10003_v1 = vld [vmem:[%s15850_s7 + $0x4e4] sm:$0xf0]  ;;  %v7294_v52 = vld [vmem:[%s15850_s7 + $0x2a8] sm:$0xf0] }
 0x1ad   :  { %2474 = vmatpush.bf16.msra.mxu2 %v7165_v31  ;;  %2487 = vmatpush.bf16.msra.mxu3 %v7421_v32  ;;  %v7836_v2 = vld [vmem:[%s15850_s7 + $0x6c8] sm:$0xf]  ;;  %v7581_v34 = vor.u32 %v10003_v1, %v7580_v0  ;;  %v7422_v0 = vld [vmem:[%s15850_s7 + $0x3a8] sm:$0xf0] }
 0x1ae   :  { %2500 = vmatpush.bf16.msrb.mxu0 %v7677_v57  ;;  %2513 = vmatpush.bf16.msrb.mxu1 %v7933_v38  ;;  %v10067_v3 = vld [vmem:[%s15850_s7 + $0x6e4] sm:$0xf0]  ;;  %v10023_v1 = vld [vmem:[%s15850_s7 + $0x58c] sm:$0xf] }
 0x1af   :  { %v7036_v8 = vld [vmem:[%s15850_s7 + $0x88] sm:$0xf]  ;;  %v7837_v7 = vor.u32 %v10067_v3, %v7836_v2  ;;  %v7678_v2 = vld [vmem:[%s15850_s7 + $0x5a8] sm:$0xf0] }
 0x1b0   :  { %v9867_v6 = vld [vmem:[%s15850_s7 + $0xa4] sm:$0xf0]  ;;  %v10087_v3 = vld [vmem:[%s15850_s7 + $0x78c] sm:$0xf] }
 0x1b1   :  { %2475 = vmatpush.bf16.msra.mxu2 %v7133_v45  ;;  %2488 = vmatpush.bf16.msra.mxu3 %v7389_v42  ;;  %v7292_v11 = vld [vmem:[%s15850_s7 + $0x288] sm:$0xf]  ;;  %v7037_v44 = vor.u32 %v9867_v6, %v7036_v8  ;;  %v9903_v42 = vld [vmem:[%s15850_s7 + $0x1cc] sm:$0xf]  ;;  %v7425_v8 = vor.u32 %v9959_v55, %v7422_v0 }
 0x1b2   :  { %2501 = vmatpush.bf16.msrb.mxu0 %v7645_v47  ;;  %2514 = vmatpush.bf16.msrb.mxu1 %v7901_v15  ;;  %v9931_v12 = vld [vmem:[%s15850_s7 + $0x2a4] sm:$0xf0]  ;;  %v7454_v47 = vld [vmem:[%s15850_s7 + $0x3e8] sm:$0xf0] }
 0x1b3   :  { %v7548_v13 = vld [vmem:[%s15850_s7 + $0x488] sm:$0xf]  ;;  %v7293_v20 = vor.u32 %v9931_v12, %v7292_v11  ;;  %v10031_v15 = vld [vmem:[%s15850_s7 + $0x5cc] sm:$0xf]  ;;  %v7457_v58 = vor.u32 %v9967_v46, %v7454_v47 }
 0x1b4   :  { %v9995_v14 = vld [vmem:[%s15850_s7 + $0x4a4] sm:$0xf0]  ;;  %v9887_v6 = vld [vmem:[%s15850_s7 + $0x14c] sm:$0xf] }
 0x1b5   :  { %2476 = vmatpush.bf16.msra.mxu2 %v7101_v56  ;;  %2489 = vmatpush.bf16.msra.mxu3 %v7357_v49  ;;  %v7804_v16 = vld [vmem:[%s15850_s7 + $0x688] sm:$0xf]  ;;  %v7549_v22 = vor.u32 %v9995_v14, %v7548_v13  ;;  %v7201_v49 = vor.u32 %v9903_v42, %v7198_v29  ;;  %v9951_v12 = vld [vmem:[%s15850_s7 + $0x34c] sm:$0xf] }
 0x1b6   :  { %2502 = vmatpush.bf16.msrb.mxu0 %v7613_v61  ;;  %2515 = vmatpush.bf16.msrb.mxu1 %v7869_v62  ;;  %v10059_v9 = vld [vmem:[%s15850_s7 + $0x6a4] sm:$0xf0]  ;;  %v7166_v61 = vld [vmem:[%s15850_s7 + $0x1a8] sm:$0xf0]  ;;  %v7713_v62 = vor.u32 %v10031_v15, %v7710_v36 }
 0x1b7   :  { %2429 = vmatmul.bf16.vlgmr.msrb.gmra.mxu2 %v11666_v60  ;;  %2442 = vmatmul.bf16.vlgmr.msrb.gmra.mxu3 %v11668_v17  ;;  %v9859_v21 = vld [vmem:[%s15850_s7 + $0x64] sm:$0xf0]  ;;  %v7805_v23 = vor.u32 %v10059_v9, %v7804_v16  ;;  %v7390_v13 = vld [vmem:[%s15850_s7 + $0x368] sm:$0xf0] }
 0x1b8   :  { %2455 = vmatmul.bf16.vlgmr.msra.gmra.mxu0 %v11670_v18  ;;  %2468 = vmatmul.bf16.vlgmr.msra.gmra.mxu1 %v11672_v19  ;;  %v9923_v25 = vld [vmem:[%s15850_s7 + $0x264] sm:$0xf0]  ;;  %v7005_v33 = vor.u32 %v9859_v21, %v7004_v4  ;;  %v10015_v14 = vld [vmem:[%s15850_s7 + $0x54c] sm:$0xf]  ;;  %v7393_v4 = vor.u32 %v9951_v12, %v7390_v13 }
 0x1b9   :  { %2477 = vmatpush.bf16.msra.mxu2 %v7069_v5  ;;  %2490 = vmatpush.bf16.msra.mxu3 %v7325_v43  ;;  %v7516_v26 = vld [vmem:[%s15850_s7 + $0x448] sm:$0xf]  ;;  %v7261_v51 = vor.u32 %v9923_v25, %v7260_v24  ;;  %v7934_v5 = vld [vmem:[%s15850_s7 + $0x7a8] sm:$0xf0]  ;;  %v7169_v43 = vor.u32 %v9895_v59, %v7166_v61 }
 0x1ba   :  { %2503 = vmatpush.bf16.msrb.mxu0 %v7581_v34  ;;  %2516 = vmatpush.bf16.msrb.mxu1 %v7837_v7  ;;  %v9987_v27 = vld [vmem:[%s15850_s7 + $0x464] sm:$0xf0]  ;;  %v7134_v34 = vld [vmem:[%s15850_s7 + $0x168] sm:$0xf0]  ;;  %v7681_v7 = vor.u32 %v10023_v1, %v7678_v2  ;;  %v7937_v11 = vor.u32 %v10087_v3, %v7934_v5 }
 0x1bb   :  { %v7772_v28 = vld [vmem:[%s15850_s7 + $0x648] sm:$0xf]  ;;  %v7517_v39 = vor.u32 %v9987_v27, %v7516_v26  ;;  %v7646_v16 = vld [vmem:[%s15850_s7 + $0x568] sm:$0xf0] }
 0x1bc   :  { %v10051_v31 = vld [vmem:[%s15850_s7 + $0x664] sm:$0xf0]  ;;  %v10079_v9 = vld [vmem:[%s15850_s7 + $0x74c] sm:$0xf] }
 0x1bd   :  { %v6972_v32 = vld [vmem:[%s15850_s7 + $0x8] sm:$0xf]  ;;  %2478 = vmatpush.bf16.msra.mxu2 %v7037_v44  ;;  %2491 = vmatpush.bf16.msra.mxu3 %v7293_v20  ;;  %v7773_v10 = vor.u32 %v10051_v31, %v7772_v28  ;;  %v7902_v44 = vld [vmem:[%s15850_s7 + $0x768] sm:$0xf0]  ;;  %v7137_v20 = vor.u32 %v9887_v6, %v7134_v34 }
 0x1be   :  { %v9851_v57 = vld [vmem:[%s15850_s7 + $0x24] sm:$0xf0]  ;;  %2504 = vmatpush.bf16.msrb.mxu0 %v7549_v22  ;;  %2517 = vmatpush.bf16.msrb.mxu1 %v7805_v23  ;;  %v9879_v21 = vld [vmem:[%s15850_s7 + $0x10c] sm:$0xf]  ;;  %v7649_v23 = vor.u32 %v10015_v14, %v7646_v16  ;;  %v7905_v24 = vor.u32 %v10079_v9, %v7902_v44 }
 0x1bf   :  { %v7228_v38 = vld [vmem:[%s15850_s7 + $0x208] sm:$0xf]  ;;  %v6973_v48 = vor.u32 %v9851_v57, %v6972_v32  ;;  %v7102_v22 = vld [vmem:[%s15850_s7 + $0x128] sm:$0xf0] }
 0x1c0   :  { %v9915_v37 = vld [vmem:[%s15850_s7 + $0x224] sm:$0xf0]  ;;  %v9943_v25 = vld [vmem:[%s15850_s7 + $0x30c] sm:$0xf] }
 0x1c1   :  { %v7484_v40 = vld [vmem:[%s15850_s7 + $0x408] sm:$0xf]  ;;  %2479 = vmatpush.bf16.msra.mxu2 %v7005_v33  ;;  %2492 = vmatpush.bf16.msra.mxu3 %v7261_v51  ;;  %v7229_v50 = vor.u32 %v9915_v37, %v7228_v38  ;;  %v7358_v26 = vld [vmem:[%s15850_s7 + $0x328] sm:$0xf0]  ;;  %v7105_v33 = vor.u32 %v9879_v21, %v7102_v22  ;;  %v9908_v21 = vld [vmem:[%s15850_s7 + $0x1ec] sm:$0xf0] }
 0x1c2   :  { %v9979_v35 = vld [vmem:[%s15850_s7 + $0x424] sm:$0xf0]  ;;  %2505 = vmatpush.bf16.msrb.mxu0 %v7517_v39  ;;  %2518 = vmatpush.bf16.msrb.mxu1 %v7773_v10  ;;  %v10007_v27 = vld [vmem:[%s15850_s7 + $0x50c] sm:$0xf]  ;;  %v7361_v51 = vor.u32 %v9943_v25, %v7358_v26  ;;  %v7460_v22 = vld [vmem:[%s15850_s7 + $0x3d0] sm:$0xf] }
 0x1c3   :  { %v7740_v41 = vld [vmem:[%s15850_s7 + $0x608] sm:$0xf]  ;;  %v7485_v54 = vor.u32 %v9979_v35, %v7484_v40  ;;  %v7614_v28 = vld [vmem:[%s15850_s7 + $0x528] sm:$0xf0] }
 0x1c4   :  { %v10043_v45 = vld [vmem:[%s15850_s7 + $0x624] sm:$0xf0]  ;;  %v10071_v31 = vld [vmem:[%s15850_s7 + $0x70c] sm:$0xf]  ;;  %v7617_v37 = vor.u32 %v10007_v27, %v7614_v28  ;;  %v10036_v27 = vld [vmem:[%s15850_s7 + $0x5ec] sm:$0xf0] }
 0x1c5   :  { %v7741_v56 = vor.u32 %v10043_v45, %v7740_v41  ;;  %2480 = vmatpush.bf16.msra.mxu2 %v6973_v48  ;;  %2493 = vmatpush.bf16.msra.mxu3 %v7229_v50  ;;  %v7870_v32 = vld [vmem:[%s15850_s7 + $0x728] sm:$0xf0]  ;;  %v7972_v28 = vld [vmem:[%s15850_s7 + $0x7d0] sm:$0xf] }
 0x1c6   :  { %2506 = vmatpush.bf16.msrb.mxu0 %v7485_v54  ;;  %v9871_v57 = vld [vmem:[%s15850_s7 + $0xcc] sm:$0xf]  ;;  %v7873_v39 = vor.u32 %v10071_v31, %v7870_v32  ;;  %v10100_v31 = vld [vmem:[%s15850_s7 + $0x7ec] sm:$0xf0] }
 0x1c7   :  { %2519 = vmatpush.bf16.msrb.mxu1 %v7741_v56  ;;  %v7070_v38 = vld [vmem:[%s15850_s7 + $0xe8] sm:$0xf0] }
 0x1c8   :  { %2481 = vmatmul.bf16.vlgmr.msra.gmra.mxu2 %v11666_v60  ;;  %2494 = vmatmul.bf16.vlgmr.msra.gmra.mxu3 %v11668_v17  ;;  %v9935_v10 = vld [vmem:[%s15850_s7 + $0x2cc] sm:$0xf]  ;;  %v7073_v29 = vor.u32 %v9871_v57, %v7070_v38  ;;  %v7172_v38 = vld [vmem:[%s15850_s7 + $0x190] sm:$0xf] }
 0x1c9   :  { %2525 = vmatpush.bf16.msrb.mxu2 %v7201_v49  ;;  %2538 = vmatpush.bf16.msrb.mxu3 %v7457_v58  ;;  %v7326_v40 = vld [vmem:[%s15850_s7 + $0x2e8] sm:$0xf0] }
 0x1ca   :  { %2551 = vmatpush.bf16.msra.mxu0 %v7713_v62  ;;  %2520 = vmatmul.bf16.vlgmr.msrb.gmra.mxu1 %v11672_v19  ;;  %v9999_v35 = vld [vmem:[%s15850_s7 + $0x4cc] sm:$0xf]  ;;  %v7329_v46 = vor.u32 %v9935_v10, %v7326_v40  ;;  %v7973_v10 = vor.u32 %v10100_v31, %v7972_v28  ;;  %v7428_v40 = vld [vmem:[%s15850_s7 + $0x390] sm:$0xf] }
 0x1cb   :  { %2564 = vmatpush.bf16.msra.mxu1 %v7969_v63  ;;  %2507 = vmatmul.bf16.vlgmr.msrb.gmra.mxu0 %v11670_v18  ;;  %v7582_v41 = vld [vmem:[%s15850_s7 + $0x4e8] sm:$0xf0]  ;;  %v9932_v28 = vld [vmem:[%s15850_s7 + $0x2ac] sm:$0xf0] }
 0x1cc   :  { %v10063_v45 = vld [vmem:[%s15850_s7 + $0x6cc] sm:$0xf]  ;;  %v7585_v48 = vor.u32 %v9999_v35, %v7582_v41  ;;  %v9964_v35 = vld [vmem:[%s15850_s7 + $0x3ac] sm:$0xf0] }
 0x1cd   :  { %2526 = vmatpush.bf16.msrb.mxu2 %v7169_v43  ;;  %2539 = vmatpush.bf16.msrb.mxu3 %v7425_v8  ;;  %v7838_v42 = vld [vmem:[%s15850_s7 + $0x6e8] sm:$0xf0]  ;;  %v7684_v41 = vld [vmem:[%s15850_s7 + $0x590] sm:$0xf] }
 0x1ce   :  { %2552 = vmatpush.bf16.msra.mxu0 %v7681_v7  ;;  %v9863_v47 = vld [vmem:[%s15850_s7 + $0x8c] sm:$0xf]  ;;  %v7841_v50 = vor.u32 %v10063_v45, %v7838_v42  ;;  %v10028_v45 = vld [vmem:[%s15850_s7 + $0x5ac] sm:$0xf0] }
 0x1cf   :  { %2565 = vmatpush.bf16.msra.mxu1 %v7937_v11  ;;  %v7038_v15 = vld [vmem:[%s15850_s7 + $0xa8] sm:$0xf0]  ;;  %v7940_v42 = vld [vmem:[%s15850_s7 + $0x790] sm:$0xf] }
 0x1d0   :  { %v9927_v36 = vld [vmem:[%s15850_s7 + $0x28c] sm:$0xf]  ;;  %v7041_v58 = vor.u32 %v9863_v47, %v7038_v15  ;;  %v7429_v47 = vor.u32 %v9964_v35, %v7428_v40  ;;  %v7140_v15 = vld [vmem:[%s15850_s7 + $0x150] sm:$0xf] }
 0x1d1   :  { %2527 = vmatpush.bf16.msrb.mxu2 %v7137_v20  ;;  %2540 = vmatpush.bf16.msrb.mxu3 %v7393_v4  ;;  %v9991_v53 = vld [vmem:[%s15850_s7 + $0x48c] sm:$0xf]  ;;  %v7297_v59 = vor.u32 %v9927_v36, %v7294_v52  ;;  %v7204_v4 = vld [vmem:[%s15850_s7 + $0x1d0] sm:$0xf] }
 0x1d2   :  { %2553 = vmatpush.bf16.msra.mxu0 %v7649_v23  ;;  %v7550_v54 = vld [vmem:[%s15850_s7 + $0x4a8] sm:$0xf0]  ;;  %v9972_v23 = vld [vmem:[%s15850_s7 + $0x3ec] sm:$0xf0] }
 0x1d3   :  { %2566 = vmatpush.bf16.msra.mxu1 %v7905_v24  ;;  %v10055_v56 = vld [vmem:[%s15850_s7 + $0x68c] sm:$0xf]  ;;  %v7553_v63 = vor.u32 %v9991_v53, %v7550_v54  ;;  %v7716_v24 = vld [vmem:[%s15850_s7 + $0x5d0] sm:$0xf]  ;;  %v7461_v57 = vor.u32 %v9972_v23, %v7460_v22 }
 0x1d4   :  { %v7806_v49 = vld [vmem:[%s15850_s7 + $0x6a8] sm:$0xf0]  ;;  %v7396_v52 = vld [vmem:[%s15850_s7 + $0x350] sm:$0xf] }
 0x1d5   :  { %2528 = vmatpush.bf16.msrb.mxu2 %v7105_v33  ;;  %2541 = vmatpush.bf16.msrb.mxu3 %v7361_v51  ;;  %v9855_v61 = vld [vmem:[%s15850_s7 + $0x4c] sm:$0xf]  ;;  %v7809_v55 = vor.u32 %v10055_v56, %v7806_v49  ;;  %v7205_v51 = vor.u32 %v9908_v21, %v7204_v4  ;;  %v9956_v53 = vld [vmem:[%s15850_s7 + $0x36c] sm:$0xf0] }
 0x1d6   :  { %2554 = vmatpush.bf16.msra.mxu0 %v7617_v37  ;;  %v7006_v62 = vld [vmem:[%s15850_s7 + $0x68] sm:$0xf0]  ;;  %v9900_v37 = vld [vmem:[%s15850_s7 + $0x1ac] sm:$0xf0] }
 0x1d7   :  { %2567 = vmatpush.bf16.msra.mxu1 %v7873_v39  ;;  %v9919_v0 = vld [vmem:[%s15850_s7 + $0x24c] sm:$0xf]  ;;  %v7009_v6 = vor.u32 %v9855_v61, %v7006_v62  ;;  %v7717_v39 = vor.u32 %v10036_v27, %v7716_v24  ;;  %v7652_v54 = vld [vmem:[%s15850_s7 + $0x550] sm:$0xf]  ;;  %v7397_v61 = vor.u32 %v9956_v53, %v7396_v52 }
 0x1d8   :  { %v7262_v1 = vld [vmem:[%s15850_s7 + $0x268] sm:$0xf0]  ;;  %v10020_v56 = vld [vmem:[%s15850_s7 + $0x56c] sm:$0xf0] }
 0x1d9   :  { %2529 = vmatpush.bf16.msrb.mxu2 %v7073_v29  ;;  %2542 = vmatpush.bf16.msrb.mxu3 %v7329_v46  ;;  %v9983_v2 = vld [vmem:[%s15850_s7 + $0x44c] sm:$0xf]  ;;  %v7265_v34 = vor.u32 %v9919_v0, %v7262_v1  ;;  %v10092_v29 = vld [vmem:[%s15850_s7 + $0x7ac] sm:$0xf0]  ;;  %v7173_v46 = vor.u32 %v9900_v37, %v7172_v38 }
 0x1da   :  { %2555 = vmatpush.bf16.msra.mxu0 %v7585_v48  ;;  %v7518_v3 = vld [vmem:[%s15850_s7 + $0x468] sm:$0xf0]  ;;  %v9892_v48 = vld [vmem:[%s15850_s7 + $0x16c] sm:$0xf0]  ;;  %v7941_v36 = vor.u32 %v10092_v29, %v7940_v42 }
 0x1db   :  { %2568 = vmatpush.bf16.msra.mxu1 %v7841_v50  ;;  %v10047_v5 = vld [vmem:[%s15850_s7 + $0x64c] sm:$0xf]  ;;  %v7521_v13 = vor.u32 %v9983_v2, %v7518_v3  ;;  %v7685_v50 = vor.u32 %v10028_v45, %v7684_v41  ;;  %v7908_v49 = vld [vmem:[%s15850_s7 + $0x750] sm:$0xf] }
 0x1dc   :  { %v7774_v43 = vld [vmem:[%s15850_s7 + $0x668] sm:$0xf0]  ;;  %v7108_v62 = vld [vmem:[%s15850_s7 + $0x110] sm:$0xf] }
 0x1dd   :  { %v9847_v8 = vld [vmem:[%s15850_s7 + $0xc] sm:$0xf]  ;;  %2530 = vmatpush.bf16.msrb.mxu2 %v7041_v58  ;;  %2543 = vmatpush.bf16.msrb.mxu3 %v7297_v59  ;;  %v7777_v14 = vor.u32 %v10047_v5, %v7774_v43  ;;  %v10084_v58 = vld [vmem:[%s15850_s7 + $0x76c] sm:$0xf0]  ;;  %v7141_v59 = vor.u32 %v9892_v48, %v7140_v15 }
 0x1de   :  { %v6974_v7 = vld [vmem:[%s15850_s7 + $0x28] sm:$0xf0]  ;;  %2556 = vmatpush.bf16.msra.mxu0 %v7553_v63  ;;  %v9884_v63 = vld [vmem:[%s15850_s7 + $0x12c] sm:$0xf0]  ;;  %v7909_v0 = vor.u32 %v10084_v58, %v7908_v49 }
 0x1df   :  { %v9911_v11 = vld [vmem:[%s15850_s7 + $0x20c] sm:$0xf]  ;;  %2569 = vmatpush.bf16.msra.mxu1 %v7809_v55  ;;  %v6977_v25 = vor.u32 %v9847_v8, %v6974_v7  ;;  %v7653_v55 = vor.u32 %v10020_v56, %v7652_v54  ;;  %v7364_v1 = vld [vmem:[%s15850_s7 + $0x310] sm:$0xf] }
 0x1e0   :  { %v7230_v12 = vld [vmem:[%s15850_s7 + $0x228] sm:$0xf0]  ;;  %v9948_v2 = vld [vmem:[%s15850_s7 + $0x32c] sm:$0xf0] }
 0x1e1   :  { %v9975_v16 = vld [vmem:[%s15850_s7 + $0x40c] sm:$0xf]  ;;  %2531 = vmatpush.bf16.msrb.mxu2 %v7009_v6  ;;  %2544 = vmatpush.bf16.msrb.mxu3 %v7265_v34  ;;  %v7233_v26 = vor.u32 %v9911_v11, %v7230_v12  ;;  %v7620_v3 = vld [vmem:[%s15850_s7 + $0x510] sm:$0xf]  ;;  %v7109_v6 = vor.u32 %v9884_v63, %v7108_v62  ;;  %v7365_v34 = vor.u32 %v9948_v2, %v7364_v1  ;;  %v7206_v62 = vld [vmem:[%s15850_s7 + $0x1f0] sm:$0xf0] }
 0x1e2   :  { %v7486_v9 = vld [vmem:[%s15850_s7 + $0x428] sm:$0xf0]  ;;  %2557 = vmatpush.bf16.msra.mxu0 %v7521_v13  ;;  %v10012_v5 = vld [vmem:[%s15850_s7 + $0x52c] sm:$0xf0]  ;;  %v9968_v63 = vld [vmem:[%s15850_s7 + $0x3d4] sm:$0xf] }
 0x1e3   :  { %v10039_v44 = vld [vmem:[%s15850_s7 + $0x60c] sm:$0xf]  ;;  %2570 = vmatpush.bf16.msra.mxu1 %v7777_v14  ;;  %v7489_v32 = vor.u32 %v9975_v16, %v7486_v9  ;;  %v7876_v43 = vld [vmem:[%s15850_s7 + $0x710] sm:$0xf]  ;;  %v7621_v12 = vor.u32 %v10012_v5, %v7620_v3  ;;  %v7718_v3 = vld [vmem:[%s15850_s7 + $0x5f0] sm:$0xf0] }
 0x1e4   :  { %v7742_v20 = vld [vmem:[%s15850_s7 + $0x628] sm:$0xf0]  ;;  %v10076_v8 = vld [vmem:[%s15850_s7 + $0x72c] sm:$0xf0]  ;;  %v10096_v5 = vld [vmem:[%s15850_s7 + $0x7d4] sm:$0xf] }
 0x1e5   :  { %v7745_v33 = vor.u32 %v10039_v44, %v7742_v20  ;;  %2532 = vmatpush.bf16.msrb.mxu2 %v6977_v25  ;;  %2545 = vmatpush.bf16.msrb.mxu3 %v7233_v26  ;;  %v7076_v7 = vld [vmem:[%s15850_s7 + $0xd0] sm:$0xf]  ;;  %v7877_v13 = vor.u32 %v10076_v8, %v7876_v43  ;;  %v7974_v43 = vld [vmem:[%s15850_s7 + $0x7f0] sm:$0xf0] }
 0x1e6   :  { %2558 = vmatpush.bf16.msra.mxu0 %v7489_v32  ;;  %v9876_v11 = vld [vmem:[%s15850_s7 + $0xec] sm:$0xf0] }
 0x1e7   :  { %2571 = vmatpush.bf16.msra.mxu1 %v7745_v33  ;;  %v7332_v14 = vld [vmem:[%s15850_s7 + $0x2d0] sm:$0xf]  ;;  %v7077_v21 = vor.u32 %v9876_v11, %v7076_v7  ;;  %v9896_v11 = vld [vmem:[%s15850_s7 + $0x194] sm:$0xf] }
 0x1e8   :  { %2533 = vmatmul.bf16.vlgmr.msrb.gmra.mxu2 %v11666_v60  ;;  %2546 = vmatmul.bf16.vlgmr.msrb.gmra.mxu3 %v11668_v17  ;;  %v9940_v16 = vld [vmem:[%s15850_s7 + $0x2ec] sm:$0xf0] }
 0x1e9   :  { %2577 = vmatpush.bf16.msra.mxu2 %v7205_v51  ;;  %2590 = vmatpush.bf16.msra.mxu3 %v7461_v57  ;;  %v7588_v9 = vld [vmem:[%s15850_s7 + $0x4d0] sm:$0xf]  ;;  %v7333_v22 = vor.u32 %v9940_v16, %v7332_v14  ;;  %v7977_v14 = vor.u32 %v10096_v5, %v7974_v43  ;;  %v9960_v16 = vld [vmem:[%s15850_s7 + $0x394] sm:$0xf] }
 0x1ea   :  { %2603 = vmatpush.bf16.msrb.mxu0 %v7717_v39  ;;  %2572 = vmatmul.bf16.vlgmr.msra.gmra.mxu1 %v11672_v19  ;;  %v10004_v44 = vld [vmem:[%s15850_s7 + $0x4ec] sm:$0xf0]  ;;  %v7302_v5 = vld [vmem:[%s15850_s7 + $0x2b0] sm:$0xf0] }
 0x1eb   :  { %2616 = vmatpush.bf16.msrb.mxu1 %v7973_v10  ;;  %2559 = vmatmul.bf16.vlgmr.msra.gmra.mxu0 %v11670_v18  ;;  %v7844_v20 = vld [vmem:[%s15850_s7 + $0x6d0] sm:$0xf]  ;;  %v7589_v25 = vor.u32 %v10004_v44, %v7588_v9  ;;  %v7430_v9 = vld [vmem:[%s15850_s7 + $0x3b0] sm:$0xf0] }
 0x1ec   :  { %v10068_v4 = vld [vmem:[%s15850_s7 + $0x6ec] sm:$0xf0]  ;;  %v10024_v44 = vld [vmem:[%s15850_s7 + $0x594] sm:$0xf] }
 0x1ed   :  { %2578 = vmatpush.bf16.msra.mxu2 %v7173_v46  ;;  %2591 = vmatpush.bf16.msra.mxu3 %v7429_v47  ;;  %v7044_v23 = vld [vmem:[%s15850_s7 + $0x90] sm:$0xf]  ;;  %v7845_v26 = vor.u32 %v10068_v4, %v7844_v20  ;;  %v7686_v20 = vld [vmem:[%s15850_s7 + $0x5b0] sm:$0xf0] }
 0x1ee   :  { %2604 = vmatpush.bf16.msrb.mxu0 %v7685_v50  ;;  %v9868_v24 = vld [vmem:[%s15850_s7 + $0xac] sm:$0xf0]  ;;  %v10088_v4 = vld [vmem:[%s15850_s7 + $0x794] sm:$0xf] }
 0x1ef   :  { %2617 = vmatpush.bf16.msrb.mxu1 %v7941_v36  ;;  %v7300_v27 = vld [vmem:[%s15850_s7 + $0x290] sm:$0xf]  ;;  %v7045_v57 = vor.u32 %v9868_v24, %v7044_v23  ;;  %v7433_v23 = vor.u32 %v9960_v16, %v7430_v9  ;;  %v9888_v24 = vld [vmem:[%s15850_s7 + $0x154] sm:$0xf] }
 0x1f0   :  { %v7556_v31 = vld [vmem:[%s15850_s7 + $0x490] sm:$0xf]  ;;  %v7301_v38 = vor.u32 %v9932_v28, %v7300_v27  ;;  %v9952_v28 = vld [vmem:[%s15850_s7 + $0x354] sm:$0xf] }
 0x1f1   :  { %2579 = vmatpush.bf16.msra.mxu2 %v7141_v59  ;;  %2592 = vmatpush.bf16.msra.mxu3 %v7397_v61  ;;  %v9996_v32 = vld [vmem:[%s15850_s7 + $0x4ac] sm:$0xf0]  ;;  %v9904_v61 = vld [vmem:[%s15850_s7 + $0x1d4] sm:$0xf] }
 0x1f2   :  { %2605 = vmatpush.bf16.msrb.mxu0 %v7653_v55  ;;  %v7812_v33 = vld [vmem:[%s15850_s7 + $0x690] sm:$0xf]  ;;  %v7557_v10 = vor.u32 %v9996_v32, %v7556_v31  ;;  %v7462_v55 = vld [vmem:[%s15850_s7 + $0x3f0] sm:$0xf0] }
 0x1f3   :  { %2618 = vmatpush.bf16.msrb.mxu1 %v7909_v0  ;;  %v10060_v51 = vld [vmem:[%s15850_s7 + $0x6ac] sm:$0xf0]  ;;  %v10032_v0 = vld [vmem:[%s15850_s7 + $0x5d4] sm:$0xf]  ;;  %v7465_v7 = vor.u32 %v9968_v63, %v7462_v55 }
 0x1f4   :  { %v7012_v37 = vld [vmem:[%s15850_s7 + $0x50] sm:$0xf]  ;;  %v7813_v40 = vor.u32 %v10060_v51, %v7812_v33  ;;  %v7398_v31 = vld [vmem:[%s15850_s7 + $0x370] sm:$0xf0] }
 0x1f5   :  { %2580 = vmatpush.bf16.msra.mxu2 %v7109_v6  ;;  %2593 = vmatpush.bf16.msra.mxu3 %v7365_v34  ;;  %v9860_v39 = vld [vmem:[%s15850_s7 + $0x6c] sm:$0xf0]  ;;  %v7209_v34 = vor.u32 %v9904_v61, %v7206_v62  ;;  %v10016_v32 = vld [vmem:[%s15850_s7 + $0x554] sm:$0xf] }
 0x1f6   :  { %2606 = vmatpush.bf16.msrb.mxu0 %v7621_v12  ;;  %v7268_v35 = vld [vmem:[%s15850_s7 + $0x250] sm:$0xf]  ;;  %v7013_v15 = vor.u32 %v9860_v39, %v7012_v37  ;;  %v7174_v12 = vld [vmem:[%s15850_s7 + $0x1b0] sm:$0xf0]  ;;  %v7401_v37 = vor.u32 %v9952_v28, %v7398_v31 }
 0x1f7   :  { %2619 = vmatpush.bf16.msrb.mxu1 %v7877_v13  ;;  %v9924_v41 = vld [vmem:[%s15850_s7 + $0x26c] sm:$0xf0]  ;;  %v7721_v13 = vor.u32 %v10032_v0, %v7718_v3  ;;  %v7654_v33 = vld [vmem:[%s15850_s7 + $0x570] sm:$0xf0] }
 0x1f8   :  { %v7524_v45 = vld [vmem:[%s15850_s7 + $0x450] sm:$0xf]  ;;  %v7269_v48 = vor.u32 %v9924_v41, %v7268_v35  ;;  %v10080_v51 = vld [vmem:[%s15850_s7 + $0x754] sm:$0xf] }
 0x1f9   :  { %2581 = vmatpush.bf16.msra.mxu2 %v7077_v21  ;;  %2594 = vmatpush.bf16.msra.mxu3 %v7333_v22  ;;  %v9988_v42 = vld [vmem:[%s15850_s7 + $0x46c] sm:$0xf0]  ;;  %v7942_v21 = vld [vmem:[%s15850_s7 + $0x7b0] sm:$0xf0]  ;;  %v7177_v22 = vor.u32 %v9896_v11, %v7174_v12 }
 0x1fa   :  { %2607 = vmatpush.bf16.msrb.mxu0 %v7589_v25  ;;  %v7780_v29 = vld [vmem:[%s15850_s7 + $0x650] sm:$0xf]  ;;  %v7525_v53 = vor.u32 %v9988_v42, %v7524_v45  ;;  %v7142_v25 = vld [vmem:[%s15850_s7 + $0x170] sm:$0xf0]  ;;  %v7945_v27 = vor.u32 %v10088_v4, %v7942_v21 }
 0x1fb   :  { %2620 = vmatpush.bf16.msrb.mxu1 %v7845_v26  ;;  %v10052_v46 = vld [vmem:[%s15850_s7 + $0x66c] sm:$0xf0]  ;;  %v7689_v26 = vor.u32 %v10024_v44, %v7686_v20  ;;  %v9880_v39 = vld [vmem:[%s15850_s7 + $0x114] sm:$0xf] }
 0x1fc   :  { %v6980_v47 = vld [vmem:[%s15850_s7 + $0x10] sm:$0xf]  ;;  %v7781_v54 = vor.u32 %v10052_v46, %v7780_v29  ;;  %v9944_v41 = vld [vmem:[%s15850_s7 + $0x314] sm:$0xf] }
 0x1fd   :  { %2582 = vmatpush.bf16.msra.mxu2 %v7045_v57  ;;  %2595 = vmatpush.bf16.msra.mxu3 %v7301_v38  ;;  %v9852_v50 = vld [vmem:[%s15850_s7 + $0x2c] sm:$0xf0]  ;;  %v7910_v57 = vld [vmem:[%s15850_s7 + $0x770] sm:$0xf0]  ;;  %v7145_v38 = vor.u32 %v9888_v24, %v7142_v25 }
 0x1fe   :  { %v7236_v36 = vld [vmem:[%s15850_s7 + $0x210] sm:$0xf]  ;;  %2608 = vmatpush.bf16.msrb.mxu0 %v7557_v10  ;;  %v6981_v1 = vor.u32 %v9852_v50, %v6980_v47  ;;  %v7110_v10 = vld [vmem:[%s15850_s7 + $0x130] sm:$0xf0]  ;;  %v7913_v35 = vor.u32 %v10080_v51, %v7910_v57 }
 0x1ff   :  { %v9916_v52 = vld [vmem:[%s15850_s7 + $0x22c] sm:$0xf0]  ;;  %2621 = vmatpush.bf16.msrb.mxu1 %v7813_v40  ;;  %v7657_v40 = vor.u32 %v10016_v32, %v7654_v33  ;;  %v7366_v45 = vld [vmem:[%s15850_s7 + $0x330] sm:$0xf0] }
 0x200   :  { %v7492_v56 = vld [vmem:[%s15850_s7 + $0x410] sm:$0xf]  ;;  %v7237_v2 = vor.u32 %v9916_v52, %v7236_v36  ;;  %v10008_v42 = vld [vmem:[%s15850_s7 + $0x514] sm:$0xf] }
 0x201   :  { %v9980_v49 = vld [vmem:[%s15850_s7 + $0x42c] sm:$0xf0]  ;;  %2583 = vmatpush.bf16.msra.mxu2 %v7013_v15  ;;  %2596 = vmatpush.bf16.msra.mxu3 %v7269_v48  ;;  %v7622_v29 = vld [vmem:[%s15850_s7 + $0x530] sm:$0xf0]  ;;  %v7113_v15 = vor.u32 %v9880_v39, %v7110_v10  ;;  %v7369_v48 = vor.u32 %v9944_v41, %v7366_v45  ;;  %v9909_v39 = vld [vmem:[%s15850_s7 + $0x1f4] sm:$0xf0] }
 0x202   :  { %v7748_v58 = vld [vmem:[%s15850_s7 + $0x610] sm:$0xf]  ;;  %2609 = vmatpush.bf16.msrb.mxu0 %v7525_v53  ;;  %v7493_v8 = vor.u32 %v9980_v49, %v7492_v56  ;;  %v10072_v46 = vld [vmem:[%s15850_s7 + $0x714] sm:$0xf]  ;;  %v7625_v52 = vor.u32 %v10008_v42, %v7622_v29  ;;  %v7468_v10 = vld [vmem:[%s15850_s7 + $0x3d8] sm:$0xf] }
 0x203   :  { %v10044_v59 = vld [vmem:[%s15850_s7 + $0x62c] sm:$0xf0]  ;;  %2622 = vmatpush.bf16.msrb.mxu1 %v7781_v54  ;;  %v7878_v47 = vld [vmem:[%s15850_s7 + $0x730] sm:$0xf0]  ;;  %v10037_v42 = vld [vmem:[%s15850_s7 + $0x5f4] sm:$0xf0] }
 0x204   :  { %v7749_v6 = vor.u32 %v10044_v59, %v7748_v58  ;;  %v9872_v50 = vld [vmem:[%s15850_s7 + $0xd4] sm:$0xf]  ;;  %v7881_v53 = vor.u32 %v10072_v46, %v7878_v47  ;;  %v7980_v29 = vld [vmem:[%s15850_s7 + $0x7d8] sm:$0xf] }
 0x205   :  { %2584 = vmatpush.bf16.msra.mxu2 %v6981_v1  ;;  %2597 = vmatpush.bf16.msra.mxu3 %v7237_v2  ;;  %v7078_v36 = vld [vmem:[%s15850_s7 + $0xf0] sm:$0xf0]  ;;  %v10101_v46 = vld [vmem:[%s15850_s7 + $0x7f4] sm:$0xf0] }
 0x206   :  { %2610 = vmatpush.bf16.msrb.mxu0 %v7493_v8  ;;  %v9936_v54 = vld [vmem:[%s15850_s7 + $0x2d4] sm:$0xf]  ;;  %v7081_v62 = vor.u32 %v9872_v50, %v7078_v36  ;;  %v7180_v36 = vld [vmem:[%s15850_s7 + $0x198] sm:$0xf] }
 0x207   :  { %2623 = vmatpush.bf16.msrb.mxu1 %v7749_v6  ;;  %v7334_v56 = vld [vmem:[%s15850_s7 + $0x2f0] sm:$0xf0] }
 0x208   :  { %2585 = vmatmul.bf16.vlgmr.msra.gmra.mxu2 %v11666_v60  ;;  %2598 = vmatmul.bf16.vlgmr.msra.gmra.mxu3 %v11668_v17  ;;  %v10000_v49 = vld [vmem:[%s15850_s7 + $0x4d4] sm:$0xf]  ;;  %v7337_v63 = vor.u32 %v9936_v54, %v7334_v56  ;;  %v7981_v54 = vor.u32 %v10101_v46, %v7980_v29  ;;  %v7436_v56 = vld [vmem:[%s15850_s7 + $0x398] sm:$0xf] }
 0x209   :  { %2629 = vmatpush.bf16.msrb.mxu2 %v7209_v34  ;;  %2642 = vmatpush.bf16.msrb.mxu3 %v7465_v7  ;;  %v7590_v58 = vld [vmem:[%s15850_s7 + $0x4f0] sm:$0xf0] }
 0x20a   :  { %2655 = vmatpush.bf16.msra.mxu0 %v7721_v13  ;;  %2624 = vmatmul.bf16.vlgmr.msrb.gmra.mxu1 %v11672_v19  ;;  %v10064_v59 = vld [vmem:[%s15850_s7 + $0x6d4] sm:$0xf]  ;;  %v7593_v1 = vor.u32 %v10000_v49, %v7590_v58  ;;  %v9965_v49 = vld [vmem:[%s15850_s7 + $0x3b4] sm:$0xf0] }
 0x20b   :  { %2668 = vmatpush.bf16.msra.mxu1 %v7977_v14  ;;  %2611 = vmatmul.bf16.vlgmr.msrb.gmra.mxu0 %v11670_v18  ;;  %v7846_v61 = vld [vmem:[%s15850_s7 + $0x6f0] sm:$0xf0]  ;;  %v7692_v58 = vld [vmem:[%s15850_s7 + $0x598] sm:$0xf] }
 0x20c   :  { %v9864_v55 = vld [vmem:[%s15850_s7 + $0x94] sm:$0xf]  ;;  %v7849_v2 = vor.u32 %v10064_v59, %v7846_v61  ;;  %v10029_v59 = vld [vmem:[%s15850_s7 + $0x5b4] sm:$0xf0] }
 0x20d   :  { %2630 = vmatpush.bf16.msrb.mxu2 %v7177_v22  ;;  %2643 = vmatpush.bf16.msrb.mxu3 %v7433_v23  ;;  %v7046_v0 = vld [vmem:[%s15850_s7 + $0xb0] sm:$0xf0]  ;;  %v7948_v61 = vld [vmem:[%s15850_s7 + $0x798] sm:$0xf] }
 0x20e   :  { %2656 = vmatpush.bf16.msra.mxu0 %v7689_v26  ;;  %v9928_v3 = vld [vmem:[%s15850_s7 + $0x294] sm:$0xf]  ;;  %v7049_v7 = vor.u32 %v9864_v55, %v7046_v0  ;;  %v7437_v55 = vor.u32 %v9965_v49, %v7436_v56  ;;  %v7148_v0 = vld [vmem:[%s15850_s7 + $0x158] sm:$0xf] }
 0x20f   :  { %2669 = vmatpush.bf16.msra.mxu1 %v7945_v27  ;;  %v9992_v43 = vld [vmem:[%s15850_s7 + $0x494] sm:$0xf]  ;;  %v7305_v11 = vor.u32 %v9928_v3, %v7302_v5  ;;  %v7404_v5 = vld [vmem:[%s15850_s7 + $0x358] sm:$0xf] }
 0x210   :  { %v7558_v8 = vld [vmem:[%s15850_s7 + $0x4b0] sm:$0xf0]  ;;  %v9997_v49 = vld [vmem:[%s15850_s7 + $0x4b4] sm:$0xf0] }
 0x211   :  { %2631 = vmatpush.bf16.msrb.mxu2 %v7145_v38  ;;  %2644 = vmatpush.bf16.msrb.mxu3 %v7401_v37  ;;  %v10056_v6 = vld [vmem:[%s15850_s7 + $0x694] sm:$0xf]  ;;  %v7561_v14 = vor.u32 %v9992_v43, %v7558_v8  ;;  %v7212_v37 = vld [vmem:[%s15850_s7 + $0x1d8] sm:$0xf] }
 0x212   :  { %2657 = vmatpush.bf16.msra.mxu0 %v7657_v40  ;;  %v7814_v34 = vld [vmem:[%s15850_s7 + $0x6b0] sm:$0xf0]  ;;  %v9973_v40 = vld [vmem:[%s15850_s7 + $0x3f4] sm:$0xf0] }
 0x213   :  { %2670 = vmatpush.bf16.msra.mxu1 %v7913_v35  ;;  %v9856_v12 = vld [vmem:[%s15850_s7 + $0x54] sm:$0xf]  ;;  %v7817_v16 = vor.u32 %v10056_v6, %v7814_v34  ;;  %v7724_v35 = vld [vmem:[%s15850_s7 + $0x5d8] sm:$0xf]  ;;  %v7469_v50 = vor.u32 %v9973_v40, %v7468_v10 }
 0x214   :  { %v7014_v13 = vld [vmem:[%s15850_s7 + $0x70] sm:$0xf0]  ;;  %v9957_v43 = vld [vmem:[%s15850_s7 + $0x374] sm:$0xf0] }
 0x215   :  { %2632 = vmatpush.bf16.msrb.mxu2 %v7113_v15  ;;  %2645 = vmatpush.bf16.msrb.mxu3 %v7369_v48  ;;  %v9920_v9 = vld [vmem:[%s15850_s7 + $0x254] sm:$0xf]  ;;  %v7017_v24 = vor.u32 %v9856_v12, %v7014_v13  ;;  %v7213_v48 = vor.u32 %v9909_v39, %v7212_v37  ;;  %v7660_v8 = vld [vmem:[%s15850_s7 + $0x558] sm:$0xf]  ;;  %v7405_v12 = vor.u32 %v9957_v43, %v7404_v5 }
 0x216   :  { %2658 = vmatpush.bf16.msra.mxu0 %v7625_v52  ;;  %v7270_v44 = vld [vmem:[%s15850_s7 + $0x270] sm:$0xf0]  ;;  %v9901_v52 = vld [vmem:[%s15850_s7 + $0x1b4] sm:$0xf0] }
 0x217   :  { %2671 = vmatpush.bf16.msra.mxu1 %v7881_v53  ;;  %v9984_v20 = vld [vmem:[%s15850_s7 + $0x454] sm:$0xf]  ;;  %v7273_v25 = vor.u32 %v9920_v9, %v7270_v44  ;;  %v7725_v53 = vor.u32 %v10037_v42, %v7724_v35  ;;  %v10021_v6 = vld [vmem:[%s15850_s7 + $0x574] sm:$0xf0] }
 0x218   :  { %v7526_v4 = vld [vmem:[%s15850_s7 + $0x470] sm:$0xf0]  ;;  %v7916_v34 = vld [vmem:[%s15850_s7 + $0x758] sm:$0xf]  ;;  %v7661_v44 = vor.u32 %v10021_v6, %v7660_v8 }
 0x219   :  { %2633 = vmatpush.bf16.msrb.mxu2 %v7081_v62  ;;  %2646 = vmatpush.bf16.msrb.mxu3 %v7337_v63  ;;  %v10048_v21 = vld [vmem:[%s15850_s7 + $0x654] sm:$0xf]  ;;  %v7529_v31 = vor.u32 %v9984_v20, %v7526_v4  ;;  %v10093_v62 = vld [vmem:[%s15850_s7 + $0x7b4] sm:$0xf0]  ;;  %v7181_v63 = vor.u32 %v9901_v52, %v7180_v36 }
 0x21a   :  { %2659 = vmatpush.bf16.msra.mxu0 %v7593_v1  ;;  %v7782_v22 = vld [vmem:[%s15850_s7 + $0x670] sm:$0xf0]  ;;  %v9893_v1 = vld [vmem:[%s15850_s7 + $0x174] sm:$0xf0]  ;;  %v7949_v3 = vor.u32 %v10093_v62, %v7948_v61 }
 0x21b   :  { %2672 = vmatpush.bf16.msra.mxu1 %v7849_v2  ;;  %v9848_v23 = vld [vmem:[%s15850_s7 + $0x14] sm:$0xf]  ;;  %v7785_v32 = vor.u32 %v10048_v21, %v7782_v22  ;;  %v7693_v2 = vor.u32 %v10029_v59, %v7692_v58  ;;  %v9885_v9 = vld [vmem:[%s15850_s7 + $0x134] sm:$0xf0] }
 0x21c   :  { %v6982_v26 = vld [vmem:[%s15850_s7 + $0x30] sm:$0xf0]  ;;  %v7372_v4 = vld [vmem:[%s15850_s7 + $0x318] sm:$0xf] }
 0x21d   :  { %2634 = vmatpush.bf16.msrb.mxu2 %v7049_v7  ;;  %2647 = vmatpush.bf16.msrb.mxu3 %v7305_v11  ;;  %v9912_v27 = vld [vmem:[%s15850_s7 + $0x214] sm:$0xf]  ;;  %v6985_v41 = vor.u32 %v9848_v23, %v6982_v26  ;;  %v10085_v7 = vld [vmem:[%s15850_s7 + $0x774] sm:$0xf0]  ;;  %v7149_v11 = vor.u32 %v9893_v1, %v7148_v0 }
 0x21e   :  { %v7238_v28 = vld [vmem:[%s15850_s7 + $0x230] sm:$0xf0]  ;;  %2660 = vmatpush.bf16.msra.mxu0 %v7561_v14  ;;  %v7917_v20 = vor.u32 %v10085_v7, %v7916_v34  ;;  %v9949_v21 = vld [vmem:[%s15850_s7 + $0x334] sm:$0xf0] }
 0x21f   :  { %2673 = vmatpush.bf16.msra.mxu1 %v7817_v16  ;;  %v9976_v33 = vld [vmem:[%s15850_s7 + $0x414] sm:$0xf]  ;;  %v7241_v45 = vor.u32 %v9912_v27, %v7238_v28  ;;  %v7116_v16 = vld [vmem:[%s15850_s7 + $0x118] sm:$0xf]  ;;  %v7373_v27 = vor.u32 %v9949_v21, %v7372_v4 }
 0x220   :  { %v7494_v51 = vld [vmem:[%s15850_s7 + $0x430] sm:$0xf0]  ;;  %v7628_v22 = vld [vmem:[%s15850_s7 + $0x518] sm:$0xf]  ;;  %v7117_v26 = vor.u32 %v9885_v9, %v7116_v16 }
 0x221   :  { %v10040_v57 = vld [vmem:[%s15850_s7 + $0x614] sm:$0xf]  ;;  %2635 = vmatpush.bf16.msrb.mxu2 %v7017_v24  ;;  %2648 = vmatpush.bf16.msrb.mxu3 %v7273_v25  ;;  %v7497_v47 = vor.u32 %v9976_v33, %v7494_v51  ;;  %v10013_v23 = vld [vmem:[%s15850_s7 + $0x534] sm:$0xf0] }
 0x222   :  { %v7750_v38 = vld [vmem:[%s15850_s7 + $0x630] sm:$0xf0]  ;;  %2661 = vmatpush.bf16.msra.mxu0 %v7529_v31  ;;  %v7884_v24 = vld [vmem:[%s15850_s7 + $0x718] sm:$0xf] }
 0x223   :  { %2674 = vmatpush.bf16.msra.mxu1 %v7785_v32  ;;  %v7753_v15 = vor.u32 %v10040_v57, %v7750_v38  ;;  %v10077_v25 = vld [vmem:[%s15850_s7 + $0x734] sm:$0xf0]  ;;  %v7629_v32 = vor.u32 %v10013_v23, %v7628_v22 }
 0x224   :  { %v7084_v28 = vld [vmem:[%s15850_s7 + $0xd8] sm:$0xf]  ;;  %v7885_v33 = vor.u32 %v10077_v25, %v7884_v24 }
 0x225   :  { %2636 = vmatpush.bf16.msrb.mxu2 %v6985_v41  ;;  %2649 = vmatpush.bf16.msrb.mxu3 %v7241_v45  ;;  %v2404_v13 = vpop.f32.mrf.mxu0  ;;  %v2417_v14 = vpop.f32.mrf.mxu1  ;;  %v9877_v31 = vld [vmem:[%s15850_s7 + $0xf4] sm:$0xf0] }
 0x226   :  { %2662 = vmatpush.bf16.msra.mxu0 %v7497_v47  ;;  %v7340_v38 = vld [vmem:[%s15850_s7 + $0x2d8] sm:$0xf]  ;;  %v7085_v42 = vor.u32 %v9877_v31, %v7084_v28 }
 0x227   :  { %2675 = vmatpush.bf16.msra.mxu1 %v7753_v15  ;;  %v9941_v37 = vld [vmem:[%s15850_s7 + $0x2f4] sm:$0xf0] }
 0x228   :  { %2637 = vmatmul.bf16.vlgmr.msrb.gmra.mxu2 %v11666_v60  ;;  %2650 = vmatmul.bf16.vlgmr.msrb.gmra.mxu3 %v11668_v17  ;;  %v7596_v39 = vld [vmem:[%s15850_s7 + $0x4d8] sm:$0xf]  ;;  %v7341_v29 = vor.u32 %v9941_v37, %v7340_v38  ;;  %v10033_v38 = vld [vmem:[%s15850_s7 + $0x5dc] sm:$0xf] }
 0x229   :  { %2681 = vmatpush.bf16.msra.mxu2 %v7213_v48  ;;  %2694 = vmatpush.bf16.msra.mxu3 %v7469_v50  ;;  %v10005_v40 = vld [vmem:[%s15850_s7 + $0x4f4] sm:$0xf0]  ;;  %v7726_v37 = vld [vmem:[%s15850_s7 + $0x5f8] sm:$0xf0] }
 0x22a   :  { %2707 = vmatpush.bf16.msrb.mxu0 %v7725_v53  ;;  %2676 = vmatmul.bf16.vlgmr.msra.gmra.mxu1 %v11672_v19  ;;  %v2378_v51 = vpop.f32.mrf.mxu2  ;;  %v2391_v57 = vpop.f32.mrf.mxu3  ;;  %v7852_v35 = vld [vmem:[%s15850_s7 + $0x6d8] sm:$0xf]  ;;  %v7597_v50 = vor.u32 %v10005_v40, %v7596_v39 }
 0x22b   :  { %2720 = vmatpush.bf16.msrb.mxu1 %v7981_v54  ;;  %2663 = vmatmul.bf16.vlgmr.msra.gmra.mxu0 %v11670_v18  ;;  %v2392_v10 = vadd.f32 %v2391_v57, %v2378_v51  ;;  %v10069_v41 = vld [vmem:[%s15850_s7 + $0x6f4] sm:$0xf0]  ;;  %v9969_v51 = vld [vmem:[%s15850_s7 + $0x3dc] sm:$0xf] }
 0x22c   :  { %v7052_v15 = vld [vmem:[%s15850_s7 + $0x98] sm:$0xf]  ;;  %v7853_v36 = vor.u32 %v10069_v41, %v7852_v35  ;;  %v7470_v57 = vld [vmem:[%s15850_s7 + $0x3f8] sm:$0xf0] }
 0x22d   :  { %2682 = vmatpush.bf16.msra.mxu2 %v7181_v63  ;;  %2695 = vmatpush.bf16.msra.mxu3 %v7437_v55  ;;  %v2405_v45 = vadd.f32 %v2404_v13, %v2392_v10  ;;  %v2406_v46 = vpop.f32.mrf.mxu0  ;;  %v2419_v47 = vpop.f32.mrf.mxu1  ;;  %v9869_v48 = vld [vmem:[%s15850_s7 + $0xb4] sm:$0xf0]  ;;  %v10097_v35 = vld [vmem:[%s15850_s7 + $0x7dc] sm:$0xf] }
 0x22e   :  { %2708 = vmatpush.bf16.msrb.mxu0 %v7693_v2  ;;  %v7308_v52 = vld [vmem:[%s15850_s7 + $0x298] sm:$0xf]  ;;  %v7053_v62 = vor.u32 %v9869_v48, %v7052_v15  ;;  %v7982_v41 = vld [vmem:[%s15850_s7 + $0x7f8] sm:$0xf0]  ;;  %v7473_v48 = vor.u32 %v9969_v51, %v7470_v57 }
 0x22f   :  { %2721 = vmatpush.bf16.msrb.mxu1 %v7949_v3  ;;  %v9933_v53 = vld [vmem:[%s15850_s7 + $0x2b4] sm:$0xf0]  ;;  %v12577_v56 = vadd.f32 %v2417_v14, %v2405_v45  ;;  %v10009_v51 = vld [vmem:[%s15850_s7 + $0x51c] sm:$0xf] }
 0x230   :  { %v7564_v54 = vld [vmem:[%s15850_s7 + $0x498] sm:$0xf]  ;;  %v7309_v63 = vor.u32 %v9933_v53, %v7308_v52  ;;  %v7182_v52 = vld [vmem:[%s15850_s7 + $0x1b8] sm:$0xf0]  ;;  %v7729_v53 = vor.u32 %v10033_v38, %v7726_v37 }
 0x231   :  { %2683 = vmatpush.bf16.msra.mxu2 %v7149_v11  ;;  %2696 = vmatpush.bf16.msra.mxu3 %v7405_v12  ;;  %v7820_v58 = vld [vmem:[%s15850_s7 + $0x698] sm:$0xf]  ;;  %v2785_v61 = vrot.slane %v12577_v56, 4  ;;  %v7565_v1 = vor.u32 %v9997_v49, %v7564_v54  ;;  %v7985_v54 = vor.u32 %v10097_v35, %v7982_v41  ;;  %v9961_v49 = vld [vmem:[%s15850_s7 + $0x39c] sm:$0xf] }
 0x232   :  { %2709 = vmatpush.bf16.msrb.mxu0 %v7661_v44  ;;  %v10061_v59 = vld [vmem:[%s15850_s7 + $0x6b4] sm:$0xf0]  ;;  %v2380_v3 = vpop.f32.mrf.mxu2  ;;  %v2393_v5 = vpop.f32.mrf.mxu3  ;;  %v7630_v57 = vld [vmem:[%s15850_s7 + $0x538] sm:$0xf0] }
 0x233   :  { %2722 = vmatpush.bf16.msrb.mxu1 %v7917_v20  ;;  %v7020_v55 = vld [vmem:[%s15850_s7 + $0x58] sm:$0xf]  ;;  %v7821_v2 = vor.u32 %v10061_v59, %v7820_v58  ;;  %v2786_v34 = vadd.f32 %v2785_v61, %v12577_v56  ;;  %v7438_v58 = vld [vmem:[%s15850_s7 + $0x3b8] sm:$0xf0] }
 0x234   :  { %v9861_v0 = vld [vmem:[%s15850_s7 + $0x74] sm:$0xf0]  ;;  %v10025_v59 = vld [vmem:[%s15850_s7 + $0x59c] sm:$0xf] }
 0x235   :  { %2684 = vmatpush.bf16.msra.mxu2 %v7117_v26  ;;  %2697 = vmatpush.bf16.msra.mxu3 %v7373_v27  ;;  %v7276_v43 = vld [vmem:[%s15850_s7 + $0x258] sm:$0xf]  ;;  %v2787_v9 = vrot.slane %v2786_v34, 2  ;;  %v7021_v44 = vor.u32 %v9861_v0, %v7020_v55  ;;  %v2456_v4 = vpop.f32.mrf.mxu0  ;;  %v2469_v21 = vpop.f32.mrf.mxu1  ;;  %v7694_v0 = vld [vmem:[%s15850_s7 + $0x5b8] sm:$0xf0] }
 0x236   :  { %2710 = vmatpush.bf16.msrb.mxu0 %v7629_v32  ;;  %v9925_v8 = vld [vmem:[%s15850_s7 + $0x274] sm:$0xf0]  ;;  %v9905_v32 = vld [vmem:[%s15850_s7 + $0x1dc] sm:$0xf] }
 0x237   :  { %2723 = vmatpush.bf16.msrb.mxu1 %v7885_v33  ;;  %v7532_v6 = vld [vmem:[%s15850_s7 + $0x458] sm:$0xf]  ;;  %v7277_v20 = vor.u32 %v9925_v8, %v7276_v43  ;;  %v2788_v31 = vadd.f32 %v2787_v9, %v2786_v34  ;;  %v7214_v33 = vld [vmem:[%s15850_s7 + $0x1f8] sm:$0xf0]  ;;  %v7441_v8 = vor.u32 %v9961_v49, %v7438_v58 }
 0x238   :  { %v9989_v7 = vld [vmem:[%s15850_s7 + $0x474] sm:$0xf0]  ;;  %v7217_v15 = vor.u32 %v9905_v32, %v7214_v33  ;;  %v7150_v34 = vld [vmem:[%s15850_s7 + $0x178] sm:$0xf0] }
 0x239   :  { %2685 = vmatpush.bf16.msra.mxu2 %v7085_v42  ;;  %2698 = vmatpush.bf16.msra.mxu3 %v7341_v29  ;;  %v7788_v11 = vld [vmem:[%s15850_s7 + $0x658] sm:$0xf]  ;;  %v7533_v24 = vor.u32 %v9989_v7, %v7532_v6  ;;  %v2789_v39 = vrot.slane %v2788_v31, 1  ;;  %v9889_v6 = vld [vmem:[%s15850_s7 + $0x15c] sm:$0xf] }
 0x23a   :  { %2711 = vmatpush.bf16.msrb.mxu0 %v7597_v50  ;;  %v10053_v12 = vld [vmem:[%s15850_s7 + $0x674] sm:$0xf0]  ;;  %v2430_v29 = vpop.f32.mrf.mxu2  ;;  %v2443_v46 = vpop.f32.mrf.mxu3  ;;  %v9953_v7 = vld [vmem:[%s15850_s7 + $0x35c] sm:$0xf] }
 0x23b   :  { %2724 = vmatpush.bf16.msrb.mxu1 %v7853_v36  ;;  %v6988_v13 = vld [vmem:[%s15850_s7 + $0x18] sm:$0xf]  ;;  %v7789_v25 = vor.u32 %v10053_v12, %v7788_v11  ;;  %v2790_v47 = vadd.f32 %v2789_v39, %v2788_v31  ;;  %v2444_v50 = vadd.f32 %v2443_v46, %v2430_v29  ;;  %v9897_v36 = vld [vmem:[%s15850_s7 + $0x19c] sm:$0xf] }
 0x23c   :  { %v9853_v14 = vld [vmem:[%s15850_s7 + $0x34] sm:$0xf0]  ;;  %v7185_v3 = vor.u32 %v9897_v36, %v7182_v52  ;;  %v7406_v12 = vld [vmem:[%s15850_s7 + $0x378] sm:$0xf0] }
 0x23d   :  { %v7244_v16 = vld [vmem:[%s15850_s7 + $0x218] sm:$0xf]  ;;  %2686 = vmatpush.bf16.msra.mxu2 %v7053_v62  ;;  %2699 = vmatpush.bf16.msra.mxu3 %v7309_v63  ;;  %v6989_v10 = vor.u32 %v9853_v14, %v6988_v13  ;;  %v2833_v61 = vmul.f32 %v2790_v47, %v10855_v30  ;;  %v2457_v62 = vadd.f32 %v2456_v4, %v2444_v50  ;;  %v2458_v63 = vpop.f32.mrf.mxu0  ;;  %v2471_v55 = vpop.f32.mrf.mxu1  ;;  %v10017_v13 = vld [vmem:[%s15850_s7 + $0x55c] sm:$0xf] }
 0x23e   :  { %v9917_v22 = vld [vmem:[%s15850_s7 + $0x234] sm:$0xf0]  ;;  %2712 = vmatpush.bf16.msrb.mxu0 %v7565_v1  ;;  %v10089_v1 = vld [vmem:[%s15850_s7 + $0x79c] sm:$0xf] }
 0x23f   :  { %v7500_v23 = vld [vmem:[%s15850_s7 + $0x418] sm:$0xf]  ;;  %2725 = vmatpush.bf16.msrb.mxu1 %v7821_v2  ;;  %v7245_v40 = vor.u32 %v9917_v22, %v7244_v16  ;;  %v7950_v2 = vld [vmem:[%s15850_s7 + $0x7b8] sm:$0xf0]  ;;  %v12688_v5 = vsub.f32 %v12577_v56, %v2833_v61  ;;  %v12690_v43 = vadd.f32 %v2469_v21, %v2457_v62  ;;  %v7697_v56 = vor.u32 %v10025_v59, %v7694_v0 }
 0x240   :  { %v9981_v26 = vld [vmem:[%s15850_s7 + $0x434] sm:$0xf0]  ;;  %v7953_v11 = vor.u32 %v10089_v1, %v7950_v2  ;;  %v7662_v14 = vld [vmem:[%s15850_s7 + $0x578] sm:$0xf0] }
 0x241   :  { %v7756_v27 = vld [vmem:[%s15850_s7 + $0x618] sm:$0xf]  ;;  %2687 = vmatpush.bf16.msra.mxu2 %v7021_v44  ;;  %2700 = vmatpush.bf16.msra.mxu3 %v7277_v20  ;;  %v7501_v45 = vor.u32 %v9981_v26, %v7500_v23  ;;  %v2849_v16 = vmul.f32 %v12688_v5, %v12688_v5  ;;  %v2791_v9 = vrot.slane %v12690_v43, 4  ;;  %v10081_v44 = vld [vmem:[%s15850_s7 + $0x75c] sm:$0xf]  ;;  %v7409_v26 = vor.u32 %v9953_v7, %v7406_v12 }
 0x242   :  { %v10045_v28 = vld [vmem:[%s15850_s7 + $0x634] sm:$0xf0]  ;;  %2713 = vmatpush.bf16.msrb.mxu0 %v7533_v24  ;;  %v7918_v20 = vld [vmem:[%s15850_s7 + $0x778] sm:$0xf0]  ;;  %v2432_v4 = vpop.f32.mrf.mxu2  ;;  %v2445_v21 = vpop.f32.mrf.mxu3  ;;  %v7665_v31 = vor.u32 %v10017_v13, %v7662_v14 }
 0x243   :  { %2726 = vmatpush.bf16.msrb.mxu1 %v7789_v25  ;;  %v7757_v42 = vor.u32 %v10045_v28, %v7756_v27  ;;  %v9881_v22 = vld [vmem:[%s15850_s7 + $0x11c] sm:$0xf]  ;;  %v2857_v23 = vrot.slane %v2849_v16, 4  ;;  %v2792_v24 = vadd.f32 %v2791_v9, %v12690_v43  ;;  %v7153_v25 = vor.u32 %v9889_v6, %v7150_v34 }
 0x244   :  { %v7118_v27 = vld [vmem:[%s15850_s7 + $0x138] sm:$0xf0]  ;;  %v7921_v32 = vor.u32 %v10081_v44, %v7918_v20 }
 0x245   :  { %2688 = vmatpush.bf16.msra.mxu2 %v6989_v10  ;;  %2701 = vmatpush.bf16.msra.mxu3 %v7245_v40  ;;  %v9945_v28 = vld [vmem:[%s15850_s7 + $0x31c] sm:$0xf]  ;;  %v2858_v38 = vadd.f32 %v2857_v23, %v2849_v16  ;;  %v2793_v37 = vrot.slane %v2792_v24, 2  ;;  %v7121_v29 = vor.u32 %v9881_v22, %v7118_v27 }
 0x246   :  { %2714 = vmatpush.bf16.msrb.mxu0 %v7501_v45  ;;  %v7374_v33 = vld [vmem:[%s15850_s7 + $0x338] sm:$0xf0] }
 0x247   :  { %2727 = vmatpush.bf16.msrb.mxu1 %v7757_v42  ;;  %v10073_v39 = vld [vmem:[%s15850_s7 + $0x71c] sm:$0xf]  ;;  %v2859_v35 = vrot.slane %v2858_v38, 2  ;;  %v2794_v41 = vadd.f32 %v2793_v37, %v2792_v24  ;;  %v2521_v42 = vpop.f32.mrf.mxu1  ;;  %v7377_v46 = vor.u32 %v9945_v28, %v7374_v33 }
 0x248   :  { %2689 = vmatmul.bf16.vlgmr.msra.gmra.mxu2 %v11666_v60  ;;  %2702 = vmatmul.bf16.vlgmr.msra.gmra.mxu3 %v11668_v17  ;;  %v7886_v10 = vld [vmem:[%s15850_s7 + $0x738] sm:$0xf0]  ;;  %v2508_v45 = vpop.f32.mrf.mxu0 }
 0x249   :  { %2733 = vmatpush.bf16.msrb.mxu2 %v7217_v15  ;;  %2746 = vmatpush.bf16.msrb.mxu3 %v7473_v48  ;;  %v9873_v40 = vld [vmem:[%s15850_s7 + $0xdc] sm:$0xf]  ;;  %v7633_v48 = vor.u32 %v10009_v51, %v7630_v57  ;;  %v7889_v50 = vor.u32 %v10073_v39, %v7886_v10  ;;  %v2795_v49 = vrot.slane %v2794_v41, 1 }
 0x24a   :  { %2759 = vmatpush.bf16.msra.mxu0 %v7729_v53  ;;  %2728 = vmatmul.bf16.vlgmr.msrb.gmra.mxu1 %v11672_v19  ;;  %v7086_v47 = vld [vmem:[%s15850_s7 + $0xf8] sm:$0xf0] }
 0x24b   :  { %2772 = vmatpush.bf16.msra.mxu1 %v7985_v54  ;;  %2715 = vmatmul.bf16.vlgmr.msrb.gmra.mxu0 %v11670_v18  ;;  %v9937_v15 = vld [vmem:[%s15850_s7 + $0x2dc] sm:$0xf]  ;;  %v2860_v54 = vadd.f32 %v2859_v35, %v2858_v38  ;;  %v2796_v62 = vadd.f32 %v2795_v49, %v2794_v41  ;;  %v7089_v63 = vor.u32 %v9873_v40, %v7086_v47  ;;  %v2495_v6 = vpop.f32.mrf.mxu3 }
 0x24c   :  { %v7342_v36 = vld [vmem:[%s15850_s7 + $0x2f8] sm:$0xf0] }
 0x24d   :  { %2734 = vmatpush.bf16.msrb.mxu2 %v7185_v3  ;;  %2747 = vmatpush.bf16.msrb.mxu3 %v7441_v8  ;;  %v10001_v52 = vld [vmem:[%s15850_s7 + $0x4dc] sm:$0xf]  ;;  %v2861_v61 = vrot.slane %v2860_v54, 1  ;;  %v7345_v55 = vor.u32 %v9937_v15, %v7342_v36  ;;  %v2482_v8 = vpop.f32.mrf.mxu2  ;;  %v2834_v12 = vmul.f32 %v2796_v62, %v10855_v30 }
 0x24e   :  { %2760 = vmatpush.bf16.msra.mxu0 %v7697_v56  ;;  %v7598_v53 = vld [vmem:[%s15850_s7 + $0x4f8] sm:$0xf0]  ;;  %v2496_v13 = vadd.f32 %v2495_v6, %v2482_v8 }
 0x24f   :  { %2773 = vmatpush.bf16.msra.mxu1 %v7953_v11  ;;  %v10065_v58 = vld [vmem:[%s15850_s7 + $0x6dc] sm:$0xf]  ;;  %v7601_v2 = vor.u32 %v10001_v52, %v7598_v53  ;;  %v2862_v11 = vadd.f32 %v2861_v61, %v2860_v54  ;;  %v12798_v20 = vsub.f32 %v12690_v43, %v2834_v12  ;;  %v2523_v22 = vpop.f32.mrf.mxu1 }
 0x250   :  { %v7854_v59 = vld [vmem:[%s15850_s7 + $0x6f8] sm:$0xf0]  ;;  %v2509_v4 = vadd.f32 %v2508_v45, %v2496_v13  ;;  %v2510_v21 = vpop.f32.mrf.mxu0 }
 0x251   :  { %2735 = vmatpush.bf16.msrb.mxu2 %v7153_v25  ;;  %2748 = vmatpush.bf16.msrb.mxu3 %v7409_v26  ;;  %v9865_v0 = vld [vmem:[%s15850_s7 + $0x9c] sm:$0xf]  ;;  %v7857_v3 = vor.u32 %v10065_v58, %v7854_v59  ;;  %v2850_v33 = vmul.f32 %v12798_v20, %v12798_v20 }
 0x252   :  { %2761 = vmatpush.bf16.msra.mxu0 %v7665_v31  ;;  %v7054_v1 = vld [vmem:[%s15850_s7 + $0xb8] sm:$0xf0]  ;;  %v2522_v51 = vadd.f32 %v2521_v42, %v2509_v4 }
 0x253   :  { %2774 = vmatpush.bf16.msra.mxu1 %v7921_v32  ;;  %v9929_v34 = vld [vmem:[%s15850_s7 + $0x29c] sm:$0xf]  ;;  %v7057_v44 = vor.u32 %v9865_v0, %v7054_v1  ;;  %v2905_v32 = vmul.f32 %v2862_v11, %v10855_v30  ;;  %v2863_v10 = vrot.slane %v2850_v33, 4  ;;  %v2497_v15 = vpop.f32.mrf.mxu3 }
 0x254   :  { %v7310_v7 = vld [vmem:[%s15850_s7 + $0x2b8] sm:$0xf0]  ;;  %v2797_v40 = vrot.slane %v2522_v51, 4 }
 0x255   :  { %2736 = vmatpush.bf16.msrb.mxu2 %v7121_v29  ;;  %2749 = vmatpush.bf16.msrb.mxu3 %v7377_v46  ;;  %v9993_v56 = vld [vmem:[%s15850_s7 + $0x49c] sm:$0xf]  ;;  %v7313_v23 = vor.u32 %v9929_v34, %v7310_v7  ;;  %v2484_v47 = vpop.f32.mrf.mxu2  ;;  %v12845_v52 = vadd.f32 1e-05, %v2905_v32  ;;  %v2864_v53 = vadd.f32 %v2863_v10, %v2850_v33 }
 0x256   :  { %2762 = vmatpush.bf16.msra.mxu0 %v7633_v48  ;;  %v7566_v14 = vld [vmem:[%s15850_s7 + $0x4b8] sm:$0xf0]  ;;  %v2798_v54 = vadd.f32 %v2797_v40, %v2522_v51 }
 0x257   :  { %2775 = vmatpush.bf16.msra.mxu1 %v7889_v50  ;;  %v10057_v16 = vld [vmem:[%s15850_s7 + $0x69c] sm:$0xf]  ;;  %v7569_v26 = vor.u32 %v9993_v56, %v7566_v14  ;;  %v2865_v59 = vrot.slane %v2864_v53, 2  ;;  %10566 = vrsqrt.f32 %v12845_v52  ;;  %vm2928_vm12 = vweird.f32 %v12845_v52 }
 0x258   :  { %v7822_v9 = vld [vmem:[%s15850_s7 + $0x6b8] sm:$0xf0]  ;;  %v2799_v61 = vrot.slane %v2798_v54, 2 }
 0x259   :  { %2737 = vmatpush.bf16.msrb.mxu2 %v7089_v63  ;;  %2750 = vmatpush.bf16.msrb.mxu3 %v7345_v55  ;;  %v9857_v24 = vld [vmem:[%s15850_s7 + $0x5c] sm:$0xf]  ;;  %v7825_v27 = vor.u32 %v10057_v16, %v7822_v9  ;;  %v2866_v1 = vadd.f32 %v2865_v59, %v2864_v53 }
 0x25a   :  { %v7022_v25 = vld [vmem:[%s15850_s7 + $0x78] sm:$0xf0]  ;;  %2763 = vmatpush.bf16.msra.mxu0 %v7601_v2  ;;  %v2800_v2 = vadd.f32 %v2799_v61, %v2798_v54 }
 0x25b   :  { %2776 = vmatpush.bf16.msra.mxu1 %v7857_v3  ;;  %v9921_v43 = vld [vmem:[%s15850_s7 + $0x25c] sm:$0xf]  ;;  %v7025_v35 = vor.u32 %v9857_v24, %v7022_v25  ;;  %v2867_v3 = vrot.slane %v2866_v1, 1 }
 0x25c   :  { %v7278_v28 = vld [vmem:[%s15850_s7 + $0x278] sm:$0xf0]  ;;  %v2801_v8 = vrot.slane %v2800_v2, 1 }
 0x25d   :  { %v9985_v31 = vld [vmem:[%s15850_s7 + $0x45c] sm:$0xf]  ;;  %2738 = vmatpush.bf16.msrb.mxu2 %v7057_v44  ;;  %2751 = vmatpush.bf16.msrb.mxu3 %v7313_v23  ;;  %v7281_v41 = vor.u32 %v9921_v43, %v7278_v28  ;;  %v2868_v6 = vadd.f32 %v2867_v3, %v2866_v1  ;;  %v10567_v7 = vpop.eup %10566 }
 0x25e   :  { %v7534_v57 = vld [vmem:[%s15850_s7 + $0x478] sm:$0xf0]  ;;  %2764 = vmatpush.bf16.msra.mxu0 %v7569_v26  ;;  %v2802_v34 = vadd.f32 %v2801_v8, %v2800_v2  ;;  %v2923_v14 = vmul.f32 %v10567_v7, %v12845_v52  ;;  %vm2929_vm9 = vweird.f32 %v10567_v7 }
 0x25f   :  { %v10049_v38 = vld [vmem:[%s15850_s7 + $0x65c] sm:$0xf]  ;;  %2777 = vmatpush.bf16.msra.mxu1 %v7825_v27  ;;  %v7537_v29 = vor.u32 %v9985_v31, %v7534_v57  ;;  %v2906_v56 = vmul.f32 %v2868_v6, %v10855_v30  ;;  %vm2930_vm13 = vmor %vm2928_vm12, %vm2929_vm9 }
 0x260   :  { %v7790_v37 = vld [vmem:[%s15850_s7 + $0x678] sm:$0xf0]  ;;  %v2835_v11 = vmul.f32 %v2802_v34, %v10855_v30  ;;  %v2924_v44 = vmul.f32 %v10567_v7, %v2923_v14 }
 0x261   :  { %v9849_v39 = vld [vmem:[%s15850_s7 + $0x1c] sm:$0xf]  ;;  %v7793_v46 = vor.u32 %v10049_v38, %v7790_v37  ;;  %2739 = vmatpush.bf16.msrb.mxu2 %v7025_v35  ;;  %2752 = vmatpush.bf16.msrb.mxu3 %v7281_v41  ;;  %v2915_v12 = vadd.f32 1e-05, %v2906_v56 }
 0x262   :  { %v6990_v45 = vld [vmem:[%s15850_s7 + $0x38] sm:$0xf0]  ;;  %2765 = vmatpush.bf16.msra.mxu0 %v7537_v29  ;;  %v12860_v13 = vsub.f32 %v2522_v51, %v2835_v11  ;;  %v2925_v22 = vmul.f32 0.5, %v2924_v44 }
 0x263   :  { %v9913_v42 = vld [vmem:[%s15850_s7 + $0x21c] sm:$0xf]  ;;  %v6993_v62 = vor.u32 %v9849_v39, %v6990_v45  ;;  %2778 = vmatpush.bf16.msra.mxu1 %v7793_v46  ;;  %10568 = vrsqrt.f32 %v2915_v12  ;;  %vm2938_vm10 = vweird.f32 %v2915_v12 }
 0x264   :  { %v7246_v48 = vld [vmem:[%s15850_s7 + $0x238] sm:$0xf0]  ;;  %v2926_v31 = vsub.f32 1.5, %v2925_v22 }
 0x265   :  { %v9977_v50 = vld [vmem:[%s15850_s7 + $0x41c] sm:$0xf]  ;;  %v7249_v63 = vor.u32 %v9913_v42, %v7246_v48  ;;  %2740 = vmatpush.bf16.msrb.mxu2 %v6993_v62 }
 0x266   :  { %v7502_v36 = vld [vmem:[%s15850_s7 + $0x438] sm:$0xf0]  ;;  %v2927_v37 = vmul.f32 %v10567_v7, %v2926_v31 }
 0x267   :  { %v10041_v49 = vld [vmem:[%s15850_s7 + $0x61c] sm:$0xf]  ;;  %v7505_v55 = vor.u32 %v9977_v50, %v7502_v36  ;;  %2753 = vmatpush.bf16.msrb.mxu3 %v7249_v63  ;;  %v2573_v9 = vpop.f32.mrf.mxu1 }
 0x268   :  { %v7758_v58 = vld [vmem:[%s15850_s7 + $0x638] sm:$0xf0]  ;;  %2741 = vmatmul.bf16.vlgmr.msrb.gmra.mxu2 %v11666_v60  ;;  %v2851_v60 = vmul.f32 %v12860_v13, %v12860_v13  ;;  %v2931_v46 = vsel %vm2930_vm13, %v10567_v7, %v2927_v37 }
 0x269   :  { %v7761_v0 = vor.u32 %v10041_v49, %v7758_v58  ;;  %2766 = vmatpush.bf16.msra.mxu0 %v7505_v55  ;;  %v10569_v4 = vpop.eup %10568 }
 0x26a   :  { %2754 = vmatmul.bf16.vlgmr.msrb.gmra.mxu3 %v11668_v17  ;;  %v2869_v16 = vrot.slane %v2851_v60, 4  ;;  %v2560_v17 = vpop.f32.mrf.mxu0  ;;  %v2933_v23 = vmul.f32 %v10569_v4, %v2915_v12  ;;  %vm2939_vm8 = vweird.f32 %v10569_v4 }
 0x26b   :  { %2779 = vmatpush.bf16.msra.mxu1 %v7761_v0  ;;  %v2547_v24 = vpop.f32.mrf.mxu3  ;;  %vm2940_vm11 = vmor %vm2938_vm10, %vm2939_vm8  ;;  %vm3020_vm10 = vcmask 1044484  }
 0x26c   :  { %2767 = vmatmul.bf16.vlgmr.msra.gmra.mxu0 %v11670_v18  ;;  %v2870_v21 = vadd.f32 %v2869_v16, %v2851_v60  ;;  %v2534_v18 = vpop.f32.mrf.mxu2  ;;  %v2934_v25 = vmul.f32 %v10569_v4, %v2933_v23 }
 0x26e   :  { %2780 = vmatmul.bf16.vlgmr.msra.gmra.mxu1 %v11672_v19  ;;  %v2548_v19 = vadd.f32 %v2547_v24, %v2534_v18  ;;  %v2871_v26 = vrot.slane %v2870_v21, 2  ;;  %v2935_v32 = vmul.f32 0.5, %v2934_v25 }
 0x26f   :  { %v2575_v28 = vpop.f32.mrf.mxu1 }
 0x270   :  { %v2561_v27 = vadd.f32 %v2560_v17, %v2548_v19  ;;  %v2936_v51 = vsub.f32 1.5, %v2935_v32  ;;  %v2872_v57 = vadd.f32 %v2871_v26, %v2870_v21 }
 0x272   :  { %v2562_v43 = vpop.f32.mrf.mxu0  ;;  %v2574_v33 = vadd.f32 %v2573_v9, %v2561_v27  ;;  %v2937_v39 = vmul.f32 %v10569_v4, %v2936_v51  ;;  %v2873_v42 = vrot.slane %v2872_v57, 1 }
 0x273   :  { %v2549_v40 = vpop.f32.mrf.mxu3 }
 0x274   :  { %v2803_v38 = vrot.slane %v2574_v33, 4  ;;  %v2536_v10 = vpop.f32.mrf.mxu2  ;;  %v2941_v41 = vsel %vm2940_vm11, %v10569_v4, %v2937_v39  ;;  %v2874_v48 = vadd.f32 %v2873_v42, %v2872_v57 }
 0x275   :  { %v3010_v45 = vrot.slane %v2941_v41, 7 }
 0x276   :  { %v2804_v35 = vadd.f32 %v2803_v38, %v2574_v33  ;;  %v2907_v53 = vmul.f32 %v2874_v48, %v10855_v30 }
 0x277   :  { %v12867_v47 = vsel %vm164_vm7, %v2931_v46, %v3010_v45 }
 0x278   :  { %v2805_v29 = vrot.slane %v2804_v35, 2  ;;  %v2916_v52 = vadd.f32 1e-05, %v2907_v53 }
 0x27a   :  { %v2806_v15 = vadd.f32 %v2805_v29, %v2804_v35  ;;  %10570 = vrsqrt.f32 %v2916_v52  ;;  %vm2948_vm14 = vweird.f32 %v2916_v52 }
 0x27c   :  { %v2807_v50 = vrot.slane %v2806_v15, 1 }
 0x27e   :  { %v2808_v36 = vadd.f32 %v2807_v50, %v2806_v15 }
 0x280   :  { %v2836_v54 = vmul.f32 %v2808_v36, %v10855_v30  ;;  %v10571_v8 = vpop.eup %10570 }
 0x281   :  { %v2943_v14 = vmul.f32 %v10571_v8, %v2916_v52  ;;  %vm2949_vm7 = vweird.f32 %v10571_v8 }
 0x282   :  { %v12871_v49 = vsub.f32 %v2574_v33, %v2836_v54  ;;  %vm2950_vm0 = vmor %vm2948_vm14, %vm2949_vm7 }
 0x283   :  { %v2944_v21 = vmul.f32 %v10571_v8, %v2943_v14 }
 0x284   :  { %v2852_v58 = vmul.f32 %v12871_v49, %v12871_v49 }
 0x285   :  { %v2945_v18 = vmul.f32 0.5, %v2944_v21 }
 0x286   :  { %v2875_v59 = vrot.slane %v2852_v58, 4 }
 0x287   :  { %v2625_v62 = vpop.f32.mrf.mxu1  ;;  %v2946_v26 = vsub.f32 1.5, %v2945_v18 }
 0x288   :  { %v2612_v61 = vpop.f32.mrf.mxu0  ;;  %v2876_v63 = vadd.f32 %v2875_v59, %v2852_v58 }
 0x289   :  { %v2947_v32 = vmul.f32 %v10571_v8, %v2946_v26 }
 0x28a   :  { %v2877_v55 = vrot.slane %v2876_v63, 2 }
 0x28b   :  { %v2586_v0 = vpop.f32.mrf.mxu2  ;;  %v2599_v1 = vpop.f32.mrf.mxu3  ;;  %v2951_v10 = vsel %vm2950_vm0, %v10571_v8, %v2947_v32  ;;  %vm3022_vm0 = vcmask 1046534  }
 0x28c   :  { %v2878_v2 = vadd.f32 %v2877_v55, %v2876_v63  ;;  %v2600_v3 = vadd.f32 %v2599_v1, %v2586_v0  ;;  %v3011_v45 = vrot.slane %v2951_v10, 6 }
 0x28e   :  { %v2879_v6 = vrot.slane %v2878_v2, 1  ;;  %v2613_v34 = vadd.f32 %v2612_v61, %v2600_v3 }
 0x28f   :  { %v2627_v56 = vpop.f32.mrf.mxu1 }
 0x290   :  { %v2614_v7 = vpop.f32.mrf.mxu0  ;;  %v2880_v11 = vadd.f32 %v2879_v6, %v2878_v2  ;;  %v2626_v12 = vadd.f32 %v2625_v62, %v2613_v34 }
 0x292   :  { %v2908_v60 = vmul.f32 %v2880_v11, %v10855_v30  ;;  %v2809_v16 = vrot.slane %v2626_v12, 4 }
 0x293   :  { %v2588_v17 = vpop.f32.mrf.mxu2  ;;  %v2601_v9 = vpop.f32.mrf.mxu3 }
 0x294   :  { %v2917_v44 = vadd.f32 1e-05, %v2908_v60  ;;  %v2810_v4 = vadd.f32 %v2809_v16, %v2626_v12 }
 0x296   :  { %10572 = vrsqrt.f32 %v2917_v44  ;;  %v2811_v22 = vrot.slane %v2810_v4, 2  ;;  %vm2958_vm1 = vweird.f32 %v2917_v44 }
 0x298   :  { %v2812_v23 = vadd.f32 %v2811_v22, %v2810_v4 }
 0x29a   :  { %v2813_v24 = vrot.slane %v2812_v23, 1 }
 0x29c   :  { %v10573_v19 = vpop.eup %10572  ;;  %v2814_v25 = vadd.f32 %v2813_v24, %v2812_v23 }
 0x29d   :  { %v2953_v27 = vmul.f32 %v10573_v19, %v2917_v44  ;;  %vm2959_vm15 = vweird.f32 %v10573_v19 }
 0x29e   :  { %v2837_v43 = vmul.f32 %v2814_v25, %v10855_v30  ;;  %vm2960_vm2 = vmor %vm2958_vm1, %vm2959_vm15  ;;  %vm3024_vm1 = vcmask 1045508  }
 0x29f   :  { %v2954_v28 = vmul.f32 %v10573_v19, %v2953_v27 }
 0x2a0   :  { %v12877_v31 = vsub.f32 %v2626_v12, %v2837_v43 }
 0x2a1   :  { %v2955_v33 = vmul.f32 0.5, %v2954_v28 }
 0x2a2   :  { %v2853_v51 = vmul.f32 %v12877_v31, %v12877_v31 }
 0x2a3   :  { %v2956_v57 = vsub.f32 1.5, %v2955_v33 }
 0x2a4   :  { %v2881_v38 = vrot.slane %v2853_v51, 4 }
 0x2a5   :  { %v2957_v40 = vmul.f32 %v10573_v19, %v2956_v57 }
 0x2a6   :  { %v2882_v35 = vadd.f32 %v2881_v38, %v2853_v51 }
 0x2a7   :  { %v2677_v39 = vpop.f32.mrf.mxu1  ;;  %v2961_v41 = vsel %vm2960_vm2, %v10573_v19, %v2957_v40  ;;  %v8184_v40 = vld [vmem:[%s15853_s10 + $0x188] sm:$0xf]  ;;  %vm3026_vm2 = vcmask 1043456  }
 0x2a8   :  { %v2664_v37 = vpop.f32.mrf.mxu0  ;;  %v3012_v42 = vrot.slane %v2961_v41, 5  ;;  %v2883_v48 = vrot.slane %v2882_v35, 2  ;;  %v8408_v41 = vld [vmem:[%s15853_s10 + $0x348] sm:$0xf] }
 0x2aa   :  { %v3018_v15 = vsel %vm792_vm5, %v3011_v45, %v3012_v42  ;;  %v2884_v58 = vadd.f32 %v2883_v48, %v2882_v35  ;;  %v10154_v35 = vld [vmem:[%s15853_s10 + $0x1a0] sm:$0xf0] }
 0x2ab   :  { %v2638_v29 = vpop.f32.mrf.mxu2  ;;  %v2651_v46 = vpop.f32.mrf.mxu3  ;;  %v12884_v36 = vsel %vm794_vm6, %v12867_v47, %v3018_v15  ;;  %v8185_v45 = vor.u32 %v10154_v35, %v8184_v40  ;;  %v10210_v42 = vld [vmem:[%s15853_s10 + $0x360] sm:$0xf0] }
 0x2ac   :  { %v2652_v50 = vadd.f32 %v2651_v46, %v2638_v29  ;;  %v2885_v55 = vrot.slane %v2884_v58, 1  ;;  %v8632_v29 = vld [vmem:[%s15853_s10 + $0x508] sm:$0xf]  ;;  %v10266_v46 = vld [vmem:[%s15853_s10 + $0x520] sm:$0xf0]  ;;  %v8409_v48 = vor.u32 %v10210_v42, %v8408_v41 }
 0x2ad   :  { %5929 = vmatpush.bf16.msra.mxu2 %v8185_v45  ;;  %v8324_v45 = vld [vmem:[%s15853_s10 + $0x2a0] sm:$0xf]  ;;  %v10189_v42 = vld [vmem:[%s15853_s10 + $0x2b8] sm:$0xf0] }
 0x2ae   :  { %v2665_v53 = vadd.f32 %v2664_v37, %v2652_v50  ;;  %v2886_v2 = vadd.f32 %v2885_v55, %v2884_v58  ;;  %v8633_v50 = vor.u32 %v10266_v46, %v8632_v29  ;;  %5942 = vmatpush.bf16.msra.mxu3 %v8409_v48  ;;  %v8380_v55 = vld [vmem:[%s15853_s10 + $0x310] sm:$0xf]  ;;  %v8548_v29 = vld [vmem:[%s15853_s10 + $0x460] sm:$0xf]  ;;  %v8325_v46 = vor.u32 %v10189_v42, %v8324_v45  ;;  %v10301_v48 = vld [vmem:[%s15853_s10 + $0x638] sm:$0xf0] }
 0x2af   :  { %v2679_v52 = vpop.f32.mrf.mxu1  ;;  %v10168_v45 = vld [vmem:[%s15853_s10 + $0x210] sm:$0xf0]  ;;  %v8464_v42 = vld [vmem:[%s15853_s10 + $0x3b8] sm:$0xf] }
 0x2b0   :  { %v2666_v54 = vpop.f32.mrf.mxu0  ;;  %v2678_v59 = vadd.f32 %v2677_v39, %v2665_v53  ;;  %v2909_v6 = vmul.f32 %v2886_v2, %v10855_v30  ;;  %v8856_v53 = vld [vmem:[%s15853_s10 + $0x6c8] sm:$0xf]  ;;  %5955 = vmatpush.bf16.msrb.mxu0 %v8633_v50  ;;  %v10203_v2 = vld [vmem:[%s15853_s10 + $0x328] sm:$0xf0] }
 0x2b1   :  { %v10322_v54 = vld [vmem:[%s15853_s10 + $0x6e0] sm:$0xf0] }
 0x2b2   :  { %v2815_v61 = vrot.slane %v2678_v59, 4  ;;  %v12888_v7 = vadd.f32 1e-05, %v2909_v6  ;;  %v8857_v58 = vor.u32 %v10322_v54, %v8856_v53 }
 0x2b3   :  { %v2640_v62 = vpop.f32.mrf.mxu2  ;;  %v2653_v63 = vpop.f32.mrf.mxu3 }
 0x2b4   :  { %v2816_v0 = vadd.f32 %v2815_v61, %v2678_v59  ;;  %10574 = vrsqrt.f32 %v12888_v7  ;;  %v8156_v62 = vld [vmem:[%s15853_s10 + $0x150] sm:$0xf]  ;;  %v10147_v63 = vld [vmem:[%s15853_s10 + $0x168] sm:$0xf0]  ;;  %5968 = vmatpush.bf16.msrb.mxu1 %v8857_v58  ;;  %vm2968_vm5 = vweird.f32 %v12888_v7 }
 0x2b6   :  { %v2817_v1 = vrot.slane %v2816_v0, 2 }
 0x2b8   :  { %v2818_v3 = vadd.f32 %v2817_v1, %v2816_v0  ;;  %v8157_v1 = vor.u32 %v10147_v63, %v8156_v62 }
 0x2ba   :  { %v2819_v8 = vrot.slane %v2818_v3, 1  ;;  %v12895_v4 = vpop.eup %10574  ;;  %5930 = vmatpush.bf16.msra.mxu2 %v8157_v1 }
 0x2bb   :  { %v2963_v25 = vmul.f32 %v12895_v4, %v12888_v7  ;;  %vm2969_vm3 = vweird.f32 %v12895_v4  ;;  %v8716_v7 = vld [vmem:[%s15853_s10 + $0x5b0] sm:$0xf] }
 0x2bc   :  { %v2820_v34 = vadd.f32 %v2819_v8, %v2818_v3  ;;  %v8604_v3 = vld [vmem:[%s15853_s10 + $0x4d0] sm:$0xf]  ;;  %v10259_v8 = vld [vmem:[%s15853_s10 + $0x4e8] sm:$0xf0]  ;;  %vm12992_vm6 = vmor %vm2968_vm5, %vm2969_vm3  ;;  %vm6670_vm3 = vcmask 130048  }
 0x2bd   :  { %v2964_v32 = vmul.f32 %v12895_v4, %v2963_v25 }
 0x2be   :  { %v2838_v47 = vmul.f32 %v2820_v34, %v10855_v30  ;;  %v8381_v34 = vor.u32 %v10203_v2, %v8380_v55  ;;  %v8072_v55 = vld [vmem:[%s15853_s10 + $0xa8] sm:$0xf] }
 0x2bf   :  { %v2965_v39 = vmul.f32 0.5, %v2964_v32  ;;  %v8296_v2 = vld [vmem:[%s15853_s10 + $0x268] sm:$0xf] }
 0x2c0   :  { %v12890_v56 = vsub.f32 %v2678_v59, %v2838_v47  ;;  %v8605_v47 = vor.u32 %v10259_v8, %v8604_v3  ;;  %5943 = vmatpush.bf16.msra.mxu3 %v8381_v34  ;;  %v10182_v3 = vld [vmem:[%s15853_s10 + $0x280] sm:$0xf0]  ;;  %v8520_v8 = vld [vmem:[%s15853_s10 + $0x428] sm:$0xf] }
 0x2c1   :  { %v2966_v52 = vsub.f32 1.5, %v2965_v39  ;;  %v8297_v34 = vor.u32 %v10182_v3, %v8296_v2  ;;  %v8660_v3 = vld [vmem:[%s15853_s10 + $0x540] sm:$0xf] }
 0x2c2   :  { %v2854_v11 = vmul.f32 %v12890_v56, %v12890_v56  ;;  %5956 = vmatpush.bf16.msrb.mxu0 %v8605_v47  ;;  %v10238_v47 = vld [vmem:[%s15853_s10 + $0x440] sm:$0xf0] }
 0x2c4   :  { %v2887_v12 = vrot.slane %v2854_v11, 4 }
 0x2c6   :  { %v2888_v16 = vadd.f32 %v2887_v12, %v2854_v11  ;;  %v8828_v11 = vld [vmem:[%s15853_s10 + $0x690] sm:$0xf]  ;;  %v10315_v12 = vld [vmem:[%s15853_s10 + $0x6a8] sm:$0xf0] }
 0x2c7   :  { %v2729_v60 = vpop.f32.mrf.mxu1 }
 0x2c8   :  { %v2716_v14 = vpop.f32.mrf.mxu0  ;;  %v2889_v17 = vrot.slane %v2888_v16, 2 }
 0x2ca   :  { %v2890_v21 = vadd.f32 %v2889_v17, %v2888_v16  ;;  %v8128_v17 = vld [vmem:[%s15853_s10 + $0x118] sm:$0xf] }
 0x2cb   :  { %v2690_v9 = vpop.f32.mrf.mxu2  ;;  %v2703_v44 = vpop.f32.mrf.mxu3 }
 0x2cc   :  { %v2704_v22 = vadd.f32 %v2703_v44, %v2690_v9  ;;  %v2891_v23 = vrot.slane %v2890_v21, 1  ;;  %v10140_v9 = vld [vmem:[%s15853_s10 + $0x130] sm:$0xf0]  ;;  %v8352_v44 = vld [vmem:[%s15853_s10 + $0x2d8] sm:$0xf] }
 0x2ce   :  { %v2717_v18 = vadd.f32 %v2716_v14, %v2704_v22  ;;  %v2892_v26 = vadd.f32 %v2891_v23, %v2890_v21  ;;  %v2967_v21 = vmul.f32 %v12895_v4, %v2966_v52  ;;  %v8129_v23 = vor.u32 %v10140_v9, %v8128_v17 }
 0x2cf   :  { %v2731_v19 = vpop.f32.mrf.mxu1 }
 0x2d0   :  { %v2718_v24 = vpop.f32.mrf.mxu0  ;;  %v2730_v27 = vadd.f32 %v2729_v60, %v2717_v18  ;;  %v2910_v43 = vmul.f32 %v2892_v26, %v10855_v30  ;;  %v8829_v60 = vor.u32 %v10315_v12, %v8828_v11  ;;  %v10196_v18 = vld [vmem:[%s15853_s10 + $0x2f0] sm:$0xf0]  ;;  %5931 = vmatpush.bf16.msra.mxu2 %v8129_v23  ;;  %v2971_v40 = vsel %vm12992_vm6, %v12895_v4, %v2967_v21  ;;  %v10245_v4 = vld [vmem:[%s15853_s10 + $0x478] sm:$0xf0]  ;;  %v8744_v11 = vld [vmem:[%s15853_s10 + $0x5e8] sm:$0xf] }
 0x2d1   :  { %v8576_v24 = vld [vmem:[%s15853_s10 + $0x498] sm:$0xf]  ;;  %v8353_v25 = vor.u32 %v10196_v18, %v8352_v44  ;;  %v10252_v26 = vld [vmem:[%s15853_s10 + $0x4b0] sm:$0xf0]  ;;  %v8549_v54 = vor.u32 %v10245_v4, %v8548_v29  ;;  %v3013_v58 = vrot.slane %v2971_v40, 4  ;;  %v8521_v44 = vor.u32 %v10238_v47, %v8520_v8 }
 0x2d2   :  { %v2821_v28 = vrot.slane %v2730_v27, 4  ;;  %v12901_v57 = vadd.f32 1e-05, %v2910_v43  ;;  %5969 = vmatpush.bf16.msrb.mxu1 %v8829_v60  ;;  %v10308_v43 = vld [vmem:[%s15853_s10 + $0x670] sm:$0xf0] }
 0x2d3   :  { %v2692_v33 = vpop.f32.mrf.mxu2  ;;  %v2705_v51 = vpop.f32.mrf.mxu3  ;;  %5944 = vmatpush.bf16.msra.mxu3 %v8353_v25  ;;  %v10294_v12 = vld [vmem:[%s15853_s10 + $0x600] sm:$0xf0]  ;;  %v10119_v23 = vld [vmem:[%s15853_s10 + $0x88] sm:$0xf0]  ;;  %v8240_v40 = vld [vmem:[%s15853_s10 + $0x1f8] sm:$0xf] }
 0x2d4   :  { %v2822_v38 = vadd.f32 %v2821_v28, %v2730_v27  ;;  %10576 = vrsqrt.f32 %v12901_v57  ;;  %vm2978_vm8 = vweird.f32 %v12901_v57  ;;  %v8577_v51 = vor.u32 %v10252_v26, %v8576_v24  ;;  %v10175_v25 = vld [vmem:[%s15853_s10 + $0x248] sm:$0xf0]  ;;  %v10224_v29 = vld [vmem:[%s15853_s10 + $0x3d0] sm:$0xf0]  ;;  %v10273_v8 = vld [vmem:[%s15853_s10 + $0x558] sm:$0xf0] }
 0x2d5   :  { %v8745_v21 = vor.u32 %v10294_v12, %v8744_v11  ;;  %v8465_v4 = vor.u32 %v10224_v29, %v8464_v42  ;;  %v8661_v12 = vor.u32 %v10273_v8, %v8660_v3  ;;  %v10364_v42 = vld [vmem:[%s15853_s10 + $0x830] sm:$0xf0]  ;;  %v9248_v29 = vld [vmem:[%s15853_s10 + $0x9d8] sm:$0xf] }
 0x2d6   :  { %v2823_v37 = vrot.slane %v2822_v38, 2  ;;  %5957 = vmatpush.bf16.msrb.mxu0 %v8577_v51  ;;  %v10287_v51 = vld [vmem:[%s15853_s10 + $0x5c8] sm:$0xf0] }
 0x2d7   :  { %5945 = vmatpush.bf16.msra.mxu3 %v8325_v46  ;;  %v8241_v46 = vor.u32 %v10168_v45, %v8240_v40  ;;  %v10539_v40 = vld [vmem:[%s15853_s10 + $0xda8] sm:$0xf0]  ;;  %v9024_v45 = vld [vmem:[%s15853_s10 + $0x818] sm:$0xf] }
 0x2d8   :  { %v2824_v10 = vadd.f32 %v2823_v37, %v2822_v38 }
 0x2da   :  { %v2825_v15 = vrot.slane %v2824_v10, 1  ;;  %v12928_v59 = vpop.eup %10576  ;;  %5958 = vmatpush.bf16.msrb.mxu0 %v8549_v54 }
 0x2db   :  { %v2973_v0 = vmul.f32 %v12928_v59, %v12901_v57  ;;  %vm2979_vm4 = vweird.f32 %v12928_v59  ;;  %v10133_v57 = vld [vmem:[%s15853_s10 + $0xf8] sm:$0xf0]  ;;  %5946 = vmatpush.bf16.msra.mxu3 %v8297_v34  ;;  %v9080_v34 = vld [vmem:[%s15853_s10 + $0x888] sm:$0xf] }
 0x2dc   :  { %v2826_v61 = vadd.f32 %v2825_v15, %v2824_v10  ;;  %vm12999_vm9 = vmor %vm2978_vm8, %vm2979_vm4  ;;  %v8100_v10 = vld [vmem:[%s15853_s10 + $0xe0] sm:$0xf] }
 0x2dd   :  { %v2974_v14 = vmul.f32 %v12928_v59, %v2973_v0  ;;  %v8101_v41 = vor.u32 %v10133_v57, %v8100_v10  ;;  %v8772_v15 = vld [vmem:[%s15853_s10 + $0x620] sm:$0xf]  ;;  %v10126_v0 = vld [vmem:[%s15853_s10 + $0xc0] sm:$0xf0]  ;;  %v8016_v10 = vld [vmem:[%s15853_s10 + $0x38] sm:$0xf] }
 0x2de   :  { %v2839_v6 = vmul.f32 %v2826_v61, %v10855_v30  ;;  %v8773_v52 = vor.u32 %v10301_v48, %v8772_v15  ;;  %5959 = vmatpush.bf16.msrb.mxu0 %v8521_v44  ;;  %v10112_v57 = vld [vmem:[%s15853_s10 + $0x50] sm:$0xf0]  ;;  %v8688_v15 = vld [vmem:[%s15853_s10 + $0x578] sm:$0xf]  ;;  %v9528_v44 = vld [vmem:[%s15853_s10 + $0xc08] sm:$0xf] }
 0x2df   :  { %v2975_v22 = vmul.f32 0.5, %v2974_v14  ;;  %5932 = vmatpush.bf16.msra.mxu2 %v8101_v41  ;;  %v8017_v41 = vor.u32 %v10112_v57, %v8016_v10  ;;  %v10280_v48 = vld [vmem:[%s15853_s10 + $0x590] sm:$0xf0] }
 0x2e0   :  { %v12959_v16 = vsub.f32 %v2730_v27, %v2839_v6  ;;  %v8800_v27 = vld [vmem:[%s15853_s10 + $0x658] sm:$0xf]  ;;  %v8689_v54 = vor.u32 %v10280_v48, %v8688_v15  ;;  %v10476_v15 = vld [vmem:[%s15853_s10 + $0xbb0] sm:$0xf0] }
 0x2e1   :  { %v2976_v28 = vsub.f32 1.5, %v2975_v22  ;;  %v8801_v38 = vor.u32 %v10308_v43, %v8800_v27  ;;  %v8044_v22 = vld [vmem:[%s15853_s10 + $0x70] sm:$0xf]  ;;  %v10231_v43 = vld [vmem:[%s15853_s10 + $0x408] sm:$0xf0] }
 0x2e2   :  { %v2855_v19 = vmul.f32 %v12959_v16, %v12959_v16  ;;  %v8045_v24 = vor.u32 %v10119_v23, %v8044_v22  ;;  %v8492_v27 = vld [vmem:[%s15853_s10 + $0x3f0] sm:$0xf] }
 0x2e3   :  { %v2977_v35 = vmul.f32 %v12928_v59, %v2976_v28  ;;  %5970 = vmatpush.bf16.msrb.mxu1 %v8801_v38 }
 0x2e4   :  { %v2893_v39 = vrot.slane %v2855_v19, 4 }
 0x2e5   :  { %v2981_v50 = vsel %vm12999_vm9, %v12928_v59, %v2977_v35  ;;  %v8073_v59 = vor.u32 %v10126_v0, %v8072_v55  ;;  %v10161_v55 = vld [vmem:[%s15853_s10 + $0x1d8] sm:$0xf0]  ;;  %v8436_v0 = vld [vmem:[%s15853_s10 + $0x380] sm:$0xf] }
 0x2e6   :  { %v2894_v53 = vadd.f32 %v2893_v39, %v2855_v19  ;;  %v3014_v61 = vrot.slane %v2981_v50, 3  ;;  %v8268_v19 = vld [vmem:[%s15853_s10 + $0x230] sm:$0xf]  ;;  %v8717_v39 = vor.u32 %v10287_v51, %v8716_v7 }
 0x2e7   :  { %5971 = vmatpush.bf16.msrb.mxu1 %v8773_v52  ;;  %5933 = vmatpush.bf16.msra.mxu2 %v8073_v59  ;;  %v8269_v26 = vor.u32 %v10175_v25, %v8268_v19  ;;  %v7988_v52 = vld [vmem:[%s15853_s10] sm:$0xf]  ;;  %v9752_v19 = vld [vmem:[%s15853_s10 + $0xdc8] sm:$0xf]  ;;  %v10546_v25 = vld [vmem:[%s15853_s10 + $0xde0] sm:$0xf0] }
 0x2e8   :  { %v13050_v6 = vsel %vm3020_vm10, %v3013_v58, %v3014_v61  ;;  %v2895_v14 = vrot.slane %v2894_v53, 2  ;;  %v10105_v58 = vld [vmem:[%s15853_s10 + $0x18] sm:$0xf0]  ;;  %v8212_v61 = vld [vmem:[%s15853_s10 + $0x1c0] sm:$0xf] }
 0x2e9   :  { %v2768_v32 = vpop.f32.mrf.mxu0  ;;  %5947 = vmatpush.bf16.msra.mxu3 %v8269_v26  ;;  %v8213_v59 = vor.u32 %v10161_v55, %v8212_v61  ;;  %v9052_v26 = vld [vmem:[%s15853_s10 + $0x850] sm:$0xf]  ;;  %v10357_v55 = vld [vmem:[%s15853_s10 + $0x7f8] sm:$0xf0] }
 0x2ea   :  { %v2896_v28 = vadd.f32 %v2895_v14, %v2894_v53  ;;  %v10378_v14 = vld [vmem:[%s15853_s10 + $0x8a0] sm:$0xf0]  ;;  %v9276_v7 = vld [vmem:[%s15853_s10 + $0xa10] sm:$0xf] }
 0x2eb   :  { %v2781_v33 = vpop.f32.mrf.mxu1  ;;  %v2742_v62 = vpop.f32.mrf.mxu2  ;;  %5972 = vmatpush.bf16.msrb.mxu1 %v8745_v21  ;;  %5934 = vmatpush.bf16.msra.mxu2 %v8045_v24  ;;  %v10490_v21 = vld [vmem:[%s15853_s10 + $0xc20] sm:$0xf0] }
 0x2ec   :  { %v2897_v50 = vrot.slane %v2896_v28, 1  ;;  %v9529_v24 = vor.u32 %v10490_v21, %v9528_v44  ;;  %v9192_v21 = vld [vmem:[%s15853_s10 + $0x968] sm:$0xf] }
 0x2ed   :  { %v2755_v63 = vpop.f32.mrf.mxu3  ;;  %5948 = vmatpush.bf16.msra.mxu3 %v8241_v46  ;;  %v9025_v46 = vor.u32 %v10364_v42, %v9024_v45  ;;  %v9612_v45 = vld [vmem:[%s15853_s10 + $0xcb0] sm:$0xf]  ;;  %v10511_v42 = vld [vmem:[%s15853_s10 + $0xcc8] sm:$0xf0] }
 0x2ee   :  { %v2756_v1 = vadd.f32 %v2755_v63, %v2742_v62  ;;  %v7989_v63 = vor.u32 %v10105_v58, %v7988_v52  ;;  %v2898_v47 = vadd.f32 %v2897_v50, %v2896_v28  ;;  %v10427_v28 = vld [vmem:[%s15853_s10 + $0xa28] sm:$0xf0]  ;;  %v9696_v52 = vld [vmem:[%s15853_s10 + $0xd58] sm:$0xf]  ;;  %v10532_v58 = vld [vmem:[%s15853_s10 + $0xd70] sm:$0xf0] }
 0x2ef   :  { %5973 = vmatpush.bf16.msrb.mxu1 %v8717_v39  ;;  %5935 = vmatpush.bf16.msra.mxu2 %v8017_v41  ;;  %v9724_v39 = vld [vmem:[%s15853_s10 + $0xd90] sm:$0xf]  ;;  %v9277_v10 = vor.u32 %v10427_v28, %v9276_v7  ;;  %v9697_v61 = vor.u32 %v10532_v58, %v9696_v52  ;;  %v10392_v52 = vld [vmem:[%s15853_s10 + $0x910] sm:$0xf0] }
 0x2f0   :  { %v2769_v60 = vadd.f32 %v2768_v32, %v2756_v1  ;;  %v10217_v1 = vld [vmem:[%s15853_s10 + $0x398] sm:$0xf0]  ;;  %v9725_v41 = vor.u32 %v10539_v40, %v9724_v39  ;;  %v10399_v39 = vld [vmem:[%s15853_s10 + $0x948] sm:$0xf0] }
 0x2f1   :  { %v2770_v17 = vpop.f32.mrf.mxu0  ;;  %v8437_v2 = vor.u32 %v10217_v1, %v8436_v0  ;;  %5949 = vmatpush.bf16.msra.mxu3 %v8213_v59  ;;  %v9220_v1 = vld [vmem:[%s15853_s10 + $0x9a0] sm:$0xf]  ;;  %v10413_v59 = vld [vmem:[%s15853_s10 + $0x9b8] sm:$0xf0] }
 0x2f2   :  { %v13067_v18 = vadd.f32 %v2781_v33, %v2769_v60  ;;  %v8493_v33 = vor.u32 %v10231_v43, %v8492_v27  ;;  %v9304_v60 = vld [vmem:[%s15853_s10 + $0xa48] sm:$0xf]  ;;  %v9081_v17 = vor.u32 %v10378_v14, %v9080_v34  ;;  %v9753_v27 = vor.u32 %v10546_v25, %v9752_v19  ;;  %v10371_v43 = vld [vmem:[%s15853_s10 + $0x868] sm:$0xf0]  ;;  %v10469_v34 = vld [vmem:[%s15853_s10 + $0xb78] sm:$0xf0] }
 0x2f3   :  { %v2783_v9 = vpop.f32.mrf.mxu1  ;;  %v2744_v38 = vpop.f32.mrf.mxu2  ;;  %5974 = vmatpush.bf16.msrb.mxu1 %v8689_v54  ;;  %5936 = vmatpush.bf16.msra.mxu2 %v7989_v63  ;;  %v9053_v51 = vor.u32 %v10371_v43, %v9052_v26  ;;  %v8996_v63 = vld [vmem:[%s15853_s10 + $0x7e0] sm:$0xf]  ;;  %v9221_v8 = vor.u32 %v10413_v59, %v9220_v1  ;;  %v9416_v19 = vld [vmem:[%s15853_s10 + $0xb28] sm:$0xf]  ;;  %v10462_v25 = vld [vmem:[%s15853_s10 + $0xb40] sm:$0xf0] }
 0x2f4   :  { %v2827_v32 = vrot.slane %v13067_v18, 4  ;;  %5960 = vmatpush.bf16.msrb.mxu0 %v8493_v33  ;;  %v10434_v9 = vld [vmem:[%s15853_s10 + $0xa60] sm:$0xf0]  ;;  %v9500_v38 = vld [vmem:[%s15853_s10 + $0xbd0] sm:$0xf]  ;;  %v8997_v0 = vor.u32 %v10357_v55, %v8996_v63 }
 0x2f5   :  { %v2757_v37 = vpop.f32.mrf.mxu3  ;;  %v9305_v23 = vor.u32 %v10434_v9, %v9304_v60  ;;  %v10350_v9 = vld [vmem:[%s15853_s10 + $0x7c0] sm:$0xf0]  ;;  %v9640_v26 = vld [vmem:[%s15853_s10 + $0xce8] sm:$0xf]  ;;  %v9584_v63 = vld [vmem:[%s15853_s10 + $0xc78] sm:$0xf] }
 0x2f6   :  { %v2828_v35 = vadd.f32 %v2827_v32, %v13067_v18  ;;  %v2911_v32 = vmul.f32 %v2898_v47, %v10855_v30  ;;  %v10483_v37 = vld [vmem:[%s15853_s10 + $0xbe8] sm:$0xf0]  ;;  %v9668_v47 = vld [vmem:[%s15853_s10 + $0xd20] sm:$0xf]  ;;  %v10518_v43 = vld [vmem:[%s15853_s10 + $0xd00] sm:$0xf0] }
 0x2f7   :  { %5975 = vmatpush.bf16.msrb.mxu1 %v8661_v12  ;;  %5981 = vmatpush.bf16.msrb.mxu2 %v9081_v17  ;;  %v9501_v57 = vor.u32 %v10483_v37, %v9500_v38  ;;  %v10525_v12 = vld [vmem:[%s15853_s10 + $0xd38] sm:$0xf0]  ;;  %v8968_v17 = vld [vmem:[%s15853_s10 + $0x7a8] sm:$0xf]  ;;  %v9164_v37 = vld [vmem:[%s15853_s10 + $0x930] sm:$0xf] }
 0x2f8   :  { %v2829_v53 = vrot.slane %v2828_v35, 2  ;;  %5961 = vmatpush.bf16.msrb.mxu0 %v8465_v4  ;;  %5994 = vmatpush.bf16.msrb.mxu3 %v9305_v23  ;;  %v9472_v4 = vld [vmem:[%s15853_s10 + $0xb98] sm:$0xf]  ;;  %v13208_v48 = vadd.f32 1e-05, %v2911_v32  ;;  %v9669_v60 = vor.u32 %v10525_v12, %v9668_v47  ;;  %v8969_v44 = vor.u32 %v10350_v9, %v8968_v17 }
 0x2f9   :  { %v9473_v54 = vor.u32 %v10476_v15, %v9472_v4  ;;  %v9641_v32 = vor.u32 %v10518_v43, %v9640_v26  ;;  %v9165_v40 = vor.u32 %v10399_v39, %v9164_v37  ;;  %v8912_v15 = vld [vmem:[%s15853_s10 + $0x738] sm:$0xf]  ;;  %v10504_v1 = vld [vmem:[%s15853_s10 + $0xc90] sm:$0xf0]  ;;  %v10385_v47 = vld [vmem:[%s15853_s10 + $0x8d8] sm:$0xf0] }
 0x2fa   :  { %v2830_v62 = vadd.f32 %v2829_v53, %v2828_v35  ;;  %10578 = vrsqrt.f32 %v13208_v48  ;;  %v9585_v59 = vor.u32 %v10504_v1, %v9584_v63  ;;  %v10441_v12 = vld [vmem:[%s15853_s10 + $0xa98] sm:$0xf0]  ;;  %v9556_v17 = vld [vmem:[%s15853_s10 + $0xc40] sm:$0xf]  ;;  %vm2988_vm12 = vweird.f32 %v13208_v48  ;;  %v10319_v63 = vld [vmem:[%s15853_s10 + $0x6cc] sm:$0xf] }
 0x2fb   :  { %6020 = vmatpush.bf16.msra.mxu1 %v9753_v27  ;;  %5982 = vmatpush.bf16.msrb.mxu2 %v9053_v51  ;;  %v9417_v27 = vor.u32 %v10462_v25, %v9416_v19  ;;  %v10343_v51 = vld [vmem:[%s15853_s10 + $0x788] sm:$0xf0]  ;;  %v10497_v9 = vld [vmem:[%s15853_s10 + $0xc58] sm:$0xf0] }
 0x2fc   :  { %v2831_v11 = vrot.slane %v2830_v62, 1  ;;  %5962 = vmatpush.bf16.msrb.mxu0 %v8437_v2  ;;  %5995 = vmatpush.bf16.msrb.mxu3 %v9277_v10  ;;  %v9444_v2 = vld [vmem:[%s15853_s10 + $0xb60] sm:$0xf]  ;;  %v9388_v10 = vld [vmem:[%s15853_s10 + $0xaf0] sm:$0xf] }
 0x2fe   :  { %v2832_v22 = vadd.f32 %v2831_v11, %v2830_v62  ;;  %v9445_v11 = vor.u32 %v10469_v34, %v9444_v2  ;;  %v8884_v2 = vld [vmem:[%s15853_s10 + $0x700] sm:$0xf] }
 0x2ff   :  { %6021 = vmatpush.bf16.msra.mxu1 %v9725_v41  ;;  %5983 = vmatpush.bf16.msrb.mxu2 %v9025_v46  ;;  %v10455_v41 = vld [vmem:[%s15853_s10 + $0xb08] sm:$0xf0] }
 0x300   :  { %v2840_v33 = vmul.f32 %v2832_v22, %v10855_v30  ;;  %6007 = vmatpush.bf16.msra.mxu0 %v9529_v24  ;;  %v10406_v22 = vld [vmem:[%s15853_s10 + $0x980] sm:$0xf0]  ;;  %v13267_v7 = vpop.eup %10578  ;;  %v9389_v46 = vor.u32 %v10455_v41, %v9388_v10 }
 0x301   :  { %v9193_v24 = vor.u32 %v10406_v22, %v9192_v21  ;;  %v9557_v21 = vor.u32 %v10497_v9, %v9556_v17  ;;  %vm2989_vm11 = vweird.f32 %v13267_v7  ;;  %v10200_v17 = vld [vmem:[%s15853_s10 + $0x314] sm:$0xf]  ;;  %v8382_v9 = vld [vmem:[%s15853_s10 + $0x32c] sm:$0xf0] }
 0x302   :  { %v13188_v35 = vsub.f32 %v13067_v18, %v2840_v33  ;;  %v10420_v18 = vld [vmem:[%s15853_s10 + $0x9f0] sm:$0xf0]  ;;  %v8940_v33 = vld [vmem:[%s15853_s10 + $0x770] sm:$0xf]  ;;  %vm2990_vm7 = vmor %vm2988_vm12, %vm2989_vm11 }
 0x303   :  { %v9249_v53 = vor.u32 %v10420_v18, %v9248_v29  ;;  %6022 = vmatpush.bf16.msra.mxu1 %v9697_v61  ;;  %5984 = vmatpush.bf16.msrb.mxu2 %v8997_v0  ;;  %v8941_v38 = vor.u32 %v10343_v51, %v8940_v33  ;;  %v2983_v29 = vmul.f32 %v13267_v7, %v13208_v48 }
 0x304   :  { %v2856_v50 = vmul.f32 %v13188_v35, %v13188_v35  ;;  %6008 = vmatpush.bf16.msra.mxu0 %v9501_v57  ;;  %v9613_v18 = vor.u32 %v10511_v42, %v9612_v45 }
 0x305   :  { %5996 = vmatpush.bf16.msrb.mxu3 %v9249_v53  ;;  %v2984_v55 = vmul.f32 %v13267_v7, %v2983_v29 }
 0x306   :  { %v2899_v62 = vrot.slane %v2856_v50, 4 }
 0x307   :  { %6023 = vmatpush.bf16.msra.mxu1 %v9669_v60  ;;  %5985 = vmatpush.bf16.msrb.mxu2 %v8969_v44  ;;  %v2985_v44 = vmul.f32 0.5, %v2984_v55 }
 0x308   :  { %v2900_v3 = vadd.f32 %v2899_v62, %v2856_v50  ;;  %6009 = vmatpush.bf16.msra.mxu0 %v9473_v54  ;;  %v10336_v50 = vld [vmem:[%s15853_s10 + $0x750] sm:$0xf0]  ;;  %v9136_v54 = vld [vmem:[%s15853_s10 + $0x8f8] sm:$0xf] }
 0x309   :  { %5997 = vmatpush.bf16.msrb.mxu3 %v9221_v8  ;;  %v8913_v53 = vor.u32 %v10336_v50, %v8912_v15  ;;  %v9137_v61 = vor.u32 %v10392_v52, %v9136_v54  ;;  %v10448_v62 = vld [vmem:[%s15853_s10 + $0xad0] sm:$0xf0]  ;;  %v9108_v8 = vld [vmem:[%s15853_s10 + $0x8c0] sm:$0xf]  ;;  %v10151_v54 = vld [vmem:[%s15853_s10 + $0x18c] sm:$0xf] }
 0x30a   :  { %v2901_v14 = vrot.slane %v2900_v3, 2 }
 0x30b   :  { %6024 = vmatpush.bf16.msra.mxu1 %v9641_v32  ;;  %5986 = vmatpush.bf16.msrb.mxu2 %v8941_v38  ;;  %v2913_v38 = vld [vmem:[%s15851_s8] sm:$0xff] }
 0x30c   :  { %v2902_v23 = vadd.f32 %v2901_v14, %v2900_v3  ;;  %6010 = vmatpush.bf16.msra.mxu0 %v9445_v11  ;;  %v10329_v3 = vld [vmem:[%s15853_s10 + $0x718] sm:$0xf0]  ;;  %v9332_v11 = vld [vmem:[%s15853_s10 + $0xa80] sm:$0xf]  ;;  %v9109_v14 = vor.u32 %v10385_v47, %v9108_v8 }
 0x30d   :  { %5998 = vmatpush.bf16.msrb.mxu3 %v9193_v24  ;;  %v8885_v34 = vor.u32 %v10329_v3, %v8884_v2  ;;  %v9333_v60 = vor.u32 %v10441_v12, %v9332_v11 }
 0x30e   :  { %v2903_v28 = vrot.slane %v2902_v23, 1 }
 0x30f   :  { %6025 = vmatpush.bf16.msra.mxu1 %v9613_v18  ;;  %5987 = vmatpush.bf16.msrb.mxu2 %v8913_v53 }
 0x310   :  { %v2904_v57 = vadd.f32 %v2903_v28, %v2902_v23  ;;  %6011 = vmatpush.bf16.msra.mxu0 %v9417_v27  ;;  %v2986_v23 = vsub.f32 1.5, %v2985_v44 }
 0x311   :  { %5999 = vmatpush.bf16.msrb.mxu3 %v9165_v40 }
 0x312   :  { %v2912_v4 = vmul.f32 %v2904_v57, %v10855_v30  ;;  %v9360_v30 = vld [vmem:[%s15853_s10 + $0xab8] sm:$0xf]  ;;  %v2987_v25 = vmul.f32 %v13267_v7, %v2986_v23  ;;  %v10256_v23 = vld [vmem:[%s15853_s10 + $0x4d4] sm:$0xf] }
 0x313   :  { %v9361_v0 = vor.u32 %v10448_v62, %v9360_v30  ;;  %6026 = vmatpush.bf16.msra.mxu1 %v9585_v59  ;;  %5988 = vmatpush.bf16.msrb.mxu2 %v8885_v34  ;;  %v8858_v59 = vld [vmem:[%s15853_s10 + $0x6e4] sm:$0xf0]  ;;  %v10144_v34 = vld [vmem:[%s15853_s10 + $0x154] sm:$0xf] }
 0x314   :  { %v2921_v58 = vadd.f32 1e-05, %v2912_v4  ;;  %6012 = vmatpush.bf16.msra.mxu0 %v9389_v46  ;;  %v2991_v43 = vsel %vm2990_vm7, %v13267_v7, %v2987_v25  ;;  %v13356_v7 = vld [vmem:[%s15852_s9] sm:$0xff]  ;;  %v10312_v25 = vld [vmem:[%s15853_s10 + $0x694] sm:$0xf] }
 0x315   :  { %6000 = vmatpush.bf16.msrb.mxu3 %v9137_v61  ;;  %v3015_v33 = vrot.slane %v2991_v43, 2  ;;  %v3057_v57 = vperm.slane %v13356_v7, 0  ;;  %v3058_v40 = vperm.slane %v13356_v7, 1  ;;  %v3060_v46 = vperm.slane %v13356_v7, 3  ;;  %v10137_v43 = vld [vmem:[%s15853_s10 + $0x11c] sm:$0xf] }
 0x316   :  { %10580 = vrsqrt.f32 %v2921_v58  ;;  %vm2998_vm14 = vweird.f32 %v2921_v58 }
 0x317   :  { %6027 = vmatpush.bf16.msra.mxu1 %v9557_v21 }
 0x318   :  { %6013 = vmatpush.bf16.msra.mxu0 %v9361_v0 }
 0x319   :  { %6001 = vmatpush.bf16.msrb.mxu3 %v9109_v14 }
 0x31c   :  { %v10581_v22 = vpop.eup %10580  ;;  %6014 = vmatpush.bf16.msra.mxu0 %v9333_v60  ;;  %v8158_v60 = vld [vmem:[%s15853_s10 + $0x16c] sm:$0xf0] }
 0x31d   :  { %v2993_v24 = vmul.f32 %v10581_v22, %v2921_v58  ;;  %vm2999_vm13 = vweird.f32 %v10581_v22 }
 0x31e   :  { %vm3000_vm15 = vmor %vm2998_vm14, %vm2999_vm13 }
 0x31f   :  { %v2994_v19 = vmul.f32 %v10581_v22, %v2993_v24  ;;  %v8606_v24 = vld [vmem:[%s15853_s10 + $0x4ec] sm:$0xf0] }
 0x321   :  { %v2995_v26 = vmul.f32 0.5, %v2994_v19 }
 0x323   :  { %v2996_v27 = vsub.f32 1.5, %v2995_v26  ;;  %v8830_v26 = vld [vmem:[%s15853_s10 + $0x6ac] sm:$0xf0] }
 0x325   :  { %v2997_v28 = vmul.f32 %v10581_v22, %v2996_v27  ;;  %v3064_v27 = vperm.slane %v13356_v7, 7 }
 0x327   :  { %v3001_v32 = vsel %vm3000_vm15, %v10581_v22, %v2997_v28  ;;  %v8861_v22 = vor.u32 %v10319_v63, %v8858_v59  ;;  %v3061_v28 = vperm.slane %v13356_v7, 4  ;;  %v10179_v63 = vld [vmem:[%s15853_s10 + $0x26c] sm:$0xf] }
 0x328   :  { %v3016_v51 = vrot.slane %v3001_v32, 1  ;;  %v3062_v32 = vperm.slane %v13356_v7, 5 }
 0x32a   :  { %v3023_v37 = vsel %vm3022_vm0, %v3015_v33, %v3016_v51  ;;  %v8161_v33 = vor.u32 %v10144_v34, %v8158_v60  ;;  %v8385_v51 = vor.u32 %v10200_v17, %v8382_v9  ;;  %v10291_v34 = vld [vmem:[%s15853_s10 + $0x5ec] sm:$0xf] }
 0x32b   :  { %v3025_v48 = vsel %vm3024_vm1, %v13050_v6, %v3023_v37  ;;  %v3059_v6 = vperm.slane %v13356_v7, 2  ;;  %v8130_v37 = vld [vmem:[%s15853_s10 + $0x134] sm:$0xf0] }
 0x32c   :  { %v3027_v39 = vsel %vm3026_vm2, %v12884_v36, %v3025_v48  ;;  %v10193_v48 = vld [vmem:[%s15853_s10 + $0x2dc] sm:$0xf] }
 0x32d   :  { %v13359_v10 = vmul.f32 %v3027_v39, %v2913_v38  ;;  %v8609_v38 = vor.u32 %v10256_v23, %v8606_v24  ;;  %v8354_v39 = vld [vmem:[%s15853_s10 + $0x2f4] sm:$0xf0]  ;;  %v10116_v23 = vld [vmem:[%s15853_s10 + $0x74] sm:$0xf]  ;;  %v8046_v24 = vld [vmem:[%s15853_s10 + $0x8c] sm:$0xf0] }
 0x32f   :  { %v3031_v41 = vperm.slane %v13359_v10, 0  ;;  %v3032_v45 = vperm.slane %v13359_v10, 1  ;;  %v3033_v42 = vperm.slane %v13359_v10, 2  ;;  %v3034_v29 = vperm.slane %v13359_v10, 3 }
 0x330   :  { %v3035_v36 = vperm.slane %v13359_v10, 4  ;;  %v3036_v18 = vperm.slane %v13359_v10, 5  ;;  %v3038_v44 = vperm.slane %v13359_v10, 7  ;;  %v3037_v19 = vperm.slane %v13359_v10, 6 }
 0x331   :  { %v3047_v4 = vmul.f32 %v3031_v41, %v12688_v5  ;;  %v3048_v15 = vmul.f32 %v3032_v45, %v12798_v20  ;;  %v3049_v50 = vmul.f32 %v3033_v42, %v12860_v13  ;;  %v3050_v53 = vmul.f32 %v3034_v29, %v12871_v49  ;;  %v8186_v5 = vld [vmem:[%s15853_s10 + $0x1a4] sm:$0xf0]  ;;  %v10207_v20 = vld [vmem:[%s15853_s10 + $0x34c] sm:$0xf]  ;;  %v8578_v41 = vld [vmem:[%s15853_s10 + $0x4b4] sm:$0xf0] }
 0x332   :  { %v13379_v52 = vmul.f32 %v3035_v36, %v12877_v31  ;;  %v13382_v30 = vmul.f32 %v3036_v18, %v12890_v56  ;;  %v8410_v13 = vld [vmem:[%s15853_s10 + $0x364] sm:$0xf0]  ;;  %v10263_v31 = vld [vmem:[%s15853_s10 + $0x50c] sm:$0xf]  ;;  %v8189_v3 = vor.u32 %v10151_v54, %v8186_v5  ;;  %v3054_v10 = vmul.f32 %v3038_v44, %v13188_v35  ;;  %v8802_v35 = vld [vmem:[%s15853_s10 + $0x674] sm:$0xf0] }
 0x333   :  { %v3073_v58 = vadd.f32 %v3057_v57, %v3047_v4  ;;  %v3074_v61 = vadd.f32 %v3058_v40, %v3048_v15  ;;  %v3075_v62 = vadd.f32 %v3059_v6, %v3049_v50  ;;  %v3076_v49 = vadd.f32 %v3060_v46, %v3050_v53  ;;  %v8634_v56 = vld [vmem:[%s15853_s10 + $0x524] sm:$0xf0]  ;;  %v10249_v40 = vld [vmem:[%s15853_s10 + $0x49c] sm:$0xf]  ;;  %v10130_v18 = vld [vmem:[%s15853_s10 + $0xe4] sm:$0xf] }
 0x334   :  { %v8413_v8 = vor.u32 %v10207_v20, %v8410_v13  ;;  %v8637_v14 = vor.u32 %v10263_v31, %v8634_v56  ;;  %v8833_v57 = vor.u32 %v10312_v25, %v8830_v26  ;;  %v3053_v45 = vmul.f32 %v3037_v19, %v12959_v16  ;;  %v10305_v6 = vld [vmem:[%s15853_s10 + $0x65c] sm:$0xf]  ;;  %v8102_v16 = vld [vmem:[%s15853_s10 + $0xfc] sm:$0xf0]  ;;  %v10186_v53 = vld [vmem:[%s15853_s10 + $0x2a4] sm:$0xf] }
 0x335   :  { %v3081_v55 = vmax.f32 %v3073_v58, 0.0  ;;  %v3082_v0 = vmax.f32 %v3074_v61, 0.0  ;;  %v3083_v1 = vmax.f32 %v3075_v62, 0.0  ;;  %v3084_v2 = vmax.f32 %v3076_v49, 0.0  ;;  %v8326_v54 = vld [vmem:[%s15853_s10 + $0x2bc] sm:$0xf0] }
 0x336   :  { %v3063_v42 = vperm.slane %v13356_v7, 6  ;;  %v8133_v29 = vor.u32 %v10137_v43, %v8130_v37  ;;  %v8357_v46 = vor.u32 %v10193_v48, %v8354_v39  ;;  %v8581_v36 = vor.u32 %v10249_v40, %v8578_v41  ;;  %v10242_v58 = vld [vmem:[%s15853_s10 + $0x464] sm:$0xf]  ;;  %v8774_v62 = vld [vmem:[%s15853_s10 + $0x63c] sm:$0xf0] }
 0x337   :  { %v13408_v47 = vpack.c.bf16 %v3081_v55, %v3081_v55  ;;  %v13410_v11 = vpack.c.bf16 %v3082_v0, %v3082_v0  ;;  %v13412_v12 = vpack.c.bf16 %v3083_v1, %v3083_v1  ;;  %v13424_v21 = vpack.c.bf16 %v3084_v2, %v3084_v2  ;;  %v10123_v5 = vld [vmem:[%s15853_s10 + $0xac] sm:$0xf]  ;;  %v8074_v20 = vld [vmem:[%s15853_s10 + $0xc4] sm:$0xf0]  ;;  %v8270_v43 = vld [vmem:[%s15853_s10 + $0x24c] sm:$0xf0] }
 0x338   :  { %v3077_v7 = vadd.f32 %v3061_v28, %v13379_v52  ;;  %v3078_v4 = vadd.f32 %v3062_v32, %v13382_v30  ;;  %v3080_v15 = vadd.f32 %v3064_v27, %v3054_v10  ;;  %v8805_v50 = vor.u32 %v10305_v6, %v8802_v35  ;;  %v8550_v52 = vld [vmem:[%s15853_s10 + $0x47c] sm:$0xf0]  ;;  %v10298_v30 = vld [vmem:[%s15853_s10 + $0x624] sm:$0xf]  ;;  %v8298_v55 = vld [vmem:[%s15853_s10 + $0x284] sm:$0xf0] }
 0x339   :  { %5937 = vmatmul.bf16.vlgmr.msra.gmra.mxu2 %v13408_v47  ;;  %5950 = vmatmul.bf16.vlgmr.msra.gmra.mxu3 %v13410_v11  ;;  %v3079_v61 = vadd.f32 %v3063_v42, %v3053_v45  ;;  %v8105_v13 = vor.u32 %v10130_v18, %v8102_v16  ;;  %v8329_v49 = vor.u32 %v10186_v53, %v8326_v54  ;;  %v10172_v27 = vld [vmem:[%s15853_s10 + $0x234] sm:$0xf]  ;;  %v8494_v32 = vld [vmem:[%s15853_s10 + $0x40c] sm:$0xf0]  ;;  %v10109_v48 = vld [vmem:[%s15853_s10 + $0x3c] sm:$0xf] }
 0x33a   :  { %5963 = vmatmul.bf16.vlgmr.msrb.gmra.mxu0 %v13412_v12  ;;  %5976 = vmatmul.bf16.vlgmr.msrb.gmra.mxu1 %v13424_v21  ;;  %v3085_v31 = vmax.f32 %v3077_v7, 0.0  ;;  %v3086_v56 = vmax.f32 %v3078_v4, 0.0  ;;  %v3088_v0 = vmax.f32 %v3080_v15, 0.0  ;;  %v8553_v1 = vor.u32 %v10242_v58, %v8550_v52  ;;  %v10228_v28 = vld [vmem:[%s15853_s10 + $0x3f4] sm:$0xf] }
 0x33b   :  { %6033 = vmatpush.bf16.msra.mxu2 %v8189_v3  ;;  %6046 = vmatpush.bf16.msra.mxu3 %v8413_v8  ;;  %v8777_v59 = vor.u32 %v10298_v30, %v8774_v62  ;;  %v3087_v2 = vmax.f32 %v3079_v61, 0.0  ;;  %v10235_v3 = vld [vmem:[%s15853_s10 + $0x42c] sm:$0xf]  ;;  %v8522_v8 = vld [vmem:[%s15853_s10 + $0x444] sm:$0xf0]  ;;  %v8077_v60 = vor.u32 %v10123_v5, %v8074_v20  ;;  %v8301_v17 = vor.u32 %v10179_v63, %v8298_v55 }
 0x33c   :  { %6059 = vmatpush.bf16.msrb.mxu0 %v8637_v14  ;;  %6072 = vmatpush.bf16.msrb.mxu1 %v8861_v22  ;;  %v8746_v14 = vld [vmem:[%s15853_s10 + $0x604] sm:$0xf0]  ;;  %v13523_v9 = vpack.c.bf16 %v3085_v31, %v3085_v31  ;;  %v13525_v44 = vpack.c.bf16 %v3086_v56, %v3086_v56  ;;  %v8525_v22 = vor.u32 %v10235_v3, %v8522_v8  ;;  %v8018_v39 = vld [vmem:[%s15853_s10 + $0x54] sm:$0xf0]  ;;  %v10165_v40 = vld [vmem:[%s15853_s10 + $0x1fc] sm:$0xf] }
 0x33d   :  { %v13533_v19 = vpack.c.bf16 %v3088_v0, %v3088_v0  ;;  %v13535_v25 = vpack.c.bf16 %v3087_v2, %v3087_v2  ;;  %v8749_v26 = vor.u32 %v10291_v34, %v8746_v14  ;;  %v8273_v37 = vor.u32 %v10172_v27, %v8270_v43  ;;  %v8242_v41 = vld [vmem:[%s15853_s10 + $0x214] sm:$0xf0]  ;;  %v10221_v45 = vld [vmem:[%s15853_s10 + $0x3bc] sm:$0xf]  ;;  %v7990_v18 = vld [vmem:[%s15853_s10 + $0x1c] sm:$0xf0] }
 0x33e   :  { %v8497_v10 = vor.u32 %v10228_v28, %v8494_v32  ;;  %v8466_v42 = vld [vmem:[%s15853_s10 + $0x3d4] sm:$0xf0]  ;;  %v10277_v6 = vld [vmem:[%s15853_s10 + $0x57c] sm:$0xf]  ;;  %v10158_v16 = vld [vmem:[%s15853_s10 + $0x1c4] sm:$0xf] }
 0x33f   :  { %6034 = vmatpush.bf16.msra.mxu2 %v8161_v33  ;;  %6047 = vmatpush.bf16.msra.mxu3 %v8385_v51  ;;  %v10284_v33 = vld [vmem:[%s15853_s10 + $0x5b4] sm:$0xf]  ;;  %v8718_v51 = vld [vmem:[%s15853_s10 + $0x5cc] sm:$0xf0]  ;;  %v8690_v35 = vld [vmem:[%s15853_s10 + $0x594] sm:$0xf0]  ;;  %v8469_v4 = vor.u32 %v10221_v45, %v8466_v42 }
 0x340   :  { %6060 = vmatpush.bf16.msrb.mxu0 %v8609_v38  ;;  %6073 = vmatpush.bf16.msrb.mxu1 %v8833_v57  ;;  %v8049_v38 = vor.u32 %v10116_v23, %v8046_v24  ;;  %v8721_v57 = vor.u32 %v10284_v33, %v8718_v51  ;;  %v8214_v7 = vld [vmem:[%s15853_s10 + $0x1dc] sm:$0xf0]  ;;  %v8693_v15 = vor.u32 %v10277_v6, %v8690_v35  ;;  %v10270_v54 = vld [vmem:[%s15853_s10 + $0x544] sm:$0xf]  ;;  %v10375_v61 = vld [vmem:[%s15853_s10 + $0x88c] sm:$0xf] }
 0x341   :  { %v8438_v53 = vld [vmem:[%s15853_s10 + $0x39c] sm:$0xf0]  ;;  %v9082_v52 = vld [vmem:[%s15853_s10 + $0x8a4] sm:$0xf0]  ;;  %v10431_v30 = vld [vmem:[%s15853_s10 + $0xa4c] sm:$0xf] }
 0x342   :  { %v8662_v58 = vld [vmem:[%s15853_s10 + $0x55c] sm:$0xf0]  ;;  %v9306_v62 = vld [vmem:[%s15853_s10 + $0xa64] sm:$0xf0]  ;;  %v10487_v5 = vld [vmem:[%s15853_s10 + $0xc0c] sm:$0xf]  ;;  %v9085_v0 = vor.u32 %v10375_v61, %v9082_v52 }
 0x343   :  { %6035 = vmatpush.bf16.msra.mxu2 %v8133_v29  ;;  %6048 = vmatpush.bf16.msra.mxu3 %v8357_v46  ;;  %v10102_v29 = vld [vmem:[%s15853_s10 + $0x4] sm:$0xf]  ;;  %v8021_v46 = vor.u32 %v10109_v48, %v8018_v39  ;;  %v10543_v31 = vld [vmem:[%s15853_s10 + $0xdcc] sm:$0xf]  ;;  %v9754_v56 = vld [vmem:[%s15853_s10 + $0xde4] sm:$0xf0]  ;;  %v8665_v55 = vor.u32 %v10270_v54, %v8662_v58 }
 0x344   :  { %6061 = vmatpush.bf16.msrb.mxu0 %v8581_v36  ;;  %6074 = vmatpush.bf16.msrb.mxu1 %v8805_v50  ;;  %v8245_v36 = vor.u32 %v10165_v40, %v8242_v41  ;;  %v10214_v50 = vld [vmem:[%s15853_s10 + $0x384] sm:$0xf]  ;;  %v7993_v20 = vor.u32 %v10102_v29, %v7990_v18  ;;  %v9054_v2 = vld [vmem:[%s15853_s10 + $0x86c] sm:$0xf0]  ;;  %v9757_v8 = vor.u32 %v10543_v31, %v9754_v56  ;;  %v10424_v34 = vld [vmem:[%s15853_s10 + $0xa14] sm:$0xf] }
 0x345   :  { %v8441_v63 = vor.u32 %v10214_v50, %v8438_v53  ;;  %v9278_v14 = vld [vmem:[%s15853_s10 + $0xa2c] sm:$0xf0]  ;;  %v10361_v27 = vld [vmem:[%s15853_s10 + $0x81c] sm:$0xf]  ;;  %v9026_v43 = vld [vmem:[%s15853_s10 + $0x834] sm:$0xf0] }
 0x346   :  { %v9726_v23 = vld [vmem:[%s15853_s10 + $0xdac] sm:$0xf0]  ;;  %v10417_v33 = vld [vmem:[%s15853_s10 + $0x9dc] sm:$0xf]  ;;  %v9250_v51 = vld [vmem:[%s15853_s10 + $0x9f4] sm:$0xf0] }
 0x347   :  { %6036 = vmatpush.bf16.msra.mxu2 %v8105_v13  ;;  %6049 = vmatpush.bf16.msra.mxu3 %v8329_v49  ;;  %v8217_v13 = vor.u32 %v10158_v16, %v8214_v7  ;;  %v9530_v49 = vld [vmem:[%s15853_s10 + $0xc24] sm:$0xf0]  ;;  %v10529_v48 = vld [vmem:[%s15853_s10 + $0xd5c] sm:$0xf]  ;;  %v9698_v39 = vld [vmem:[%s15853_s10 + $0xd74] sm:$0xf0] }
 0x348   :  { %6062 = vmatpush.bf16.msrb.mxu0 %v8553_v1  ;;  %6075 = vmatpush.bf16.msrb.mxu1 %v8777_v59  ;;  %v9309_v1 = vor.u32 %v10431_v30, %v9306_v62  ;;  %v10368_v59 = vld [vmem:[%s15853_s10 + $0x854] sm:$0xf]  ;;  %v9533_v3 = vor.u32 %v10487_v5, %v9530_v49  ;;  %v10354_v40 = vld [vmem:[%s15853_s10 + $0x7e4] sm:$0xf]  ;;  %v8998_v41 = vld [vmem:[%s15853_s10 + $0x7fc] sm:$0xf0]  ;;  %v9701_v42 = vor.u32 %v10529_v48, %v9698_v39 }
 0x349   :  { %5989 = vmatmul.bf16.vlgmr.msrb.gmra.mxu2 %v13523_v9  ;;  %6002 = vmatmul.bf16.vlgmr.msrb.gmra.mxu3 %v13525_v44  ;;  %v9057_v24 = vor.u32 %v10368_v59, %v9054_v2  ;;  %v10410_v6 = vld [vmem:[%s15853_s10 + $0x9a4] sm:$0xf]  ;;  %v9222_v35 = vld [vmem:[%s15853_s10 + $0x9bc] sm:$0xf0]  ;;  %v9001_v16 = vor.u32 %v10354_v40, %v8998_v41  ;;  %v10403_v54 = vld [vmem:[%s15853_s10 + $0x96c] sm:$0xf] }
 0x34a   :  { %6015 = vmatmul.bf16.vlgmr.msra.gmra.mxu0 %v13535_v25  ;;  %6028 = vmatmul.bf16.vlgmr.msra.gmra.mxu1 %v13533_v19  ;;  %v10466_v29 = vld [vmem:[%s15853_s10 + $0xb64] sm:$0xf]  ;;  %v9670_v18 = vld [vmem:[%s15853_s10 + $0xd3c] sm:$0xf0]  ;;  %v9225_v7 = vor.u32 %v10410_v6, %v9222_v35  ;;  %v9194_v58 = vld [vmem:[%s15853_s10 + $0x984] sm:$0xf0] }
 0x34b   :  { %6037 = vmatpush.bf16.msra.mxu2 %v8077_v60  ;;  %6050 = vmatpush.bf16.msra.mxu3 %v8301_v17  ;;  %v10480_v60 = vld [vmem:[%s15853_s10 + $0xbd4] sm:$0xf]  ;;  %v9502_v17 = vld [vmem:[%s15853_s10 + $0xbec] sm:$0xf0]  ;;  %v10459_v61 = vld [vmem:[%s15853_s10 + $0xb2c] sm:$0xf] }
 0x34c   :  { %6063 = vmatpush.bf16.msrb.mxu0 %v8525_v22  ;;  %6076 = vmatpush.bf16.msrb.mxu1 %v8749_v26  ;;  %v10536_v22 = vld [vmem:[%s15853_s10 + $0xd94] sm:$0xf]  ;;  %v9281_v26 = vor.u32 %v10424_v34, %v9278_v14  ;;  %v9505_v28 = vor.u32 %v10480_v60, %v9502_v17  ;;  %v9418_v52 = vld [vmem:[%s15853_s10 + $0xb44] sm:$0xf0]  ;;  %v10515_v30 = vld [vmem:[%s15853_s10 + $0xcec] sm:$0xf] }
 0x34d   :  { %v9729_v32 = vor.u32 %v10536_v22, %v9726_v23  ;;  %v9642_v62 = vld [vmem:[%s15853_s10 + $0xd04] sm:$0xf0]  ;;  %v8942_v49 = vld [vmem:[%s15853_s10 + $0x78c] sm:$0xf0]  ;;  %v9421_v31 = vor.u32 %v10459_v61, %v9418_v52  ;;  %v10508_v59 = vld [vmem:[%s15853_s10 + $0xcb4] sm:$0xf] }
 0x34e   :  { %v9645_v56 = vor.u32 %v10515_v30, %v9642_v62  ;;  %v9614_v2 = vld [vmem:[%s15853_s10 + $0xccc] sm:$0xf0]  ;;  %v10333_v34 = vld [vmem:[%s15853_s10 + $0x73c] sm:$0xf]  ;;  %v8914_v14 = vld [vmem:[%s15853_s10 + $0x754] sm:$0xf0] }
 0x34f   :  { %6038 = vmatpush.bf16.msra.mxu2 %v8049_v38  ;;  %6051 = vmatpush.bf16.msra.mxu3 %v8273_v37  ;;  %v10473_v38 = vld [vmem:[%s15853_s10 + $0xb9c] sm:$0xf]  ;;  %v9474_v37 = vld [vmem:[%s15853_s10 + $0xbb4] sm:$0xf0]  ;;  %v9617_v17 = vor.u32 %v10508_v59, %v9614_v2  ;;  %v10494_v40 = vld [vmem:[%s15853_s10 + $0xc44] sm:$0xf] }
 0x350   :  { %6064 = vmatpush.bf16.msrb.mxu0 %v8497_v10  ;;  %6077 = vmatpush.bf16.msrb.mxu1 %v8721_v57  ;;  %v9029_v10 = vor.u32 %v10361_v27, %v9026_v43  ;;  %v9253_v57 = vor.u32 %v10417_v33, %v9250_v51  ;;  %v9477_v45 = vor.u32 %v10473_v38, %v9474_v37  ;;  %v10389_v22 = vld [vmem:[%s15853_s10 + $0x8fc] sm:$0xf]  ;;  %v9138_v23 = vld [vmem:[%s15853_s10 + $0x914] sm:$0xf0]  ;;  %v8886_v51 = vld [vmem:[%s15853_s10 + $0x71c] sm:$0xf0] }
 0x351   :  { %v10501_v27 = vld [vmem:[%s15853_s10 + $0xc7c] sm:$0xf]  ;;  %v9586_v43 = vld [vmem:[%s15853_s10 + $0xc94] sm:$0xf0]  ;;  %v9141_v33 = vor.u32 %v10389_v22, %v9138_v23  ;;  %v10382_v38 = vld [vmem:[%s15853_s10 + $0x8c4] sm:$0xf] }
 0x352   :  { %v9110_v37 = vld [vmem:[%s15853_s10 + $0x8dc] sm:$0xf0]  ;;  %v9589_v39 = vor.u32 %v10501_v27, %v9586_v43  ;;  %v8416_v6 = vld [vmem:[%s15853_s10 + $0x350] sm:$0xf]  ;;  %v10211_v35 = vld [vmem:[%s15853_s10 + $0x368] sm:$0xf0] }
 0x353   :  { %6039 = vmatpush.bf16.msra.mxu2 %v8021_v46  ;;  %6052 = vmatpush.bf16.msra.mxu3 %v8245_v36  ;;  %v9446_v46 = vld [vmem:[%s15853_s10 + $0xb7c] sm:$0xf0]  ;;  %v10522_v36 = vld [vmem:[%s15853_s10 + $0xd24] sm:$0xf]  ;;  %v8388_v30 = vld [vmem:[%s15853_s10 + $0x318] sm:$0xf] }
 0x354   :  { %6065 = vmatpush.bf16.msrb.mxu0 %v8469_v4  ;;  %6078 = vmatpush.bf16.msrb.mxu1 %v8693_v15  ;;  %v10347_v4 = vld [vmem:[%s15853_s10 + $0x7ac] sm:$0xf]  ;;  %v8970_v15 = vld [vmem:[%s15853_s10 + $0x7c4] sm:$0xf0]  ;;  %v9449_v50 = vor.u32 %v10466_v29, %v9446_v46  ;;  %v9673_v53 = vor.u32 %v10522_v36, %v9670_v18  ;;  %v9558_v41 = vld [vmem:[%s15853_s10 + $0xc5c] sm:$0xf0]  ;;  %v9113_v36 = vor.u32 %v10382_v38, %v9110_v37 }
 0x355   :  { %v8973_v5 = vor.u32 %v10347_v4, %v8970_v15  ;;  %v8640_v29 = vld [vmem:[%s15853_s10 + $0x510] sm:$0xf]  ;;  %v10267_v18 = vld [vmem:[%s15853_s10 + $0x528] sm:$0xf0]  ;;  %v9561_v15 = vor.u32 %v10494_v40, %v9558_v41  ;;  %v10204_v62 = vld [vmem:[%s15853_s10 + $0x330] sm:$0xf0] }
 0x356   :  { %v8641_v61 = vor.u32 %v10267_v18, %v8640_v29  ;;  %v8360_v59 = vld [vmem:[%s15853_s10 + $0x2e0] sm:$0xf]  ;;  %v10197_v2 = vld [vmem:[%s15853_s10 + $0x2f8] sm:$0xf0]  ;;  %v8108_v22 = vld [vmem:[%s15853_s10 + $0xe8] sm:$0xf] }
 0x357   :  { %6040 = vmatpush.bf16.msra.mxu2 %v7993_v20  ;;  %6053 = vmatpush.bf16.msra.mxu3 %v8217_v13  ;;  %v9197_v20 = vor.u32 %v10403_v54, %v9194_v58  ;;  %v10340_v13 = vld [vmem:[%s15853_s10 + $0x774] sm:$0xf]  ;;  %v8164_v54 = vld [vmem:[%s15853_s10 + $0x158] sm:$0xf]  ;;  %v10134_v23 = vld [vmem:[%s15853_s10 + $0x100] sm:$0xf0] }
 0x358   :  { %6066 = vmatpush.bf16.msrb.mxu0 %v8441_v63  ;;  %6079 = vmatpush.bf16.msrb.mxu1 %v8665_v55  ;;  %v10396_v63 = vld [vmem:[%s15853_s10 + $0x934] sm:$0xf]  ;;  %v9166_v55 = vld [vmem:[%s15853_s10 + $0x94c] sm:$0xf0]  ;;  %v8332_v27 = vld [vmem:[%s15853_s10 + $0x2a8] sm:$0xf]  ;;  %v8109_v38 = vor.u32 %v10134_v23, %v8108_v22 }
 0x359   :  { %v10148_v58 = vld [vmem:[%s15853_s10 + $0x170] sm:$0xf0]  ;;  %v10190_v43 = vld [vmem:[%s15853_s10 + $0x2c0] sm:$0xf0]  ;;  %v8304_v40 = vld [vmem:[%s15853_s10 + $0x270] sm:$0xf] }
 0x35a   :  { %6041 = vmatmul.bf16.vlgmr.msra.gmra.mxu2 %v13408_v47  ;;  %6054 = vmatmul.bf16.vlgmr.msra.gmra.mxu3 %v13410_v11  ;;  %v8333_v37 = vor.u32 %v10190_v43, %v8332_v27  ;;  %v10183_v41 = vld [vmem:[%s15853_s10 + $0x288] sm:$0xf0]  ;;  %v10120_v18 = vld [vmem:[%s15853_s10 + $0x90] sm:$0xf0]  ;;  %v8668_v22 = vld [vmem:[%s15853_s10 + $0x548] sm:$0xf] }
 0x35b   :  { %6085 = vmatpush.bf16.msrb.mxu2 %v9085_v0  ;;  %6098 = vmatpush.bf16.msrb.mxu3 %v9309_v1  ;;  %v10452_v0 = vld [vmem:[%s15853_s10 + $0xaf4] sm:$0xf]  ;;  %v9390_v1 = vld [vmem:[%s15853_s10 + $0xb0c] sm:$0xf0]  ;;  %v10274_v23 = vld [vmem:[%s15853_s10 + $0x560] sm:$0xf0] }
 0x35c   :  { %6111 = vmatpush.bf16.msra.mxu0 %v9533_v3  ;;  %6124 = vmatpush.bf16.msra.mxu1 %v9757_v8  ;;  %v8945_v3 = vor.u32 %v10340_v13, %v8942_v49  ;;  %v9169_v8 = vor.u32 %v10396_v63, %v9166_v55  ;;  %v9393_v60 = vor.u32 %v10452_v0, %v9390_v1  ;;  %v8836_v13 = vld [vmem:[%s15853_s10 + $0x698] sm:$0xf]  ;;  %v10316_v49 = vld [vmem:[%s15853_s10 + $0x6b0] sm:$0xf0]  ;;  %v8136_v63 = vld [vmem:[%s15853_s10 + $0x120] sm:$0xf] }
 0x35d   :  { %6067 = vmatmul.bf16.vlgmr.msrb.gmra.mxu0 %v13412_v12  ;;  %6080 = vmatmul.bf16.vlgmr.msrb.gmra.mxu1 %v13424_v21  ;;  %v10141_v55 = vld [vmem:[%s15853_s10 + $0x138] sm:$0xf0]  ;;  %v8837_v1 = vor.u32 %v10316_v49, %v8836_v13  ;;  %v8248_v13 = vld [vmem:[%s15853_s10 + $0x200] sm:$0xf]  ;;  %v9312_v27 = vld [vmem:[%s15853_s10 + $0xa50] sm:$0xf] }
 0x35e   :  { %v10169_v49 = vld [vmem:[%s15853_s10 + $0x218] sm:$0xf0]  ;;  %v10435_v43 = vld [vmem:[%s15853_s10 + $0xa68] sm:$0xf0] }
 0x35f   :  { %6086 = vmatpush.bf16.msrb.mxu2 %v9057_v24  ;;  %6099 = vmatpush.bf16.msrb.mxu3 %v9281_v26  ;;  %v10445_v24 = vld [vmem:[%s15853_s10 + $0xabc] sm:$0xf]  ;;  %v9362_v26 = vld [vmem:[%s15853_s10 + $0xad4] sm:$0xf0] }
 0x360   :  { %6112 = vmatpush.bf16.msra.mxu0 %v9505_v28  ;;  %6125 = vmatpush.bf16.msra.mxu1 %v9729_v32  ;;  %v10326_v28 = vld [vmem:[%s15853_s10 + $0x704] sm:$0xf]  ;;  %v8917_v32 = vor.u32 %v10333_v34, %v8914_v14  ;;  %v9365_v48 = vor.u32 %v10445_v24, %v9362_v26  ;;  %v8808_v34 = vld [vmem:[%s15853_s10 + $0x660] sm:$0xf]  ;;  %v10309_v14 = vld [vmem:[%s15853_s10 + $0x678] sm:$0xf0] }
 0x361   :  { %v8889_v46 = vor.u32 %v10326_v28, %v8886_v51  ;;  %v8809_v26 = vor.u32 %v10309_v14, %v8808_v34  ;;  %v8556_v28 = vld [vmem:[%s15853_s10 + $0x468] sm:$0xf]  ;;  %v10302_v51 = vld [vmem:[%s15853_s10 + $0x640] sm:$0xf0] }
 0x363   :  { %6087 = vmatpush.bf16.msrb.mxu2 %v9029_v10  ;;  %6100 = vmatpush.bf16.msrb.mxu3 %v9253_v57  ;;  %v10438_v10 = vld [vmem:[%s15853_s10 + $0xa84] sm:$0xf]  ;;  %v9334_v57 = vld [vmem:[%s15853_s10 + $0xa9c] sm:$0xf0] }
 0x364   :  { %6113 = vmatpush.bf16.msra.mxu0 %v9477_v45  ;;  %6126 = vmatpush.bf16.msra.mxu1 %v9701_v42  ;;  %v8192_v45 = vld [vmem:[%s15853_s10 + $0x190] sm:$0xf]  ;;  %v10155_v42 = vld [vmem:[%s15853_s10 + $0x1a8] sm:$0xf0]  ;;  %v9337_v4 = vor.u32 %v10438_v10, %v9334_v57 }
 0x367   :  { %6088 = vmatpush.bf16.msrb.mxu2 %v9001_v16  ;;  %6101 = vmatpush.bf16.msrb.mxu3 %v9225_v7  ;;  %v8864_v16 = vld [vmem:[%s15853_s10 + $0x6d0] sm:$0xf]  ;;  %v10323_v7 = vld [vmem:[%s15853_s10 + $0x6e8] sm:$0xf0] }
 0x368   :  { %6114 = vmatpush.bf16.msra.mxu0 %v9449_v50  ;;  %6127 = vmatpush.bf16.msra.mxu1 %v9673_v53  ;;  %v8193_v50 = vor.u32 %v10155_v42, %v8192_v45  ;;  %v8417_v53 = vor.u32 %v10211_v35, %v8416_v6  ;;  %v8865_v52 = vor.u32 %v10323_v7, %v8864_v16  ;;  %v8528_v45 = vld [vmem:[%s15853_s10 + $0x430] sm:$0xf]  ;;  %v10239_v42 = vld [vmem:[%s15853_s10 + $0x448] sm:$0xf0] }
 0x369   :  { %v8752_v6 = vld [vmem:[%s15853_s10 + $0x5f0] sm:$0xf]  ;;  %v10295_v35 = vld [vmem:[%s15853_s10 + $0x608] sm:$0xf0]  ;;  %v8529_v16 = vor.u32 %v10239_v42, %v8528_v45 }
 0x36a   :  { %v8753_v7 = vor.u32 %v10295_v35, %v8752_v6  ;;  %v9284_v6 = vld [vmem:[%s15853_s10 + $0xa18] sm:$0xf]  ;;  %v10428_v35 = vld [vmem:[%s15853_s10 + $0xa30] sm:$0xf0] }
 0x36b   :  { %6089 = vmatpush.bf16.msrb.mxu2 %v8973_v5  ;;  %6102 = vmatpush.bf16.msrb.mxu3 %v9197_v20  ;;  %v8612_v5 = vld [vmem:[%s15853_s10 + $0x4d8] sm:$0xf]  ;;  %v10260_v20 = vld [vmem:[%s15853_s10 + $0x4f0] sm:$0xf0] }
 0x36c   :  { %6115 = vmatpush.bf16.msra.mxu0 %v9421_v31  ;;  %6128 = vmatpush.bf16.msra.mxu1 %v9645_v56  ;;  %v8165_v31 = vor.u32 %v10148_v58, %v8164_v54  ;;  %v8389_v56 = vor.u32 %v10204_v62, %v8388_v30  ;;  %v8613_v0 = vor.u32 %v10260_v20, %v8612_v5  ;;  %v8724_v54 = vld [vmem:[%s15853_s10 + $0x5b8] sm:$0xf]  ;;  %v10288_v58 = vld [vmem:[%s15853_s10 + $0x5d0] sm:$0xf0]  ;;  %v8024_v30 = vld [vmem:[%s15853_s10 + $0x40] sm:$0xf] }
 0x36d   :  { %v10113_v62 = vld [vmem:[%s15853_s10 + $0x58] sm:$0xf0]  ;;  %v8725_v20 = vor.u32 %v10288_v58, %v8724_v54  ;;  %v9256_v54 = vld [vmem:[%s15853_s10 + $0x9e0] sm:$0xf] }
 0x36e   :  { %v10421_v58 = vld [vmem:[%s15853_s10 + $0x9f8] sm:$0xf0] }
 0x36f   :  { %6090 = vmatpush.bf16.msrb.mxu2 %v8945_v3  ;;  %6103 = vmatpush.bf16.msrb.mxu3 %v9169_v8  ;;  %v8584_v3 = vld [vmem:[%s15853_s10 + $0x4a0] sm:$0xf]  ;;  %v10253_v8 = vld [vmem:[%s15853_s10 + $0x4b8] sm:$0xf0] }
 0x370   :  { %6116 = vmatpush.bf16.msra.mxu0 %v9393_v60  ;;  %6129 = vmatpush.bf16.msra.mxu1 %v9617_v17  ;;  %v8137_v60 = vor.u32 %v10141_v55, %v8136_v63  ;;  %v8361_v17 = vor.u32 %v10197_v2, %v8360_v59  ;;  %v8585_v24 = vor.u32 %v10253_v8, %v8584_v3  ;;  %v8696_v63 = vld [vmem:[%s15853_s10 + $0x580] sm:$0xf]  ;;  %v10281_v55 = vld [vmem:[%s15853_s10 + $0x598] sm:$0xf0]  ;;  %v10106_v2 = vld [vmem:[%s15853_s10 + $0x20] sm:$0xf0] }
 0x371   :  { %v8249_v59 = vor.u32 %v10169_v49, %v8248_v13  ;;  %v8220_v3 = vld [vmem:[%s15853_s10 + $0x1c8] sm:$0xf]  ;;  %v10162_v8 = vld [vmem:[%s15853_s10 + $0x1e0] sm:$0xf0]  ;;  %v8697_v14 = vor.u32 %v10281_v55, %v8696_v63 }
 0x372   :  { %v9004_v13 = vld [vmem:[%s15853_s10 + $0x7e8] sm:$0xf]  ;;  %v10358_v49 = vld [vmem:[%s15853_s10 + $0x800] sm:$0xf0] }
 0x373   :  { %6091 = vmatpush.bf16.msrb.mxu2 %v8917_v32  ;;  %6104 = vmatpush.bf16.msrb.mxu3 %v9141_v33  ;;  %v10246_v32 = vld [vmem:[%s15853_s10 + $0x480] sm:$0xf0]  ;;  %v8780_v33 = vld [vmem:[%s15853_s10 + $0x628] sm:$0xf] }
 0x374   :  { %6117 = vmatpush.bf16.msra.mxu0 %v9365_v48  ;;  %6130 = vmatpush.bf16.msra.mxu1 %v9589_v39  ;;  %v8080_v48 = vld [vmem:[%s15853_s10 + $0xb0] sm:$0xf]  ;;  %v10127_v39 = vld [vmem:[%s15853_s10 + $0xc8] sm:$0xf0]  ;;  %v8557_v10 = vor.u32 %v10246_v32, %v8556_v28  ;;  %v8781_v57 = vor.u32 %v10302_v51, %v8780_v33  ;;  %v8221_v33 = vor.u32 %v10162_v8, %v8220_v3  ;;  %v9228_v63 = vld [vmem:[%s15853_s10 + $0x9a8] sm:$0xf] }
 0x375   :  { %v8081_v29 = vor.u32 %v10127_v39, %v8080_v48  ;;  %v9536_v28 = vld [vmem:[%s15853_s10 + $0xc10] sm:$0xf]  ;;  %v10491_v51 = vld [vmem:[%s15853_s10 + $0xc28] sm:$0xf0]  ;;  %v8669_v39 = vor.u32 %v10274_v23, %v8668_v22  ;;  %v10414_v55 = vld [vmem:[%s15853_s10 + $0x9c0] sm:$0xf0]  ;;  %v9005_v3 = vor.u32 %v10358_v49, %v9004_v13 }
 0x376   :  { %v9537_v45 = vor.u32 %v10491_v51, %v9536_v28  ;;  %v9229_v8 = vor.u32 %v10414_v55, %v9228_v63  ;;  %v9200_v22 = vld [vmem:[%s15853_s10 + $0x970] sm:$0xf]  ;;  %v10407_v23 = vld [vmem:[%s15853_s10 + $0x988] sm:$0xf0]  ;;  %v10344_v51 = vld [vmem:[%s15853_s10 + $0x790] sm:$0xf0] }
 0x377   :  { %6092 = vmatpush.bf16.msrb.mxu2 %v8889_v46  ;;  %6105 = vmatpush.bf16.msrb.mxu3 %v9113_v36  ;;  %v8305_v46 = vor.u32 %v10183_v41, %v8304_v40  ;;  %v8052_v36 = vld [vmem:[%s15853_s10 + $0x78] sm:$0xf]  ;;  %v10372_v41 = vld [vmem:[%s15853_s10 + $0x870] sm:$0xf0]  ;;  %v9564_v13 = vld [vmem:[%s15853_s10 + $0xc48] sm:$0xf] }
 0x378   :  { %6118 = vmatpush.bf16.msra.mxu0 %v9337_v4  ;;  %6131 = vmatpush.bf16.msra.mxu1 %v9561_v15  ;;  %v8276_v4 = vld [vmem:[%s15853_s10 + $0x238] sm:$0xf]  ;;  %v10176_v15 = vld [vmem:[%s15853_s10 + $0x250] sm:$0xf0]  ;;  %v10498_v49 = vld [vmem:[%s15853_s10 + $0xc60] sm:$0xf0] }
 0x379   :  { %v9060_v40 = vld [vmem:[%s15853_s10 + $0x858] sm:$0xf]  ;;  %v10208_v63 = vld [vmem:[%s15853_s10 + $0x354] sm:$0xf]  ;;  %v8418_v55 = vld [vmem:[%s15853_s10 + $0x36c] sm:$0xf0] }
 0x37a   :  { %6093 = vmatmul.bf16.vlgmr.msrb.gmra.mxu2 %v13523_v9  ;;  %6106 = vmatmul.bf16.vlgmr.msrb.gmra.mxu3 %v13525_v44 }
 0x37b   :  { %6137 = vmatpush.bf16.msra.mxu2 %v8193_v50  ;;  %6150 = vmatpush.bf16.msra.mxu3 %v8417_v53  ;;  %v8500_v50 = vld [vmem:[%s15853_s10 + $0x3f8] sm:$0xf]  ;;  %v10232_v53 = vld [vmem:[%s15853_s10 + $0x410] sm:$0xf0] }
 0x37c   :  { %6163 = vmatpush.bf16.msrb.mxu0 %v8641_v61  ;;  %6176 = vmatpush.bf16.msrb.mxu1 %v8865_v52  ;;  %v8053_v61 = vor.u32 %v10120_v18, %v8052_v36  ;;  %v8277_v52 = vor.u32 %v10176_v15, %v8276_v4  ;;  %v8501_v5 = vor.u32 %v10232_v53, %v8500_v50  ;;  %v9732_v36 = vld [vmem:[%s15853_s10 + $0xd98] sm:$0xf]  ;;  %v10540_v18 = vld [vmem:[%s15853_s10 + $0xdb0] sm:$0xf0]  ;;  %v9032_v4 = vld [vmem:[%s15853_s10 + $0x820] sm:$0xf] }
 0x37d   :  { %6119 = vmatmul.bf16.vlgmr.msra.gmra.mxu0 %v13535_v25  ;;  %6132 = vmatmul.bf16.vlgmr.msra.gmra.mxu1 %v13533_v19  ;;  %v10365_v15 = vld [vmem:[%s15853_s10 + $0x838] sm:$0xf0]  ;;  %v9733_v53 = vor.u32 %v10540_v18, %v9732_v36  ;;  %v9144_v36 = vld [vmem:[%s15853_s10 + $0x900] sm:$0xf] }
 0x37e   :  { %v10393_v18 = vld [vmem:[%s15853_s10 + $0x918] sm:$0xf0] }
 0x37f   :  { %6138 = vmatpush.bf16.msra.mxu2 %v8165_v31  ;;  %6151 = vmatpush.bf16.msra.mxu3 %v8389_v56  ;;  %v8472_v31 = vld [vmem:[%s15853_s10 + $0x3c0] sm:$0xf]  ;;  %v10225_v56 = vld [vmem:[%s15853_s10 + $0x3d8] sm:$0xf0] }
 0x380   :  { %6164 = vmatpush.bf16.msrb.mxu0 %v8613_v0  ;;  %6177 = vmatpush.bf16.msrb.mxu1 %v8837_v1  ;;  %v7996_v0 = vld [vmem:[%s15853_s10 + $0x8] sm:$0xf]  ;;  %v8025_v1 = vor.u32 %v10113_v62, %v8024_v30  ;;  %v8473_v34 = vor.u32 %v10225_v56, %v8472_v31  ;;  %v9704_v30 = vld [vmem:[%s15853_s10 + $0xd60] sm:$0xf]  ;;  %v10533_v62 = vld [vmem:[%s15853_s10 + $0xd78] sm:$0xf0] }
 0x381   :  { %v7997_v32 = vor.u32 %v10106_v2, %v7996_v0  ;;  %v9705_v56 = vor.u32 %v10533_v62, %v9704_v30  ;;  %v9452_v0 = vld [vmem:[%s15853_s10 + $0xb68] sm:$0xf]  ;;  %v10526_v2 = vld [vmem:[%s15853_s10 + $0xd40] sm:$0xf0] }
 0x383   :  { %6139 = vmatpush.bf16.msra.mxu2 %v8137_v60  ;;  %6152 = vmatpush.bf16.msra.mxu3 %v8361_v17  ;;  %v8444_v60 = vld [vmem:[%s15853_s10 + $0x388] sm:$0xf]  ;;  %v10218_v17 = vld [vmem:[%s15853_s10 + $0x3a0] sm:$0xf0] }
 0x384   :  { %6165 = vmatpush.bf16.msrb.mxu0 %v8585_v24  ;;  %6178 = vmatpush.bf16.msrb.mxu1 %v8809_v26  ;;  %v9088_v24 = vld [vmem:[%s15853_s10 + $0x890] sm:$0xf]  ;;  %v10379_v26 = vld [vmem:[%s15853_s10 + $0x8a8] sm:$0xf0]  ;;  %v8445_v48 = vor.u32 %v10218_v17, %v8444_v60 }
 0x387   :  { %6140 = vmatpush.bf16.msra.mxu2 %v8109_v38  ;;  %6153 = vmatpush.bf16.msra.mxu3 %v8333_v37  ;;  %v9760_v38 = vld [vmem:[%s15853_s10 + $0xdd0] sm:$0xf]  ;;  %v10547_v37 = vld [vmem:[%s15853_s10 + $0xde8] sm:$0xf0] }
 0x388   :  { %6166 = vmatpush.bf16.msrb.mxu0 %v8557_v10  ;;  %6179 = vmatpush.bf16.msrb.mxu1 %v8781_v57  ;;  %v9089_v10 = vor.u32 %v10379_v26, %v9088_v24  ;;  %v9313_v57 = vor.u32 %v10435_v43, %v9312_v27  ;;  %v9761_v42 = vor.u32 %v10547_v37, %v9760_v38  ;;  %v9424_v24 = vld [vmem:[%s15853_s10 + $0xb30] sm:$0xf]  ;;  %v10463_v26 = vld [vmem:[%s15853_s10 + $0xb48] sm:$0xf0] }
 0x389   :  { %v9648_v27 = vld [vmem:[%s15853_s10 + $0xcf0] sm:$0xf]  ;;  %v10519_v43 = vld [vmem:[%s15853_s10 + $0xd08] sm:$0xf0]  ;;  %v9425_v38 = vor.u32 %v10463_v26, %v9424_v24 }
 0x38a   :  { %v9649_v37 = vor.u32 %v10519_v43, %v9648_v27  ;;  %v10201_v27 = vld [vmem:[%s15853_s10 + $0x31c] sm:$0xf]  ;;  %v8390_v43 = vld [vmem:[%s15853_s10 + $0x334] sm:$0xf0] }
 0x38b   :  { %6141 = vmatpush.bf16.msra.mxu2 %v8081_v29  ;;  %6154 = vmatpush.bf16.msra.mxu3 %v8305_v46  ;;  %v9508_v29 = vld [vmem:[%s15853_s10 + $0xbd8] sm:$0xf]  ;;  %v10484_v46 = vld [vmem:[%s15853_s10 + $0xbf0] sm:$0xf0] }
 0x38c   :  { %6167 = vmatpush.bf16.msrb.mxu0 %v8529_v16  ;;  %6180 = vmatpush.bf16.msrb.mxu1 %v8753_v7  ;;  %v9061_v16 = vor.u32 %v10372_v41, %v9060_v40  ;;  %v9285_v7 = vor.u32 %v10428_v35, %v9284_v6  ;;  %v9509_v50 = vor.u32 %v10484_v46, %v9508_v29  ;;  %v9620_v40 = vld [vmem:[%s15853_s10 + $0xcb8] sm:$0xf]  ;;  %v10512_v41 = vld [vmem:[%s15853_s10 + $0xcd0] sm:$0xf0]  ;;  %v8920_v6 = vld [vmem:[%s15853_s10 + $0x740] sm:$0xf] }
 0x38d   :  { %v10337_v35 = vld [vmem:[%s15853_s10 + $0x758] sm:$0xf0]  ;;  %v9621_v46 = vor.u32 %v10512_v41, %v9620_v40  ;;  %v10194_v40 = vld [vmem:[%s15853_s10 + $0x2e4] sm:$0xf]  ;;  %v8362_v41 = vld [vmem:[%s15853_s10 + $0x2fc] sm:$0xf0] }
 0x38f   :  { %6142 = vmatpush.bf16.msra.mxu2 %v8053_v61  ;;  %6155 = vmatpush.bf16.msra.mxu3 %v8277_v52  ;;  %v9480_v61 = vld [vmem:[%s15853_s10 + $0xba0] sm:$0xf]  ;;  %v10477_v52 = vld [vmem:[%s15853_s10 + $0xbb8] sm:$0xf0] }
 0x390   :  { %6168 = vmatpush.bf16.msrb.mxu0 %v8501_v5  ;;  %6181 = vmatpush.bf16.msrb.mxu1 %v8725_v20  ;;  %v9033_v5 = vor.u32 %v10365_v15, %v9032_v4  ;;  %v9257_v20 = vor.u32 %v10421_v58, %v9256_v54  ;;  %v9481_v31 = vor.u32 %v10477_v52, %v9480_v61  ;;  %v9592_v4 = vld [vmem:[%s15853_s10 + $0xc80] sm:$0xf]  ;;  %v10505_v15 = vld [vmem:[%s15853_s10 + $0xc98] sm:$0xf0]  ;;  %v10330_v58 = vld [vmem:[%s15853_s10 + $0x720] sm:$0xf0] }
 0x391   :  { %v9145_v54 = vor.u32 %v10393_v18, %v9144_v36  ;;  %v9116_v61 = vld [vmem:[%s15853_s10 + $0x8c8] sm:$0xf]  ;;  %v10386_v52 = vld [vmem:[%s15853_s10 + $0x8e0] sm:$0xf0]  ;;  %v9593_v62 = vor.u32 %v10505_v15, %v9592_v4  ;;  %v10187_v4 = vld [vmem:[%s15853_s10 + $0x2ac] sm:$0xf] }
 0x393   :  { %6143 = vmatpush.bf16.msra.mxu2 %v8025_v1  ;;  %6156 = vmatpush.bf16.msra.mxu3 %v8249_v59  ;;  %v10470_v1 = vld [vmem:[%s15853_s10 + $0xb80] sm:$0xf0]  ;;  %v9676_v59 = vld [vmem:[%s15853_s10 + $0xd28] sm:$0xf] }
 0x394   :  { %6169 = vmatpush.bf16.msrb.mxu0 %v8473_v34  ;;  %6182 = vmatpush.bf16.msrb.mxu1 %v8697_v14  ;;  %v8976_v34 = vld [vmem:[%s15853_s10 + $0x7b0] sm:$0xf]  ;;  %v10351_v14 = vld [vmem:[%s15853_s10 + $0x7c8] sm:$0xf0]  ;;  %v9453_v60 = vor.u32 %v10470_v1, %v9452_v0  ;;  %v9677_v17 = vor.u32 %v10526_v2, %v9676_v59  ;;  %v10264_v0 = vld [vmem:[%s15853_s10 + $0x514] sm:$0xf]  ;;  %v9117_v59 = vor.u32 %v10386_v52, %v9116_v61 }
 0x395   :  { %v8977_v28 = vor.u32 %v10351_v14, %v8976_v34  ;;  %v8642_v2 = vld [vmem:[%s15853_s10 + $0x52c] sm:$0xf0]  ;;  %v9565_v14 = vor.u32 %v10498_v49, %v9564_v13  ;;  %v8558_v61 = vld [vmem:[%s15853_s10 + $0x484] sm:$0xf0]  ;;  %v10299_v52 = vld [vmem:[%s15853_s10 + $0x62c] sm:$0xf] }
 0x396   :  { %v8645_v24 = vor.u32 %v10264_v0, %v8642_v2  ;;  %v10124_v13 = vld [vmem:[%s15853_s10 + $0xb4] sm:$0xf]  ;;  %v8082_v49 = vld [vmem:[%s15853_s10 + $0xcc] sm:$0xf0] }
 0x397   :  { %6144 = vmatpush.bf16.msra.mxu2 %v7997_v32  ;;  %6157 = vmatpush.bf16.msra.mxu3 %v8221_v33  ;;  %v9201_v32 = vor.u32 %v10407_v23, %v9200_v22  ;;  %v8948_v33 = vld [vmem:[%s15853_s10 + $0x778] sm:$0xf]  ;;  %v10145_v22 = vld [vmem:[%s15853_s10 + $0x15c] sm:$0xf]  ;;  %v10180_v0 = vld [vmem:[%s15853_s10 + $0x274] sm:$0xf] }
 0x398   :  { %6170 = vmatpush.bf16.msrb.mxu0 %v8445_v48  ;;  %6183 = vmatpush.bf16.msrb.mxu1 %v8669_v39  ;;  %v9172_v48 = vld [vmem:[%s15853_s10 + $0x938] sm:$0xf]  ;;  %v10400_v39 = vld [vmem:[%s15853_s10 + $0x950] sm:$0xf0]  ;;  %v8530_v2 = vld [vmem:[%s15853_s10 + $0x44c] sm:$0xf0] }
 0x399   :  { %v8166_v23 = vld [vmem:[%s15853_s10 + $0x174] sm:$0xf0] }
 0x39a   :  { %6145 = vmatmul.bf16.vlgmr.msra.gmra.mxu2 %v13408_v47  ;;  %6158 = vmatmul.bf16.vlgmr.msra.gmra.mxu3 %v13410_v11 }
 0x39b   :  { %6189 = vmatpush.bf16.msrb.mxu2 %v9089_v10  ;;  %6202 = vmatpush.bf16.msrb.mxu3 %v9313_v57  ;;  %v9396_v10 = vld [vmem:[%s15853_s10 + $0xaf8] sm:$0xf]  ;;  %v10456_v57 = vld [vmem:[%s15853_s10 + $0xb10] sm:$0xf0] }
 0x39c   :  { %6215 = vmatpush.bf16.msra.mxu0 %v9537_v45  ;;  %6228 = vmatpush.bf16.msra.mxu1 %v9761_v42  ;;  %v8949_v45 = vor.u32 %v10344_v51, %v8948_v33  ;;  %v9173_v42 = vor.u32 %v10400_v39, %v9172_v48  ;;  %v9397_v29 = vor.u32 %v10456_v57, %v9396_v10  ;;  %v10313_v33 = vld [vmem:[%s15853_s10 + $0x69c] sm:$0xf]  ;;  %v8838_v51 = vld [vmem:[%s15853_s10 + $0x6b4] sm:$0xf0]  ;;  %v10138_v48 = vld [vmem:[%s15853_s10 + $0x124] sm:$0xf] }
 0x39d   :  { %6171 = vmatmul.bf16.vlgmr.msrb.gmra.mxu0 %v13412_v12  ;;  %6184 = vmatmul.bf16.vlgmr.msrb.gmra.mxu1 %v13424_v21  ;;  %v8138_v39 = vld [vmem:[%s15853_s10 + $0x13c] sm:$0xf0]  ;;  %v8841_v57 = vor.u32 %v10313_v33, %v8838_v51  ;;  %v8502_v33 = vld [vmem:[%s15853_s10 + $0x414] sm:$0xf0]  ;;  %v10285_v51 = vld [vmem:[%s15853_s10 + $0x5bc] sm:$0xf] }
 0x39f   :  { %6190 = vmatpush.bf16.msrb.mxu2 %v9061_v16  ;;  %6203 = vmatpush.bf16.msrb.mxu3 %v9285_v7  ;;  %v9368_v16 = vld [vmem:[%s15853_s10 + $0xac0] sm:$0xf]  ;;  %v10449_v7 = vld [vmem:[%s15853_s10 + $0xad8] sm:$0xf0] }
 0x3a0   :  { %6216 = vmatpush.bf16.msra.mxu0 %v9509_v50  ;;  %6229 = vmatpush.bf16.msra.mxu1 %v9733_v53  ;;  %v8892_v50 = vld [vmem:[%s15853_s10 + $0x708] sm:$0xf]  ;;  %v8921_v53 = vor.u32 %v10337_v35, %v8920_v6  ;;  %v9369_v30 = vor.u32 %v10449_v7, %v9368_v16  ;;  %v10306_v6 = vld [vmem:[%s15853_s10 + $0x664] sm:$0xf]  ;;  %v8810_v35 = vld [vmem:[%s15853_s10 + $0x67c] sm:$0xf0] }
 0x3a1   :  { %v8893_v1 = vor.u32 %v10330_v58, %v8892_v50  ;;  %v10131_v16 = vld [vmem:[%s15853_s10 + $0xec] sm:$0xf]  ;;  %v8110_v7 = vld [vmem:[%s15853_s10 + $0x104] sm:$0xf0]  ;;  %v8813_v50 = vor.u32 %v10306_v6, %v8810_v35  ;;  %v14293_v58 = vld [vmem:[%s15854_s11] sm:$0x7f] }
 0x3a2   :  { %v10166_v6 = vld [vmem:[%s15853_s10 + $0x204] sm:$0xf]  ;;  %v8250_v35 = vld [vmem:[%s15853_s10 + $0x21c] sm:$0xf0] }
 0x3a3   :  { %6191 = vmatpush.bf16.msrb.mxu2 %v9033_v5  ;;  %6204 = vmatpush.bf16.msrb.mxu3 %v9257_v20  ;;  %v9340_v5 = vld [vmem:[%s15853_s10 + $0xa88] sm:$0xf]  ;;  %v10442_v20 = vld [vmem:[%s15853_s10 + $0xaa0] sm:$0xf0] }
 0x3a4   :  { %6217 = vmatpush.bf16.msra.mxu0 %v9481_v31  ;;  %6230 = vmatpush.bf16.msra.mxu1 %v9705_v56  ;;  %v10152_v31 = vld [vmem:[%s15853_s10 + $0x194] sm:$0xf]  ;;  %v8194_v56 = vld [vmem:[%s15853_s10 + $0x1ac] sm:$0xf0]  ;;  %v9341_v34 = vor.u32 %v10442_v20, %v9340_v5  ;;  %v3611_v20 = vperm.slane %v14293_v58, 0 }
 0x3a7   :  { %6192 = vmatpush.bf16.msrb.mxu2 %v9005_v3  ;;  %6205 = vmatpush.bf16.msrb.mxu3 %v9229_v8  ;;  %v10320_v3 = vld [vmem:[%s15853_s10 + $0x6d4] sm:$0xf]  ;;  %v8866_v8 = vld [vmem:[%s15853_s10 + $0x6ec] sm:$0xf0] }
 0x3a8   :  { %6218 = vmatpush.bf16.msra.mxu0 %v9453_v60  ;;  %6231 = vmatpush.bf16.msra.mxu1 %v9677_v17  ;;  %v8197_v60 = vor.u32 %v10152_v31, %v8194_v56  ;;  %v8421_v17 = vor.u32 %v10208_v63, %v8418_v55  ;;  %v8869_v26 = vor.u32 %v10320_v3, %v8866_v8  ;;  %v10292_v3 = vld [vmem:[%s15853_s10 + $0x5f4] sm:$0xf]  ;;  %v8754_v8 = vld [vmem:[%s15853_s10 + $0x60c] sm:$0xf0] }
 0x3ab   :  { %6193 = vmatpush.bf16.msrb.mxu2 %v8977_v28  ;;  %6206 = vmatpush.bf16.msrb.mxu3 %v9201_v32  ;;  %v10257_v28 = vld [vmem:[%s15853_s10 + $0x4dc] sm:$0xf]  ;;  %v8614_v32 = vld [vmem:[%s15853_s10 + $0x4f4] sm:$0xf0] }
 0x3ac   :  { %6219 = vmatpush.bf16.msra.mxu0 %v9425_v38  ;;  %6232 = vmatpush.bf16.msra.mxu1 %v9649_v37  ;;  %v8169_v38 = vor.u32 %v10145_v22, %v8166_v23  ;;  %v8393_v37 = vor.u32 %v10201_v27, %v8390_v43  ;;  %v8617_v10 = vor.u32 %v10257_v28, %v8614_v32  ;;  %v10117_v23 = vld [vmem:[%s15853_s10 + $0x7c] sm:$0xf]  ;;  %v8278_v28 = vld [vmem:[%s15853_s10 + $0x254] sm:$0xf0] }
 0x3ad   :  { %v8757_v27 = vor.u32 %v10292_v3, %v8754_v8  ;;  %v10173_v43 = vld [vmem:[%s15853_s10 + $0x23c] sm:$0xf]  ;;  %v9538_v3 = vld [vmem:[%s15853_s10 + $0xc2c] sm:$0xf0]  ;;  %v10544_v8 = vld [vmem:[%s15853_s10 + $0xdd4] sm:$0xf] }
 0x3ae   :  { %v10229_v32 = vld [vmem:[%s15853_s10 + $0x3fc] sm:$0xf] }
 0x3af   :  { %6194 = vmatpush.bf16.msrb.mxu2 %v8949_v45  ;;  %6207 = vmatpush.bf16.msrb.mxu3 %v9173_v42  ;;  %v10250_v45 = vld [vmem:[%s15853_s10 + $0x4a4] sm:$0xf]  ;;  %v8586_v42 = vld [vmem:[%s15853_s10 + $0x4bc] sm:$0xf0] }
 0x3b0   :  { %6220 = vmatpush.bf16.msra.mxu0 %v9397_v29  ;;  %6233 = vmatpush.bf16.msra.mxu1 %v9621_v46  ;;  %v8141_v29 = vor.u32 %v10138_v48, %v8138_v39  ;;  %v8365_v46 = vor.u32 %v10194_v40, %v8362_v41  ;;  %v8589_v15 = vor.u32 %v10250_v45, %v8586_v42 }
 0x3b1   :  { %v8281_v39 = vor.u32 %v10173_v43, %v8278_v28  ;;  %v8505_v40 = vor.u32 %v10229_v32, %v8502_v33  ;;  %v10369_v43 = vld [vmem:[%s15853_s10 + $0x85c] sm:$0xf]  ;;  %v9062_v28 = vld [vmem:[%s15853_s10 + $0x874] sm:$0xf0] }
 0x3b3   :  { %6195 = vmatpush.bf16.msrb.mxu2 %v8921_v53  ;;  %6208 = vmatpush.bf16.msrb.mxu3 %v9145_v54  ;;  %v8334_v53 = vld [vmem:[%s15853_s10 + $0x2c4] sm:$0xf0]  ;;  %v10243_v54 = vld [vmem:[%s15853_s10 + $0x46c] sm:$0xf] }
 0x3b4   :  { %6221 = vmatpush.bf16.msra.mxu0 %v9369_v30  ;;  %6234 = vmatpush.bf16.msra.mxu1 %v9593_v62  ;;  %v8782_v30 = vld [vmem:[%s15853_s10 + $0x644] sm:$0xf0]  ;;  %v8113_v62 = vor.u32 %v10131_v16, %v8110_v7  ;;  %v8337_v5 = vor.u32 %v10187_v4, %v8334_v53  ;;  %v8561_v31 = vor.u32 %v10243_v54, %v8558_v61  ;;  %v10278_v16 = vld [vmem:[%s15853_s10 + $0x584] sm:$0xf]  ;;  %v8698_v7 = vld [vmem:[%s15853_s10 + $0x59c] sm:$0xf0] }
 0x3b5   :  { %v8785_v56 = vor.u32 %v10299_v52, %v8782_v30  ;;  %v10103_v4 = vld [vmem:[%s15853_s10 + $0xc] sm:$0xf]  ;;  %v8253_v53 = vor.u32 %v10166_v6, %v8250_v35  ;;  %v7998_v52 = vld [vmem:[%s15853_s10 + $0x24] sm:$0xf0]  ;;  %v10362_v6 = vld [vmem:[%s15853_s10 + $0x824] sm:$0xf] }
 0x3b6   :  { %v10159_v30 = vld [vmem:[%s15853_s10 + $0x1cc] sm:$0xf]  ;;  %v9034_v35 = vld [vmem:[%s15853_s10 + $0x83c] sm:$0xf0] }
 0x3b7   :  { %6196 = vmatpush.bf16.msrb.mxu2 %v8893_v1  ;;  %6209 = vmatpush.bf16.msrb.mxu3 %v9117_v59  ;;  %v14271_v36 = vpop.f32.mrf.mxu0  ;;  %v14273_v18 = vpop.f32.mrf.mxu1  ;;  %v8306_v1 = vld [vmem:[%s15853_s10 + $0x28c] sm:$0xf0]  ;;  %v10236_v59 = vld [vmem:[%s15853_s10 + $0x434] sm:$0xf] }
 0x3b8   :  { %6222 = vmatpush.bf16.msra.mxu0 %v9341_v34  ;;  %6235 = vmatpush.bf16.msra.mxu1 %v9565_v14  ;;  %v8085_v14 = vor.u32 %v10124_v13, %v8082_v49  ;;  %v8446_v13 = vld [vmem:[%s15853_s10 + $0x3a4] sm:$0xf0]  ;;  %v10271_v49 = vld [vmem:[%s15853_s10 + $0x54c] sm:$0xf] }
 0x3ba   :  { %6197 = vmatmul.bf16.vlgmr.msrb.gmra.mxu2 %v13523_v9  ;;  %6210 = vmatmul.bf16.vlgmr.msrb.gmra.mxu3 %v13525_v44 }
 0x3bb   :  { %6241 = vmatpush.bf16.msra.mxu2 %v8197_v60  ;;  %6254 = vmatpush.bf16.msra.mxu3 %v8421_v17  ;;  %v8309_v60 = vor.u32 %v10180_v0, %v8306_v1  ;;  %v9314_v0 = vld [vmem:[%s15853_s10 + $0xa6c] sm:$0xf0]  ;;  %v10488_v1 = vld [vmem:[%s15853_s10 + $0xc14] sm:$0xf] }
 0x3bc   :  { %6267 = vmatpush.bf16.msrb.mxu0 %v8645_v24  ;;  %6280 = vmatpush.bf16.msrb.mxu1 %v8869_v26  ;;  %v5938_v63 = vpop.f32.mrf.mxu2  ;;  %v5951_v55 = vpop.f32.mrf.mxu3  ;;  %v8054_v24 = vld [vmem:[%s15853_s10 + $0x94] sm:$0xf0]  ;;  %v8533_v26 = vor.u32 %v10236_v59, %v8530_v2  ;;  %v8001_v59 = vor.u32 %v10103_v4, %v7998_v52  ;;  %v9541_v32 = vor.u32 %v10488_v1, %v9538_v3  ;;  %v10474_v4 = vld [vmem:[%s15853_s10 + $0xba4] sm:$0xf] }
 0x3bd   :  { %6223 = vmatmul.bf16.vlgmr.msra.gmra.mxu0 %v13535_v25  ;;  %6236 = vmatmul.bf16.vlgmr.msra.gmra.mxu1 %v13533_v19  ;;  %v5939_v34 = vadd.f32 %v5938_v63, %v3611_v20  ;;  %v8057_v48 = vor.u32 %v10117_v23, %v8054_v24  ;;  %v10215_v20 = vld [vmem:[%s15853_s10 + $0x38c] sm:$0xf]  ;;  %v9090_v63 = vld [vmem:[%s15853_s10 + $0x8ac] sm:$0xf0] }
 0x3bf   :  { %6242 = vmatpush.bf16.msra.mxu2 %v8169_v38  ;;  %6255 = vmatpush.bf16.msra.mxu3 %v8393_v37  ;;  %v5966_v17 = vpop.f32.mrf.mxu0  ;;  %v5979_v22 = vpop.f32.mrf.mxu1  ;;  %v8726_v38 = vld [vmem:[%s15853_s10 + $0x5d4] sm:$0xf0]  ;;  %v5952_v37 = vadd.f32 %v5951_v55, %v5939_v34  ;;  %v10432_v55 = vld [vmem:[%s15853_s10 + $0xa54] sm:$0xf]  ;;  %v9762_v34 = vld [vmem:[%s15853_s10 + $0xdec] sm:$0xf0] }
 0x3c0   :  { %6268 = vmatpush.bf16.msrb.mxu0 %v8617_v10  ;;  %6281 = vmatpush.bf16.msrb.mxu1 %v8841_v57  ;;  %v10110_v10 = vld [vmem:[%s15853_s10 + $0x44] sm:$0xf]  ;;  %v8026_v57 = vld [vmem:[%s15853_s10 + $0x5c] sm:$0xf0]  ;;  %v8729_v41 = vor.u32 %v10285_v51, %v8726_v38  ;;  %v9765_v33 = vor.u32 %v10544_v8, %v9762_v34  ;;  %v9286_v51 = vld [vmem:[%s15853_s10 + $0xa34] sm:$0xf0] }
 0x3c1   :  { %v10481_v38 = vld [vmem:[%s15853_s10 + $0xbdc] sm:$0xf]  ;;  %v10348_v8 = vld [vmem:[%s15853_s10 + $0x7b4] sm:$0xf]  ;;  %v8978_v34 = vld [vmem:[%s15853_s10 + $0x7cc] sm:$0xf0] }
 0x3c3   :  { %6243 = vmatpush.bf16.msra.mxu2 %v8141_v29  ;;  %6256 = vmatpush.bf16.msra.mxu3 %v8365_v46  ;;  %v10222_v29 = vld [vmem:[%s15853_s10 + $0x3c4] sm:$0xf]  ;;  %v8474_v46 = vld [vmem:[%s15853_s10 + $0x3dc] sm:$0xf0] }
 0x3c4   :  { %6269 = vmatpush.bf16.msrb.mxu0 %v8589_v15  ;;  %6282 = vmatpush.bf16.msrb.mxu1 %v8813_v50  ;;  %v5940_v45 = vpop.f32.mrf.mxu2  ;;  %v5953_v42 = vpop.f32.mrf.mxu3  ;;  %v5965_v15 = vadd.f32 %v14271_v36, %v5952_v37  ;;  %v8029_v50 = vor.u32 %v10110_v10, %v8026_v57  ;;  %v8477_v36 = vor.u32 %v10222_v29, %v8474_v46  ;;  %v9510_v10 = vld [vmem:[%s15853_s10 + $0xbf4] sm:$0xf0]  ;;  %v10537_v57 = vld [vmem:[%s15853_s10 + $0xd9c] sm:$0xf] }
 0x3c5   :  { %v9065_v45 = vor.u32 %v10369_v43, %v9062_v28  ;;  %v9513_v29 = vor.u32 %v10481_v38, %v9510_v10  ;;  %v9650_v43 = vld [vmem:[%s15853_s10 + $0xd0c] sm:$0xf0]  ;;  %v8981_v28 = vor.u32 %v10348_v8, %v8978_v34  ;;  %v9174_v10 = vld [vmem:[%s15853_s10 + $0x954] sm:$0xf0]  ;;  %v10156_v34 = vld [vmem:[%s15853_s10 + $0x1b0] sm:$0xf0] }
 0x3c6   :  { %v8200_v8 = vld [vmem:[%s15853_s10 + $0x198] sm:$0xf] }
 0x3c7   :  { %6244 = vmatpush.bf16.msra.mxu2 %v8113_v62  ;;  %6257 = vmatpush.bf16.msra.mxu3 %v8337_v5  ;;  %v6016_v54 = vpop.f32.mrf.mxu0  ;;  %v14381_v61 = vpop.f32.mrf.mxu1  ;;  %v8222_v62 = vld [vmem:[%s15853_s10 + $0x1e4] sm:$0xf0]  ;;  %v8701_v5 = vor.u32 %v10278_v16, %v8698_v7  ;;  %v10418_v16 = vld [vmem:[%s15853_s10 + $0x9e4] sm:$0xf]  ;;  %v9258_v7 = vld [vmem:[%s15853_s10 + $0x9fc] sm:$0xf0] }
 0x3c8   :  { %6270 = vmatpush.bf16.msrb.mxu0 %v8561_v31  ;;  %6283 = vmatpush.bf16.msrb.mxu1 %v8785_v56  ;;  %v8670_v31 = vld [vmem:[%s15853_s10 + $0x564] sm:$0xf0]  ;;  %v10376_v56 = vld [vmem:[%s15853_s10 + $0x894] sm:$0xf]  ;;  %v8225_v2 = vor.u32 %v10159_v30, %v8222_v62  ;;  %v9037_v30 = vor.u32 %v10362_v6, %v9034_v35  ;;  %v9261_v62 = vor.u32 %v10418_v16, %v9258_v7  ;;  %v8922_v16 = vld [vmem:[%s15853_s10 + $0x75c] sm:$0xf0] }
 0x3c9   :  { %v8673_v17 = vor.u32 %v10271_v49, %v8670_v31  ;;  %v9093_v24 = vor.u32 %v10376_v56, %v9090_v63  ;;  %v10411_v49 = vld [vmem:[%s15853_s10 + $0x9ac] sm:$0xf]  ;;  %v9230_v31 = vld [vmem:[%s15853_s10 + $0x9c4] sm:$0xf0] }
 0x3ca   :  { %v10467_v56 = vld [vmem:[%s15853_s10 + $0xb6c] sm:$0xf]  ;;  %v9454_v63 = vld [vmem:[%s15853_s10 + $0xb84] sm:$0xf0]  ;;  %v9233_v3 = vor.u32 %v10411_v49, %v9230_v31 }
 0x3cb   :  { %6245 = vmatpush.bf16.msra.mxu2 %v8085_v14  ;;  %6258 = vmatpush.bf16.msra.mxu3 %v8309_v60  ;;  %v5978_v14 = vadd.f32 %v14273_v18, %v5965_v15  ;;  %v8449_v60 = vor.u32 %v10215_v20, %v8446_v13  ;;  %v10425_v18 = vld [vmem:[%s15853_s10 + $0xa1c] sm:$0xf] }
 0x3cc   :  { %6271 = vmatpush.bf16.msrb.mxu0 %v8533_v26  ;;  %6284 = vmatpush.bf16.msrb.mxu1 %v8757_v27  ;;  %v5990_v22 = vpop.f32.mrf.mxu2  ;;  %v6003_v23 = vpop.f32.mrf.mxu3  ;;  %v9317_v26 = vor.u32 %v10432_v55, %v9314_v0  ;;  %v9289_v42 = vor.u32 %v10425_v18, %v9286_v51  ;;  %v10523_v55 = vld [vmem:[%s15853_s10 + $0xd2c] sm:$0xf]  ;;  %v9678_v0 = vld [vmem:[%s15853_s10 + $0xd44] sm:$0xf0]  ;;  %v8950_v18 = vld [vmem:[%s15853_s10 + $0x794] sm:$0xf0] }
 0x3cd   :  { %v5991_v27 = vadd.f32 %v5990_v22, %v5978_v14  ;;  %v9457_v14 = vor.u32 %v10467_v56, %v9454_v63  ;;  %v9202_v22 = vld [vmem:[%s15853_s10 + $0x98c] sm:$0xf0] }
 0x3cf   :  { %6246 = vmatpush.bf16.msra.mxu2 %v8057_v48  ;;  %6259 = vmatpush.bf16.msra.mxu3 %v8281_v39  ;;  %v6004_v37 = vadd.f32 %v6003_v23, %v5991_v27  ;;  %v6018_v48 = vpop.f32.mrf.mxu0  ;;  %v6031_v39 = vpop.f32.mrf.mxu1  ;;  %v10460_v23 = vld [vmem:[%s15853_s10 + $0xb34] sm:$0xf] }
 0x3d0   :  { %6272 = vmatpush.bf16.msrb.mxu0 %v8505_v40  ;;  %6285 = vmatpush.bf16.msrb.mxu1 %v8729_v41  ;;  %v9734_v40 = vld [vmem:[%s15853_s10 + $0xdb4] sm:$0xf0]  ;;  %v10516_v27 = vld [vmem:[%s15853_s10 + $0xcf4] sm:$0xf]  ;;  %v10397_v39 = vld [vmem:[%s15853_s10 + $0x93c] sm:$0xf] }
 0x3d1   :  { %v6017_v41 = vadd.f32 %v6016_v54, %v6004_v37  ;;  %v9737_v46 = vor.u32 %v10537_v57, %v9734_v40  ;;  %v9706_v54 = vld [vmem:[%s15853_s10 + $0xd7c] sm:$0xf0]  ;;  %v9653_v38 = vor.u32 %v10516_v27, %v9650_v43  ;;  %v10453_v57 = vld [vmem:[%s15853_s10 + $0xafc] sm:$0xf]  ;;  %v9398_v40 = vld [vmem:[%s15853_s10 + $0xb14] sm:$0xf0] }
 0x3d2   :  { %v9401_v7 = vor.u32 %v10453_v57, %v9398_v40  ;;  %v10324_v27 = vld [vmem:[%s15853_s10 + $0x6f0] sm:$0xf0]  ;;  %v8396_v57 = vld [vmem:[%s15853_s10 + $0x320] sm:$0xf] }
 0x3d3   :  { %6247 = vmatpush.bf16.msra.mxu2 %v8029_v50  ;;  %6260 = vmatpush.bf16.msra.mxu3 %v8253_v53  ;;  %v6030_v15 = vadd.f32 %v14381_v61, %v6017_v41  ;;  %v9482_v50 = vld [vmem:[%s15853_s10 + $0xbbc] sm:$0xf0]  ;;  %v10530_v53 = vld [vmem:[%s15853_s10 + $0xd64] sm:$0xf]  ;;  %v10509_v41 = vld [vmem:[%s15853_s10 + $0xcbc] sm:$0xf] }
 0x3d4   :  { %6273 = vmatpush.bf16.msrb.mxu0 %v8477_v36  ;;  %6286 = vmatpush.bf16.msrb.mxu1 %v8701_v5  ;;  %v5992_v61 = vpop.f32.mrf.mxu2  ;;  %v6005_v52 = vpop.f32.mrf.mxu3  ;;  %v10355_v36 = vld [vmem:[%s15853_s10 + $0x7ec] sm:$0xf]  ;;  %v9006_v5 = vld [vmem:[%s15853_s10 + $0x804] sm:$0xf0]  ;;  %v9485_v20 = vor.u32 %v10474_v4, %v9482_v50  ;;  %v9709_v13 = vor.u32 %v10530_v53, %v9706_v54  ;;  %v9146_v50 = vld [vmem:[%s15853_s10 + $0x91c] sm:$0xf0] }
 0x3d5   :  { %10582 = vtanh.f32 %v6030_v15  ;;  %v10390_v15 = vld [vmem:[%s15853_s10 + $0x904] sm:$0xf]  ;;  %v9370_v54 = vld [vmem:[%s15853_s10 + $0xadc] sm:$0xf0] }
 0x3d6   :  { %v10446_v53 = vld [vmem:[%s15853_s10 + $0xac4] sm:$0xf]  ;;  %v9594_v52 = vld [vmem:[%s15853_s10 + $0xc9c] sm:$0xf0] }
 0x3d7   :  { %6248 = vmatpush.bf16.msra.mxu2 %v8001_v59  ;;  %6261 = vmatpush.bf16.msra.mxu3 %v8225_v2  ;;  %v9009_v2 = vor.u32 %v10355_v36, %v9006_v5  ;;  %v10502_v61 = vld [vmem:[%s15853_s10 + $0xc84] sm:$0xf]  ;;  %v9149_v36 = vor.u32 %v10390_v15, %v9146_v50  ;;  %v8894_v5 = vld [vmem:[%s15853_s10 + $0x724] sm:$0xf0]  ;;  %v9373_v49 = vor.u32 %v10446_v53, %v9370_v54  ;;  %v8620_v40 = vld [vmem:[%s15853_s10 + $0x4e0] sm:$0xf] }
 0x3d8   :  { %6274 = vmatpush.bf16.msrb.mxu0 %v8449_v60  ;;  %6287 = vmatpush.bf16.msrb.mxu1 %v8673_v17  ;;  %v9681_v60 = vor.u32 %v10523_v55, %v9678_v0  ;;  %v10404_v17 = vld [vmem:[%s15853_s10 + $0x974] sm:$0xf]  ;;  %v9597_v31 = vor.u32 %v10502_v61, %v9594_v52  ;;  %v10439_v55 = vld [vmem:[%s15853_s10 + $0xa8c] sm:$0xf]  ;;  %v9342_v0 = vld [vmem:[%s15853_s10 + $0xaa4] sm:$0xf0] }
 0x3d9   :  { %v9345_v43 = vor.u32 %v10439_v55, %v9342_v0  ;;  %v10198_v15 = vld [vmem:[%s15853_s10 + $0x300] sm:$0xf0]  ;;  %v8592_v50 = vld [vmem:[%s15853_s10 + $0x4a8] sm:$0xf]  ;;  %v10303_v55 = vld [vmem:[%s15853_s10 + $0x648] sm:$0xf0] }
 0x3da   :  { %6249 = vmatmul.bf16.vlgmr.msra.gmra.mxu2 %v13408_v47  ;;  %6262 = vmatmul.bf16.vlgmr.msra.gmra.mxu3 %v13410_v11  ;;  %v14506_v1 = vpop.f32.mrf.mxu0  ;;  %v14508_v59 = vpop.f32.mrf.mxu1  ;;  %v10254_v53 = vld [vmem:[%s15853_s10 + $0x4c0] sm:$0xf0]  ;;  %v8816_v54 = vld [vmem:[%s15853_s10 + $0x668] sm:$0xf] }
 0x3db   :  { %6293 = vmatpush.bf16.msrb.mxu2 %v9093_v24  ;;  %6306 = vmatpush.bf16.msrb.mxu3 %v9317_v26  ;;  %v10583_v24 = vpop.eup %10582  ;;  %v9426_v26 = vld [vmem:[%s15853_s10 + $0xb4c] sm:$0xf0]  ;;  %v10310_v61 = vld [vmem:[%s15853_s10 + $0x680] sm:$0xf0] }
 0x3dc   :  { %6319 = vmatpush.bf16.msra.mxu0 %v9541_v32  ;;  %6332 = vmatpush.bf16.msra.mxu1 %v9765_v33  ;;  %6664 = vst [vmem:[#allocation2] sm:$0xff] %v10583_v24  ;;  %v9205_v32 = vor.u32 %v10404_v17, %v9202_v22  ;;  %v10341_v33 = vld [vmem:[%s15853_s10 + $0x77c] sm:$0xf]  ;;  %v9429_v51 = vor.u32 %v10460_v23, %v9426_v26  ;;  %v8648_v17 = vld [vmem:[%s15853_s10 + $0x518] sm:$0xf] }
 0x3dd   :  { %6275 = vmatmul.bf16.vlgmr.msrb.gmra.mxu0 %v13412_v12  ;;  %6288 = vmatmul.bf16.vlgmr.msrb.gmra.mxu1 %v13424_v21  ;;  %v14540_v37 = vpop.f32.mrf.mxu2  ;;  %v14542_v48 = vpop.f32.mrf.mxu3  ;;  %v8953_v35 = vor.u32 %v10341_v33, %v8950_v18  ;;  %v10268_v24 = vld [vmem:[%s15853_s10 + $0x530] sm:$0xf0]  ;;  %v8872_v26 = vld [vmem:[%s15853_s10 + $0x6d8] sm:$0xf]  ;;  %v8201_v33 = vor.u32 %v10156_v34, %v8200_v8 }
 0x3df   :  { %6294 = vmatpush.bf16.msrb.mxu2 %v9065_v45  ;;  %6307 = vmatpush.bf16.msrb.mxu3 %v9289_v42  ;;  %v9622_v45 = vld [vmem:[%s15853_s10 + $0xcd4] sm:$0xf0] }
 0x3e0   :  { %6320 = vmatpush.bf16.msra.mxu0 %v9513_v29  ;;  %6333 = vmatpush.bf16.msra.mxu1 %v9737_v46  ;;  %v9177_v29 = vor.u32 %v10397_v39, %v9174_v10  ;;  %v10334_v46 = vld [vmem:[%s15853_s10 + $0x744] sm:$0xf]  ;;  %v9625_v4 = vor.u32 %v10509_v41, %v9622_v45  ;;  %v8649_v39 = vor.u32 %v10268_v24, %v8648_v17  ;;  %v10261_v41 = vld [vmem:[%s15853_s10 + $0x4f8] sm:$0xf0]  ;;  %v8844_v45 = vld [vmem:[%s15853_s10 + $0x6a0] sm:$0xf] }
 0x3e1   :  { %v8873_v10 = vor.u32 %v10324_v27, %v8872_v26  ;;  %v8536_v24 = vld [vmem:[%s15853_s10 + $0x438] sm:$0xf]  ;;  %v10240_v26 = vld [vmem:[%s15853_s10 + $0x450] sm:$0xf0] }
 0x3e2   :  { %v6070_v42 = vpop.f32.mrf.mxu0  ;;  %v6083_v6 = vpop.f32.mrf.mxu1  ;;  %v8760_v27 = vld [vmem:[%s15853_s10 + $0x5f8] sm:$0xf] }
 0x3e3   :  { %6295 = vmatpush.bf16.msrb.mxu2 %v9037_v30  ;;  %6308 = vmatpush.bf16.msrb.mxu3 %v9261_v62  ;;  %v10327_v30 = vld [vmem:[%s15853_s10 + $0x70c] sm:$0xf]  ;;  %v8925_v62 = vor.u32 %v10334_v46, %v8922_v16  ;;  %v10317_v42 = vld [vmem:[%s15853_s10 + $0x6b8] sm:$0xf0]  ;;  %v8144_v46 = vld [vmem:[%s15853_s10 + $0x128] sm:$0xf] }
 0x3e4   :  { %6321 = vmatpush.bf16.msra.mxu0 %v9485_v20  ;;  %6334 = vmatpush.bf16.msra.mxu1 %v9709_v13  ;;  %v10383_v20 = vld [vmem:[%s15853_s10 + $0x8cc] sm:$0xf]  ;;  %v9118_v13 = vld [vmem:[%s15853_s10 + $0x8e4] sm:$0xf0]  ;;  %v8897_v22 = vor.u32 %v10327_v30, %v8894_v5  ;;  %v10142_v16 = vld [vmem:[%s15853_s10 + $0x140] sm:$0xf0] }
 0x3e5   :  { %v6044_v56 = vpop.f32.mrf.mxu2  ;;  %v6057_v63 = vpop.f32.mrf.mxu3  ;;  %v9121_v23 = vor.u32 %v10383_v20, %v9118_v13  ;;  %v8145_v30 = vor.u32 %v10142_v16, %v8144_v46  ;;  %v10135_v5 = vld [vmem:[%s15853_s10 + $0x108] sm:$0xf0]  ;;  %v8593_v20 = vor.u32 %v10254_v53, %v8592_v50  ;;  %v8817_v13 = vor.u32 %v10310_v61, %v8816_v54  ;;  %v8256_v53 = vld [vmem:[%s15853_s10 + $0x208] sm:$0xf]  ;;  %v10170_v54 = vld [vmem:[%s15853_s10 + $0x220] sm:$0xf0] }
 0x3e6   :  { %v10247_v56 = vld [vmem:[%s15853_s10 + $0x488] sm:$0xf0]  ;;  %v8788_v63 = vld [vmem:[%s15853_s10 + $0x630] sm:$0xf]  ;;  %v8480_v61 = vld [vmem:[%s15853_s10 + $0x3c8] sm:$0xf] }
 0x3e7   :  { %6296 = vmatpush.bf16.msrb.mxu2 %v9009_v2  ;;  %6309 = vmatpush.bf16.msrb.mxu3 %v9233_v3  ;;  %v10495_v2 = vld [vmem:[%s15853_s10 + $0xc4c] sm:$0xf]  ;;  %v9566_v3 = vld [vmem:[%s15853_s10 + $0xc64] sm:$0xf0] }
 0x3e8   :  { %6322 = vmatpush.bf16.msra.mxu0 %v9457_v14  ;;  %6335 = vmatpush.bf16.msra.mxu1 %v9681_v60  ;;  %v8424_v14 = vld [vmem:[%s15853_s10 + $0x358] sm:$0xf]  ;;  %v10212_v60 = vld [vmem:[%s15853_s10 + $0x370] sm:$0xf0] }
 0x3e9   :  { %v8425_v18 = vor.u32 %v10212_v60, %v8424_v14  ;;  %v8088_v14 = vld [vmem:[%s15853_s10 + $0xb8] sm:$0xf]  ;;  %v10128_v60 = vld [vmem:[%s15853_s10 + $0xd0] sm:$0xf0] }
 0x3eb   :  { %6297 = vmatpush.bf16.msrb.mxu2 %v8981_v28  ;;  %6310 = vmatpush.bf16.msrb.mxu3 %v9205_v32  ;;  %v9569_v28 = vor.u32 %v10495_v2, %v9566_v3  ;;  %v3612_v32 = vperm.slane %v14293_v58, 1  ;;  %v10205_v58 = vld [vmem:[%s15853_s10 + $0x338] sm:$0xf0] }
 0x3ec   :  { %6323 = vmatpush.bf16.msra.mxu0 %v9429_v51  ;;  %6336 = vmatpush.bf16.msra.mxu1 %v9653_v38  ;;  %v8172_v51 = vld [vmem:[%s15853_s10 + $0x160] sm:$0xf]  ;;  %v10149_v38 = vld [vmem:[%s15853_s10 + $0x178] sm:$0xf0] }
 0x3ed   :  { %v6043_v6 = vadd.f32 %v14540_v37, %v3612_v32  ;;  %v8368_v37 = vld [vmem:[%s15853_s10 + $0x2e8] sm:$0xf] }
 0x3ef   :  { %6298 = vmatpush.bf16.msrb.mxu2 %v8953_v35  ;;  %6311 = vmatpush.bf16.msrb.mxu3 %v9177_v29  ;;  %v8173_v35 = vor.u32 %v10149_v38, %v8172_v51  ;;  %v8397_v29 = vor.u32 %v10205_v58, %v8396_v57  ;;  %v6056_v52 = vadd.f32 %v14542_v48, %v6043_v6  ;;  %v8340_v48 = vld [vmem:[%s15853_s10 + $0x2b0] sm:$0xf]  ;;  %v10121_v51 = vld [vmem:[%s15853_s10 + $0x98] sm:$0xf0]  ;;  %v8284_v58 = vld [vmem:[%s15853_s10 + $0x240] sm:$0xf] }
 0x3f0   :  { %6324 = vmatpush.bf16.msra.mxu0 %v9401_v7  ;;  %6337 = vmatpush.bf16.msra.mxu1 %v9625_v4  ;;  %v8621_v7 = vor.u32 %v10261_v41, %v8620_v40  ;;  %v8845_v4 = vor.u32 %v10317_v42, %v8844_v45  ;;  %v8537_v38 = vor.u32 %v10240_v26, %v8536_v24  ;;  %v8508_v40 = vld [vmem:[%s15853_s10 + $0x400] sm:$0xf]  ;;  %v10233_v45 = vld [vmem:[%s15853_s10 + $0x418] sm:$0xf0] }
 0x3f1   :  { %v6069_v0 = vadd.f32 %v14506_v1, %v6056_v52  ;;  %v8312_v1 = vld [vmem:[%s15853_s10 + $0x278] sm:$0xf]  ;;  %v8732_v42 = vld [vmem:[%s15853_s10 + $0x5c0] sm:$0xf]  ;;  %v10289_v6 = vld [vmem:[%s15853_s10 + $0x5d8] sm:$0xf0] }
 0x3f2   :  { %v8733_v50 = vor.u32 %v10289_v6, %v8732_v42  ;;  %v9740_v42 = vld [vmem:[%s15853_s10 + $0xda0] sm:$0xf]  ;;  %v10541_v6 = vld [vmem:[%s15853_s10 + $0xdb8] sm:$0xf0] }
 0x3f3   :  { %6299 = vmatpush.bf16.msrb.mxu2 %v8925_v62  ;;  %6312 = vmatpush.bf16.msrb.mxu3 %v9149_v36  ;;  %v8369_v62 = vor.u32 %v10198_v15, %v8368_v37  ;;  %v8116_v36 = vld [vmem:[%s15853_s10 + $0xf0] sm:$0xf]  ;;  %v10114_v37 = vld [vmem:[%s15853_s10 + $0x60] sm:$0xf0]  ;;  %v8509_v15 = vor.u32 %v10233_v45, %v8508_v40  ;;  %v9516_v40 = vld [vmem:[%s15853_s10 + $0xbe0] sm:$0xf] }
 0x3f4   :  { %6325 = vmatpush.bf16.msra.mxu0 %v9373_v49  ;;  %6338 = vmatpush.bf16.msra.mxu1 %v9597_v31  ;;  %v10191_v49 = vld [vmem:[%s15853_s10 + $0x2c8] sm:$0xf0]  ;;  %v8564_v31 = vld [vmem:[%s15853_s10 + $0x470] sm:$0xf]  ;;  %v8117_v8 = vor.u32 %v10135_v5, %v8116_v36  ;;  %v10282_v36 = vld [vmem:[%s15853_s10 + $0x5a0] sm:$0xf0] }
 0x3f5   :  { %v8341_v34 = vor.u32 %v10191_v49, %v8340_v48  ;;  %v8565_v17 = vor.u32 %v10247_v56, %v8564_v31  ;;  %v8004_v5 = vld [vmem:[%s15853_s10 + $0x10] sm:$0xf]  ;;  %v8257_v48 = vor.u32 %v10170_v54, %v8256_v53  ;;  %v10107_v49 = vld [vmem:[%s15853_s10 + $0x28] sm:$0xf0]  ;;  %v10485_v45 = vld [vmem:[%s15853_s10 + $0xbf8] sm:$0xf0] }
 0x3f6   :  { %v8228_v31 = vld [vmem:[%s15853_s10 + $0x1d0] sm:$0xf]  ;;  %v10163_v56 = vld [vmem:[%s15853_s10 + $0x1e8] sm:$0xf0]  ;;  %v8005_v24 = vor.u32 %v10107_v49, %v8004_v5  ;;  %v10478_v53 = vld [vmem:[%s15853_s10 + $0xbc0] sm:$0xf0] }
 0x3f7   :  { %6300 = vmatpush.bf16.msrb.mxu2 %v8897_v22  ;;  %6313 = vmatpush.bf16.msrb.mxu3 %v9121_v23  ;;  %v8789_v22 = vor.u32 %v10303_v55, %v8788_v63  ;;  %v10184_v23 = vld [vmem:[%s15853_s10 + $0x290] sm:$0xf0]  ;;  %v8229_v26 = vor.u32 %v10163_v56, %v8228_v31  ;;  %v9712_v54 = vld [vmem:[%s15853_s10 + $0xd68] sm:$0xf]  ;;  %v9460_v49 = vld [vmem:[%s15853_s10 + $0xb70] sm:$0xf] }
 0x3f8   :  { %6326 = vmatpush.bf16.msra.mxu0 %v9345_v43  ;;  %6339 = vmatpush.bf16.msra.mxu1 %v9569_v28  ;;  %v10296_v43 = vld [vmem:[%s15853_s10 + $0x610] sm:$0xf0]  ;;  %v8089_v28 = vor.u32 %v10128_v60, %v8088_v14  ;;  %v8313_v32 = vor.u32 %v10184_v23, %v8312_v1  ;;  %v10275_v14 = vld [vmem:[%s15853_s10 + $0x568] sm:$0xf0]  ;;  %v9096_v60 = vld [vmem:[%s15853_s10 + $0x898] sm:$0xf] }
 0x3f9   :  { %v10436_v1 = vld [vmem:[%s15853_s10 + $0xa70] sm:$0xf0]  ;;  %v9544_v23 = vld [vmem:[%s15853_s10 + $0xc18] sm:$0xf]  ;;  %v10471_v31 = vld [vmem:[%s15853_s10 + $0xb88] sm:$0xf0] }
 0x3fa   :  { %6301 = vmatmul.bf16.vlgmr.msrb.gmra.mxu2 %v13523_v9  ;;  %6314 = vmatmul.bf16.vlgmr.msrb.gmra.mxu3 %v13525_v44  ;;  %v6120_v2 = vpop.f32.mrf.mxu0  ;;  %v6133_v3 = vpop.f32.mrf.mxu1  ;;  %v9684_v56 = vld [vmem:[%s15853_s10 + $0xd30] sm:$0xf] }
 0x3fb   :  { %6345 = vmatpush.bf16.msra.mxu2 %v8201_v33  ;;  %6358 = vmatpush.bf16.msra.mxu3 %v8425_v18  ;;  %v6082_v33 = vadd.f32 %v14508_v59, %v6069_v0  ;;  %v8060_v18 = vld [vmem:[%s15853_s10 + $0x80] sm:$0xf]  ;;  %v10177_v59 = vld [vmem:[%s15853_s10 + $0x258] sm:$0xf0] }
 0x3fc   :  { %6371 = vmatpush.bf16.msrb.mxu0 %v8649_v39  ;;  %6384 = vmatpush.bf16.msrb.mxu1 %v8873_v10  ;;  %v8761_v39 = vor.u32 %v10296_v43, %v8760_v27  ;;  %v8061_v16 = vor.u32 %v10121_v51, %v8060_v18  ;;  %v10492_v27 = vld [vmem:[%s15853_s10 + $0xc30] sm:$0xf0]  ;;  %v9768_v43 = vld [vmem:[%s15853_s10 + $0xdd8] sm:$0xf] }
 0x3fd   :  { %6327 = vmatmul.bf16.vlgmr.msra.gmra.mxu0 %v13535_v25  ;;  %6340 = vmatmul.bf16.vlgmr.msra.gmra.mxu1 %v13533_v19  ;;  %v6094_v10 = vpop.f32.mrf.mxu2  ;;  %v6107_v57 = vpop.f32.mrf.mxu3 }
 0x3fe   :  { %v6095_v41 = vadd.f32 %v6094_v10, %v6082_v33  ;;  %v9545_v10 = vor.u32 %v10492_v27, %v9544_v23  ;;  %v10464_v23 = vld [vmem:[%s15853_s10 + $0xb50] sm:$0xf0] }
 0x3ff   :  { %6346 = vmatpush.bf16.msra.mxu2 %v8173_v35  ;;  %6359 = vmatpush.bf16.msra.mxu3 %v8397_v29 }
 0x400   :  { %6372 = vmatpush.bf16.msrb.mxu0 %v8621_v7  ;;  %6385 = vmatpush.bf16.msrb.mxu1 %v8845_v4  ;;  %v6108_v35 = vadd.f32 %v6107_v57, %v6095_v41  ;;  %v8285_v7 = vor.u32 %v10177_v59, %v8284_v58  ;;  %v8032_v4 = vld [vmem:[%s15853_s10 + $0x48] sm:$0xf]  ;;  %v9292_v58 = vld [vmem:[%s15853_s10 + $0xa20] sm:$0xf]  ;;  %v10429_v59 = vld [vmem:[%s15853_s10 + $0xa38] sm:$0xf0] }
 0x402   :  { %v6122_v29 = vpop.f32.mrf.mxu0  ;;  %v6135_v46 = vpop.f32.mrf.mxu1  ;;  %v6121_v52 = vadd.f32 %v6120_v2, %v6108_v35 }
 0x403   :  { %6347 = vmatpush.bf16.msra.mxu2 %v8145_v30  ;;  %6360 = vmatpush.bf16.msra.mxu3 %v8369_v62  ;;  %v10226_v30 = vld [vmem:[%s15853_s10 + $0x3e0] sm:$0xf0]  ;;  %v8704_v62 = vld [vmem:[%s15853_s10 + $0x588] sm:$0xf]  ;;  %v9293_v29 = vor.u32 %v10429_v59, %v9292_v58  ;;  %v10457_v58 = vld [vmem:[%s15853_s10 + $0xb18] sm:$0xf0] }
 0x404   :  { %6373 = vmatpush.bf16.msrb.mxu0 %v8593_v20  ;;  %6386 = vmatpush.bf16.msrb.mxu1 %v8817_v13  ;;  %v6134_v20 = vadd.f32 %v6133_v3, %v6121_v52  ;;  %v8033_v13 = vor.u32 %v10114_v37, %v8032_v4  ;;  %v8481_v63 = vor.u32 %v10226_v30, %v8480_v61  ;;  %v8452_v3 = vld [vmem:[%s15853_s10 + $0x390] sm:$0xf]  ;;  %v9040_v46 = vld [vmem:[%s15853_s10 + $0x828] sm:$0xf]  ;;  %v10534_v61 = vld [vmem:[%s15853_s10 + $0xd80] sm:$0xf0] }
 0x405   :  { %v8705_v55 = vor.u32 %v10282_v36, %v8704_v62  ;;  %v6096_v0 = vpop.f32.mrf.mxu2  ;;  %v6109_v2 = vpop.f32.mrf.mxu3  ;;  %v9741_v4 = vor.u32 %v10541_v6, %v9740_v42  ;;  %v9264_v37 = vld [vmem:[%s15853_s10 + $0x9e8] sm:$0xf]  ;;  %v9012_v62 = vld [vmem:[%s15853_s10 + $0x7f0] sm:$0xf]  ;;  %v10359_v36 = vld [vmem:[%s15853_s10 + $0x808] sm:$0xf0] }
 0x406   :  { %10584 = vtanh.f32 %v6134_v20  ;;  %v9713_v20 = vor.u32 %v10534_v61, %v9712_v54  ;;  %v9013_v2 = vor.u32 %v10359_v36, %v9012_v62  ;;  %v9628_v59 = vld [vmem:[%s15853_s10 + $0xcc0] sm:$0xf]  ;;  %v8900_v54 = vld [vmem:[%s15853_s10 + $0x710] sm:$0xf]  ;;  %v10387_v36 = vld [vmem:[%s15853_s10 + $0x8e8] sm:$0xf0] }
 0x407   :  { %6348 = vmatpush.bf16.msra.mxu2 %v8117_v8  ;;  %6361 = vmatpush.bf16.msra.mxu3 %v8341_v34  ;;  %v10219_v8 = vld [vmem:[%s15853_s10 + $0x3a8] sm:$0xf0]  ;;  %v8676_v34 = vld [vmem:[%s15853_s10 + $0x550] sm:$0xf] }
 0x408   :  { %6374 = vmatpush.bf16.msrb.mxu0 %v8565_v17  ;;  %6387 = vmatpush.bf16.msrb.mxu1 %v8789_v22  ;;  %v10380_v17 = vld [vmem:[%s15853_s10 + $0x8b0] sm:$0xf0]  ;;  %v9320_v22 = vld [vmem:[%s15853_s10 + $0xa58] sm:$0xf]  ;;  %v8677_v33 = vor.u32 %v10275_v14, %v8676_v34  ;;  %v9461_v14 = vor.u32 %v10471_v31, %v9460_v49  ;;  %v9124_v62 = vld [vmem:[%s15853_s10 + $0x8d0] sm:$0xf] }
 0x409   :  { %v9097_v18 = vor.u32 %v10380_v17, %v9096_v60  ;;  %v9321_v51 = vor.u32 %v10436_v1, %v9320_v22  ;;  %v10352_v34 = vld [vmem:[%s15853_s10 + $0x7d0] sm:$0xf0]  ;;  %v9208_v17 = vld [vmem:[%s15853_s10 + $0x978] sm:$0xf]  ;;  %v9348_v49 = vld [vmem:[%s15853_s10 + $0xa90] sm:$0xf] }
 0x40a   :  { %v10408_v22 = vld [vmem:[%s15853_s10 + $0x990] sm:$0xf0]  ;;  %v9432_v1 = vld [vmem:[%s15853_s10 + $0xb38] sm:$0xf]  ;;  %v10443_v31 = vld [vmem:[%s15853_s10 + $0xaa8] sm:$0xf0] }
 0x40b   :  { %6349 = vmatpush.bf16.msra.mxu2 %v8089_v28  ;;  %6362 = vmatpush.bf16.msra.mxu3 %v8313_v32  ;;  %v10548_v28 = vld [vmem:[%s15853_s10 + $0xdf0] sm:$0xf0]  ;;  %v8453_v32 = vor.u32 %v10219_v8, %v8452_v3  ;;  %v8984_v8 = vld [vmem:[%s15853_s10 + $0x7b8] sm:$0xf] }
 0x40c   :  { %6375 = vmatpush.bf16.msrb.mxu0 %v8537_v38  ;;  %6388 = vmatpush.bf16.msrb.mxu1 %v8761_v39  ;;  %v9068_v38 = vld [vmem:[%s15853_s10 + $0x860] sm:$0xf]  ;;  %v10373_v39 = vld [vmem:[%s15853_s10 + $0x878] sm:$0xf0]  ;;  %v9769_v57 = vor.u32 %v10548_v28, %v9768_v43  ;;  %v10585_v41 = vpop.eup %10584  ;;  %v8985_v27 = vor.u32 %v10352_v34, %v8984_v8  ;;  %v9209_v43 = vor.u32 %v10408_v22, %v9208_v17  ;;  %v8426_v34 = vld [vmem:[%s15853_s10 + $0x374] sm:$0xf0] }
 0x40d   :  { %6665 = vst [vmem:[#allocation2 + $0x8] sm:$0xff] %v10585_v41  ;;  %v9069_v35 = vor.u32 %v10373_v39, %v9068_v38  ;;  %v8956_v28 = vld [vmem:[%s15853_s10 + $0x780] sm:$0xf]  ;;  %v10209_v8 = vld [vmem:[%s15853_s10 + $0x35c] sm:$0xf]  ;;  %v9125_v17 = vor.u32 %v10387_v36, %v9124_v62 }
 0x40e   :  { %v9180_v39 = vld [vmem:[%s15853_s10 + $0x940] sm:$0xf]  ;;  %v8650_v22 = vld [vmem:[%s15853_s10 + $0x534] sm:$0xf0]  ;;  %v8118_v62 = vld [vmem:[%s15853_s10 + $0x10c] sm:$0xf0] }
 0x40f   :  { %6350 = vmatpush.bf16.msra.mxu2 %v8061_v16  ;;  %6363 = vmatpush.bf16.msra.mxu3 %v8285_v7  ;;  %v10366_v16 = vld [vmem:[%s15853_s10 + $0x840] sm:$0xf0]  ;;  %v9517_v7 = vor.u32 %v10485_v45, %v9516_v40  ;;  %v10513_v40 = vld [vmem:[%s15853_s10 + $0xcd8] sm:$0xf0] }
 0x410   :  { %6376 = vmatpush.bf16.msrb.mxu0 %v8509_v15  ;;  %6389 = vmatpush.bf16.msrb.mxu1 %v8733_v50  ;;  %v10422_v15 = vld [vmem:[%s15853_s10 + $0xa00] sm:$0xf0]  ;;  %v9488_v50 = vld [vmem:[%s15853_s10 + $0xba8] sm:$0xf]  ;;  %v9041_v52 = vor.u32 %v10366_v16, %v9040_v46  ;;  %v9629_v16 = vor.u32 %v10513_v40, %v9628_v59  ;;  %v8622_v40 = vld [vmem:[%s15853_s10 + $0x4fc] sm:$0xf0] }
 0x411   :  { %v9265_v30 = vor.u32 %v10422_v15, %v9264_v37  ;;  %v9489_v5 = vor.u32 %v10478_v53, %v9488_v50  ;;  %v9376_v37 = vld [vmem:[%s15853_s10 + $0xac8] sm:$0xf]  ;;  %v10450_v15 = vld [vmem:[%s15853_s10 + $0xae0] sm:$0xf0] }
 0x412   :  { %v9600_v50 = vld [vmem:[%s15853_s10 + $0xc88] sm:$0xf]  ;;  %v10506_v53 = vld [vmem:[%s15853_s10 + $0xca0] sm:$0xf0] }
 0x413   :  { %6351 = vmatpush.bf16.msra.mxu2 %v8033_v13  ;;  %6364 = vmatpush.bf16.msra.mxu3 %v8257_v48  ;;  %v9236_v13 = vld [vmem:[%s15853_s10 + $0x9b0] sm:$0xf]  ;;  %v10415_v48 = vld [vmem:[%s15853_s10 + $0x9c8] sm:$0xf0]  ;;  %v10258_v59 = vld [vmem:[%s15853_s10 + $0x4e4] sm:$0xf] }
 0x414   :  { %6377 = vmatpush.bf16.msrb.mxu0 %v8481_v63  ;;  %6390 = vmatpush.bf16.msrb.mxu1 %v8705_v55  ;;  %v10527_v63 = vld [vmem:[%s15853_s10 + $0xd48] sm:$0xf0]  ;;  %v9237_v3 = vor.u32 %v10415_v48, %v9236_v13 }
 0x415   :  { %v9685_v60 = vor.u32 %v10527_v63, %v9684_v56  ;;  %v9572_v56 = vld [vmem:[%s15853_s10 + $0xc50] sm:$0xf]  ;;  %v10499_v63 = vld [vmem:[%s15853_s10 + $0xc68] sm:$0xf0] }
 0x417   :  { %6352 = vmatpush.bf16.msra.mxu2 %v8005_v24  ;;  %6365 = vmatpush.bf16.msra.mxu3 %v8229_v26  ;;  %v9656_v24 = vld [vmem:[%s15853_s10 + $0xcf8] sm:$0xf]  ;;  %v10520_v26 = vld [vmem:[%s15853_s10 + $0xd10] sm:$0xf0] }
 0x418   :  { %6378 = vmatpush.bf16.msrb.mxu0 %v8453_v32  ;;  %6391 = vmatpush.bf16.msrb.mxu1 %v8677_v33  ;;  %v10345_v32 = vld [vmem:[%s15853_s10 + $0x798] sm:$0xf0]  ;;  %v9433_v33 = vor.u32 %v10464_v23, %v9432_v1  ;;  %v8874_v23 = vld [vmem:[%s15853_s10 + $0x6f4] sm:$0xf0] }
 0x419   :  { %v8957_v42 = vor.u32 %v10345_v32, %v8956_v28  ;;  %v10321_v1 = vld [vmem:[%s15853_s10 + $0x6dc] sm:$0xf]  ;;  %v8429_v32 = vor.u32 %v10209_v8, %v8426_v34 }
 0x41a   :  { %6353 = vmatmul.bf16.vlgmr.msra.gmra.mxu2 %v13408_v47  ;;  %6366 = vmatmul.bf16.vlgmr.msra.gmra.mxu3 %v13410_v11  ;;  %v14911_v55 = vpop.f32.mrf.mxu0  ;;  %v14913_v0 = vpop.f32.mrf.mxu1  ;;  %v10125_v34 = vld [vmem:[%s15853_s10 + $0xbc] sm:$0xf] }
 0x41b   :  { %6397 = vmatpush.bf16.msrb.mxu2 %v9097_v18  ;;  %6410 = vmatpush.bf16.msrb.mxu3 %v9321_v51  ;;  %v9657_v18 = vor.u32 %v10520_v26, %v9656_v24  ;;  %v9349_v24 = vor.u32 %v10443_v31, %v9348_v49  ;;  %v9573_v26 = vor.u32 %v10499_v63, %v9572_v56  ;;  %v10300_v49 = vld [vmem:[%s15853_s10 + $0x634] sm:$0xf]  ;;  %v8790_v31 = vld [vmem:[%s15853_s10 + $0x64c] sm:$0xf0] }
 0x41c   :  { %6423 = vmatpush.bf16.msra.mxu0 %v9545_v10  ;;  %6436 = vmatpush.bf16.msra.mxu1 %v9769_v57  ;;  %v10401_v10 = vld [vmem:[%s15853_s10 + $0x958] sm:$0xf0]  ;;  %v9404_v57 = vld [vmem:[%s15853_s10 + $0xb00] sm:$0xf] }
 0x41d   :  { %6379 = vmatmul.bf16.vlgmr.msrb.gmra.mxu0 %v13412_v12  ;;  %6392 = vmatmul.bf16.vlgmr.msrb.gmra.mxu1 %v13424_v21  ;;  %v14945_v51 = vpop.f32.mrf.mxu2  ;;  %v14947_v38 = vpop.f32.mrf.mxu3  ;;  %v9181_v6 = vor.u32 %v10401_v10, %v9180_v39  ;;  %v9405_v46 = vor.u32 %v10457_v58, %v9404_v57  ;;  %v8877_v10 = vor.u32 %v10321_v1, %v8874_v23  ;;  %v10202_v57 = vld [vmem:[%s15853_s10 + $0x324] sm:$0xf]  ;;  %v8398_v58 = vld [vmem:[%s15853_s10 + $0x33c] sm:$0xf0]  ;;  %v10237_v1 = vld [vmem:[%s15853_s10 + $0x43c] sm:$0xf] }
 0x41e   :  { %v8538_v23 = vld [vmem:[%s15853_s10 + $0x454] sm:$0xf0] }
 0x41f   :  { %6398 = vmatpush.bf16.msrb.mxu2 %v9069_v35  ;;  %6411 = vmatpush.bf16.msrb.mxu3 %v9293_v29  ;;  %v8928_v35 = vld [vmem:[%s15853_s10 + $0x748] sm:$0xf]  ;;  %v10338_v29 = vld [vmem:[%s15853_s10 + $0x760] sm:$0xf0] }
 0x420   :  { %6424 = vmatpush.bf16.msra.mxu0 %v9517_v7  ;;  %6437 = vmatpush.bf16.msra.mxu1 %v9741_v4  ;;  %v9152_v7 = vld [vmem:[%s15853_s10 + $0x908] sm:$0xf]  ;;  %v10394_v4 = vld [vmem:[%s15853_s10 + $0x920] sm:$0xf0]  ;;  %v8929_v61 = vor.u32 %v10338_v29, %v8928_v35  ;;  %v8401_v35 = vor.u32 %v10202_v57, %v8398_v58  ;;  %v10139_v29 = vld [vmem:[%s15853_s10 + $0x12c] sm:$0xf] }
 0x422   :  { %v6174_v41 = vpop.f32.mrf.mxu0  ;;  %v6187_v45 = vpop.f32.mrf.mxu1 }
 0x423   :  { %6399 = vmatpush.bf16.msrb.mxu2 %v9041_v52  ;;  %6412 = vmatpush.bf16.msrb.mxu3 %v9265_v30  ;;  %v9153_v52 = vor.u32 %v10394_v4, %v9152_v7  ;;  %v10331_v30 = vld [vmem:[%s15853_s10 + $0x728] sm:$0xf0]  ;;  %v10314_v41 = vld [vmem:[%s15853_s10 + $0x6a4] sm:$0xf]  ;;  %v8846_v45 = vld [vmem:[%s15853_s10 + $0x6bc] sm:$0xf0] }
 0x424   :  { %6425 = vmatpush.bf16.msra.mxu0 %v9489_v5  ;;  %6438 = vmatpush.bf16.msra.mxu1 %v9713_v20  ;;  %v9377_v5 = vor.u32 %v10450_v15, %v9376_v37  ;;  %v9601_v20 = vor.u32 %v10506_v53, %v9600_v50  ;;  %v8849_v7 = vor.u32 %v10314_v41, %v8846_v45  ;;  %v8370_v4 = vld [vmem:[%s15853_s10 + $0x304] sm:$0xf0]  ;;  %v10251_v37 = vld [vmem:[%s15853_s10 + $0x4ac] sm:$0xf]  ;;  %v8510_v45 = vld [vmem:[%s15853_s10 + $0x41c] sm:$0xf0] }
 0x425   :  { %v6148_v13 = vpop.f32.mrf.mxu2  ;;  %v6161_v48 = vpop.f32.mrf.mxu3  ;;  %v8594_v15 = vld [vmem:[%s15853_s10 + $0x4c4] sm:$0xf0]  ;;  %v10307_v50 = vld [vmem:[%s15853_s10 + $0x66c] sm:$0xf] }
 0x426   :  { %v8818_v53 = vld [vmem:[%s15853_s10 + $0x684] sm:$0xf0]  ;;  %v8597_v36 = vor.u32 %v10251_v37, %v8594_v15  ;;  %v10244_v13 = vld [vmem:[%s15853_s10 + $0x474] sm:$0xf]  ;;  %v8566_v48 = vld [vmem:[%s15853_s10 + $0x48c] sm:$0xf0] }
 0x427   :  { %6400 = vmatpush.bf16.msrb.mxu2 %v9013_v2  ;;  %6413 = vmatpush.bf16.msrb.mxu3 %v9237_v3  ;;  %v10153_v2 = vld [vmem:[%s15853_s10 + $0x19c] sm:$0xf]  ;;  %v8202_v3 = vld [vmem:[%s15853_s10 + $0x1b4] sm:$0xf0] }
 0x428   :  { %6426 = vmatpush.bf16.msra.mxu0 %v9461_v14  ;;  %6439 = vmatpush.bf16.msra.mxu1 %v9685_v60  ;;  %v10265_v14 = vld [vmem:[%s15853_s10 + $0x51c] sm:$0xf]  ;;  %v8901_v60 = vor.u32 %v10331_v30, %v8900_v54  ;;  %v8205_v28 = vor.u32 %v10153_v2, %v8202_v3  ;;  %v10132_v30 = vld [vmem:[%s15853_s10 + $0xf4] sm:$0xf] }
 0x429   :  { %v8653_v39 = vor.u32 %v10265_v14, %v8650_v22  ;;  %v8121_v3 = vor.u32 %v10132_v30, %v8118_v62  ;;  %v8090_v14 = vld [vmem:[%s15853_s10 + $0xd4] sm:$0xf0]  ;;  %v10279_v30 = vld [vmem:[%s15853_s10 + $0x58c] sm:$0xf]  ;;  %v8706_v62 = vld [vmem:[%s15853_s10 + $0x5a4] sm:$0xf0] }
 0x42a   :  { %v8314_v22 = vld [vmem:[%s15853_s10 + $0x294] sm:$0xf0] }
 0x42b   :  { %6401 = vmatpush.bf16.msrb.mxu2 %v8985_v27  ;;  %6414 = vmatpush.bf16.msrb.mxu3 %v9209_v43  ;;  %v15042_v27 = vld [vmem:[%s15854_s11] sm:$0x7f] }
 0x42c   :  { %6427 = vmatpush.bf16.msra.mxu0 %v9433_v33  ;;  %6440 = vmatpush.bf16.msra.mxu1 %v9657_v18  ;;  %v3613_v43 = vperm.slane %v15042_v27, 2  ;;  %v10146_v33 = vld [vmem:[%s15853_s10 + $0x164] sm:$0xf]  ;;  %v8174_v18 = vld [vmem:[%s15853_s10 + $0x17c] sm:$0xf0] }
 0x42f   :  { %6402 = vmatpush.bf16.msrb.mxu2 %v8957_v42  ;;  %6415 = vmatpush.bf16.msrb.mxu3 %v9181_v6  ;;  %v6147_v42 = vadd.f32 %v14945_v51, %v3613_v43  ;;  %v8177_v6 = vor.u32 %v10146_v33, %v8174_v18  ;;  %v10195_v51 = vld [vmem:[%s15853_s10 + $0x2ec] sm:$0xf]  ;;  %v8093_v43 = vor.u32 %v10125_v34, %v8090_v14  ;;  %v10118_v33 = vld [vmem:[%s15853_s10 + $0x84] sm:$0xf]  ;;  %v8062_v18 = vld [vmem:[%s15853_s10 + $0x9c] sm:$0xf0] }
 0x430   :  { %6428 = vmatpush.bf16.msra.mxu0 %v9405_v46  ;;  %6441 = vmatpush.bf16.msra.mxu1 %v9629_v16  ;;  %v8146_v46 = vld [vmem:[%s15853_s10 + $0x144] sm:$0xf0]  ;;  %v8625_v16 = vor.u32 %v10258_v59, %v8622_v40  ;;  %v10174_v59 = vld [vmem:[%s15853_s10 + $0x244] sm:$0xf]  ;;  %v10272_v34 = vld [vmem:[%s15853_s10 + $0x554] sm:$0xf] }
 0x431   :  { %v6160_v54 = vadd.f32 %v14947_v38, %v6147_v42  ;;  %v10188_v38 = vld [vmem:[%s15853_s10 + $0x2b4] sm:$0xf]  ;;  %v10230_v40 = vld [vmem:[%s15853_s10 + $0x404] sm:$0xf]  ;;  %v8678_v14 = vld [vmem:[%s15853_s10 + $0x56c] sm:$0xf0] }
 0x432   :  { %v10286_v42 = vld [vmem:[%s15853_s10 + $0x5c4] sm:$0xf]  ;;  %v8513_v37 = vor.u32 %v10230_v40, %v8510_v45  ;;  %v9294_v40 = vld [vmem:[%s15853_s10 + $0xa3c] sm:$0xf0] }
 0x433   :  { %6403 = vmatpush.bf16.msrb.mxu2 %v8929_v61  ;;  %6416 = vmatpush.bf16.msrb.mxu3 %v9153_v52  ;;  %v8149_v61 = vor.u32 %v10139_v29, %v8146_v46  ;;  %v8373_v52 = vor.u32 %v10195_v51, %v8370_v4  ;;  %v6173_v56 = vadd.f32 %v14911_v55, %v6160_v54  ;;  %v10181_v55 = vld [vmem:[%s15853_s10 + $0x27c] sm:$0xf]  ;;  %v10111_v51 = vld [vmem:[%s15853_s10 + $0x4c] sm:$0xf]  ;;  %v8034_v4 = vld [vmem:[%s15853_s10 + $0x64] sm:$0xf0] }
 0x434   :  { %6429 = vmatpush.bf16.msra.mxu0 %v9377_v5  ;;  %6442 = vmatpush.bf16.msra.mxu1 %v9601_v20  ;;  %v8821_v5 = vor.u32 %v10307_v50, %v8818_v53  ;;  %v8342_v20 = vld [vmem:[%s15853_s10 + $0x2cc] sm:$0xf0]  ;;  %v10167_v50 = vld [vmem:[%s15853_s10 + $0x20c] sm:$0xf]  ;;  %v8258_v53 = vld [vmem:[%s15853_s10 + $0x224] sm:$0xf0] }
 0x435   :  { %v8345_v8 = vor.u32 %v10188_v38, %v8342_v20  ;;  %v10223_v54 = vld [vmem:[%s15853_s10 + $0x3cc] sm:$0xf]  ;;  %v8037_v38 = vor.u32 %v10111_v51, %v8034_v4  ;;  %v8261_v20 = vor.u32 %v10167_v50, %v8258_v53  ;;  %v9490_v53 = vld [vmem:[%s15853_s10 + $0xbc4] sm:$0xf0] }
 0x436   :  { %v10475_v50 = vld [vmem:[%s15853_s10 + $0xbac] sm:$0xf] }
 0x437   :  { %6404 = vmatpush.bf16.msrb.mxu2 %v8901_v60  ;;  %6417 = vmatpush.bf16.msrb.mxu3 %v9125_v17  ;;  %v8569_v60 = vor.u32 %v10244_v13, %v8566_v48  ;;  %v8793_v17 = vor.u32 %v10300_v49, %v8790_v31  ;;  %v8006_v13 = vld [vmem:[%s15853_s10 + $0x2c] sm:$0xf0]  ;;  %v10160_v48 = vld [vmem:[%s15853_s10 + $0x1d4] sm:$0xf] }
 0x438   :  { %6430 = vmatpush.bf16.msra.mxu0 %v9349_v24  ;;  %6443 = vmatpush.bf16.msra.mxu1 %v9573_v26  ;;  %v10293_v24 = vld [vmem:[%s15853_s10 + $0x5fc] sm:$0xf]  ;;  %v8762_v26 = vld [vmem:[%s15853_s10 + $0x614] sm:$0xf0]  ;;  %v8230_v49 = vld [vmem:[%s15853_s10 + $0x1ec] sm:$0xf0] }
 0x43a   :  { %6405 = vmatmul.bf16.vlgmr.msrb.gmra.mxu2 %v13523_v9  ;;  %6418 = vmatmul.bf16.vlgmr.msrb.gmra.mxu3 %v13525_v44  ;;  %v6224_v63 = vpop.f32.mrf.mxu0  ;;  %v6237_v2 = vpop.f32.mrf.mxu1 }
 0x43b   :  { %6449 = vmatpush.bf16.msra.mxu2 %v8205_v28  ;;  %6462 = vmatpush.bf16.msra.mxu3 %v8429_v32  ;;  %v8317_v28 = vor.u32 %v10181_v55, %v8314_v22  ;;  %v6186_v32 = vadd.f32 %v14913_v0, %v6173_v56  ;;  %v8286_v0 = vld [vmem:[%s15853_s10 + $0x25c] sm:$0xf0]  ;;  %v8709_v56 = vor.u32 %v10279_v30, %v8706_v62  ;;  %v10433_v55 = vld [vmem:[%s15853_s10 + $0xa5c] sm:$0xf]  ;;  %v9322_v22 = vld [vmem:[%s15853_s10 + $0xa74] sm:$0xf0] }
 0x43c   :  { %6475 = vmatpush.bf16.msrb.mxu0 %v8653_v39  ;;  %6488 = vmatpush.bf16.msrb.mxu1 %v8877_v10  ;;  %v8541_v39 = vor.u32 %v10237_v1, %v8538_v23  ;;  %v8765_v10 = vor.u32 %v10293_v24, %v8762_v26  ;;  %v10489_v1 = vld [vmem:[%s15853_s10 + $0xc1c] sm:$0xf]  ;;  %v8233_v24 = vor.u32 %v10160_v48, %v8230_v49  ;;  %v9546_v26 = vld [vmem:[%s15853_s10 + $0xc34] sm:$0xf0]  ;;  %v10356_v62 = vld [vmem:[%s15853_s10 + $0x7f4] sm:$0xf] }
 0x43d   :  { %6431 = vmatmul.bf16.vlgmr.msra.gmra.mxu0 %v13535_v25  ;;  %6444 = vmatmul.bf16.vlgmr.msra.gmra.mxu1 %v13533_v19  ;;  %v6198_v57 = vpop.f32.mrf.mxu2  ;;  %v6211_v58 = vpop.f32.mrf.mxu3  ;;  %v10468_v48 = vld [vmem:[%s15853_s10 + $0xb74] sm:$0xf]  ;;  %v9462_v49 = vld [vmem:[%s15853_s10 + $0xb8c] sm:$0xf0] }
 0x43e   :  { %v6199_v41 = vadd.f32 %v6198_v57, %v6186_v32  ;;  %v9070_v57 = vld [vmem:[%s15853_s10 + $0x87c] sm:$0xf0] }
 0x43f   :  { %6450 = vmatpush.bf16.msra.mxu2 %v8177_v6  ;;  %6463 = vmatpush.bf16.msra.mxu3 %v8401_v35  ;;  %v8734_v6 = vld [vmem:[%s15853_s10 + $0x5dc] sm:$0xf0] }
 0x440   :  { %6476 = vmatpush.bf16.msrb.mxu0 %v8625_v16  ;;  %6489 = vmatpush.bf16.msrb.mxu1 %v8849_v7  ;;  %v6212_v35 = vadd.f32 %v6211_v58, %v6199_v41  ;;  %v8065_v16 = vor.u32 %v10118_v33, %v8062_v18  ;;  %v8289_v7 = vor.u32 %v10174_v59, %v8286_v0  ;;  %v10426_v0 = vld [vmem:[%s15853_s10 + $0xa24] sm:$0xf] }
 0x441   :  { %v8737_v15 = vor.u32 %v10286_v42, %v8734_v6  ;;  %v8681_v33 = vor.u32 %v10272_v34, %v8678_v14  ;;  %v9549_v58 = vor.u32 %v10489_v1, %v9546_v26  ;;  %v10482_v41 = vld [vmem:[%s15853_s10 + $0xbe4] sm:$0xf]  ;;  %v9518_v42 = vld [vmem:[%s15853_s10 + $0xbfc] sm:$0xf0]  ;;  %v10349_v34 = vld [vmem:[%s15853_s10 + $0x7bc] sm:$0xf] }
 0x442   :  { %v6226_v29 = vpop.f32.mrf.mxu0  ;;  %v6239_v46 = vpop.f32.mrf.mxu1  ;;  %v10538_v6 = vld [vmem:[%s15853_s10 + $0xda4] sm:$0xf]  ;;  %v9521_v51 = vor.u32 %v10482_v41, %v9518_v42  ;;  %v8986_v14 = vld [vmem:[%s15853_s10 + $0x7d4] sm:$0xf0]  ;;  %v10461_v1 = vld [vmem:[%s15853_s10 + $0xb3c] sm:$0xf] }
 0x443   :  { %6451 = vmatpush.bf16.msra.mxu2 %v8149_v61  ;;  %6464 = vmatpush.bf16.msra.mxu3 %v8373_v52  ;;  %v6225_v61 = vadd.f32 %v6224_v63, %v6212_v35  ;;  %v8482_v52 = vld [vmem:[%s15853_s10 + $0x3e4] sm:$0xf0]  ;;  %v9742_v35 = vld [vmem:[%s15853_s10 + $0xdbc] sm:$0xf0]  ;;  %v9297_v46 = vor.u32 %v10426_v0, %v9294_v40  ;;  %v9658_v26 = vld [vmem:[%s15853_s10 + $0xd14] sm:$0xf0] }
 0x444   :  { %6477 = vmatpush.bf16.msrb.mxu0 %v8597_v36  ;;  %6490 = vmatpush.bf16.msrb.mxu1 %v8821_v5  ;;  %v10104_v36 = vld [vmem:[%s15853_s10 + $0x14] sm:$0xf]  ;;  %v8485_v31 = vor.u32 %v10223_v54, %v8482_v52  ;;  %v9745_v4 = vor.u32 %v10538_v6, %v9742_v35  ;;  %v10531_v54 = vld [vmem:[%s15853_s10 + $0xd6c] sm:$0xf]  ;;  %v10454_v0 = vld [vmem:[%s15853_s10 + $0xb04] sm:$0xf] }
 0x445   :  { %v6238_v5 = vadd.f32 %v6237_v2, %v6225_v61  ;;  %v6200_v63 = vpop.f32.mrf.mxu2  ;;  %v6213_v2 = vpop.f32.mrf.mxu3  ;;  %v8009_v23 = vor.u32 %v10104_v36, %v8006_v13  ;;  %v9714_v61 = vld [vmem:[%s15853_s10 + $0xd84] sm:$0xf0]  ;;  %v9014_v36 = vld [vmem:[%s15853_s10 + $0x80c] sm:$0xf0]  ;;  %v9406_v40 = vld [vmem:[%s15853_s10 + $0xb1c] sm:$0xf0] }
 0x446   :  { %v9238_v13 = vld [vmem:[%s15853_s10 + $0x9cc] sm:$0xf0]  ;;  %v10510_v41 = vld [vmem:[%s15853_s10 + $0xcc4] sm:$0xf] }
 0x447   :  { %6452 = vmatpush.bf16.msra.mxu2 %v8121_v3  ;;  %6465 = vmatpush.bf16.msra.mxu3 %v8345_v8  ;;  %v10216_v3 = vld [vmem:[%s15853_s10 + $0x394] sm:$0xf]  ;;  %v8454_v8 = vld [vmem:[%s15853_s10 + $0x3ac] sm:$0xf0]  ;;  %10586 = vtanh.f32 %v6238_v5  ;;  %v9493_v5 = vor.u32 %v10475_v50, %v9490_v53  ;;  %v9378_v50 = vld [vmem:[%s15853_s10 + $0xae4] sm:$0xf0] }
 0x448   :  { %6478 = vmatpush.bf16.msrb.mxu0 %v8569_v60  ;;  %6491 = vmatpush.bf16.msrb.mxu1 %v8793_v17  ;;  %v10377_v60 = vld [vmem:[%s15853_s10 + $0x89c] sm:$0xf]  ;;  %v9098_v17 = vld [vmem:[%s15853_s10 + $0x8b4] sm:$0xf0]  ;;  %v8457_v32 = vor.u32 %v10216_v3, %v8454_v8  ;;  %v9017_v3 = vor.u32 %v10356_v62, %v9014_v36  ;;  %v10503_v53 = vld [vmem:[%s15853_s10 + $0xc8c] sm:$0xf] }
 0x449   :  { %v9101_v18 = vor.u32 %v10377_v60, %v9098_v17  ;;  %v9465_v60 = vor.u32 %v10468_v48, %v9462_v49  ;;  %v8902_v62 = vld [vmem:[%s15853_s10 + $0x72c] sm:$0xf0]  ;;  %v10384_v36 = vld [vmem:[%s15853_s10 + $0x8d4] sm:$0xf] }
 0x44a   :  { %v10440_v49 = vld [vmem:[%s15853_s10 + $0xa94] sm:$0xf] }
 0x44b   :  { %6453 = vmatpush.bf16.msra.mxu2 %v8093_v43  ;;  %6466 = vmatpush.bf16.msra.mxu3 %v8317_v28  ;;  %v10545_v43 = vld [vmem:[%s15853_s10 + $0xddc] sm:$0xf]  ;;  %v9770_v28 = vld [vmem:[%s15853_s10 + $0xdf4] sm:$0xf0] }
 0x44c   :  { %6479 = vmatpush.bf16.msrb.mxu0 %v8541_v39  ;;  %6492 = vmatpush.bf16.msrb.mxu1 %v8765_v10  ;;  %v9325_v39 = vor.u32 %v10433_v55, %v9322_v22  ;;  %v10370_v10 = vld [vmem:[%s15853_s10 + $0x864] sm:$0xf]  ;;  %v9773_v59 = vor.u32 %v10545_v43, %v9770_v28  ;;  %v10405_v55 = vld [vmem:[%s15853_s10 + $0x97c] sm:$0xf]  ;;  %v9210_v22 = vld [vmem:[%s15853_s10 + $0x994] sm:$0xf0]  ;;  %v8989_v43 = vor.u32 %v10349_v34, %v8986_v14 }
 0x44d   :  { %v10587_v45 = vpop.eup %10586  ;;  %v9073_v29 = vor.u32 %v10370_v10, %v9070_v57  ;;  %v9213_v28 = vor.u32 %v10405_v55, %v9210_v22  ;;  %v10157_v34 = vld [vmem:[%s15853_s10 + $0x1b8] sm:$0xf0]  ;;  %v8432_v14 = vld [vmem:[%s15853_s10 + $0x360] sm:$0xf] }
 0x44e   :  { %6666 = vst [vmem:[#allocation2 + $0x10] sm:$0xff] %v10587_v45  ;;  %v9630_v45 = vld [vmem:[%s15853_s10 + $0xcdc] sm:$0xf0] }
 0x44f   :  { %6454 = vmatpush.bf16.msra.mxu2 %v8065_v16  ;;  %6467 = vmatpush.bf16.msra.mxu3 %v8289_v7  ;;  %v10363_v16 = vld [vmem:[%s15853_s10 + $0x82c] sm:$0xf]  ;;  %v9042_v7 = vld [vmem:[%s15853_s10 + $0x844] sm:$0xf0] }
 0x450   :  { %6480 = vmatpush.bf16.msrb.mxu0 %v8513_v37  ;;  %6493 = vmatpush.bf16.msrb.mxu1 %v8737_v15  ;;  %v10419_v37 = vld [vmem:[%s15853_s10 + $0x9ec] sm:$0xf]  ;;  %v9266_v15 = vld [vmem:[%s15853_s10 + $0xa04] sm:$0xf0]  ;;  %v9045_v52 = vor.u32 %v10363_v16, %v9042_v7  ;;  %v9409_v7 = vor.u32 %v10454_v0, %v9406_v40 }
 0x451   :  { %v9269_v30 = vor.u32 %v10419_v37, %v9266_v15  ;;  %v8930_v16 = vld [vmem:[%s15853_s10 + $0x764] sm:$0xf0]  ;;  %v10447_v15 = vld [vmem:[%s15853_s10 + $0xacc] sm:$0xf] }
 0x452   :  { %v9154_v37 = vld [vmem:[%s15853_s10 + $0x924] sm:$0xf0] }
 0x453   :  { %6455 = vmatpush.bf16.msra.mxu2 %v8037_v38  ;;  %6468 = vmatpush.bf16.msra.mxu3 %v8261_v20  ;;  %v9717_v38 = vor.u32 %v10531_v54, %v9714_v61  ;;  %v10412_v20 = vld [vmem:[%s15853_s10 + $0x9b4] sm:$0xf]  ;;  %v9602_v54 = vld [vmem:[%s15853_s10 + $0xca4] sm:$0xf0] }
 0x454   :  { %6481 = vmatpush.bf16.msrb.mxu0 %v8485_v31  ;;  %6494 = vmatpush.bf16.msrb.mxu1 %v8709_v56  ;;  %v10524_v31 = vld [vmem:[%s15853_s10 + $0xd34] sm:$0xf]  ;;  %v9686_v56 = vld [vmem:[%s15853_s10 + $0xd4c] sm:$0xf0]  ;;  %v9241_v8 = vor.u32 %v10412_v20, %v9238_v13  ;;  %v9605_v20 = vor.u32 %v10503_v53, %v9602_v54  ;;  %v8404_v0 = vld [vmem:[%s15853_s10 + $0x328] sm:$0xf] }
 0x455   :  { %v9689_v17 = vor.u32 %v10524_v31, %v9686_v56  ;;  %v10328_v61 = vld [vmem:[%s15853_s10 + $0x714] sm:$0xf]  ;;  %v9350_v31 = vld [vmem:[%s15853_s10 + $0xaac] sm:$0xf0]  ;;  %v8628_v40 = vld [vmem:[%s15853_s10 + $0x4e8] sm:$0xf] }
 0x456   :  { %v10496_v56 = vld [vmem:[%s15853_s10 + $0xc54] sm:$0xf]  ;;  %v8905_v55 = vor.u32 %v10328_v61, %v8902_v62  ;;  %v10311_v53 = vld [vmem:[%s15853_s10 + $0x688] sm:$0xf0] }
 0x457   :  { %6456 = vmatpush.bf16.msra.mxu2 %v8009_v23  ;;  %6469 = vmatpush.bf16.msra.mxu3 %v8233_v24  ;;  %v9434_v23 = vld [vmem:[%s15853_s10 + $0xb54] sm:$0xf0]  ;;  %v10517_v24 = vld [vmem:[%s15853_s10 + $0xcfc] sm:$0xf]  ;;  %v10136_v62 = vld [vmem:[%s15853_s10 + $0x110] sm:$0xf0] }
 0x458   :  { %6482 = vmatpush.bf16.msrb.mxu0 %v8457_v32  ;;  %6495 = vmatpush.bf16.msrb.mxu1 %v8681_v33  ;;  %v10342_v32 = vld [vmem:[%s15853_s10 + $0x784] sm:$0xf]  ;;  %v8958_v33 = vld [vmem:[%s15853_s10 + $0x79c] sm:$0xf0] }
 0x459   :  { %v8961_v35 = vor.u32 %v10342_v32, %v8958_v33 }
 0x45a   :  { %6457 = vmatmul.bf16.vlgmr.msra.gmra.mxu2 %v13408_v47  ;;  %6470 = vmatmul.bf16.vlgmr.msra.gmra.mxu3 %v13410_v11  ;;  %v15321_v63 = vpop.f32.mrf.mxu0  ;;  %v15323_v2 = vpop.f32.mrf.mxu1 }
 0x45b   :  { %6501 = vmatpush.bf16.msrb.mxu2 %v9101_v18  ;;  %6514 = vmatpush.bf16.msrb.mxu3 %v9325_v39  ;;  %v9437_v18 = vor.u32 %v10461_v1, %v9434_v23  ;;  %v9661_v39 = vor.u32 %v10517_v24, %v9658_v26  ;;  %v10269_v1 = vld [vmem:[%s15853_s10 + $0x538] sm:$0xf0]  ;;  %v8880_v23 = vld [vmem:[%s15853_s10 + $0x6e0] sm:$0xf]  ;;  %v9353_v26 = vor.u32 %v10440_v49, %v9350_v31  ;;  %v10304_v49 = vld [vmem:[%s15853_s10 + $0x650] sm:$0xf0] }
 0x45c   :  { %6527 = vmatpush.bf16.msra.mxu0 %v9549_v58  ;;  %6540 = vmatpush.bf16.msra.mxu1 %v9773_v59  ;;  %v10398_v58 = vld [vmem:[%s15853_s10 + $0x944] sm:$0xf]  ;;  %v9182_v59 = vld [vmem:[%s15853_s10 + $0x95c] sm:$0xf0]  ;;  %v10325_v24 = vld [vmem:[%s15853_s10 + $0x6f8] sm:$0xf0] }
 0x45d   :  { %6483 = vmatmul.bf16.vlgmr.msrb.gmra.mxu0 %v13412_v12  ;;  %6496 = vmatmul.bf16.vlgmr.msrb.gmra.mxu1 %v13424_v21  ;;  %v15355_v10 = vpop.f32.mrf.mxu2  ;;  %v15357_v57 = vpop.f32.mrf.mxu3 }
 0x45f   :  { %6502 = vmatpush.bf16.msrb.mxu2 %v9073_v29  ;;  %6515 = vmatpush.bf16.msrb.mxu3 %v9297_v46  ;;  %v9185_v29 = vor.u32 %v10398_v58, %v9182_v59  ;;  %v10335_v46 = vld [vmem:[%s15853_s10 + $0x74c] sm:$0xf]  ;;  %v8881_v59 = vor.u32 %v10325_v24, %v8880_v23  ;;  %v10241_v23 = vld [vmem:[%s15853_s10 + $0x458] sm:$0xf0]  ;;  %v8768_v24 = vld [vmem:[%s15853_s10 + $0x600] sm:$0xf] }
 0x460   :  { %6528 = vmatpush.bf16.msra.mxu0 %v9521_v51  ;;  %6541 = vmatpush.bf16.msra.mxu1 %v9745_v4  ;;  %v9633_v51 = vor.u32 %v10510_v41, %v9630_v45  ;;  %v10391_v4 = vld [vmem:[%s15853_s10 + $0x90c] sm:$0xf]  ;;  %v10262_v41 = vld [vmem:[%s15853_s10 + $0x500] sm:$0xf0]  ;;  %v8852_v45 = vld [vmem:[%s15853_s10 + $0x6a8] sm:$0xf] }
 0x462   :  { %v6278_v42 = vpop.f32.mrf.mxu0  ;;  %v6291_v6 = vpop.f32.mrf.mxu1 }
 0x463   :  { %6503 = vmatpush.bf16.msrb.mxu2 %v9045_v52  ;;  %6516 = vmatpush.bf16.msrb.mxu3 %v9269_v30  ;;  %v8933_v52 = vor.u32 %v10335_v46, %v8930_v16  ;;  %v9157_v30 = vor.u32 %v10391_v4, %v9154_v37  ;;  %v10318_v42 = vld [vmem:[%s15853_s10 + $0x6c0] sm:$0xf0]  ;;  %v8152_v46 = vld [vmem:[%s15853_s10 + $0x130] sm:$0xf]  ;;  %v10143_v16 = vld [vmem:[%s15853_s10 + $0x148] sm:$0xf0] }
 0x464   :  { %6529 = vmatpush.bf16.msra.mxu0 %v9493_v5  ;;  %6542 = vmatpush.bf16.msra.mxu1 %v9717_v38  ;;  %v9126_v5 = vld [vmem:[%s15853_s10 + $0x8ec] sm:$0xf0]  ;;  %v9381_v38 = vor.u32 %v10447_v15, %v9378_v50  ;;  %v10199_v4 = vld [vmem:[%s15853_s10 + $0x308] sm:$0xf0]  ;;  %v8153_v61 = vor.u32 %v10143_v16, %v8152_v46 }
 0x465   :  { %v6252_v13 = vpop.f32.mrf.mxu2  ;;  %v6265_v48 = vpop.f32.mrf.mxu3  ;;  %v9129_v22 = vor.u32 %v10384_v36, %v9126_v5  ;;  %v8600_v37 = vld [vmem:[%s15853_s10 + $0x4b0] sm:$0xf]  ;;  %v10255_v15 = vld [vmem:[%s15853_s10 + $0x4c8] sm:$0xf0] }
 0x466   :  { %v8824_v50 = vld [vmem:[%s15853_s10 + $0x670] sm:$0xf]  ;;  %v8601_v36 = vor.u32 %v10255_v15, %v8600_v37  ;;  %v10248_v13 = vld [vmem:[%s15853_s10 + $0x490] sm:$0xf0]  ;;  %v8796_v48 = vld [vmem:[%s15853_s10 + $0x638] sm:$0xf] }
 0x467   :  { %6504 = vmatpush.bf16.msrb.mxu2 %v9017_v3  ;;  %6517 = vmatpush.bf16.msrb.mxu3 %v9241_v8  ;;  %v9574_v3 = vld [vmem:[%s15853_s10 + $0xc6c] sm:$0xf0]  ;;  %v8208_v8 = vld [vmem:[%s15853_s10 + $0x1a0] sm:$0xf]  ;;  %v8825_v5 = vor.u32 %v10311_v53, %v8824_v50  ;;  %v10171_v50 = vld [vmem:[%s15853_s10 + $0x228] sm:$0xf0] }
 0x468   :  { %6530 = vmatpush.bf16.msra.mxu0 %v9465_v60  ;;  %6543 = vmatpush.bf16.msra.mxu1 %v9689_v17  ;;  %v10213_v60 = vld [vmem:[%s15853_s10 + $0x378] sm:$0xf0]  ;;  %v8656_v17 = vld [vmem:[%s15853_s10 + $0x520] sm:$0xf]  ;;  %v8209_v32 = vor.u32 %v10157_v34, %v8208_v8  ;;  %v8264_v15 = vld [vmem:[%s15853_s10 + $0x210] sm:$0xf] }
 0x469   :  { %v8433_v33 = vor.u32 %v10213_v60, %v8432_v14  ;;  %v8657_v58 = vor.u32 %v10269_v1, %v8656_v17  ;;  %v8096_v14 = vld [vmem:[%s15853_s10 + $0xc0] sm:$0xf]  ;;  %v10129_v60 = vld [vmem:[%s15853_s10 + $0xd8] sm:$0xf0]  ;;  %v8488_v53 = vld [vmem:[%s15853_s10 + $0x3d0] sm:$0xf] }
 0x46a   :  { %v8544_v1 = vld [vmem:[%s15853_s10 + $0x440] sm:$0xf] }
 0x46b   :  { %6505 = vmatpush.bf16.msrb.mxu2 %v8989_v43  ;;  %6518 = vmatpush.bf16.msrb.mxu3 %v9213_v28  ;;  %v9577_v43 = vor.u32 %v10496_v56, %v9574_v3  ;;  %v3614_v28 = vperm.slane %v15042_v27, 3  ;;  %v10206_v27 = vld [vmem:[%s15853_s10 + $0x340] sm:$0xf0] }
 0x46c   :  { %6531 = vmatpush.bf16.msra.mxu0 %v9437_v18  ;;  %6544 = vmatpush.bf16.msra.mxu1 %v9661_v39  ;;  %v8180_v18 = vld [vmem:[%s15853_s10 + $0x168] sm:$0xf]  ;;  %v10150_v39 = vld [vmem:[%s15853_s10 + $0x180] sm:$0xf0] }
 0x46d   :  { %v6251_v6 = vadd.f32 %v15355_v10, %v3614_v28  ;;  %v8376_v10 = vld [vmem:[%s15853_s10 + $0x2f0] sm:$0xf] }
 0x46f   :  { %6506 = vmatpush.bf16.msrb.mxu2 %v8961_v35  ;;  %6519 = vmatpush.bf16.msrb.mxu3 %v9185_v29  ;;  %v8181_v35 = vor.u32 %v10150_v39, %v8180_v18  ;;  %v8405_v29 = vor.u32 %v10206_v27, %v8404_v0  ;;  %v6264_v54 = vadd.f32 %v15357_v57, %v6251_v6  ;;  %v8348_v57 = vld [vmem:[%s15853_s10 + $0x2b8] sm:$0xf]  ;;  %v10122_v18 = vld [vmem:[%s15853_s10 + $0xa0] sm:$0xf0]  ;;  %v8292_v27 = vld [vmem:[%s15853_s10 + $0x248] sm:$0xf] }
 0x470   :  { %6532 = vmatpush.bf16.msra.mxu0 %v9409_v7  ;;  %6545 = vmatpush.bf16.msra.mxu1 %v9633_v51  ;;  %v8629_v7 = vor.u32 %v10262_v41, %v8628_v40  ;;  %v8853_v51 = vor.u32 %v10318_v42, %v8852_v45  ;;  %v8545_v39 = vor.u32 %v10241_v23, %v8544_v1  ;;  %v8516_v40 = vld [vmem:[%s15853_s10 + $0x408] sm:$0xf]  ;;  %v10234_v45 = vld [vmem:[%s15853_s10 + $0x420] sm:$0xf0] }
 0x471   :  { %v6277_v31 = vadd.f32 %v15321_v63, %v6264_v54  ;;  %v8320_v63 = vld [vmem:[%s15853_s10 + $0x280] sm:$0xf]  ;;  %v8740_v42 = vld [vmem:[%s15853_s10 + $0x5c8] sm:$0xf]  ;;  %v10290_v6 = vld [vmem:[%s15853_s10 + $0x5e0] sm:$0xf0] }
 0x472   :  { %v8741_v37 = vor.u32 %v10290_v6, %v8740_v42  ;;  %v9748_v42 = vld [vmem:[%s15853_s10 + $0xda8] sm:$0xf]  ;;  %v10542_v6 = vld [vmem:[%s15853_s10 + $0xdc0] sm:$0xf0] }
 0x473   :  { %6507 = vmatpush.bf16.msrb.mxu2 %v8933_v52  ;;  %6520 = vmatpush.bf16.msrb.mxu3 %v9157_v30  ;;  %v8377_v52 = vor.u32 %v10199_v4, %v8376_v10  ;;  %v8124_v30 = vld [vmem:[%s15853_s10 + $0xf8] sm:$0xf]  ;;  %v10115_v10 = vld [vmem:[%s15853_s10 + $0x68] sm:$0xf0]  ;;  %v8517_v4 = vor.u32 %v10234_v45, %v8516_v40  ;;  %v9524_v40 = vld [vmem:[%s15853_s10 + $0xbe8] sm:$0xf] }
 0x474   :  { %6533 = vmatpush.bf16.msra.mxu0 %v9381_v38  ;;  %6546 = vmatpush.bf16.msra.mxu1 %v9605_v20  ;;  %v10192_v38 = vld [vmem:[%s15853_s10 + $0x2d0] sm:$0xf0]  ;;  %v8572_v20 = vld [vmem:[%s15853_s10 + $0x478] sm:$0xf]  ;;  %v8125_v8 = vor.u32 %v10136_v62, %v8124_v30  ;;  %v10283_v30 = vld [vmem:[%s15853_s10 + $0x5a8] sm:$0xf0] }
 0x475   :  { %v8349_v34 = vor.u32 %v10192_v38, %v8348_v57  ;;  %v8573_v17 = vor.u32 %v10248_v13, %v8572_v20  ;;  %v8012_v62 = vld [vmem:[%s15853_s10 + $0x18] sm:$0xf]  ;;  %v8265_v57 = vor.u32 %v10171_v50, %v8264_v15  ;;  %v10108_v38 = vld [vmem:[%s15853_s10 + $0x30] sm:$0xf0]  ;;  %v10486_v45 = vld [vmem:[%s15853_s10 + $0xc00] sm:$0xf0] }
 0x476   :  { %v8236_v20 = vld [vmem:[%s15853_s10 + $0x1d8] sm:$0xf]  ;;  %v10164_v13 = vld [vmem:[%s15853_s10 + $0x1f0] sm:$0xf0]  ;;  %v8013_v1 = vor.u32 %v10108_v38, %v8012_v62  ;;  %v10479_v15 = vld [vmem:[%s15853_s10 + $0xbc8] sm:$0xf0] }
 0x477   :  { %6508 = vmatpush.bf16.msrb.mxu2 %v8905_v55  ;;  %6521 = vmatpush.bf16.msrb.mxu3 %v9129_v22  ;;  %v8797_v55 = vor.u32 %v10304_v49, %v8796_v48  ;;  %v10185_v22 = vld [vmem:[%s15853_s10 + $0x298] sm:$0xf0]  ;;  %v8237_v23 = vor.u32 %v10164_v13, %v8236_v20  ;;  %v9720_v50 = vld [vmem:[%s15853_s10 + $0xd70] sm:$0xf]  ;;  %v9468_v62 = vld [vmem:[%s15853_s10 + $0xb78] sm:$0xf] }
 0x478   :  { %6534 = vmatpush.bf16.msra.mxu0 %v9353_v26  ;;  %6547 = vmatpush.bf16.msra.mxu1 %v9577_v43  ;;  %v10297_v26 = vld [vmem:[%s15853_s10 + $0x618] sm:$0xf0]  ;;  %v8097_v43 = vor.u32 %v10129_v60, %v8096_v14  ;;  %v8321_v28 = vor.u32 %v10185_v22, %v8320_v63  ;;  %v10276_v14 = vld [vmem:[%s15853_s10 + $0x570] sm:$0xf0]  ;;  %v9104_v60 = vld [vmem:[%s15853_s10 + $0x8a0] sm:$0xf] }
 0x479   :  { %v10437_v63 = vld [vmem:[%s15853_s10 + $0xa78] sm:$0xf0]  ;;  %v9552_v22 = vld [vmem:[%s15853_s10 + $0xc20] sm:$0xf] }
 0x47a   :  { %6509 = vmatmul.bf16.vlgmr.msrb.gmra.mxu2 %v13523_v9  ;;  %6522 = vmatmul.bf16.vlgmr.msrb.gmra.mxu3 %v13525_v44  ;;  %v6328_v56 = vpop.f32.mrf.mxu0  ;;  %v6341_v3 = vpop.f32.mrf.mxu1 }
 0x47b   :  { %6553 = vmatpush.bf16.msra.mxu2 %v8209_v32  ;;  %6566 = vmatpush.bf16.msra.mxu3 %v8433_v33  ;;  %v6290_v32 = vadd.f32 %v15323_v2, %v6277_v31  ;;  %v8068_v33 = vld [vmem:[%s15853_s10 + $0x88] sm:$0xf]  ;;  %v10178_v2 = vld [vmem:[%s15853_s10 + $0x260] sm:$0xf0] }
 0x47c   :  { %6579 = vmatpush.bf16.msrb.mxu0 %v8657_v58  ;;  %6592 = vmatpush.bf16.msrb.mxu1 %v8881_v59  ;;  %v8769_v58 = vor.u32 %v10297_v26, %v8768_v24  ;;  %v8069_v16 = vor.u32 %v10122_v18, %v8068_v33  ;;  %v10493_v24 = vld [vmem:[%s15853_s10 + $0xc38] sm:$0xf0]  ;;  %v9776_v26 = vld [vmem:[%s15853_s10 + $0xde0] sm:$0xf] }
 0x47d   :  { %6535 = vmatmul.bf16.vlgmr.msra.gmra.mxu0 %v13535_v25  ;;  %6548 = vmatmul.bf16.vlgmr.msra.gmra.mxu1 %v13533_v19  ;;  %v6302_v59 = vpop.f32.mrf.mxu2  ;;  %v6315_v0 = vpop.f32.mrf.mxu3 }
 0x47e   :  { %v6303_v41 = vadd.f32 %v6302_v59, %v6290_v32  ;;  %v9553_v59 = vor.u32 %v10493_v24, %v9552_v22 }
 0x47f   :  { %6554 = vmatpush.bf16.msra.mxu2 %v8181_v35  ;;  %6567 = vmatpush.bf16.msra.mxu3 %v8405_v29 }
 0x480   :  { %6580 = vmatpush.bf16.msrb.mxu0 %v8629_v7  ;;  %6593 = vmatpush.bf16.msrb.mxu1 %v8853_v51  ;;  %v6316_v35 = vadd.f32 %v6315_v0, %v6303_v41  ;;  %v8293_v7 = vor.u32 %v10178_v2, %v8292_v27  ;;  %v8040_v51 = vld [vmem:[%s15853_s10 + $0x50] sm:$0xf]  ;;  %v9300_v27 = vld [vmem:[%s15853_s10 + $0xa28] sm:$0xf]  ;;  %v10430_v2 = vld [vmem:[%s15853_s10 + $0xa40] sm:$0xf0] }
 0x482   :  { %v6330_v29 = vpop.f32.mrf.mxu0  ;;  %v6343_v46 = vpop.f32.mrf.mxu1  ;;  %v6329_v54 = vadd.f32 %v6328_v56, %v6316_v35 }
 0x483   :  { %6555 = vmatpush.bf16.msra.mxu2 %v8153_v61  ;;  %6568 = vmatpush.bf16.msra.mxu3 %v8377_v52  ;;  %v10227_v61 = vld [vmem:[%s15853_s10 + $0x3e8] sm:$0xf0]  ;;  %v8712_v52 = vld [vmem:[%s15853_s10 + $0x590] sm:$0xf]  ;;  %v9301_v29 = vor.u32 %v10430_v2, %v9300_v27 }
 0x484   :  { %6581 = vmatpush.bf16.msrb.mxu0 %v8601_v36  ;;  %6594 = vmatpush.bf16.msrb.mxu1 %v8825_v5  ;;  %v6342_v36 = vadd.f32 %v6341_v3, %v6329_v54  ;;  %v8041_v5 = vor.u32 %v10115_v10, %v8040_v51  ;;  %v8489_v48 = vor.u32 %v10227_v61, %v8488_v53  ;;  %v8460_v3 = vld [vmem:[%s15853_s10 + $0x398] sm:$0xf]  ;;  %v9048_v46 = vld [vmem:[%s15853_s10 + $0x830] sm:$0xf]  ;;  %v10535_v53 = vld [vmem:[%s15853_s10 + $0xd88] sm:$0xf0] }
 0x485   :  { %v8713_v49 = vor.u32 %v10283_v30, %v8712_v52  ;;  %v6304_v31 = vpop.f32.mrf.mxu2  ;;  %v6317_v56 = vpop.f32.mrf.mxu3  ;;  %v9749_v51 = vor.u32 %v10542_v6, %v9748_v42  ;;  %v9272_v10 = vld [vmem:[%s15853_s10 + $0x9f0] sm:$0xf]  ;;  %v9020_v54 = vld [vmem:[%s15853_s10 + $0x7f8] sm:$0xf]  ;;  %v10360_v61 = vld [vmem:[%s15853_s10 + $0x810] sm:$0xf0]  ;;  %v9721_v30 = vor.u32 %v10535_v53, %v9720_v50 }
 0x486   :  { %10588 = vtanh.f32 %v6342_v36  ;;  %v10472_v36 = vld [vmem:[%s15853_s10 + $0xb90] sm:$0xf0]  ;;  %v9021_v13 = vor.u32 %v10360_v61, %v9020_v54  ;;  %v10353_v31 = vld [vmem:[%s15853_s10 + $0x7d8] sm:$0xf0]  ;;  %v9132_v54 = vld [vmem:[%s15853_s10 + $0x8d8] sm:$0xf] }
 0x487   :  { %6556 = vmatpush.bf16.msra.mxu2 %v8125_v8  ;;  %6569 = vmatpush.bf16.msra.mxu3 %v8349_v34  ;;  %v10220_v8 = vld [vmem:[%s15853_s10 + $0x3b0] sm:$0xf0]  ;;  %v8684_v34 = vld [vmem:[%s15853_s10 + $0x558] sm:$0xf]  ;;  %v9469_v56 = vor.u32 %v10472_v36, %v9468_v62 }
 0x488   :  { %6582 = vmatpush.bf16.msrb.mxu0 %v8573_v17  ;;  %6595 = vmatpush.bf16.msrb.mxu1 %v8797_v55  ;;  %v10381_v17 = vld [vmem:[%s15853_s10 + $0x8b8] sm:$0xf0]  ;;  %v9328_v55 = vld [vmem:[%s15853_s10 + $0xa60] sm:$0xf]  ;;  %v8685_v32 = vor.u32 %v10276_v14, %v8684_v34  ;;  %v10388_v61 = vld [vmem:[%s15853_s10 + $0x8f0] sm:$0xf0] }
 0x489   :  { %v9105_v33 = vor.u32 %v10381_v17, %v9104_v60  ;;  %v9329_v18 = vor.u32 %v10437_v63, %v9328_v55  ;;  %v10409_v34 = vld [vmem:[%s15853_s10 + $0x998] sm:$0xf0]  ;;  %v9440_v14 = vld [vmem:[%s15853_s10 + $0xb40] sm:$0xf]  ;;  %v9133_v36 = vor.u32 %v10388_v61, %v9132_v54 }
 0x48a   :  { %v10465_v60 = vld [vmem:[%s15853_s10 + $0xb58] sm:$0xf0]  ;;  %v9664_v17 = vld [vmem:[%s15853_s10 + $0xd00] sm:$0xf] }
 0x48b   :  { %6557 = vmatpush.bf16.msra.mxu2 %v8097_v43  ;;  %6570 = vmatpush.bf16.msra.mxu3 %v8321_v28  ;;  %v10549_v43 = vld [vmem:[%s15853_s10 + $0xdf8] sm:$0xf0]  ;;  %v8461_v28 = vor.u32 %v10220_v8, %v8460_v3  ;;  %v9216_v8 = vld [vmem:[%s15853_s10 + $0x980] sm:$0xf]  ;;  %v9441_v24 = vor.u32 %v10465_v60, %v9440_v14 }
 0x48c   :  { %6583 = vmatpush.bf16.msrb.mxu0 %v8545_v39  ;;  %6596 = vmatpush.bf16.msrb.mxu1 %v8769_v58  ;;  %v9076_v39 = vld [vmem:[%s15853_s10 + $0x868] sm:$0xf]  ;;  %v10374_v58 = vld [vmem:[%s15853_s10 + $0x880] sm:$0xf0]  ;;  %v9777_v0 = vor.u32 %v10549_v43, %v9776_v26  ;;  %v10589_v41 = vpop.eup %10588  ;;  %v10521_v55 = vld [vmem:[%s15853_s10 + $0xd18] sm:$0xf0]  ;;  %v9217_v22 = vor.u32 %v10409_v34, %v9216_v8 }
 0x48d   :  { %6667 = vst [vmem:[#allocation2 + $0x18] sm:$0xff] %v10589_v41  ;;  %v9077_v35 = vor.u32 %v10374_v58, %v9076_v39  ;;  %v9665_v26 = vor.u32 %v10521_v55, %v9664_v17  ;;  %v10458_v39 = vld [vmem:[%s15853_s10 + $0xb20] sm:$0xf0]  ;;  %v9636_v58 = vld [vmem:[%s15853_s10 + $0xcc8] sm:$0xf] }
 0x48e   :  { %v8936_v41 = vld [vmem:[%s15853_s10 + $0x750] sm:$0xf] }
 0x48f   :  { %6558 = vmatpush.bf16.msra.mxu2 %v8069_v16  ;;  %6571 = vmatpush.bf16.msra.mxu3 %v8293_v7  ;;  %v10367_v16 = vld [vmem:[%s15853_s10 + $0x848] sm:$0xf0]  ;;  %v9525_v7 = vor.u32 %v10486_v45, %v9524_v40 }
 0x490   :  { %6584 = vmatpush.bf16.msrb.mxu0 %v8517_v4  ;;  %6597 = vmatpush.bf16.msrb.mxu1 %v8741_v37  ;;  %v10423_v4 = vld [vmem:[%s15853_s10 + $0xa08] sm:$0xf0]  ;;  %v9496_v37 = vld [vmem:[%s15853_s10 + $0xbb0] sm:$0xf] }
 0x491   :  { %v9497_v52 = vor.u32 %v10479_v15, %v9496_v37  ;;  %v10339_v45 = vld [vmem:[%s15853_s10 + $0x768] sm:$0xf0]  ;;  %v8908_v37 = vld [vmem:[%s15853_s10 + $0x718] sm:$0xf]  ;;  %v10332_v15 = vld [vmem:[%s15853_s10 + $0x730] sm:$0xf0] }
 0x492   :  { %v8909_v62 = vor.u32 %v10332_v15, %v8908_v37 }
 0x493   :  { %6559 = vmatpush.bf16.msra.mxu2 %v8041_v5  ;;  %6572 = vmatpush.bf16.msra.mxu3 %v8265_v57  ;;  %v9692_v5 = vld [vmem:[%s15853_s10 + $0xd38] sm:$0xf]  ;;  %v10528_v57 = vld [vmem:[%s15853_s10 + $0xd50] sm:$0xf0] }
 0x494   :  { %6585 = vmatpush.bf16.msrb.mxu0 %v8489_v48  ;;  %6598 = vmatpush.bf16.msrb.mxu1 %v8713_v49  ;;  %v8992_v49 = vld [vmem:[%s15853_s10 + $0x7c0] sm:$0xf]  ;;  %v9693_v3 = vor.u32 %v10528_v57, %v9692_v5 }
 0x495   :  { %v8993_v63 = vor.u32 %v10353_v31, %v8992_v49 }
 0x497   :  { %6560 = vmatpush.bf16.msra.mxu2 %v8013_v1  ;;  %6573 = vmatpush.bf16.msra.mxu3 %v8237_v23  ;;  %v8964_v1 = vld [vmem:[%s15853_s10 + $0x788] sm:$0xf]  ;;  %v10346_v23 = vld [vmem:[%s15853_s10 + $0x7a0] sm:$0xf0] }
 0x498   :  { %6586 = vmatpush.bf16.msrb.mxu0 %v8461_v28  ;;  %6599 = vmatpush.bf16.msrb.mxu1 %v8685_v32  ;;  %v9188_v32 = vld [vmem:[%s15853_s10 + $0x948] sm:$0xf]  ;;  %v8965_v2 = vor.u32 %v10346_v23, %v8964_v1 }
 0x49a   :  { %6561 = vmatmul.bf16.vlgmr.msra.gmra.mxu2 %v13408_v47  ;;  %6574 = vmatmul.bf16.vlgmr.msra.gmra.mxu3 %v13410_v11  ;;  %v9049_v47 = vor.u32 %v10367_v16, %v9048_v46  ;;  %v9273_v11 = vor.u32 %v10423_v4, %v9272_v10  ;;  %v15726_v38 = vpop.f32.mrf.mxu0  ;;  %v15728_v20 = vpop.f32.mrf.mxu1  ;;  %v9384_v46 = vld [vmem:[%s15853_s10 + $0xad0] sm:$0xf]  ;;  %v10451_v16 = vld [vmem:[%s15853_s10 + $0xae8] sm:$0xf0]  ;;  %v8937_v10 = vor.u32 %v10339_v45, %v8936_v41 }
 0x49b   :  { %6605 = vmatpush.bf16.msrb.mxu2 %v9105_v33  ;;  %6618 = vmatpush.bf16.msrb.mxu3 %v9329_v18  ;;  %v10402_v33 = vld [vmem:[%s15853_s10 + $0x960] sm:$0xf0]  ;;  %v9412_v18 = vld [vmem:[%s15853_s10 + $0xb08] sm:$0xf]  ;;  %v9385_v50 = vor.u32 %v10451_v16, %v9384_v46 }
 0x49c   :  { %6631 = vmatpush.bf16.msra.mxu0 %v9553_v59  ;;  %6644 = vmatpush.bf16.msra.mxu1 %v9777_v0  ;;  %v10514_v59 = vld [vmem:[%s15853_s10 + $0xce0] sm:$0xf0]  ;;  %v9189_v40 = vor.u32 %v10402_v33, %v9188_v32  ;;  %v9413_v42 = vor.u32 %v10458_v39, %v9412_v18 }
 0x49d   :  { %6587 = vmatmul.bf16.vlgmr.msrb.gmra.mxu0 %v13412_v12  ;;  %6600 = vmatmul.bf16.vlgmr.msrb.gmra.mxu1 %v13424_v21  ;;  %v9244_v12 = vld [vmem:[%s15853_s10 + $0x9b8] sm:$0xf]  ;;  %v10416_v21 = vld [vmem:[%s15853_s10 + $0x9d0] sm:$0xf0]  ;;  %v6354_v43 = vpop.f32.mrf.mxu2  ;;  %v6367_v28 = vpop.f32.mrf.mxu3  ;;  %v9637_v6 = vor.u32 %v10514_v59, %v9636_v58 }
 0x49e   :  { %v9245_v48 = vor.u32 %v10416_v21, %v9244_v12  ;;  %v9580_v12 = vld [vmem:[%s15853_s10 + $0xc58] sm:$0xf]  ;;  %v10500_v21 = vld [vmem:[%s15853_s10 + $0xc70] sm:$0xf0] }
 0x49f   :  { %6606 = vmatpush.bf16.msrb.mxu2 %v9077_v35  ;;  %6619 = vmatpush.bf16.msrb.mxu3 %v9301_v29  ;;  %v9160_v35 = vld [vmem:[%s15853_s10 + $0x910] sm:$0xf]  ;;  %v10395_v29 = vld [vmem:[%s15853_s10 + $0x928] sm:$0xf0]  ;;  %v9581_v57 = vor.u32 %v10500_v21, %v9580_v12 }
 0x4a0   :  { %6632 = vmatpush.bf16.msra.mxu0 %v9525_v7  ;;  %6645 = vmatpush.bf16.msra.mxu1 %v9749_v51  ;;  %v9608_v7 = vld [vmem:[%s15853_s10 + $0xc90] sm:$0xf]  ;;  %v10507_v51 = vld [vmem:[%s15853_s10 + $0xca8] sm:$0xf0]  ;;  %v9161_v4 = vor.u32 %v10395_v29, %v9160_v35 }
 0x4a1   :  { %v9609_v53 = vor.u32 %v10507_v51, %v9608_v7 }
 0x4a2   :  { %v6382_v0 = vpop.f32.mrf.mxu0  ;;  %v6395_v27 = vpop.f32.mrf.mxu1 }
 0x4a3   :  { %6607 = vmatpush.bf16.msrb.mxu2 %v9049_v47  ;;  %6620 = vmatpush.bf16.msrb.mxu3 %v9273_v11 }
 0x4a4   :  { %6633 = vmatpush.bf16.msra.mxu0 %v9497_v52  ;;  %6646 = vmatpush.bf16.msra.mxu1 %v9721_v30  ;;  %v9356_v52 = vld [vmem:[%s15853_s10 + $0xa98] sm:$0xf]  ;;  %v10444_v30 = vld [vmem:[%s15853_s10 + $0xab0] sm:$0xf0]  ;;  %s10625_s10 = smov [#allocation2]  }
 0x4a5   :  { %v6356_v47 = vpop.f32.mrf.mxu2  ;;  %v6369_v11 = vpop.f32.mrf.mxu3  ;;  %v9357_v5 = vor.u32 %v10444_v30, %v9356_v52 }
 0x4a7   :  { %6608 = vmatpush.bf16.msrb.mxu2 %v9021_v13  ;;  %6621 = vmatpush.bf16.msrb.mxu3 %v9245_v48  ;;  %v15829_v13 = vld [vmem:[%s15854_s11] sm:$0x7f]  ;;  %s6677_s11 = sshll.u32 %s10625_s10, 4  ;;  %s6678_s11 = int_to_ptr.vmem [resolvable:$true] %s6677_s11 }
 0x4a8   :  { %6634 = vmatpush.bf16.msra.mxu0 %v9469_v56  ;;  %6647 = vmatpush.bf16.msra.mxu1 %v9693_v3  ;;  %v3615_v48 = vperm.slane %v15829_v13, 4  ;;  %v3616_v33 = vperm.slane %v15829_v13, 5  ;;  %v3617_v11 = vperm.slane %v15829_v13, 6 }
 0x4aa   :  { %v6355_v49 = vadd.f32 %v6354_v43, %v3615_v48 }
 0x4ab   :  { %6609 = vmatpush.bf16.msrb.mxu2 %v8993_v63  ;;  %6622 = vmatpush.bf16.msrb.mxu3 %v9217_v22 }
 0x4ac   :  { %6635 = vmatpush.bf16.msra.mxu0 %v9441_v24  ;;  %6648 = vmatpush.bf16.msra.mxu1 %v9665_v26  ;;  %v6368_v31 = vadd.f32 %v6367_v28, %v6355_v49 }
 0x4ae   :  { %v6381_v56 = vadd.f32 %v15726_v38, %v6368_v31 }
 0x4af   :  { %6610 = vmatpush.bf16.msrb.mxu2 %v8965_v2  ;;  %6623 = vmatpush.bf16.msrb.mxu3 %v9189_v40 }
 0x4b0   :  { %6636 = vmatpush.bf16.msra.mxu0 %v9413_v42  ;;  %6649 = vmatpush.bf16.msra.mxu1 %v9637_v6  ;;  %v6394_v34 = vadd.f32 %v15728_v20, %v6381_v56 }
 0x4b3   :  { %6611 = vmatpush.bf16.msrb.mxu2 %v8937_v10  ;;  %6624 = vmatpush.bf16.msrb.mxu3 %v9161_v4 }
 0x4b4   :  { %6637 = vmatpush.bf16.msra.mxu0 %v9385_v50  ;;  %6650 = vmatpush.bf16.msra.mxu1 %v9609_v53 }
 0x4b7   :  { %6612 = vmatpush.bf16.msrb.mxu2 %v8909_v62  ;;  %6625 = vmatpush.bf16.msrb.mxu3 %v9133_v36 }
 0x4b8   :  { %6638 = vmatpush.bf16.msra.mxu0 %v9357_v5  ;;  %6651 = vmatpush.bf16.msra.mxu1 %v9581_v57 }
 0x4ba   :  { %6613 = vmatmul.bf16.vlgmr.msrb.gmra.mxu2 %v13523_v9  ;;  %6626 = vmatmul.bf16.vlgmr.msrb.gmra.mxu3 %v13525_v44  ;;  %v6432_v3 = vpop.f32.mrf.mxu0  ;;  %v6445_v8 = vpop.f32.mrf.mxu1 }
 0x4bb   :  { %6639 = vmatmul.bf16.vlgmr.msra.gmra.mxu0 %v13535_v25  ;;  %6652 = vmatmul.bf16.vlgmr.msra.gmra.mxu1 %v13533_v19 }
 0x4bd   :  { %v6406_v14 = vpop.f32.mrf.mxu2  ;;  %v6419_v60 = vpop.f32.mrf.mxu3 }
 0x4be   :  { %v6407_v17 = vadd.f32 %v6406_v14, %v6394_v34 }
 0x4c0   :  { %v6420_v55 = vadd.f32 %v6419_v60, %v6407_v17 }
 0x4c2   :  { %v6434_v63 = vpop.f32.mrf.mxu0  ;;  %v6447_v22 = vpop.f32.mrf.mxu1  ;;  %v6433_v9 = vadd.f32 %v6432_v3, %v6420_v55 }
 0x4c4   :  { %v6446_v1 = vadd.f32 %v6445_v8, %v6433_v9 }
 0x4c5   :  { %v6408_v44 = vpop.f32.mrf.mxu2  ;;  %v6421_v23 = vpop.f32.mrf.mxu3 }
 0x4c6   :  { %10590 = vtanh.f32 %v6446_v1 }
 0x4cc   :  { %v10591_v25 = vpop.eup %10590 }
 0x4cd   :  { %6668 = vst [vmem:[#allocation2 + $0x20] sm:$0xff] %v10591_v25 }
 0x4da   :  { %v6484_v19 = vpop.f32.mrf.mxu0  ;;  %v6497_v24 = vpop.f32.mrf.mxu1 }
 0x4dd   :  { %v6458_v38 = vpop.f32.mrf.mxu2  ;;  %v6471_v26 = vpop.f32.mrf.mxu3 }
 0x4de   :  { %v6459_v18 = vadd.f32 %v6458_v38, %v3616_v33 }
 0x4e0   :  { %v6472_v39 = vadd.f32 %v6471_v26, %v6459_v18 }
 0x4e2   :  { %v6486_v43 = vpop.f32.mrf.mxu0  ;;  %v6499_v28 = vpop.f32.mrf.mxu1  ;;  %v6485_v58 = vadd.f32 %v6484_v19, %v6472_v39 }
 0x4e4   :  { %v6498_v27 = vadd.f32 %v6497_v24, %v6485_v58 }
 0x4e5   :  { %v6460_v20 = vpop.f32.mrf.mxu2  ;;  %v6473_v32 = vpop.f32.mrf.mxu3 }
 0x4fa   :  { %v6536_v59 = vpop.f32.mrf.mxu0  ;;  %v6549_v0 = vpop.f32.mrf.mxu1 }
 0x4fd   :  { %v6510_v2 = vpop.f32.mrf.mxu2  ;;  %v6523_v40 = vpop.f32.mrf.mxu3 }
 0x4fe   :  { %v6511_v41 = vadd.f32 %v6510_v2, %v6498_v27 }
 0x500   :  { %v6524_v45 = vadd.f32 %v6523_v40, %v6511_v41 }
 0x502   :  { %v6538_v42 = vpop.f32.mrf.mxu0  ;;  %v6551_v6 = vpop.f32.mrf.mxu1  ;;  %v6537_v35 = vadd.f32 %v6536_v59, %v6524_v45 }
 0x504   :  { %v6550_v29 = vadd.f32 %v6549_v0, %v6537_v35 }
 0x505   :  { %v6512_v46 = vpop.f32.mrf.mxu2  ;;  %v6525_v16 = vpop.f32.mrf.mxu3 }
 0x506   :  { %10592 = vtanh.f32 %v6550_v29 }
 0x50c   :  { %v10593_v7 = vpop.eup %10592 }
 0x50d   :  { %6669 = vst [vmem:[#allocation2 + $0x28] sm:$0xff] %v10593_v7 }
 0x51a   :  { %v6588_v51 = vpop.f32.mrf.mxu0  ;;  %v6601_v10 = vpop.f32.mrf.mxu1 }
 0x51d   :  { %v6562_v4 = vpop.f32.mrf.mxu2  ;;  %v6575_v37 = vpop.f32.mrf.mxu3 }
 0x51e   :  { %v6563_v54 = vadd.f32 %v6562_v4, %v3617_v11 }
 0x520   :  { %v6576_v61 = vadd.f32 %v6575_v37, %v6563_v54 }
 0x522   :  { %v6590_v15 = vpop.f32.mrf.mxu0  ;;  %v6603_v50 = vpop.f32.mrf.mxu1  ;;  %v6589_v52 = vadd.f32 %v6588_v51, %v6576_v61 }
 0x524   :  { %v6602_v21 = vadd.f32 %v6601_v10, %v6589_v52 }
 0x525   :  { %v6564_v53 = vpop.f32.mrf.mxu2  ;;  %v6577_v47 = vpop.f32.mrf.mxu3 }
 0x538   :  { %v6640_v30 = vpop.f32.mrf.mxu0  ;;  %v6653_v12 = vpop.f32.mrf.mxu1 }
 0x53d   :  { %v6614_v62 = vpop.f32.mrf.mxu2  ;;  %v6627_v36 = vpop.f32.mrf.mxu3 }
 0x53e   :  { %v6615_v5 = vadd.f32 %v6614_v62, %v6602_v21 }
 0x540   :  { %v6628_v57 = vadd.f32 %v6627_v36, %v6615_v5  ;;  %v6642_v48 = vpop.f32.mrf.mxu0  ;;  %v6655_v49 = vpop.f32.mrf.mxu1 }
 0x542   :  { %v6641_v31 = vadd.f32 %v6640_v30, %v6628_v57 }
 0x544   :  { %v6654_v56 = vadd.f32 %v6653_v12, %v6641_v31 }
 0x545   :  { %v6616_v3 = vpop.f32.mrf.mxu2  ;;  %v6629_v8 = vpop.f32.mrf.mxu3 }
 0x546   :  { %10594 = vtanh.f32 %v6654_v56 }
 0x54c   :  { %v10595_v13 = vpop.eup %10594 }
 0x54d   :  { %6671 = vst.msk [vmem:[#allocation2 + $0x30] sm:$0xff] %vm6670_vm3, %v10595_v13 }
 0x54e   :  { %6682 = dma.vmem_to_hbm [thread:$0]  %s6678_s11, 896, %s6680_s3, [#allocation3]  }
 0x54f   :  { %10622 = dma.done.wait [#allocation3], 896  }
 0x550   :  { %10623 = vsyncadd [#allocation3], 4294966400 }
 0x551   :  { %6687 = vsyncpa [#allocation3], 1 }

</bundles_post_ra>
